<compile_context>
chip_gen: v7x
topology: tpu7x:2x2x1
jax: 0.10.0
libtpu: 0.0.40
codegen_flags: <defaults>
</compile_context>

<pallas_src>
import jax
import jax.numpy as jnp
from jax.experimental import pallas as pl
from jax.experimental.pallas import tpu as pltpu


def _im2col_patches(flat_ref, H, W):
    """Build the (H*W, 9*C) im2col matrix from a flattened, zero-haloed image.

    flat_ref: VMEM ref of shape (PAD + H*W + PAD, C). Rows [PAD, PAD+H*W) hold the
    image flattened row-major; the PAD halo rows above/below are zero. Tap (kh, kw)
    of the 3x3 stencil is just the H*W-long window starting at PAD + (kh-1)*W + (kw-1):
    reads that fall off the top/bottom land in the zero halo, and reads that would
    wrap across an image row (w +/- 1 out of range) are masked to zero.
    Column order is (kh, kw, ci) -> (kh*3 + kw)*C + ci, matching the wrapper-side
    weight reshape.
    """
    HW = H * W
    C = flat_ref.shape[1]
    PAD = (flat_ref.shape[0] - HW) // 2

    col = jax.lax.broadcasted_iota(jnp.int32, (HW, 1), 0) % W
    not_left = col >= 1          # tap with dw = -1 is invalid at w == 0
    not_right = col <= W - 2     # tap with dw = +1 is invalid at w == W-1

    pieces = []
    for kh in range(3):
        for kw in range(3):
            dh, dw = kh - 1, kw - 1
            start = PAD + dh * W + dw            # static Python int
            piece = flat_ref[pl.ds(start, HW), :]   # (HW, C) f32
            if dw == -1:
                piece = jnp.where(not_left, piece, 0.0)
            elif dw == 1:
                piece = jnp.where(not_right, piece, 0.0)
            pieces.append(piece)
    # Single K = 9*C contraction axis for one MXU matmul per layer.
    return jnp.concatenate(pieces, axis=-1)          # (HW, 9*C) f32


def conv_block_kernel(x_ref, w1_ref, s1_ref, b1_ref, w2_ref, s2_ref, b2_ref,
                      o_ref, flat1_ref, flat2_ref):
    """One batch element of the fused double conv+BN+ReLU block.

    x_ref : (1, H, W, Cin)          NHWC input tile (unpadded)
    w1_ref: (9*Cin, Cout)  bf16     im2col-reshaped conv1 weight
    s1/b1 : (1, Cout)      f32      folded BN1 scale / bias
    w2_ref: (9*Cout, Cout) bf16     im2col-reshaped conv2 weight
    s2/b2 : (1, Cout)      f32      folded BN2 scale / bias
    o_ref : (1, H, W*Cout)          lane-dense output block
    flat1_ref / flat2_ref: zero-haloed flat VMEM scratches for layer 1 / layer 2.
    """
    _, H, W, Cin = x_ref.shape
    Cout = s1_ref.shape[1]
    HW = H * W
    PAD1 = (flat1_ref.shape[0] - HW) // 2
    PAD2 = (flat2_ref.shape[0] - HW) // 2

    def conv_bn_relu(flat_ref, w_ref, s_ref, b_ref):
        patches = _im2col_patches(flat_ref, H, W).astype(jnp.bfloat16)
        y = jnp.dot(patches, w_ref[...], preferred_element_type=jnp.float32)
        return jnp.maximum(y * s_ref[0] + b_ref[0], 0.0)     # (HW, Cout) f32

    # ---- layer 1: stage the input into the zero-haloed flat scratch ----------
    z1 = jnp.zeros((PAD1, Cin), jnp.float32)
    flat1_ref[pl.ds(0, PAD1), :] = z1
    flat1_ref[pl.ds(PAD1 + HW, PAD1), :] = z1
    flat1_ref[pl.ds(PAD1, HW), :] = x_ref[0].reshape(HW, Cin)
    y1 = conv_bn_relu(flat1_ref, w1_ref, s1_ref, b1_ref)

    # ---- layer 2: intermediate stays on-chip (VMEM), never written to HBM ----
    z2 = jnp.zeros((PAD2, Cout), jnp.float32)
    flat2_ref[pl.ds(0, PAD2), :] = z2
    flat2_ref[pl.ds(PAD2 + HW, PAD2), :] = z2
    flat2_ref[pl.ds(PAD2, HW), :] = y1
    y2 = conv_bn_relu(flat2_ref, w2_ref, s2_ref, b2_ref)     # (HW, Cout) f32

    # ---- lane-dense store: rows of W*Cout lanes (=128 at the demo shapes) -----
    y2_3d = y2.reshape(H, W, Cout)
    row_blocks = [y2_3d[:, w:w + 1, :].reshape(H, Cout) for w in range(W)]
    o_ref[0] = jnp.concatenate(row_blocks, axis=-1).astype(o_ref.dtype)


def conv_block(x_nchw, params):
    """ConvBlock forward: NCHW in, NCHW out (PyTorch convention)."""
    (w1, s1, b1), (w2, s2, b2) = params
    B, Cin, H, W = x_nchw.shape
    Cout = s1.shape[0]
    HW = H * W
    # Halo size: >= W+1 rows and a multiple of 8 so the halo stores stay sublane-aligned.
    pad = -(-(W + 1) // 8) * 8

    x = jnp.transpose(x_nchw, (0, 2, 3, 1))   # NCHW -> NHWC (channels on lanes)

    out = pl.pallas_call(
        conv_block_kernel,
        out_shape=jax.ShapeDtypeStruct((B, H, W * Cout), x.dtype),
        grid=(B,),
        in_specs=[
            pl.BlockSpec((1, H, W, Cin), lambda b: (b, 0, 0, 0)),
            pl.BlockSpec((9 * Cin, Cout), lambda b: (0, 0)),
            pl.BlockSpec((1, Cout), lambda b: (0, 0)),
            pl.BlockSpec((1, Cout), lambda b: (0, 0)),
            pl.BlockSpec((9 * Cout, Cout), lambda b: (0, 0)),
            pl.BlockSpec((1, Cout), lambda b: (0, 0)),
            pl.BlockSpec((1, Cout), lambda b: (0, 0)),
        ],
        out_specs=pl.BlockSpec((1, H, W * Cout), lambda b: (b, 0, 0)),
        scratch_shapes=[
            pltpu.VMEM((pad + HW + pad, Cin), jnp.float32),
            pltpu.VMEM((pad + HW + pad, Cout), jnp.float32),
        ],
        compiler_params=pltpu.CompilerParams(
            dimension_semantics=("parallel",)),
    )(x, w1, s1.reshape(1, Cout), b1.reshape(1, Cout),
      w2, s2.reshape(1, Cout), b2.reshape(1, Cout))

    out = out.reshape(B, H, W, Cout)           # undo the lane-dense flattening
    return jnp.transpose(out, (0, 3, 1, 2))    # NHWC -> NCHW


def make_conv_block_params(key, in_channels, out_channels):
    """Deterministic parameters matching ConvBlock's __init__ shapes."""
    k1, k2, k3, k4 = jax.random.split(key, 4)
    eps = 1e-5

    def layer_params(kw, kb, cin, cout):
        # PyTorch conv weight is (Cout, Cin, 3, 3); store it as the (9*Cin, Cout)
        # im2col slab (row index = (kh*3 + kw)*Cin + ci) the kernel consumes, in bf16.
        w_oihw = 0.1 * jax.random.normal(kw, (cout, cin, 3, 3), jnp.float32)
        w_hwio = jnp.transpose(w_oihw, (2, 3, 1, 0))              # (3, 3, Cin, Cout)
        w_im2col = w_hwio.reshape(9 * cin, cout).astype(jnp.bfloat16)
        conv_bias = 0.1 * jax.random.normal(kb, (cout,), jnp.float32)
        # BatchNorm2d defaults (eval mode): gamma=1, beta=0, mean=0, var=1.
        gamma = jnp.ones((cout,), jnp.float32)
        beta = jnp.zeros((cout,), jnp.float32)
        running_mean = jnp.zeros((cout,), jnp.float32)
        running_var = jnp.ones((cout,), jnp.float32)
        scale = gamma / jnp.sqrt(running_var + eps)
        bias = beta + (conv_bias - running_mean) * scale
        return w_im2col, scale, bias

    p1 = layer_params(k1, k2, in_channels, out_channels)
    p2 = layer_params(k3, k4, out_channels, out_channels)
    return p1, p2


if __name__ == "__main__":
    key = jax.random.PRNGKey(0)
    k_x, k_p = jax.random.split(key)

    B, Cin, H, W = 2, 4, 16, 16
    Cout = 8
    x = jax.random.normal(k_x, (B, Cin, H, W), jnp.float32)
    params = make_conv_block_params(k_p, Cin, Cout)

    out = jax.jit(conv_block)(x, params)
    jax.block_until_ready(out)
    assert out.shape == (B, Cout, H, W), out.shape
    print("KERNEL_OK")
</pallas_src>

<mosaic_0001>
module attributes {stable_mosaic.version = 11 : i64} {
  func.func @conv_block_kernel(%arg0: i32, %arg1: memref<1x16x16x4xf32, #tpu.memory_space<vmem>>, %arg2: memref<36x8xbf16, #tpu.memory_space<vmem>>, %arg3: memref<1x8xf32, #tpu.memory_space<vmem>>, %arg4: memref<1x8xf32, #tpu.memory_space<vmem>>, %arg5: memref<72x8xbf16, #tpu.memory_space<vmem>>, %arg6: memref<1x8xf32, #tpu.memory_space<vmem>>, %arg7: memref<1x8xf32, #tpu.memory_space<vmem>>, %arg8: memref<1x16x128xf32, #tpu.memory_space<vmem>>, %arg9: memref<304x4xf32, #tpu.memory_space<vmem>>, %arg10: memref<304x8xf32, #tpu.memory_space<vmem>>) attributes {dimension_semantics = [#tpu.dimension_semantics<parallel>], iteration_bounds = array<i64: 2>, scalar_prefetch = 0 : i64, scratch_operands = 2 : i64, tpu.core_type = #tpu.core_type<tc>, window_params = [{transform_indices = @transform_0, window_bounds = array<i64: 1, 16, 16, 4>}, {pipeline_mode = #tpu.pipeline_mode<synchronous>, transform_indices = @transform_1, window_bounds = array<i64: 36, 8>}, {pipeline_mode = #tpu.pipeline_mode<synchronous>, transform_indices = @transform_2, window_bounds = array<i64: 1, 8>}, {pipeline_mode = #tpu.pipeline_mode<synchronous>, transform_indices = @transform_3, window_bounds = array<i64: 1, 8>}, {pipeline_mode = #tpu.pipeline_mode<synchronous>, transform_indices = @transform_4, window_bounds = array<i64: 72, 8>}, {pipeline_mode = #tpu.pipeline_mode<synchronous>, transform_indices = @transform_5, window_bounds = array<i64: 1, 8>}, {pipeline_mode = #tpu.pipeline_mode<synchronous>, transform_indices = @transform_6, window_bounds = array<i64: 1, 8>}, {transform_indices = @transform_7, window_bounds = array<i64: 1, 16, 128>}]} {
    %cst = arith.constant 0.000000e+00 : f32
    %0 = vector.broadcast %cst : f32 to vector<24x4xf32>
    %c0 = arith.constant 0 : index
    %c0_0 = arith.constant 0 : index
    %1 = vector.load %arg9[%c0, %c0_0] : memref<304x4xf32, #tpu.memory_space<vmem>>, vector<24x4xf32>
    tpu.vector_store %arg9[%c0, %c0_0], %0 {strides = array<i32>} : memref<304x4xf32, #tpu.memory_space<vmem>>, vector<24x4xf32>,
    %c280 = arith.constant 280 : index
    %c0_1 = arith.constant 0 : index
    %2 = vector.load %arg9[%c280, %c0_1] : memref<304x4xf32, #tpu.memory_space<vmem>>, vector<24x4xf32>
    tpu.vector_store %arg9[%c280, %c0_1], %0 {strides = array<i32>} : memref<304x4xf32, #tpu.memory_space<vmem>>, vector<24x4xf32>,
    %c0_2 = arith.constant 0 : index
    %c0_3 = arith.constant 0 : index
    %c0_4 = arith.constant 0 : index
    %c0_5 = arith.constant 0 : index
    %3 = vector.load %arg1[%c0_2, %c0_3, %c0_4, %c0_5] : memref<1x16x16x4xf32, #tpu.memory_space<vmem>>, vector<1x16x16x4xf32>
    %4 = vector.shape_cast %3 : vector<1x16x16x4xf32> to vector<16x16x4xf32>
    %5 = vector.shape_cast %4 : vector<16x16x4xf32> to vector<256x4xf32>
    %c24 = arith.constant 24 : index
    %c0_6 = arith.constant 0 : index
    %6 = vector.load %arg9[%c24, %c0_6] : memref<304x4xf32, #tpu.memory_space<vmem>>, vector<256x4xf32>
    tpu.vector_store %arg9[%c24, %c0_6], %5 {strides = array<i32>} : memref<304x4xf32, #tpu.memory_space<vmem>>, vector<256x4xf32>,
    %7 = tpu.iota {dimensions = array<i32: 0>} : vector<256x1xi32>
    %c16_i32 = arith.constant 16 : i32
    %c0_i32 = arith.constant 0 : i32
    %8 = arith.cmpi eq, %c16_i32, %c0_i32 : i32
    %c1_i32 = arith.constant 1 : i32
    %9 = arith.select %8, %c1_i32, %c16_i32 : i32
    %10 = vector.broadcast %9 : i32 to vector<256x1xi32>
    %11 = arith.remsi %7, %10 : vector<256x1xi32>
    %c0_i32_7 = arith.constant 0 : i32
    %12 = vector.broadcast %c0_i32_7 : i32 to vector<256x1xi32>
    %13 = arith.cmpi ne, %11, %12 : vector<256x1xi32>
    %c0_i32_8 = arith.constant 0 : i32
    %14 = vector.broadcast %c0_i32_8 : i32 to vector<256x1xi32>
    %15 = arith.cmpi slt, %11, %14 : vector<256x1xi32>
    %c0_i32_9 = arith.constant 0 : i32
    %16 = arith.cmpi slt, %9, %c0_i32_9 : i32
    %17 = vector.broadcast %16 : i1 to vector<256x1xi1>
    %18 = vector.broadcast %17 : vector<256x1xi1> to vector<256x1xi1>
    %19 = arith.xori %15, %18 : vector<256x1xi1>
    %20 = arith.andi %19, %13 : vector<256x1xi1>
    %21 = vector.broadcast %9 : i32 to vector<256x1xi32>
    %22 = arith.addi %11, %21 : vector<256x1xi32>
    %23 = arith.select %20, %22, %11 : vector<256x1xi1>, vector<256x1xi32>
    %c1_i32_10 = arith.constant 1 : i32
    %24 = vector.broadcast %c1_i32_10 : i32 to vector<256x1xi32>
    %25 = arith.cmpi sge, %23, %24 : vector<256x1xi32>
    %c14_i32 = arith.constant 14 : i32
    %26 = vector.broadcast %c14_i32 : i32 to vector<256x1xi32>
    %27 = arith.cmpi sle, %23, %26 : vector<256x1xi32>
    %c7 = arith.constant 7 : index
    %c0_11 = arith.constant 0 : index
    %28 = vector.load %arg9[%c7, %c0_11] : memref<304x4xf32, #tpu.memory_space<vmem>>, vector<256x4xf32>
    %cst_12 = arith.constant 0.000000e+00 : f32
    %29 = vector.shape_cast %25 : vector<256x1xi1> to vector<256x1xi1>
    %30 = vector.broadcast %29 : vector<256x1xi1> to vector<256x4xi1>
    %31 = vector.broadcast %cst_12 : f32 to vector<256x4xf32>
    %32 = arith.select %30, %28, %31 : vector<256x4xi1>, vector<256x4xf32>
    %c8 = arith.constant 8 : index
    %c0_13 = arith.constant 0 : index
    %33 = vector.load %arg9[%c8, %c0_13] : memref<304x4xf32, #tpu.memory_space<vmem>>, vector<256x4xf32>
    %c9 = arith.constant 9 : index
    %c0_14 = arith.constant 0 : index
    %34 = vector.load %arg9[%c9, %c0_14] : memref<304x4xf32, #tpu.memory_space<vmem>>, vector<256x4xf32>
    %cst_15 = arith.constant 0.000000e+00 : f32
    %35 = vector.shape_cast %27 : vector<256x1xi1> to vector<256x1xi1>
    %36 = vector.broadcast %35 : vector<256x1xi1> to vector<256x4xi1>
    %37 = vector.broadcast %cst_15 : f32 to vector<256x4xf32>
    %38 = arith.select %36, %34, %37 : vector<256x4xi1>, vector<256x4xf32>
    %c23 = arith.constant 23 : index
    %c0_16 = arith.constant 0 : index
    %39 = vector.load %arg9[%c23, %c0_16] : memref<304x4xf32, #tpu.memory_space<vmem>>, vector<256x4xf32>
    %cst_17 = arith.constant 0.000000e+00 : f32
    %40 = vector.shape_cast %25 : vector<256x1xi1> to vector<256x1xi1>
    %41 = vector.broadcast %40 : vector<256x1xi1> to vector<256x4xi1>
    %42 = vector.broadcast %cst_17 : f32 to vector<256x4xf32>
    %43 = arith.select %41, %39, %42 : vector<256x4xi1>, vector<256x4xf32>
    %c24_18 = arith.constant 24 : index
    %c0_19 = arith.constant 0 : index
    %44 = vector.load %arg9[%c24_18, %c0_19] : memref<304x4xf32, #tpu.memory_space<vmem>>, vector<256x4xf32>
    %c25 = arith.constant 25 : index
    %c0_20 = arith.constant 0 : index
    %45 = vector.load %arg9[%c25, %c0_20] : memref<304x4xf32, #tpu.memory_space<vmem>>, vector<256x4xf32>
    %cst_21 = arith.constant 0.000000e+00 : f32
    %46 = vector.shape_cast %27 : vector<256x1xi1> to vector<256x1xi1>
    %47 = vector.broadcast %46 : vector<256x1xi1> to vector<256x4xi1>
    %48 = vector.broadcast %cst_21 : f32 to vector<256x4xf32>
    %49 = arith.select %47, %45, %48 : vector<256x4xi1>, vector<256x4xf32>
    %c39 = arith.constant 39 : index
    %c0_22 = arith.constant 0 : index
    %50 = vector.load %arg9[%c39, %c0_22] : memref<304x4xf32, #tpu.memory_space<vmem>>, vector<256x4xf32>
    %cst_23 = arith.constant 0.000000e+00 : f32
    %51 = vector.shape_cast %25 : vector<256x1xi1> to vector<256x1xi1>
    %52 = vector.broadcast %51 : vector<256x1xi1> to vector<256x4xi1>
    %53 = vector.broadcast %cst_23 : f32 to vector<256x4xf32>
    %54 = arith.select %52, %50, %53 : vector<256x4xi1>, vector<256x4xf32>
    %c40 = arith.constant 40 : index
    %c0_24 = arith.constant 0 : index
    %55 = vector.load %arg9[%c40, %c0_24] : memref<304x4xf32, #tpu.memory_space<vmem>>, vector<256x4xf32>
    %c41 = arith.constant 41 : index
    %c0_25 = arith.constant 0 : index
    %56 = vector.load %arg9[%c41, %c0_25] : memref<304x4xf32, #tpu.memory_space<vmem>>, vector<256x4xf32>
    %cst_26 = arith.constant 0.000000e+00 : f32
    %57 = vector.shape_cast %27 : vector<256x1xi1> to vector<256x1xi1>
    %58 = vector.broadcast %57 : vector<256x1xi1> to vector<256x4xi1>
    %59 = vector.broadcast %cst_26 : f32 to vector<256x4xf32>
    %60 = arith.select %58, %56, %59 : vector<256x4xi1>, vector<256x4xf32>
    %61 = tpu.concatenate %32, %33, %38, %43, %44, %49, %54, %55, %60 in 1 : vector<256x4xf32>, vector<256x4xf32>, vector<256x4xf32>, vector<256x4xf32>, vector<256x4xf32>, vector<256x4xf32>, vector<256x4xf32>, vector<256x4xf32>, vector<256x4xf32> -> vector<256x36xf32>
    %62 = arith.truncf %61 : vector<256x36xf32> to vector<256x36xbf16>
    %c0_27 = arith.constant 0 : index
    %c0_28 = arith.constant 0 : index
    %63 = vector.load %arg2[%c0_27, %c0_28] : memref<36x8xbf16, #tpu.memory_space<vmem>>, vector<36x8xbf16>
    %cst_29 = arith.constant dense<0.000000e+00> : vector<256x8xf32>
    %64 = tpu.matmul %62, %63, %cst_29 {dimension_numbers = #tpu.dot_dimension_numbers<[1], [0], [0], [1], [0, 0, 1, 1], [], []>} : vector<256x36xbf16>, vector<36x8xbf16>, vector<256x8xf32> -> vector<256x8xf32>
    %c0_30 = arith.constant 0 : index
    %c0_31 = arith.constant 0 : index
    %65 = vector.load %arg3[%c0_30, %c0_31] : memref<1x8xf32, #tpu.memory_space<vmem>>, vector<1x8xf32>
    %66 = vector.shape_cast %65 : vector<1x8xf32> to vector<8xf32>
    %67 = vector.shape_cast %66 : vector<8xf32> to vector<1x8xf32>
    %68 = vector.broadcast %67 : vector<1x8xf32> to vector<256x8xf32>
    %69 = arith.mulf %64, %68 : vector<256x8xf32>
    %c0_32 = arith.constant 0 : index
    %c0_33 = arith.constant 0 : index
    %70 = vector.load %arg4[%c0_32, %c0_33] : memref<1x8xf32, #tpu.memory_space<vmem>>, vector<1x8xf32>
    %71 = vector.shape_cast %70 : vector<1x8xf32> to vector<8xf32>
    %72 = vector.shape_cast %71 : vector<8xf32> to vector<1x8xf32>
    %73 = vector.broadcast %72 : vector<1x8xf32> to vector<256x8xf32>
    %74 = arith.addf %69, %73 : vector<256x8xf32>
    %cst_34 = arith.constant 0.000000e+00 : f32
    %75 = vector.broadcast %cst_34 : f32 to vector<256x8xf32>
    %76 = arith.maximumf %74, %75 : vector<256x8xf32>
    %cst_35 = arith.constant 0.000000e+00 : f32
    %77 = vector.broadcast %cst_35 : f32 to vector<24x8xf32>
    %c0_36 = arith.constant 0 : index
    %c0_37 = arith.constant 0 : index
    %78 = vector.load %arg10[%c0_36, %c0_37] : memref<304x8xf32, #tpu.memory_space<vmem>>, vector<24x8xf32>
    tpu.vector_store %arg10[%c0_36, %c0_37], %77 {strides = array<i32>} : memref<304x8xf32, #tpu.memory_space<vmem>>, vector<24x8xf32>,
    %c280_38 = arith.constant 280 : index
    %c0_39 = arith.constant 0 : index
    %79 = vector.load %arg10[%c280_38, %c0_39] : memref<304x8xf32, #tpu.memory_space<vmem>>, vector<24x8xf32>
    tpu.vector_store %arg10[%c280_38, %c0_39], %77 {strides = array<i32>} : memref<304x8xf32, #tpu.memory_space<vmem>>, vector<24x8xf32>,
    %c24_40 = arith.constant 24 : index
    %c0_41 = arith.constant 0 : index
    %80 = vector.load %arg10[%c24_40, %c0_41] : memref<304x8xf32, #tpu.memory_space<vmem>>, vector<256x8xf32>
    tpu.vector_store %arg10[%c24_40, %c0_41], %76 {strides = array<i32>} : memref<304x8xf32, #tpu.memory_space<vmem>>, vector<256x8xf32>,
    %81 = tpu.iota {dimensions = array<i32: 0>} : vector<256x1xi32>
    %c16_i32_42 = arith.constant 16 : i32
    %c0_i32_43 = arith.constant 0 : i32
    %82 = arith.cmpi eq, %c16_i32_42, %c0_i32_43 : i32
    %c1_i32_44 = arith.constant 1 : i32
    %83 = arith.select %82, %c1_i32_44, %c16_i32_42 : i32
    %84 = vector.broadcast %83 : i32 to vector<256x1xi32>
    %85 = arith.remsi %81, %84 : vector<256x1xi32>
    %c0_i32_45 = arith.constant 0 : i32
    %86 = vector.broadcast %c0_i32_45 : i32 to vector<256x1xi32>
    %87 = arith.cmpi ne, %85, %86 : vector<256x1xi32>
    %c0_i32_46 = arith.constant 0 : i32
    %88 = vector.broadcast %c0_i32_46 : i32 to vector<256x1xi32>
    %89 = arith.cmpi slt, %85, %88 : vector<256x1xi32>
    %c0_i32_47 = arith.constant 0 : i32
    %90 = arith.cmpi slt, %83, %c0_i32_47 : i32
    %91 = vector.broadcast %90 : i1 to vector<256x1xi1>
    %92 = vector.broadcast %91 : vector<256x1xi1> to vector<256x1xi1>
    %93 = arith.xori %89, %92 : vector<256x1xi1>
    %94 = arith.andi %93, %87 : vector<256x1xi1>
    %95 = vector.broadcast %83 : i32 to vector<256x1xi32>
    %96 = arith.addi %85, %95 : vector<256x1xi32>
    %97 = arith.select %94, %96, %85 : vector<256x1xi1>, vector<256x1xi32>
    %c1_i32_48 = arith.constant 1 : i32
    %98 = vector.broadcast %c1_i32_48 : i32 to vector<256x1xi32>
    %99 = arith.cmpi sge, %97, %98 : vector<256x1xi32>
    %c14_i32_49 = arith.constant 14 : i32
    %100 = vector.broadcast %c14_i32_49 : i32 to vector<256x1xi32>
    %101 = arith.cmpi sle, %97, %100 : vector<256x1xi32>
    %c7_50 = arith.constant 7 : index
    %c0_51 = arith.constant 0 : index
    %102 = vector.load %arg10[%c7_50, %c0_51] : memref<304x8xf32, #tpu.memory_space<vmem>>, vector<256x8xf32>
    %cst_52 = arith.constant 0.000000e+00 : f32
    %103 = vector.shape_cast %99 : vector<256x1xi1> to vector<256x1xi1>
    %104 = vector.broadcast %103 : vector<256x1xi1> to vector<256x8xi1>
    %105 = vector.broadcast %cst_52 : f32 to vector<256x8xf32>
    %106 = arith.select %104, %102, %105 : vector<256x8xi1>, vector<256x8xf32>
    %c8_53 = arith.constant 8 : index
    %c0_54 = arith.constant 0 : index
    %107 = vector.load %arg10[%c8_53, %c0_54] : memref<304x8xf32, #tpu.memory_space<vmem>>, vector<256x8xf32>
    %c9_55 = arith.constant 9 : index
    %c0_56 = arith.constant 0 : index
    %108 = vector.load %arg10[%c9_55, %c0_56] : memref<304x8xf32, #tpu.memory_space<vmem>>, vector<256x8xf32>
    %cst_57 = arith.constant 0.000000e+00 : f32
    %109 = vector.shape_cast %101 : vector<256x1xi1> to vector<256x1xi1>
    %110 = vector.broadcast %109 : vector<256x1xi1> to vector<256x8xi1>
    %111 = vector.broadcast %cst_57 : f32 to vector<256x8xf32>
    %112 = arith.select %110, %108, %111 : vector<256x8xi1>, vector<256x8xf32>
    %c23_58 = arith.constant 23 : index
    %c0_59 = arith.constant 0 : index
    %113 = vector.load %arg10[%c23_58, %c0_59] : memref<304x8xf32, #tpu.memory_space<vmem>>, vector<256x8xf32>
    %cst_60 = arith.constant 0.000000e+00 : f32
    %114 = vector.shape_cast %99 : vector<256x1xi1> to vector<256x1xi1>
    %115 = vector.broadcast %114 : vector<256x1xi1> to vector<256x8xi1>
    %116 = vector.broadcast %cst_60 : f32 to vector<256x8xf32>
    %117 = arith.select %115, %113, %116 : vector<256x8xi1>, vector<256x8xf32>
    %c24_61 = arith.constant 24 : index
    %c0_62 = arith.constant 0 : index
    %118 = vector.load %arg10[%c24_61, %c0_62] : memref<304x8xf32, #tpu.memory_space<vmem>>, vector<256x8xf32>
    %c25_63 = arith.constant 25 : index
    %c0_64 = arith.constant 0 : index
    %119 = vector.load %arg10[%c25_63, %c0_64] : memref<304x8xf32, #tpu.memory_space<vmem>>, vector<256x8xf32>
    %cst_65 = arith.constant 0.000000e+00 : f32
    %120 = vector.shape_cast %101 : vector<256x1xi1> to vector<256x1xi1>
    %121 = vector.broadcast %120 : vector<256x1xi1> to vector<256x8xi1>
    %122 = vector.broadcast %cst_65 : f32 to vector<256x8xf32>
    %123 = arith.select %121, %119, %122 : vector<256x8xi1>, vector<256x8xf32>
    %c39_66 = arith.constant 39 : index
    %c0_67 = arith.constant 0 : index
    %124 = vector.load %arg10[%c39_66, %c0_67] : memref<304x8xf32, #tpu.memory_space<vmem>>, vector<256x8xf32>
    %cst_68 = arith.constant 0.000000e+00 : f32
    %125 = vector.shape_cast %99 : vector<256x1xi1> to vector<256x1xi1>
    %126 = vector.broadcast %125 : vector<256x1xi1> to vector<256x8xi1>
    %127 = vector.broadcast %cst_68 : f32 to vector<256x8xf32>
    %128 = arith.select %126, %124, %127 : vector<256x8xi1>, vector<256x8xf32>
    %c40_69 = arith.constant 40 : index
    %c0_70 = arith.constant 0 : index
    %129 = vector.load %arg10[%c40_69, %c0_70] : memref<304x8xf32, #tpu.memory_space<vmem>>, vector<256x8xf32>
    %c41_71 = arith.constant 41 : index
    %c0_72 = arith.constant 0 : index
    %130 = vector.load %arg10[%c41_71, %c0_72] : memref<304x8xf32, #tpu.memory_space<vmem>>, vector<256x8xf32>
    %cst_73 = arith.constant 0.000000e+00 : f32
    %131 = vector.shape_cast %101 : vector<256x1xi1> to vector<256x1xi1>
    %132 = vector.broadcast %131 : vector<256x1xi1> to vector<256x8xi1>
    %133 = vector.broadcast %cst_73 : f32 to vector<256x8xf32>
    %134 = arith.select %132, %130, %133 : vector<256x8xi1>, vector<256x8xf32>
    %135 = tpu.concatenate %106, %107, %112, %117, %118, %123, %128, %129, %134 in 1 : vector<256x8xf32>, vector<256x8xf32>, vector<256x8xf32>, vector<256x8xf32>, vector<256x8xf32>, vector<256x8xf32>, vector<256x8xf32>, vector<256x8xf32>, vector<256x8xf32> -> vector<256x72xf32>
    %136 = arith.truncf %135 : vector<256x72xf32> to vector<256x72xbf16>
    %c0_74 = arith.constant 0 : index
    %c0_75 = arith.constant 0 : index
    %137 = vector.load %arg5[%c0_74, %c0_75] : memref<72x8xbf16, #tpu.memory_space<vmem>>, vector<72x8xbf16>
    %cst_76 = arith.constant dense<0.000000e+00> : vector<256x8xf32>
    %138 = tpu.matmul %136, %137, %cst_76 {dimension_numbers = #tpu.dot_dimension_numbers<[1], [0], [0], [1], [0, 0, 1, 1], [], []>} : vector<256x72xbf16>, vector<72x8xbf16>, vector<256x8xf32> -> vector<256x8xf32>
    %c0_77 = arith.constant 0 : index
    %c0_78 = arith.constant 0 : index
    %139 = vector.load %arg6[%c0_77, %c0_78] : memref<1x8xf32, #tpu.memory_space<vmem>>, vector<1x8xf32>
    %140 = vector.shape_cast %139 : vector<1x8xf32> to vector<8xf32>
    %141 = vector.shape_cast %140 : vector<8xf32> to vector<1x8xf32>
    %142 = vector.broadcast %141 : vector<1x8xf32> to vector<256x8xf32>
    %143 = arith.mulf %138, %142 : vector<256x8xf32>
    %c0_79 = arith.constant 0 : index
    %c0_80 = arith.constant 0 : index
    %144 = vector.load %arg7[%c0_79, %c0_80] : memref<1x8xf32, #tpu.memory_space<vmem>>, vector<1x8xf32>
    %145 = vector.shape_cast %144 : vector<1x8xf32> to vector<8xf32>
    %146 = vector.shape_cast %145 : vector<8xf32> to vector<1x8xf32>
    %147 = vector.broadcast %146 : vector<1x8xf32> to vector<256x8xf32>
    %148 = arith.addf %143, %147 : vector<256x8xf32>
    %cst_81 = arith.constant 0.000000e+00 : f32
    %149 = vector.broadcast %cst_81 : f32 to vector<256x8xf32>
    %150 = arith.maximumf %148, %149 : vector<256x8xf32>
    %151 = vector.shape_cast %150 : vector<256x8xf32> to vector<16x16x8xf32>
    %152 = vector.extract_strided_slice %151 {offsets = [0, 0, 0], sizes = [16, 1, 8], strides = [1, 1, 1]} : vector<16x16x8xf32> to vector<16x1x8xf32>
    %153 = vector.shape_cast %152 : vector<16x1x8xf32> to vector<16x8xf32>
    %154 = vector.extract_strided_slice %151 {offsets = [0, 1, 0], sizes = [16, 1, 8], strides = [1, 1, 1]} : vector<16x16x8xf32> to vector<16x1x8xf32>
    %155 = vector.shape_cast %154 : vector<16x1x8xf32> to vector<16x8xf32>
    %156 = vector.extract_strided_slice %151 {offsets = [0, 2, 0], sizes = [16, 1, 8], strides = [1, 1, 1]} : vector<16x16x8xf32> to vector<16x1x8xf32>
    %157 = vector.shape_cast %156 : vector<16x1x8xf32> to vector<16x8xf32>
    %158 = vector.extract_strided_slice %151 {offsets = [0, 3, 0], sizes = [16, 1, 8], strides = [1, 1, 1]} : vector<16x16x8xf32> to vector<16x1x8xf32>
    %159 = vector.shape_cast %158 : vector<16x1x8xf32> to vector<16x8xf32>
    %160 = vector.extract_strided_slice %151 {offsets = [0, 4, 0], sizes = [16, 1, 8], strides = [1, 1, 1]} : vector<16x16x8xf32> to vector<16x1x8xf32>
    %161 = vector.shape_cast %160 : vector<16x1x8xf32> to vector<16x8xf32>
    %162 = vector.extract_strided_slice %151 {offsets = [0, 5, 0], sizes = [16, 1, 8], strides = [1, 1, 1]} : vector<16x16x8xf32> to vector<16x1x8xf32>
    %163 = vector.shape_cast %162 : vector<16x1x8xf32> to vector<16x8xf32>
    %164 = vector.extract_strided_slice %151 {offsets = [0, 6, 0], sizes = [16, 1, 8], strides = [1, 1, 1]} : vector<16x16x8xf32> to vector<16x1x8xf32>
    %165 = vector.shape_cast %164 : vector<16x1x8xf32> to vector<16x8xf32>
    %166 = vector.extract_strided_slice %151 {offsets = [0, 7, 0], sizes = [16, 1, 8], strides = [1, 1, 1]} : vector<16x16x8xf32> to vector<16x1x8xf32>
    %167 = vector.shape_cast %166 : vector<16x1x8xf32> to vector<16x8xf32>
    %168 = vector.extract_strided_slice %151 {offsets = [0, 8, 0], sizes = [16, 1, 8], strides = [1, 1, 1]} : vector<16x16x8xf32> to vector<16x1x8xf32>
    %169 = vector.shape_cast %168 : vector<16x1x8xf32> to vector<16x8xf32>
    %170 = vector.extract_strided_slice %151 {offsets = [0, 9, 0], sizes = [16, 1, 8], strides = [1, 1, 1]} : vector<16x16x8xf32> to vector<16x1x8xf32>
    %171 = vector.shape_cast %170 : vector<16x1x8xf32> to vector<16x8xf32>
    %172 = vector.extract_strided_slice %151 {offsets = [0, 10, 0], sizes = [16, 1, 8], strides = [1, 1, 1]} : vector<16x16x8xf32> to vector<16x1x8xf32>
    %173 = vector.shape_cast %172 : vector<16x1x8xf32> to vector<16x8xf32>
    %174 = vector.extract_strided_slice %151 {offsets = [0, 11, 0], sizes = [16, 1, 8], strides = [1, 1, 1]} : vector<16x16x8xf32> to vector<16x1x8xf32>
    %175 = vector.shape_cast %174 : vector<16x1x8xf32> to vector<16x8xf32>
    %176 = vector.extract_strided_slice %151 {offsets = [0, 12, 0], sizes = [16, 1, 8], strides = [1, 1, 1]} : vector<16x16x8xf32> to vector<16x1x8xf32>
    %177 = vector.shape_cast %176 : vector<16x1x8xf32> to vector<16x8xf32>
    %178 = vector.extract_strided_slice %151 {offsets = [0, 13, 0], sizes = [16, 1, 8], strides = [1, 1, 1]} : vector<16x16x8xf32> to vector<16x1x8xf32>
    %179 = vector.shape_cast %178 : vector<16x1x8xf32> to vector<16x8xf32>
    %180 = vector.extract_strided_slice %151 {offsets = [0, 14, 0], sizes = [16, 1, 8], strides = [1, 1, 1]} : vector<16x16x8xf32> to vector<16x1x8xf32>
    %181 = vector.shape_cast %180 : vector<16x1x8xf32> to vector<16x8xf32>
    %182 = vector.extract_strided_slice %151 {offsets = [0, 15, 0], sizes = [16, 1, 8], strides = [1, 1, 1]} : vector<16x16x8xf32> to vector<16x1x8xf32>
    %183 = vector.shape_cast %182 : vector<16x1x8xf32> to vector<16x8xf32>
    %184 = tpu.concatenate %153, %155, %157, %159, %161, %163, %165, %167, %169, %171, %173, %175, %177, %179, %181, %183 in 1 : vector<16x8xf32>, vector<16x8xf32>, vector<16x8xf32>, vector<16x8xf32>, vector<16x8xf32>, vector<16x8xf32>, vector<16x8xf32>, vector<16x8xf32>, vector<16x8xf32>, vector<16x8xf32>, vector<16x8xf32>, vector<16x8xf32>, vector<16x8xf32>, vector<16x8xf32>, vector<16x8xf32>, vector<16x8xf32> -> vector<16x128xf32>
    %c0_82 = arith.constant 0 : index
    %c0_83 = arith.constant 0 : index
    %c0_84 = arith.constant 0 : index
    %185 = vector.load %arg8[%c0_82, %c0_83, %c0_84] : memref<1x16x128xf32, #tpu.memory_space<vmem>>, vector<1x16x128xf32>
    %186 = vector.shape_cast %185 : vector<1x16x128xf32> to vector<16x128xf32>
    %187 = vector.shape_cast %184 : vector<16x128xf32> to vector<1x16x128xf32>
    tpu.vector_store %arg8[%c0_82, %c0_83, %c0_84], %187 {strides = array<i32>} : memref<1x16x128xf32, #tpu.memory_space<vmem>>, vector<1x16x128xf32>,
    return
  }
  func.func @transform_0(%arg0: i32) -> (i32, i32, i32, i32) {
    %c0_i32 = arith.constant 0 : i32
    %c0_i32_0 = arith.constant 0 : i32
    %c0_i32_1 = arith.constant 0 : i32
    %c0_i32_2 = arith.constant 0 : i32
    return %arg0, %c0_i32, %c0_i32_0, %c0_i32_1 : i32, i32, i32, i32
  }
  func.func @transform_1(%arg0: i32) -> (i32, i32) {
    %c0_i32 = arith.constant 0 : i32
    %c0_i32_0 = arith.constant 0 : i32
    %c0_i32_1 = arith.constant 0 : i32
    return %c0_i32, %c0_i32_0 : i32, i32
  }
  func.func @transform_2(%arg0: i32) -> (i32, i32) {
    %c0_i32 = arith.constant 0 : i32
    %c0_i32_0 = arith.constant 0 : i32
    %c0_i32_1 = arith.constant 0 : i32
    return %c0_i32, %c0_i32_0 : i32, i32
  }
  func.func @transform_3(%arg0: i32) -> (i32, i32) {
    %c0_i32 = arith.constant 0 : i32
    %c0_i32_0 = arith.constant 0 : i32
    %c0_i32_1 = arith.constant 0 : i32
    return %c0_i32, %c0_i32_0 : i32, i32
  }
  func.func @transform_4(%arg0: i32) -> (i32, i32) {
    %c0_i32 = arith.constant 0 : i32
    %c0_i32_0 = arith.constant 0 : i32
    %c0_i32_1 = arith.constant 0 : i32
    return %c0_i32, %c0_i32_0 : i32, i32
  }
  func.func @transform_5(%arg0: i32) -> (i32, i32) {
    %c0_i32 = arith.constant 0 : i32
    %c0_i32_0 = arith.constant 0 : i32
    %c0_i32_1 = arith.constant 0 : i32
    return %c0_i32, %c0_i32_0 : i32, i32
  }
  func.func @transform_6(%arg0: i32) -> (i32, i32) {
    %c0_i32 = arith.constant 0 : i32
    %c0_i32_0 = arith.constant 0 : i32
    %c0_i32_1 = arith.constant 0 : i32
    return %c0_i32, %c0_i32_0 : i32, i32
  }
  func.func @transform_7(%arg0: i32) -> (i32, i32, i32) {
    %c0_i32 = arith.constant 0 : i32
    %c0_i32_0 = arith.constant 0 : i32
    %c0_i32_1 = arith.constant 0 : i32
    return %arg0, %c0_i32, %c0_i32_0 : i32, i32, i32
  }
}

</mosaic_0001>

<bundles_post_ra>
// kernel: conv_block.1
= control target key start
LH: loop header
LB: loop body
LE: loop exit
PB: predicated region body
PF: predicated region fallthrough
CT: control target
= control target key end

     0   :  { %s7058_s24 = smov 0   ;;  %s11063_s0 = inlined_call_operand.vmem [shape: f32[2,16,16,4], index: 0, kind: input, shape index: {}]   ;;  %s11064_s1 = inlined_call_operand.vmem [shape: bf16[36,8], index: 1, kind: input, shape index: {}]   ;;  %s11065_s2 = inlined_call_operand.vmem [shape: f32[1,8], index: 2, kind: input, shape index: {}]   ;;  %s11066_s3 = inlined_call_operand.vmem [shape: f32[1,8], index: 3, kind: input, shape index: {}]   ;;  %s11067_s4 = inlined_call_operand.vmem [shape: bf16[72,8], index: 4, kind: input, shape index: {}]   ;;  %s11068_s5 = inlined_call_operand.vmem [shape: f32[1,8], index: 5, kind: input, shape index: {}]   ;;  %s11069_s6 = inlined_call_operand.vmem [shape: f32[1,8], index: 6, kind: input, shape index: {}]   ;;  %s11070_s7 = inlined_call_operand.vmem [shape: f32[2,16,128], index: 7, kind: output, shape index: {}]  }
   0x1 LB: > { %s5457_s25 = sadd.s32 4294967295, %s6996_s24   ;;  %p5461_p0 = scmp.ge.s32.totalorder %s6996_s24, 1  ;;  %s6996_s24 = sphi %s7058_s24, %s17_s24  }
   0x2   : > { %p237_p1 = scmp.lt.s32.totalorder %s6996_s24, 3 }
   0x4   : > { %p238_p2 = pnand %p5461_p0, %p237_p1 }
   0x6   : > { %241 = sbr.rel (%p238_p2) target bundleno = 1393 (0x571), region = 48 }
   0xd   : > { %vm11089_vm0 = vcmask 31744   ;;  %p269_p3 = scmp.lt.s32.totalorder %s5457_s25, 1  ;;  %v11071_v0 = vmov 0.0   ;;  %s6999_s30 = smov 4   ;;  %v351_v45 = vlaneseq  ;;  %vm11106_vm15 = vcmask 64512  }
   0xe   : > { %282 = vst.msk [vmem:[#allocation2 + $0x8] sm:$0xff] %vm11089_vm0, %v11071_v0  ;;  %283 = vst.msk [vmem:[#allocation2 + $0x10] sm:$0xff] %vm11089_vm0, %v11071_v0  ;;  %s7000_s8 = smov 8   ;;  %s7001_s9 = smov 12  }
   0xf   : > { %281 = vst.msk [vmem:[#allocation2] sm:$0xff] %vm11089_vm0, %v11071_v0  ;;  %284 = vst.msk [vmem:[#allocation2 + $0x118] sm:$0xff] %vm11089_vm0, %v11071_v0  ;;  %s12396_s25 = smov (!%p269_p3, %s5457_s25), 1  ;;  %v7167_v57 = vshrl.u32 %v351_v45, 7  ;;  %s7002_s10 = smov 16  }
  0x10   : > { %285 = vst.msk [vmem:[#allocation2 + $0x120] sm:$0xff] %vm11089_vm0, %v11071_v0  ;;  %286 = vst.msk [vmem:[#allocation2 + $0x128] sm:$0xff] %vm11089_vm0, %v11071_v0  ;;  %s5512_s26 = sshll.u32 %s12396_s25, 8  ;;  %s7003_s11 = smov 20  }
  0x11   : > { %s7084_s29 = scalar_lea.vmem %s11063_s0, %s5512_s26  ;;  %s7004_s12 = smov 24  }
  0x12   : > { %v289_v1 = vld [vmem:[%s7084_s29 + $0x10] sm:$0xff]  ;;  %v290_v2 = vld [vmem:[%s7084_s29 + $0x18] sm:$0xff]  ;;  %v287_v3 = vld [vmem:[%s7084_s29] sm:$0xff]  ;;  %s7005_s19 = smov 28   ;;  %s7006_s20 = smov 32  }
  0x13   : > { %321 = vst.msk [vmem:[#allocation2 + $0x28] sm:$0xff] %vm11089_vm0, %v289_v1  ;;  %322 = vst.msk [vmem:[#allocation2 + $0x30] sm:$0xff] %vm11089_vm0, %v290_v2  ;;  %v288_v4 = vld [vmem:[%s7084_s29 + $0x8] sm:$0xff]  ;;  %v291_v5 = vld [vmem:[%s7084_s29 + $0x20] sm:$0xff]  ;;  %v353_v1 = vadd.s32 8, %v7167_v57  ;;  %s7007_s27 = smov 56  }
  0x14   : > { %319 = vst.msk [vmem:[#allocation2 + $0x18] sm:$0xff] %vm11089_vm0, %v287_v3  ;;  %v292_v6 = vld [vmem:[%s7084_s29 + $0x28] sm:$0xff]  ;;  %320 = vst.msk [vmem:[#allocation2 + $0x20] sm:$0xff] %vm11089_vm0, %v288_v4  ;;  %v293_v9 = vld [vmem:[%s7084_s29 + $0x30] sm:$0xff]  ;;  %s7009_s13 = smov 48   ;;  %s7010_s16 = smov 64  }
  0x15   : > { %v960_v7 = vld [vmem:[#allocation2 + $0x8] sm:$0xff]  ;;  %v961_v8 = vld [vmem:[#allocation2 + $0x10] sm:$0xff]  ;;  %323 = vst.msk [vmem:[#allocation2 + $0x38] sm:$0xff] %vm11089_vm0, %v291_v5  ;;  %324 = vst.msk [vmem:[#allocation2 + $0x40] sm:$0xff] %vm11089_vm0, %v292_v6  ;;  %s7014_s14 = smov 88   ;;  %s7015_s15 = smov 96  }
  0x16   : > { %v5664_v10 = vpack.i.bf16 %v961_v8, %v960_v7  ;;  %v294_v11 = vld [vmem:[%s7084_s29 + $0x38] sm:$0xff]  ;;  %325 = vst.msk [vmem:[#allocation2 + $0x48] sm:$0xff] %vm11089_vm0, %v293_v9  ;;  %v295_v12 = vld [vmem:[%s7084_s29 + $0x40] sm:$0xff]  ;;  %v296_v13 = vld [vmem:[%s7084_s29 + $0x48] sm:$0xff]  ;;  %v355_v8 = vadd.s32 24, %v7167_v57  ;;  %v395_v9 = vand.u32 15, %v353_v1 }
  0x17   : > { %326 = vst.msk [vmem:[#allocation2 + $0x50] sm:$0xff] %vm11089_vm0, %v294_v11  ;;  %327 = vst.msk [vmem:[#allocation2 + $0x58] sm:$0xff] %vm11089_vm0, %v295_v12  ;;  %v297_v14 = vld [vmem:[%s7084_s29 + $0x50] sm:$0xff]  ;;  %v298_v15 = vld [vmem:[%s7084_s29 + $0x58] sm:$0xff]  ;;  %s7016_s17 = smov 104   ;;  %s7017_s18 = smov 120  }
  0x18   : > { %328 = vst.msk [vmem:[#allocation2 + $0x60] sm:$0xff] %vm11089_vm0, %v296_v13  ;;  %v299_v16 = vld [vmem:[%s7084_s29 + $0x60] sm:$0xff]  ;;  %5665 = vrot.lane.b32.xlu0 %v5664_v10, %s6999_s30  ;;  %329 = vst.msk [vmem:[#allocation2 + $0x68] sm:$0xff] %vm11089_vm0, %v297_v14  ;;  %v300_v17 = vld [vmem:[%s7084_s29 + $0x68] sm:$0xff]  ;;  %v357_v10 = vadd.s32 40, %v7167_v57  ;;  %vm7197_vm1 = vcmp.le.s32.totalorder %v395_v9, 14 }
  0x19   : > { %330 = vst.msk [vmem:[#allocation2 + $0x70] sm:$0xff] %vm11089_vm0, %v298_v15  ;;  %331 = vst.msk [vmem:[#allocation2 + $0x78] sm:$0xff] %vm11089_vm0, %v299_v16  ;;  %v301_v18 = vld [vmem:[%s7084_s29 + $0x70] sm:$0xff]  ;;  %v302_v19 = vld [vmem:[%s7084_s29 + $0x78] sm:$0xff]  ;;  %v11368_v9 = vmov 0 }
  0x1a   : > { %332 = vst.msk [vmem:[#allocation2 + $0x80] sm:$0xff] %vm11089_vm0, %v300_v17  ;;  %333 = vst.msk [vmem:[#allocation2 + $0x88] sm:$0xff] %vm11089_vm0, %v301_v18  ;;  %v303_v20 = vld [vmem:[%s7084_s29 + $0x80] sm:$0xff]  ;;  %v304_v21 = vld [vmem:[%s7084_s29 + $0x88] sm:$0xff]  ;;  %v409_v17 = vand.u32 15, %v355_v8  ;;  %v359_v18 = vadd.s32 56, %v7167_v57 }
  0x1b   : > { %334 = vst.msk [vmem:[#allocation2 + $0x90] sm:$0xff] %vm11089_vm0, %v302_v19  ;;  %v305_v22 = vld [vmem:[%s7084_s29 + $0x90] sm:$0xff]  ;;  %335 = vst.msk [vmem:[#allocation2 + $0x98] sm:$0xff] %vm11089_vm0, %v303_v20  ;;  %v306_v23 = vld [vmem:[%s7084_s29 + $0x98] sm:$0xff]  ;;  %v11353_v19 = vmov 0 }
  0x1c   : > { %336 = vst.msk [vmem:[#allocation2 + $0xa0] sm:$0xff] %vm11089_vm0, %v304_v21  ;;  %337 = vst.msk [vmem:[#allocation2 + $0xa8] sm:$0xff] %vm11089_vm0, %v305_v22  ;;  %v307_v24 = vld [vmem:[%s7084_s29 + $0xa0] sm:$0xff]  ;;  %v308_v25 = vld [vmem:[%s7084_s29 + $0xa8] sm:$0xff]  ;;  %v11354_v19 = vsel %vm7197_vm1, 4294967295, %v11353_v19  ;;  %v423_v21 = vand.u32 15, %v357_v10 }
  0x1d   : > { %v964_v26 = vld [vmem:[#allocation2 + $0x28] sm:$0xff]  ;;  %v965_v27 = vld [vmem:[#allocation2 + $0x30] sm:$0xff]  ;;  %v962_v28 = vld [vmem:[#allocation2 + $0x18] sm:$0xff]  ;;  %338 = vst.msk [vmem:[#allocation2 + $0xb0] sm:$0xff] %vm11089_vm0, %v306_v23  ;;  %v361_v22 = vadd.s32 72, %v7167_v57  ;;  %vm7215_vm2 = vcmp.le.s32.totalorder %v409_v17, 14 }
  0x1e   : > { %339 = vst.msk [vmem:[#allocation2 + $0xb8] sm:$0xff] %vm11089_vm0, %v307_v24  ;;  %340 = vst.msk [vmem:[#allocation2 + $0xc0] sm:$0xff] %vm11089_vm0, %v308_v25  ;;  %v7131_v29 = vpack.i.bf16 %v965_v27, %v964_v26  ;;  %v963_v30 = vld [vmem:[#allocation2 + $0x20] sm:$0xff]  ;;  %v966_v31 = vld [vmem:[#allocation2 + $0x38] sm:$0xff]  ;;  %vm7222_vm3 = vcmp.le.s32.totalorder %v423_v21, 14 }
  0x1f   : > { %v967_v32 = vld [vmem:[#allocation2 + $0x40] sm:$0xff]  ;;  %v7133_v33 = vpack.i.bf16 %v963_v30, %v962_v28  ;;  %v968_v34 = vld [vmem:[#allocation2 + $0x48] sm:$0xff]  ;;  %v309_v35 = vld [vmem:[%s7084_s29 + $0xb0] sm:$0xff]  ;;  %11355 = vst [vmem:[#allocation4_spill] sm:$0xff] %v11354_v19  ;;  %v363_v28 = vadd.s32 88, %v7167_v57 }
  0x20   : > { %v310_v36 = vld [vmem:[%s7084_s29 + $0xb8] sm:$0xff]  ;;  %5675 = vrot.lane.b32.xlu1 %v7131_v29, %s6999_s30  ;;  %v7139_v37 = vpack.i.bf16 %v967_v32, %v966_v31  ;;  %v969_v38 = vld [vmem:[#allocation2 + $0x50] sm:$0xff]  ;;  %341 = vst.msk [vmem:[#allocation2 + $0xc8] sm:$0xff] %vm11089_vm0, %v309_v35  ;;  %v971_v41 = vld [vmem:[#allocation2 + $0x60] sm:$0xff]  ;;  %v11356_v32 = vmov 0  ;;  %v437_v35 = vand.u32 15, %v359_v18 }
  0x21   : > { %342 = vst.msk [vmem:[#allocation2 + $0xd0] sm:$0xff] %vm11089_vm0, %v310_v36  ;;  %5670 = vrot.lane.b32.xlu0 %v7133_v33, %s6999_s30  ;;  %v7145_v39 = vpack.i.bf16 %v969_v38, %v968_v34  ;;  %v970_v40 = vld [vmem:[#allocation2 + $0x58] sm:$0xff]  ;;  %v972_v42 = vld [vmem:[#allocation2 + $0x68] sm:$0xff]  ;;  %v973_v43 = vld [vmem:[#allocation2 + $0x70] sm:$0xff]  ;;  %v11357_v32 = vsel %vm7215_vm2, 4294967295, %v11356_v32  ;;  %v365_v36 = vadd.s32 104, %v7167_v57 }
  0x22   : > { %v974_v44 = vld [vmem:[#allocation2 + $0x78] sm:$0xff]  ;;  %v7149_v46 = vpack.i.bf16 %v971_v41, %v970_v40  ;;  %v975_v47 = vld [vmem:[#allocation2 + $0x80] sm:$0xff]  ;;  %v976_v48 = vld [vmem:[#allocation2 + $0x88] sm:$0xff]  ;;  %v7153_v50 = vpack.i.bf16 %v973_v43, %v972_v42  ;;  %11358 = vst [vmem:[#allocation5_spill] sm:$0xff] %v11357_v32  ;;  %v11359_v38 = vmov 0  ;;  %v451_v41 = vand.u32 15, %v361_v22 }
  0x23   : > { %v977_v49 = vld [vmem:[#allocation2 + $0x90] sm:$0xff]  ;;  %v311_v51 = vld [vmem:[%s7084_s29 + $0xc0] sm:$0xff]  ;;  %v312_v52 = vld [vmem:[%s7084_s29 + $0xc8] sm:$0xff]  ;;  %v7171_v58 = vpack.i.bf16 %v975_v47, %v974_v44  ;;  %v11360_v38 = vsel %vm7222_vm3, 4294967295, %v11359_v38  ;;  %v367_v42 = vadd.s32 120, %v7167_v57  ;;  %v369_v44 = vadd.s32 136, %v7167_v57 }
  0x24   : > { %5680 = vrot.lane.b32.xlu1 %v7139_v37, %s6999_s30  ;;  %v313_v53 = vld [vmem:[%s7084_s29 + $0xd0] sm:$0xff]  ;;  %343 = vst.msk [vmem:[#allocation2 + $0xd8] sm:$0xff] %vm11089_vm0, %v311_v51  ;;  %344 = vst.msk [vmem:[#allocation2 + $0xe0] sm:$0xff] %vm11089_vm0, %v312_v52  ;;  %v314_v54 = vld [vmem:[%s7084_s29 + $0xd8] sm:$0xff]  ;;  %v7175_v59 = vpack.i.bf16 %v977_v49, %v976_v48  ;;  %v465_v49 = vand.u32 15, %v363_v28  ;;  %vm7246_vm4 = vcmp.le.s32.totalorder %v437_v35, 14 }
  0x25   : > { %5685 = vrot.lane.b32.xlu0 %v7145_v39, %s6999_s30  ;;  %345 = vst.msk [vmem:[#allocation2 + $0xe8] sm:$0xff] %vm11089_vm0, %v313_v53  ;;  %v315_v55 = vld [vmem:[%s7084_s29 + $0xe0] sm:$0xff]  ;;  %v316_v56 = vld [vmem:[%s7084_s29 + $0xe8] sm:$0xff]  ;;  %346 = vst.msk [vmem:[#allocation2 + $0xf0] sm:$0xff] %vm11089_vm0, %v314_v54  ;;  %v11362_v53 = vmov 0  ;;  %vm7252_vm5 = vcmp.le.s32.totalorder %v451_v41, 14 }
  0x26   : > { %347 = vst.msk [vmem:[#allocation2 + $0xf8] sm:$0xff] %vm11089_vm0, %v315_v55  ;;  %348 = vst.msk [vmem:[#allocation2 + $0x100] sm:$0xff] %vm11089_vm0, %v316_v56  ;;  %v978_v60 = vld [vmem:[#allocation2 + $0x98] sm:$0xff]  ;;  %v979_v61 = vld [vmem:[#allocation2 + $0xa0] sm:$0xff]  ;;  %v11363_v53 = vsel %vm7246_vm4, 4294967295, %v11362_v53  ;;  %v479_v55 = vand.u32 15, %v365_v36 }
  0x27   : > { %v980_v62 = vld [vmem:[#allocation2 + $0xa8] sm:$0xff]  ;;  %v981_v63 = vld [vmem:[#allocation2 + $0xb0] sm:$0xff]  ;;  %v7180_v2 = vpack.i.bf16 %v979_v61, %v978_v60  ;;  %v982_v4 = vld [vmem:[#allocation2 + $0xb8] sm:$0xff]  ;;  %11361 = vst [vmem:[#allocation6_spill] sm:$0xff] %v11360_v38  ;;  %v11365_v56 = vmov 0  ;;  %v493_v61 = vand.u32 15, %v367_v42 }
  0x28   : > { %5690 = vrot.lane.b32.xlu1 %v7149_v46, %s6999_s30  ;;  %v7184_v3 = vpack.i.bf16 %v981_v63, %v980_v62  ;;  %v983_v5 = vld [vmem:[#allocation2 + $0xc0] sm:$0xff]  ;;  %v984_v6 = vld [vmem:[#allocation2 + $0xc8] sm:$0xff]  ;;  %v985_v7 = vld [vmem:[#allocation2 + $0xd0] sm:$0xff]  ;;  %11364 = vst [vmem:[#allocation7_spill] sm:$0xff] %v11363_v53  ;;  %v11366_v56 = vsel %vm7252_vm5, 4294967295, %v11365_v56  ;;  %v371_v62 = vadd.s32 152, %v7167_v57 }
  0x29   : > { %5695 = vrot.lane.b32.xlu0 %v7153_v50, %s6999_s30  ;;  %v7190_v11 = vpack.i.bf16 %v983_v5, %v982_v4  ;;  %v7194_v12 = vpack.i.bf16 %v985_v7, %v984_v6  ;;  %v993_v20 = vld [vmem:[#allocation2 + $0x11] sm:$0xff]  ;;  %v992_v30 = vld [vmem:[#allocation2 + $0x9] sm:$0xff]  ;;  %v7219_v34 = vld [vmem:[#allocation2 + $0x21] sm:$0xff]  ;;  %11367 = vst [vmem:[#allocation8_spill] sm:$0xff] %v11366_v56  ;;  %v373_v63 = vadd.s32 168, %v7167_v57  ;;  %v507_v4 = vand.u32 15, %v369_v44 }
  0x2a   : > { %v317_v23 = vld [vmem:[%s7084_s29 + $0xf0] sm:$0xff]  ;;  %v1089_v31 = vsel %vm7197_vm1, %v993_v20, 0.0  ;;  %v7236_v47 = vld [vmem:[#allocation2 + $0x19] sm:$0xff]  ;;  %v1091_v48 = vsel %vm7215_vm2, %v7219_v34, 0.0  ;;  %v7250_v54 = vld [vmem:[#allocation2 + $0x41] sm:$0xff]  ;;  %v375_v5 = vadd.s32 184, %v7167_v57 }
  0x2b   : > { %v986_v13 = vld [vmem:[#allocation2 + $0xd8] sm:$0xff]  ;;  %v987_v14 = vld [vmem:[#allocation2 + $0xe0] sm:$0xff]  ;;  %349 = vst.msk [vmem:[#allocation2 + $0x108] sm:$0xff] %vm11089_vm0, %v317_v23  ;;  %v5744_v45 = vpack.i.bf16 %v1089_v31, %v992_v30  ;;  %v7241_v51 = vld [vmem:[#allocation2 + $0x29] sm:$0xff]  ;;  %v5749_v1 = vpack.i.bf16 %v1091_v48, %v7236_v47  ;;  %v1095_v8 = vsel %vm7246_vm4, %v7250_v54, 0.0  ;;  %vm7271_vm6 = vcmp.le.s32.totalorder %v465_v49, 14 }
  0x2c   : > { %5700 = vrot.lane.b32.xlu1 %v7171_v58, %s6999_s30  ;;  %v988_v15 = vld [vmem:[#allocation2 + $0xe8] sm:$0xff]  ;;  %v989_v16 = vld [vmem:[#allocation2 + $0xf0] sm:$0xff]  ;;  %v7205_v24 = vpack.i.bf16 %v987_v14, %v986_v13  ;;  %v7266_v7 = vld [vmem:[#allocation2 + $0x39] sm:$0xff]  ;;  %v11369_v9 = vsel %vm7271_vm6, 4294967295, %v11368_v9  ;;  %vm7282_vm7 = vcmp.le.s32.totalorder %v479_v55, 14  ;;  %vm7289_vm8 = vcmp.le.s32.totalorder %v493_v61, 14 }
  0x2d   : > { %5705 = vrot.lane.b32.xlu0 %v7175_v59, %s6999_s30  ;;  %v7210_v25 = vpack.i.bf16 %v989_v16, %v988_v15  ;;  %v990_v26 = vld [vmem:[#allocation2 + $0xf8] sm:$0xff]  ;;  %v991_v27 = vld [vmem:[#allocation2 + $0x100] sm:$0xff]  ;;  %11370 = vst [vmem:[#allocation9_spill] sm:$0xff] %v11369_v9  ;;  %v7277_v13 = vld [vmem:[#allocation2 + $0x49] sm:$0xff]  ;;  %v11371_v15 = vmov 0  ;;  %v380_v16 = vadd.s32 224, %v7167_v57 }
  0x2e   : > { %v7226_v40 = vld [vmem:[#allocation2 + $0x31] sm:$0xff]  ;;  %v7231_v43 = vpack.i.bf16 %v991_v27, %v990_v26  ;;  %v7275_v10 = vld [vmem:[#allocation2 + $0x61] sm:$0xff]  ;;  %v11372_v15 = vsel %vm7282_vm7, 4294967295, %v11371_v15  ;;  %v11374_v18 = vmov 0  ;;  %v521_v20 = vand.u32 15, %v371_v62  ;;  %v7297_v27 = vld [vmem:[#allocation2 + $0x59] sm:$0xff] }
  0x2f   : > { %v1093_v52 = vsel %vm7222_vm3, %v7226_v40, 0.0  ;;  %v7256_v60 = vld [vmem:[#allocation2 + $0x51] sm:$0xff]  ;;  %11373 = vst [vmem:[#allocation10_spill] sm:$0xff] %v11372_v15  ;;  %v11375_v18 = vsel %vm7289_vm8, 4294967295, %v11374_v18  ;;  %v535_v21 = vand.u32 15, %v373_v63  ;;  %v377_v22 = vadd.s32 200, %v7167_v57 }
  0x30   : > { %5710 = vrot.lane.b32.xlu1 %v7180_v2, %s6999_s30  ;;  %v5754_v6 = vpack.i.bf16 %v1093_v52, %v7241_v51  ;;  %v1097_v14 = vsel %vm7252_vm5, %v7256_v60, 0.0  ;;  %v7287_v17 = vld [vmem:[#allocation2 + $0x71] sm:$0xff]  ;;  %11376 = vst [vmem:[#allocation11_spill] sm:$0xff] %v11375_v18  ;;  %v5759_v26 = vpack.i.bf16 %v1095_v8, %v7266_v7  ;;  %v1099_v28 = vsel %vm7271_vm6, %v7275_v10, 0.0  ;;  %v7309_v36 = vld [vmem:[#allocation2 + $0x81] sm:$0xff]  ;;  %v7311_v42 = vld [vmem:[#allocation2 + $0x69] sm:$0xff] }
  0x31   : > { %5715 = vrot.lane.b32.xlu0 %v7184_v3, %s6999_s30  ;;  %v318_v23 = vld [vmem:[%s7084_s29 + $0xf8] sm:$0xff]  ;;  %vm7302_vm9 = vcmp.le.s32.totalorder %v507_v4, 14  ;;  %v11377_v30 = vmov 0  ;;  %v549_v31 = vand.u32 15, %v375_v5  ;;  %v5764_v35 = vpack.i.bf16 %v1097_v14, %v7277_v13  ;;  %v7329_v63 = vld [vmem:[#allocation2 + $0x89] sm:$0xff]  ;;  %s7011_s29 = smov 112  }
  0x32   : > { %v11378_v30 = vsel %vm7302_vm9, 4294967295, %v11377_v30  ;;  %350 = vst.msk [vmem:[#allocation2 + $0x110] sm:$0xff] %vm11089_vm0, %v318_v23  ;;  %v584_v41 = vand.u32 15, %v380_v16  ;;  %v1101_v44 = vsel %vm7282_vm7, %v7287_v17, 0.0  ;;  %v379_v48 = vadd.s32 216, %v7167_v57  ;;  %v7324_v61 = vld [vmem:[#allocation2 + $0x79] sm:$0xff] }
  0x33   : > { %11379 = vst [vmem:[#allocation12_spill] sm:$0xff] %v11378_v30  ;;  %v563_v49 = vand.u32 15, %v377_v22  ;;  %v7320_v52 = vadd.s32 232, %v7167_v57  ;;  %v5769_v55 = vpack.i.bf16 %v1099_v28, %v7297_v27  ;;  %v1103_v62 = vsel %vm7289_vm8, %v7309_v36, 0.0  ;;  %11381 = vst [vmem:[#allocation14_spill] sm:$0xff] %v7329_v63  ;;  %v7346_v14 = vld [vmem:[#allocation2 + $0x107] sm:$0xff] }
  0x34   : > { %5720 = vrot.lane.b32.xlu1 %v7190_v11, %s6999_s30  ;;  %vm7331_vm10 = vcmp.le.s32.totalorder %v521_v20, 14  ;;  %v5774_v4 = vpack.i.bf16 %v1101_v44, %v7311_v42  ;;  %vm7342_vm11 = vcmp.ge.s32.totalorder %v584_v41, 1  ;;  %v11386_v8 = vmov 0  ;;  %v7352_v20 = vld [vmem:[#allocation2 + $0xb1] sm:$0xff]  ;;  %v1154_v0 = vld [vmem:[#allocation2 + $0x108] sm:$0xff]  ;;  %v7384_v18 = vld [vmem:[#allocation2 + $0x99] sm:$0xff] }
  0x35   : > { %5725 = vrot.lane.b32.xlu0 %v7194_v12, %s6999_s30  ;;  %v11387_v8 = vsel %vm7342_vm11, 4294967295, %v11386_v8  ;;  %vm7348_vm12 = vcmp.le.s32.totalorder %v535_v21, 14  ;;  %v11389_v16 = vmov 0  ;;  %11392 = vst [vmem:[#allocation19_spill] sm:$0xff] %v7352_v20  ;;  %vm7354_vm13 = vcmp.le.s32.totalorder %v549_v31, 14  ;;  %11400 = vst [vmem:[#allocation23_spill] sm:$0xff] %v7384_v18 }
  0x36   : > { %11388 = vst [vmem:[#allocation17_spill] sm:$0xff] %v11387_v8  ;;  %v11390_v16 = vsel %vm7348_vm12, 4294967295, %v11389_v16  ;;  %v11393_v22 = vmov 0  ;;  %v577_v23 = vand.u32 15, %v379_v48  ;;  %vm7361_vm14 = vcmp.le.s32.totalorder %v563_v49, 14 }
  0x37   : > { %11391 = vst [vmem:[#allocation18_spill] sm:$0xff] %v11390_v16  ;;  %v11394_v22 = vsel %vm7354_vm13, 4294967295, %v11393_v22  ;;  %v11396_v28 = vmov 0  ;;  %v591_v21 = vand.u32 15, %v7320_v52  ;;  %v7370_v41 = vadd.s32 16, %v7167_v57 }
  0x38   : > { %5730 = vrot.lane.b32.xlu1 %v7205_v24, %s6999_s30  ;;  %11395 = vst [vmem:[#allocation20_spill] sm:$0xff] %v11394_v22  ;;  %v11397_v28 = vsel %vm7361_vm14, 4294967295, %v11396_v28  ;;  %v5779_v44 = vpack.i.bf16 %v1103_v62, %v7324_v61  ;;  %vm7453_vm0 = vcmp.le.s32.totalorder %v577_v23, 14  ;;  %v11414_v22 = vmov 0.0  }
  0x39   : > { %5735 = vrot.lane.b32.xlu0 %v7210_v25, %s6999_s30  ;;  %11398 = vst [vmem:[#allocation21_spill] sm:$0xff] %v11397_v28  ;;  %v7372_v31 = vld [vmem:[#allocation2 + $0x10f] sm:$0xff]  ;;  %2847 = vst.msk [vmem:[#allocation3] sm:$0xff] %vm11106_vm15, %v11414_v22  ;;  %v11415_v23 = vmov 0  ;;  %v356_v28 = vadd.s32 32, %v7167_v57  ;;  %v11490_v56 = vmov 0 }
  0x3a   : > { %v1155_v30 = vld [vmem:[#allocation2 + $0x110] sm:$0xff]  ;;  %2848 = vst.msk [vmem:[#allocation3 + $0x8] sm:$0xff] %vm11106_vm15, %v11414_v22  ;;  %2849 = vst.msk [vmem:[#allocation3 + $0x10] sm:$0xff] %vm11106_vm15, %v11414_v22 }
  0x3b   : > { %v7389_v62 = vpack.i.bf16 %v1155_v30, %v1154_v0  ;;  %v1163_v0 = vsel %vm7222_vm3, %v7250_v54, 0.0  ;;  %v7413_v30 = vld [vmem:[#allocation2 + $0xd1] sm:$0xff]  ;;  %2850 = vst.msk [vmem:[#allocation3 + $0x118] sm:$0xff] %vm11106_vm15, %v11414_v22  ;;  %2851 = vst.msk [vmem:[#allocation3 + $0x120] sm:$0xff] %vm11106_vm15, %v11414_v22 }
  0x3c   : > { %5740 = vrot.lane.b32.xlu1 %v7231_v43, %s6999_s30  ;;  %11404 = vst [vmem:[#allocation27_spill] sm:$0xff] %v7413_v30  ;;  %2852 = vst.msk [vmem:[#allocation3 + $0x128] sm:$0xff] %vm11106_vm15, %v11414_v22  ;;  %s7008_s30 = smov 40  }
  0x3d   : > { %5745 = vrot.lane.b32.xlu0 %v5744_v45, %s7000_s8  ;;  %v7316_v45 = vld [vmem:[#allocation2 + $0x91] sm:$0xff]  ;;  %11401 = vst [vmem:[#allocation24_spill] sm:$0xff] %v7389_v62 }
  0x3e   : > { %11380 = vst [vmem:[#allocation13_spill] sm:$0xff] %v7316_v45  ;;  %v1105_v5 = vsel %vm7302_vm9, %v7316_v45, 0.0 }
  0x3f   : > { %v5784_v48 = vpack.i.bf16 %v1105_v5, %v7329_v63  ;;  %v1159_v5 = vsel %vm7197_vm1, %v7219_v34, 0.0  ;;  %v1165_v34 = vsel %vm7246_vm4, %v7256_v60, 0.0 }
  0x40   : > { %5750 = vrot.lane.b32.xlu1 %v5749_v1, %s7000_s8  ;;  %v11382_v1 = vmov 0  ;;  %v7419_v63 = vpack.i.bf16 %v1165_v34, %v7277_v13  ;;  %v1171_v34 = vsel %vm7282_vm7, %v7309_v36, 0.0  ;;  %vm7472_vm7 = vcmp.le.s32.totalorder %v591_v21, 14  ;;  %v7486_v21 = vld [vmem:[#allocation2 + $0xd9] sm:$0xff] }
  0x41   : > { %5755 = vrot.lane.b32.xlu0 %v5754_v6, %s7000_s8  ;;  %v11383_v1 = vsel %vm7331_vm10, 4294967295, %v11382_v1  ;;  %v7340_v6 = vld [vmem:[#allocation2 + $0xa1] sm:$0xff]  ;;  %v11416_v23 = vsel %vm7472_vm7, 4294967295, %v11415_v23  ;;  %11420 = vst [vmem:[#allocation38_spill] sm:$0xff] %v7486_v21 }
  0x42   : > { %11384 = vst [vmem:[#allocation15_spill] sm:$0xff] %v11383_v1  ;;  %11385 = vst [vmem:[#allocation16_spill] sm:$0xff] %v7340_v6  ;;  %v1107_v49 = vsel %vm7331_vm10, %v7340_v6, 0.0  ;;  %v7399_v1 = vld [vmem:[#allocation2 + $0xc1] sm:$0xff] }
  0x43   : > { %11403 = vst [vmem:[#allocation26_spill] sm:$0xff] %v7399_v1  ;;  %11405 = vst [vmem:[#allocation28_spill] sm:$0xff] %v7419_v63  ;;  %v7440_v63 = vld [vmem:[#allocation2 + $0xb9] sm:$0xff] }
  0x44   : > { %5760 = vrot.lane.b32.xlu1 %v5759_v26, %s7000_s8  ;;  %v1220_v26 = vsel %vm7342_vm11, %v7346_v14, 0.0  ;;  %11407 = vst [vmem:[#allocation30_spill] sm:$0xff] %v7440_v63  ;;  %11417 = vst [vmem:[#allocation35_spill] sm:$0xff] %v11416_v23  ;;  %v360_v23 = vadd.s32 64, %v7167_v57 }
  0x45   : > { %5765 = vrot.lane.b32.xlu0 %v5764_v35, %s7000_s8  ;;  %v7367_v35 = vadd.s32 248, %v7167_v57  ;;  %v7381_v52 = vpack.i.bf16 %v7372_v31, %v1220_v26  ;;  %v1161_v26 = vsel %vm7215_vm2, %v7226_v40, 0.0 }
  0x46   : > { %v7405_v16 = vpack.i.bf16 %v1161_v26, %v7241_v51  ;;  %v5789_v26 = vpack.i.bf16 %v1107_v49, %v7384_v18  ;;  %v7446_v49 = vpack.i.bf16 %v1171_v34, %v7324_v61  ;;  %v388_v34 = vand.u32 15, %v7167_v57 }
  0x47   : > { %11399 = vst [vmem:[#allocation22_spill] sm:$0xff] %v7381_v52  ;;  %v7397_v52 = vld [vmem:[#allocation2 + $0xa9] sm:$0xff]  ;;  %v605_v15 = vand.u32 15, %v7367_v35  ;;  %v7476_v35 = vld [vmem:[#allocation2 + $0xf1] sm:$0xff]  ;;  %v402_v18 = vand.u32 15, %v7370_v41  ;;  %v358_v41 = vadd.s32 48, %v7167_v57 }
  0x48   : > { %5770 = vrot.lane.b32.xlu1 %v5769_v55, %s7000_s8  ;;  %v1109_v55 = vsel %vm7348_vm12, %v7352_v20, 0.0  ;;  %11402 = vst [vmem:[#allocation25_spill] sm:$0xff] %v7397_v52  ;;  %v7416_v20 = vpack.i.bf16 %v1163_v0, %v7266_v7  ;;  %11408 = vst [vmem:[#allocation31_spill] sm:$0xff] %v7446_v49  ;;  %v7492_v49 = vld [vmem:[#allocation2 + $0x109] sm:$0xff] }
  0x49   : > { %5775 = vrot.lane.b32.xlu0 %v5774_v4, %s7000_s8  ;;  %v7402_v4 = vpack.i.bf16 %v1159_v5, %v7236_v47  ;;  %v1167_v47 = vsel %vm7252_vm5, %v7275_v10, 0.0  ;;  %v1169_v5 = vsel %vm7271_vm6, %v7287_v17, 0.0  ;;  %v5794_v45 = vpack.i.bf16 %v1109_v55, %v7397_v52  ;;  %v7457_v55 = vld [vmem:[#allocation2 + $0xe1] sm:$0xff]  ;;  %11418 = vst [vmem:[#allocation36_spill] sm:$0xff] %v7476_v35  ;;  %v7482_v52 = vld [vmem:[#allocation2 + $0x111] sm:$0xff]  ;;  %11421 = vst [vmem:[#allocation39_spill] sm:$0xff] %v7492_v49 }
  0x4a   : > { %v7430_v6 = vpack.i.bf16 %v1167_v47, %v7297_v27  ;;  %v7433_v0 = vpack.i.bf16 %v1169_v5, %v7311_v42  ;;  %v7448_v47 = vld [vmem:[#allocation2 + $0xc9] sm:$0xff]  ;;  %v1113_v5 = vsel %vm7361_vm14, %v7413_v30, 0.0  ;;  %11413 = vst [vmem:[#allocation34_spill] sm:$0xff] %v7457_v55  ;;  %11419 = vst [vmem:[#allocation37_spill] sm:$0xff] %v7482_v52  ;;  %vm7502_vm15 = vcmp.le.s32.totalorder %v605_v15, 14 }
  0x4b   : > { %11409 = vst [vmem:[#allocation32_spill] sm:$0xff] %v7448_v47  ;;  %v5804_v22 = vpack.i.bf16 %v1113_v5, %v7448_v47  ;;  %v11423_v5 = vmov 0 }
  0x4c   : > { %5780 = vrot.lane.b32.xlu1 %v5779_v44, %s7000_s8  ;;  %11406 = vst [vmem:[#allocation29_spill] sm:$0xff] %v7433_v0  ;;  %v1111_v44 = vsel %vm7354_vm13, %v7399_v1, 0.0  ;;  %v1115_v1 = vsel %vm7453_vm0, %v7457_v55, 0.0  ;;  %v11424_v5 = vsel %vm7502_vm15, 4294967295, %v11423_v5  ;;  %v11428_v55 = vmov 0 }
  0x4d   : > { %5785 = vrot.lane.b32.xlu0 %v5784_v48, %s7000_s8  ;;  %v11410_v48 = vmov 0  ;;  %v5799_v30 = vpack.i.bf16 %v1111_v44, %v7440_v63  ;;  %v7497_v44 = vld [vmem:[#allocation2 + $0xe9] sm:$0xff]  ;;  %11425 = vst [vmem:[#allocation41_spill] sm:$0xff] %v11424_v5  ;;  %v416_v63 = vand.u32 15, %v356_v28  ;;  %v5809_v15 = vpack.i.bf16 %v1115_v1, %v7486_v21  ;;  %v7545_v5 = vld [vmem:[#allocation2 + $0x37] sm:$0xff] }
  0x4e   : > { %v11411_v48 = vsel %vm7453_vm0, 4294967295, %v11410_v48  ;;  %11422 = vst [vmem:[#allocation40_spill] sm:$0xff] %v7497_v44  ;;  %vm7512_vm0 = vcmp.ge.s32.totalorder %v388_v34, 1  ;;  %v364_v28 = vadd.s32 96, %v7167_v57  ;;  %v366_v0 = vadd.s32 112, %v7167_v57 }
  0x4f   : > { %11412 = vst [vmem:[#allocation33_spill] sm:$0xff] %v11411_v48  ;;  %v7506_v48 = vld [vmem:[#allocation2 + $0x101] sm:$0xff]  ;;  %v11429_v55 = vsel %vm7512_vm0, 4294967295, %v11428_v55  ;;  %vm7541_vm14 = vcmp.ge.s32.totalorder %v416_v63, 1 }
  0x50   : > { %5790 = vrot.lane.b32.xlu1 %v5789_v26, %s7000_s8  ;;  %v1257_v26 = vsel %vm7472_vm7, %v7482_v52, 0.0  ;;  %11426 = vst [vmem:[#allocation42_spill] sm:$0xff] %v7506_v48  ;;  %11430 = vst [vmem:[#allocation44_spill] sm:$0xff] %v11429_v55  ;;  %v7516_v52 = vld [vmem:[#allocation2 + $0x17] sm:$0xff]  ;;  %v1119_v34 = vsel %vm7502_vm15, %v7506_v48, 0.0  ;;  %v444_v48 = vand.u32 15, %v360_v23 }
  0x51   : > { %5795 = vrot.lane.b32.xlu0 %v5794_v45, %s7000_s8  ;;  %v1117_v45 = vsel %vm7472_vm7, %v7476_v35, 0.0  ;;  %v7510_v47 = vpack.i.bf16 %v1257_v26, %v7492_v49  ;;  %11431 = vst [vmem:[#allocation45_spill] sm:$0xff] %v7516_v52  ;;  %v362_v35 = vadd.s32 80, %v7167_v57  ;;  %vm7530_vm7 = vcmp.ge.s32.totalorder %v402_v18, 1  ;;  %v7552_v55 = vld [vmem:[#allocation2 + $0x2f] sm:$0xff] }
  0x52   : > { %v5814_v26 = vpack.i.bf16 %v1117_v45, %v7497_v44  ;;  %v11433_v49 = vmov 0  ;;  %v1122_v1 = vsel %vm7512_vm0, %v7516_v52, 0.0  ;;  %v430_v45 = vand.u32 15, %v358_v41  ;;  %11440 = vst [vmem:[#allocation50_spill] sm:$0xff] %v7552_v55 }
  0x53   : > { %11427 = vst [vmem:[#allocation43_spill] sm:$0xff] %v7510_v47  ;;  %v7524_v47 = vld [vmem:[#allocation2 + $0xf9] sm:$0xff]  ;;  %v11434_v49 = vsel %vm7530_vm7, 4294967295, %v11433_v49  ;;  %v11437_v44 = vmov 0  ;;  %v458_v21 = vand.u32 15, %v362_v35  ;;  %v472_v41 = vand.u32 15, %v364_v28 }
  0x54   : > { %5800 = vrot.lane.b32.xlu1 %v5799_v30, %s7000_s8  ;;  %11432 = vst [vmem:[#allocation46_spill] sm:$0xff] %v7524_v47  ;;  %11435 = vst [vmem:[#allocation47_spill] sm:$0xff] %v11434_v49  ;;  %v7534_v30 = vld [vmem:[#allocation2 + $0x1f] sm:$0xff]  ;;  %v11438_v44 = vsel %vm7541_vm14, 4294967295, %v11437_v44  ;;  %v5819_v18 = vpack.i.bf16 %v1119_v34, %v7524_v47  ;;  %vm7557_vm0 = vcmp.ge.s32.totalorder %v430_v45, 1  ;;  %v11441_v23 = vmov 0 }
  0x55   : > { %5805 = vrot.lane.b32.xlu0 %v5804_v22, %s7000_s8  ;;  %11436 = vst [vmem:[#allocation48_spill] sm:$0xff] %v7534_v30  ;;  %v7539_v22 = vld [vmem:[#allocation2 + $0x27] sm:$0xff]  ;;  %11439 = vst [vmem:[#allocation49_spill] sm:$0xff] %v11438_v44  ;;  %v5824_v52 = vpack.i.bf16 %v7534_v30, %v1122_v1  ;;  %v11442_v23 = vsel %vm7557_vm0, 4294967295, %v11441_v23  ;;  %v1126_v35 = vsel %vm7541_vm14, %v7545_v5, 0.0  ;;  %v1229_v34 = vsel %vm7197_vm1, %v7226_v40, 0.0 }
  0x56   : > { %v1124_v63 = vsel %vm7530_vm7, %v7539_v22, 0.0  ;;  %11443 = vst [vmem:[#allocation51_spill] sm:$0xff] %v11442_v23  ;;  %v1231_v28 = vsel %vm7215_vm2, %v7250_v54, 0.0  ;;  %vm7574_vm7 = vcmp.ge.s32.totalorder %v444_v48, 1  ;;  %v11445_v1 = vmov 0  ;;  %v7578_v45 = vld [vmem:[#allocation2 + $0x57] sm:$0xff] }
  0x57   : > { %v11446_v1 = vsel %vm7574_vm7, 4294967295, %v11445_v1  ;;  %11448 = vst [vmem:[#allocation54_spill] sm:$0xff] %v7578_v45  ;;  %v368_v30 = vadd.s32 128, %v7167_v57  ;;  %v7582_v44 = vpack.i.bf16 %v1229_v34, %v7241_v51  ;;  %v7585_v49 = vpack.i.bf16 %v1231_v28, %v7266_v7  ;;  %v7591_v48 = vld [vmem:[#allocation2 + $0x4f] sm:$0xff]  ;;  %v7613_v28 = vld [vmem:[#allocation2 + $0x77] sm:$0xff] }
  0x58   : > { %5810 = vrot.lane.b32.xlu1 %v5809_v15, %s7000_s8  ;;  %v7561_v15 = vld [vmem:[#allocation2 + $0x3f] sm:$0xff]  ;;  %11447 = vst [vmem:[#allocation53_spill] sm:$0xff] %v11446_v1  ;;  %v5829_v40 = vpack.i.bf16 %v7552_v55, %v1124_v63  ;;  %v486_v32 = vand.u32 15, %v366_v0  ;;  %11451 = vst [vmem:[#allocation57_spill] sm:$0xff] %v7591_v48  ;;  %v370_v34 = vadd.s32 144, %v7167_v57  ;;  %v372_v7 = vadd.s32 160, %v7167_v57 }
  0x59   : > { %5815 = vrot.lane.b32.xlu0 %v5814_v26, %s7000_s8  ;;  %11444 = vst [vmem:[#allocation52_spill] sm:$0xff] %v7561_v15  ;;  %v7566_v26 = vld [vmem:[#allocation2 + $0x47] sm:$0xff]  ;;  %11449 = vst [vmem:[#allocation55_spill] sm:$0xff] %v7582_v44  ;;  %v5834_v54 = vpack.i.bf16 %v7561_v15, %v1126_v35  ;;  %vm7598_vm2 = vcmp.ge.s32.totalorder %v458_v21, 1  ;;  %v7602_v0 = vld [vmem:[#allocation2 + $0x5f] sm:$0xff]  ;;  %vm7609_vm1 = vcmp.ge.s32.totalorder %v472_v41, 1 }
  0x5a   : > { %11450 = vst [vmem:[#allocation56_spill] sm:$0xff] %v7585_v49  ;;  %v1128_v51 = vsel %vm7557_vm0, %v7566_v26, 0.0  ;;  %v7607_v63 = vld [vmem:[#allocation2 + $0x67] sm:$0xff]  ;;  %v11455_v35 = vmov 0  ;;  %11458 = vst [vmem:[#allocation60_spill] sm:$0xff] %v7613_v28  ;;  %v500_v19 = vand.u32 15, %v368_v30 }
  0x5b   : > { %v11456_v35 = vsel %vm7609_vm1, 4294967295, %v11455_v35  ;;  %v5839_v21 = vpack.i.bf16 %v7591_v48, %v1128_v51  ;;  %vm7617_vm0 = vcmp.ge.s32.totalorder %v486_v32, 1  ;;  %v11459_v49 = vmov 0  ;;  %v7623_v1 = vld [vmem:[#allocation2 + $0x6f] sm:$0xff] }
  0x5c   : > { %5820 = vrot.lane.b32.xlu1 %v5819_v18, %s7000_s8  ;;  %v11452_v18 = vmov 0  ;;  %11457 = vst [vmem:[#allocation59_spill] sm:$0xff] %v11456_v35  ;;  %v11460_v49 = vsel %vm7617_vm0, 4294967295, %v11459_v49  ;;  %v1132_v41 = vsel %vm7598_vm2, %v7607_v63, 0.0  ;;  %v514_v23 = vand.u32 15, %v370_v34 }
  0x5d   : > { %5825 = vrot.lane.b32.xlu0 %v5824_v52, %s7001_s9  ;;  %v11453_v18 = vsel %vm7598_vm2, 4294967295, %v11452_v18  ;;  %v1130_v52 = vsel %vm7574_vm7, %v7578_v45, 0.0  ;;  %11461 = vst [vmem:[#allocation61_spill] sm:$0xff] %v11460_v49  ;;  %v528_v30 = vand.u32 15, %v372_v7  ;;  %v7628_v45 = vld [vmem:[#allocation2 + $0x7f] sm:$0xff]  ;;  %v1134_v32 = vsel %vm7609_vm1, %v7613_v28, 0.0 }
  0x5e   : > { %11454 = vst [vmem:[#allocation58_spill] sm:$0xff] %v11453_v18  ;;  %v5844_v44 = vpack.i.bf16 %v7602_v0, %v1130_v52  ;;  %11462 = vst [vmem:[#allocation62_spill] sm:$0xff] %v7628_v45  ;;  %v1233_v51 = vsel %vm7222_vm3, %v7256_v60, 0.0  ;;  %v1235_v52 = vsel %vm7246_vm4, %v7275_v10, 0.0  ;;  %vm7642_vm2 = vcmp.ge.s32.totalorder %v500_v19, 1  ;;  %v7646_v7 = vld [vmem:[#allocation2 + $0x97] sm:$0xff] }
  0x5f   : > { %v11463_v34 = vmov 0  ;;  %v376_v35 = vadd.s32 192, %v7167_v57  ;;  %v7650_v18 = vpack.i.bf16 %v1233_v51, %v7277_v13  ;;  %v7653_v28 = vpack.i.bf16 %v1235_v52, %v7297_v27  ;;  %v7659_v10 = vld [vmem:[#allocation2 + $0x8f] sm:$0xff]  ;;  %v7668_v27 = vld [vmem:[#allocation2 + $0x9f] sm:$0xff]  ;;  %v7679_v51 = vld [vmem:[#allocation2 + $0xb7] sm:$0xff] }
  0x60   : > { %5830 = vrot.lane.b32.xlu1 %v5829_v40, %s7001_s9  ;;  %v7633_v40 = vld [vmem:[#allocation2 + $0x87] sm:$0xff]  ;;  %v11464_v34 = vsel %vm7642_vm2, 4294967295, %v11463_v34  ;;  %v5849_v60 = vpack.i.bf16 %v7623_v1, %v1132_v41  ;;  %v5854_v19 = vpack.i.bf16 %v7628_v45, %v1134_v32  ;;  %11468 = vst [vmem:[#allocation66_spill] sm:$0xff] %v7659_v10  ;;  %vm7664_vm4 = vcmp.ge.s32.totalorder %v514_v23, 1  ;;  %11472 = vst [vmem:[#allocation68_spill] sm:$0xff] %v7668_v27 }
  0x61   : > { %5835 = vrot.lane.b32.xlu0 %v5834_v54, %s7001_s9  ;;  %v374_v54 = vadd.s32 176, %v7167_v57  ;;  %11465 = vst [vmem:[#allocation63_spill] sm:$0xff] %v11464_v34  ;;  %11466 = vst [vmem:[#allocation64_spill] sm:$0xff] %v7650_v18  ;;  %v1136_v53 = vsel %vm7617_vm0, %v7633_v40, 0.0  ;;  %v11469_v13 = vmov 0  ;;  %vm7673_vm3 = vcmp.ge.s32.totalorder %v528_v30, 1 }
  0x62   : > { %11467 = vst [vmem:[#allocation65_spill] sm:$0xff] %v7653_v28  ;;  %v11470_v13 = vsel %vm7664_vm4, 4294967295, %v11469_v13  ;;  %v7677_v41 = vld [vmem:[#allocation2 + $0xa7] sm:$0xff]  ;;  %11476 = vst [vmem:[#allocation70_spill] sm:$0xff] %v7679_v51  ;;  %v378_v23 = vadd.s32 208, %v7167_v57  ;;  %v556_v52 = vand.u32 15, %v376_v35  ;;  %v5859_v38 = vpack.i.bf16 %v7659_v10, %v1136_v53 }
  0x63   : > { %11471 = vst [vmem:[#allocation67_spill] sm:$0xff] %v11470_v13  ;;  %v542_v32 = vand.u32 15, %v374_v54  ;;  %v7686_v30 = vld [vmem:[#allocation2 + $0xaf] sm:$0xff]  ;;  %v1140_v18 = vsel %vm7664_vm4, %v7677_v41, 0.0  ;;  %v1142_v54 = vsel %vm7673_vm3, %v7679_v51, 0.0  ;;  %v382_v35 = vadd.s32 240, %v7167_v57 }
  0x64   : > { %5840 = vrot.lane.b32.xlu1 %v5839_v21, %s7001_s9  ;;  %v1138_v21 = vsel %vm7642_vm2, %v7646_v7, 0.0  ;;  %11477 = vst [vmem:[#allocation71_spill] sm:$0xff] %v7686_v30  ;;  %v7699_v53 = vld [vmem:[#allocation2 + $0xbf] sm:$0xff]  ;;  %v1237_v13 = vsel %vm7252_vm5, %v7287_v17, 0.0  ;;  %v11481_v51 = vmov 0  ;;  %v7713_v57 = vld [vmem:[#allocation2 + $0xd7] sm:$0xff]  ;;  %v5869_v17 = vpack.i.bf16 %v7686_v30, %v1140_v18 }
  0x65   : > { %5845 = vrot.lane.b32.xlu0 %v5844_v44, %s7001_s9  ;;  %v11473_v44 = vmov 0  ;;  %v5864_v28 = vpack.i.bf16 %v7668_v27, %v1138_v21  ;;  %vm7695_vm2 = vcmp.ge.s32.totalorder %v542_v32, 1  ;;  %v570_v21 = vand.u32 15, %v378_v23  ;;  %v7725_v23 = vld [vmem:[#allocation2 + $0xcf] sm:$0xff]  ;;  %v7739_v18 = vld [vmem:[#allocation2 + $0xe7] sm:$0xff] }
  0x66   : > { %v11474_v44 = vsel %vm7673_vm3, 4294967295, %v11473_v44  ;;  %vm7709_vm3 = vcmp.ge.s32.totalorder %v556_v52, 1  ;;  %v7716_v32 = vpack.i.bf16 %v1237_v13, %v7311_v42  ;;  %11484 = vst [vmem:[#allocation74_spill] sm:$0xff] %v7725_v23  ;;  %v11485_v42 = vmov 0  ;;  %11488 = vst [vmem:[#allocation76_spill] sm:$0xff] %v7739_v18  ;;  %v7741_v13 = vld [vmem:[#allocation2 + $0xf7] sm:$0xff] }
  0x67   : > { %11475 = vst [vmem:[#allocation69_spill] sm:$0xff] %v11474_v44  ;;  %v1239_v44 = vsel %vm7271_vm6, %v7309_v36, 0.0  ;;  %v11482_v51 = vsel %vm7709_vm3, 4294967295, %v11481_v51  ;;  %v5874_v36 = vpack.i.bf16 %v7699_v53, %v1142_v54  ;;  %vm7730_vm6 = vcmp.ge.s32.totalorder %v570_v21, 1  ;;  %11489 = vst [vmem:[#allocation77_spill] sm:$0xff] %v7741_v13  ;;  %v7747_v21 = vld [vmem:[#allocation2 + $0xef] sm:$0xff] }
  0x68   : > { %5850 = vrot.lane.b32.xlu1 %v5849_v60, %s7001_s9  ;;  %v11478_v60 = vmov 0  ;;  %11483 = vst [vmem:[#allocation73_spill] sm:$0xff] %v11482_v51  ;;  %v7719_v27 = vpack.i.bf16 %v1239_v44, %v7324_v61  ;;  %v11486_v42 = vsel %vm7730_vm6, 4294967295, %v11485_v42  ;;  %v7734_v61 = vld [vmem:[#allocation2 + $0xdf] sm:$0xff]  ;;  %v1148_v9 = vsel %vm7730_vm6, %v7739_v18, 0.0 }
  0x69   : > { %5855 = vrot.lane.b32.xlu0 %v5854_v19, %s7001_s9  ;;  %v11479_v60 = vsel %vm7695_vm2, 4294967295, %v11478_v60  ;;  %v7701_v19 = vld [vmem:[#allocation2 + $0xc7] sm:$0xff]  ;;  %11487 = vst [vmem:[#allocation75_spill] sm:$0xff] %v11486_v42 }
  0x6a   : > { %11480 = vst [vmem:[#allocation72_spill] sm:$0xff] %v11479_v60  ;;  %v1144_v52 = vsel %vm7695_vm2, %v7701_v19, 0.0 }
  0x6b   : > { %v5879_v44 = vpack.i.bf16 %v7725_v23, %v1144_v52 }
  0x6c   : > { %5860 = vrot.lane.b32.xlu1 %v5859_v38, %s7001_s9  ;;  %v1146_v38 = vsel %vm7709_vm3, %v7713_v57, 0.0 }
  0x6d   : > { %5865 = vrot.lane.b32.xlu0 %v5864_v28, %s7001_s9  ;;  %v598_v28 = vand.u32 15, %v382_v35  ;;  %v5884_v54 = vpack.i.bf16 %v7734_v61, %v1146_v38  ;;  %v7756_v35 = vld [vmem:[#allocation2 + $0xff] sm:$0xff] }
  0x6e   : > { %11493 = vst [vmem:[#allocation79_spill] sm:$0xff] %v7756_v35 }
  0x6f   : > { %vm7752_vm5 = vcmp.ge.s32.totalorder %v598_v28, 1 }
  0x70   : > { %5870 = vrot.lane.b32.xlu1 %v5869_v17, %s7001_s9  ;;  %v11491_v56 = vsel %vm7752_vm5, 4294967295, %v11490_v56  ;;  %v1150_v17 = vsel %vm7342_vm11, %v7741_v13, 0.0  ;;  %v1152_v38 = vsel %vm7752_vm5, %v7346_v14, 0.0  ;;  %v11506_v14 = vld [vmem:[#allocation13_spill] sm:$0xff]  ;;  %v11538_v13 = vld [vmem:[#allocation35_spill] sm:$0xff] }
  0x71   : > { %5875 = vrot.lane.b32.xlu0 %v5874_v36, %s7001_s9  ;;  %11492 = vst [vmem:[#allocation78_spill] sm:$0xff] %v11491_v56  ;;  %v5889_v36 = vpack.i.bf16 %v7747_v21, %v1148_v9  ;;  %v5894_v52 = vpack.i.bf16 %v7756_v35, %v1150_v17  ;;  %v5899_v28 = vpack.i.bf16 %v7372_v31, %v1152_v38  ;;  %v11528_v56 = vld [vmem:[#allocation21_spill] sm:$0xff] }
  0x72   : > { %vm11529_vm11 = vnez %v11528_v56  ;;  %vm11539_vm6 = vnez %v11538_v13 }
  0x74   : > { %5880 = vrot.lane.b32.xlu1 %v5879_v44, %s7001_s9 }
  0x75   : > { %5885 = vrot.lane.b32.xlu0 %v5884_v54, %s7001_s9  ;;  %v11613_v54 = vld [vmem:[#allocation21_spill] sm:$0xff] }
  0x78   : > { %5890 = vrot.lane.b32.xlu1 %v5889_v36, %s7001_s9  ;;  %v11512_v36 = vld [vmem:[#allocation29_spill] sm:$0xff] }
  0x79   : > { %5895 = vrot.lane.b32.xlu0 %v5894_v52, %s7001_s9  ;;  %v11513_v52 = vld [vmem:[#allocation14_spill] sm:$0xff] }
  0x7c   : > { %5900 = vrot.lane.b32.xlu1 %v5899_v28, %s7001_s9  ;;  %v11514_v28 = vld [vmem:[#allocation31_spill] sm:$0xff]  ;;  %s7012_s9 = smov 72  }
  0x7d   : > { %5905 = vrot.lane.b32.xlu0 %v7133_v33, %s7002_s10 }
  0x80   : > { %5910 = vrot.lane.b32.xlu1 %v7131_v29, %s7002_s10 }
  0x81   : > { %5915 = vrot.lane.b32.xlu0 %v7139_v37, %s7002_s10 }
  0x84   : > { %5920 = vrot.lane.b32.xlu1 %v7145_v39, %s7002_s10 }
  0x85   : > { %5925 = vrot.lane.b32.xlu0 %v7149_v46, %s7002_s10 }
  0x88   : > { %5930 = vrot.lane.b32.xlu1 %v7153_v50, %s7002_s10 }
  0x89   : > { %5935 = vrot.lane.b32.xlu0 %v7171_v58, %s7002_s10 }
  0x8a   : > { %v7790_v33 = vpop.permute.xlu0 %5665 }
  0x8b   : > { %11494 = vst [vmem:[#allocation80_spill] sm:$0xff] %v7790_v33  ;;  %v11534_v33 = vld [vmem:[#allocation33_spill] sm:$0xff] }
  0x8c   : > { %5940 = vrot.lane.b32.xlu1 %v7175_v59, %s7002_s10  ;;  %vm11535_vm5 = vnez %v11534_v33 }
  0x8d   : > { %5945 = vrot.lane.b32.xlu0 %v7180_v2, %s7002_s10 }
  0x90   : > { %5950 = vrot.lane.b32.xlu1 %v7184_v3, %s7002_s10 }
  0x91   : > { %5955 = vrot.lane.b32.xlu0 %v7190_v11, %s7002_s10 }
  0x92   : > { %v7796_v9 = vpop.permute.xlu1 %5675 }
  0x93   : > { %11495 = vst [vmem:[#allocation81_spill] sm:$0xff] %v7796_v9  ;;  %v7798_v50 = vpop.permute.xlu0 %5670 }
  0x94   : > { %11496 = vst [vmem:[#allocation82_spill] sm:$0xff] %v7798_v50  ;;  %5960 = vrot.lane.b32.xlu1 %v7194_v12, %s7002_s10 }
  0x95   : > { %5965 = vrot.lane.b32.xlu0 %v7205_v24, %s7002_s10 }
  0x96   : > { %v7804_v58 = vpop.permute.xlu1 %5680 }
  0x97   : > { %11497 = vst [vmem:[#allocation83_spill] sm:$0xff] %v7804_v58  ;;  %v7806_v59 = vpop.permute.xlu0 %5685 }
  0x98   : > { %11498 = vst [vmem:[#allocation84_spill] sm:$0xff] %v7806_v59  ;;  %5970 = vrot.lane.b32.xlu1 %v7210_v25, %s7002_s10 }
  0x99   : > { %5975 = vrot.lane.b32.xlu0 %v7231_v43, %s7002_s10  ;;  %v11505_v43 = vld [vmem:[#allocation28_spill] sm:$0xff] }
  0x9a   : > { %v7812_v2 = vpop.permute.xlu1 %5690 }
  0x9b   : > { %11499 = vst [vmem:[#allocation85_spill] sm:$0xff] %v7812_v2  ;;  %v7814_v3 = vpop.permute.xlu0 %5695  ;;  %v11524_v2 = vld [vmem:[#allocation27_spill] sm:$0xff] }
  0x9c   : > { %11500 = vst [vmem:[#allocation86_spill] sm:$0xff] %v7814_v3  ;;  %5980 = vrot.lane.b32.xlu1 %v7389_v62, %s7002_s10  ;;  %v11516_v62 = vld [vmem:[#allocation19_spill] sm:$0xff]  ;;  %v1181_v58 = vsel %vm7354_vm13, %v11524_v2, 0.0 }
  0x9d   : > { %5985 = vrot.lane.b32.xlu0 %v7402_v4, %s7003_s11  ;;  %v1173_v4 = vsel %vm7289_vm8, %v11506_v14, 0.0 }
  0x9e   : > { %v7820_v11 = vpop.permute.xlu1 %5700  ;;  %v6019_v38 = vpack.i.bf16 %v1173_v4, %v11513_v52  ;;  %v11522_v4 = vld [vmem:[#allocation25_spill] sm:$0xff] }
  0x9f   : > { %11501 = vst [vmem:[#allocation87_spill] sm:$0xff] %v7820_v11  ;;  %v7822_v12 = vpop.permute.xlu0 %5705  ;;  %v6969_v11 = vld [vmem:[#allocation2 + $0xf0] sm:$0xff] }
  0xa0   : > { %11502 = vst [vmem:[#allocation88_spill] sm:$0xff] %v7822_v12  ;;  %5990 = vrot.lane.b32.xlu1 %v7405_v16, %s7003_s11  ;;  %v11509_v16 = vld [vmem:[#allocation16_spill] sm:$0xff]  ;;  %v11519_v12 = vld [vmem:[#allocation26_spill] sm:$0xff] }
  0xa1   : > { %5995 = vrot.lane.b32.xlu0 %v7416_v20, %s7003_s11  ;;  %v1175_v20 = vsel %vm7302_vm9, %v11509_v16, 0.0 }
  0xa2   : > { %v7828_v24 = vpop.permute.xlu1 %5710 }
  0xa3   : > { %11503 = vst [vmem:[#allocation89_spill] sm:$0xff] %v7828_v24  ;;  %v7830_v25 = vpop.permute.xlu0 %5715 }
  0xa4   : > { %11504 = vst [vmem:[#allocation90_spill] sm:$0xff] %v7830_v25  ;;  %6000 = vrot.lane.b32.xlu1 %v11505_v43, %s7003_s11 }
  0xa5   : > { %6005 = vrot.lane.b32.xlu0 %v7430_v6, %s7003_s11  ;;  %v11515_v6 = vld [vmem:[#allocation23_spill] sm:$0xff] }
  0xa6   : > { %v7839_v44 = vpop.permute.xlu1 %5720  ;;  %v6024_v43 = vpack.i.bf16 %v1175_v20, %v11515_v6 }
  0xa7   : > { %11508 = vst [vmem:[#allocation28_spill] sm:$0xff] %v7839_v44  ;;  %v7844_v17 = vpop.permute.xlu0 %5725  ;;  %v1177_v44 = vsel %vm7331_vm10, %v11516_v62, 0.0 }
  0xa8   : > { %11511 = vst [vmem:[#allocation13_spill] sm:$0xff] %v7844_v17  ;;  %6010 = vrot.lane.b32.xlu1 %v11512_v36, %s7003_s11  ;;  %v1179_v17 = vsel %vm7348_vm12, %v11519_v12, 0.0  ;;  %v6029_v36 = vpack.i.bf16 %v1177_v44, %v11522_v4 }
  0xa9   : > { %6015 = vrot.lane.b32.xlu0 %v11514_v28, %s7003_s11  ;;  %v11523_v28 = vld [vmem:[#allocation30_spill] sm:$0xff] }
  0xaa   : > { %v7855_v24 = vpop.permute.xlu1 %5730  ;;  %v6034_v20 = vpack.i.bf16 %v1179_v17, %v11523_v28 }
  0xab   : > { %11518 = vst [vmem:[#allocation16_spill] sm:$0xff] %v7855_v24  ;;  %v7860_v3 = vpop.permute.xlu0 %5735  ;;  %v11527_v24 = vld [vmem:[#allocation34_spill] sm:$0xff] }
  0xac   : > { %11521 = vst [vmem:[#allocation29_spill] sm:$0xff] %v7860_v3  ;;  %6020 = vrot.lane.b32.xlu1 %v6019_v38, %s7003_s11  ;;  %v1183_v50 = vsel %vm11529_vm11, %v11527_v24, 0.0  ;;  %v11531_v38 = vld [vmem:[#allocation32_spill] sm:$0xff]  ;;  %vm11567_vm11 = vnez %v11464_v34 }
  0xad   : > { %6025 = vrot.lane.b32.xlu0 %v6024_v43, %s7003_s11  ;;  %v6039_v44 = vpack.i.bf16 %v1181_v58, %v11531_v38  ;;  %v11532_v43 = vld [vmem:[#allocation38_spill] sm:$0xff]  ;;  %v11533_v3 = vld [vmem:[#allocation36_spill] sm:$0xff] }
  0xae   : > { %v7869_v8 = vpop.permute.xlu1 %5740  ;;  %v6044_v17 = vpack.i.bf16 %v1183_v50, %v11532_v43  ;;  %v1185_v35 = vsel %vm11535_vm5, %v11533_v3, 0.0 }
  0xaf   : > { %11526 = vst [vmem:[#allocation14_spill] sm:$0xff] %v7869_v8  ;;  %v7874_v9 = vpop.permute.xlu0 %5745  ;;  %v11537_v8 = vld [vmem:[#allocation42_spill] sm:$0xff] }
  0xb0   : > { %11530 = vst [vmem:[#allocation31_spill] sm:$0xff] %v7874_v9  ;;  %6030 = vrot.lane.b32.xlu1 %v6029_v36, %s7003_s11  ;;  %v1187_v56 = vsel %vm11539_vm6, %v11537_v8, 0.0  ;;  %v11541_v36 = vld [vmem:[#allocation40_spill] sm:$0xff]  ;;  %v1196_v9 = vsel %vm7541_vm14, %v7566_v26, 0.0 }
  0xb1   : > { %6035 = vrot.lane.b32.xlu0 %v6034_v20, %s7003_s11  ;;  %v6049_v58 = vpack.i.bf16 %v1185_v35, %v11541_v36  ;;  %v6054_v50 = vpack.i.bf16 %v1187_v56, %v7524_v47  ;;  %v11542_v20 = vld [vmem:[#allocation37_spill] sm:$0xff]  ;;  %v1204_v36 = vsel %vm7609_vm1, %v7633_v40, 0.0 }
  0xb2   : > { %v7883_v42 = vpop.permute.xlu1 %5750  ;;  %v1189_v33 = vsel %vm7502_vm15, %v11542_v20, 0.0 }
  0xb3   : > { %11536 = vst [vmem:[#allocation23_spill] sm:$0xff] %v7883_v42  ;;  %v7888_v59 = vpop.permute.xlu0 %5755  ;;  %v11545_v42 = vld [vmem:[#allocation44_spill] sm:$0xff] }
  0xb4   : > { %11540 = vst [vmem:[#allocation19_spill] sm:$0xff] %v7888_v59  ;;  %6040 = vrot.lane.b32.xlu1 %v6039_v44, %s7003_s11  ;;  %vm11546_vm5 = vnez %v11545_v42  ;;  %v11548_v44 = vld [vmem:[#allocation39_spill] sm:$0xff] }
  0xb5   : > { %6045 = vrot.lane.b32.xlu0 %v6044_v17, %s7003_s11  ;;  %v1192_v13 = vsel %vm11546_vm5, %v7539_v22, 0.0  ;;  %v6059_v35 = vpack.i.bf16 %v1189_v33, %v11548_v44  ;;  %v11549_v17 = vld [vmem:[#allocation47_spill] sm:$0xff] }
  0xb6   : > { %v7897_v3 = vpop.permute.xlu1 %5760  ;;  %v6064_v56 = vpack.i.bf16 %v7552_v55, %v1192_v13  ;;  %vm11550_vm6 = vnez %v11549_v17  ;;  %v6074_v13 = vpack.i.bf16 %v7591_v48, %v1196_v9  ;;  %v1200_v55 = vsel %vm7574_vm7, %v7607_v63, 0.0  ;;  %v11619_v17 = vld [vmem:[#allocation44_spill] sm:$0xff] }
  0xb7   : > { %11544 = vst [vmem:[#allocation26_spill] sm:$0xff] %v7897_v3  ;;  %v7902_v8 = vpop.permute.xlu0 %5765  ;;  %v1194_v20 = vsel %vm11550_vm6, %v7545_v5, 0.0  ;;  %v6084_v9 = vpack.i.bf16 %v7623_v1, %v1200_v55  ;;  %v6094_v55 = vpack.i.bf16 %v7659_v10, %v1204_v36  ;;  %v6944_v36 = vld [vmem:[%s11064_s1] sm:$0xff]  }
  0xb8   : > { %11547 = vst [vmem:[#allocation25_spill] sm:$0xff] %v7902_v8  ;;  %6050 = vrot.lane.b32.xlu1 %v6049_v58, %s7003_s11  ;;  %v6069_v33 = vpack.i.bf16 %v7561_v15, %v1194_v20  ;;  %v11554_v58 = vld [vmem:[#allocation54_spill] sm:$0xff]  ;;  %5554 = vmatprep.subr.bf16.mxu0 %v6944_v36 }
  0xb9   : > { %6055 = vrot.lane.b32.xlu0 %v6054_v50, %s7003_s11  ;;  %v11555_v50 = vld [vmem:[#allocation51_spill] sm:$0xff]  ;;  %v11561_v20 = vld [vmem:[#allocation58_spill] sm:$0xff]  ;;  %5555 = vmatpush3.bf16.msra.mxu0 %v6944_v36 }
  0xba   : > { %v7911_v59 = vpop.permute.xlu1 %5770  ;;  %vm11556_vm15 = vnez %v11555_v50  ;;  %vm11562_vm5 = vnez %v11561_v20 }
  0xbb   : > { %11551 = vst [vmem:[#allocation30_spill] sm:$0xff] %v7911_v59  ;;  %v7916_v47 = vpop.permute.xlu0 %5775  ;;  %v1198_v44 = vsel %vm11556_vm15, %v11554_v58, 0.0 }
  0xbc   : > { %11553 = vst [vmem:[#allocation27_spill] sm:$0xff] %v7916_v47  ;;  %6060 = vrot.lane.b32.xlu1 %v6059_v35, %s7003_s11  ;;  %v6079_v35 = vpack.i.bf16 %v7602_v0, %v1198_v44  ;;  %s7013_s11 = smov 80  }
  0xbd   : > { %6065 = vrot.lane.b32.xlu0 %v6064_v56, %s7004_s12  ;;  %v11560_v56 = vld [vmem:[#allocation60_spill] sm:$0xff] }
  0xbe   : > { %v7925_v59 = vpop.permute.xlu1 %5780  ;;  %v1202_v48 = vsel %vm11562_vm5, %v11560_v56, 0.0 }
  0xbf   : > { %11557 = vst [vmem:[#allocation34_spill] sm:$0xff] %v7925_v59  ;;  %v7930_v47 = vpop.permute.xlu0 %5785  ;;  %v11672_v59 = vld [vmem:[#allocation24_spill] sm:$0xff] }
  0xc0   : > { %11559 = vst [vmem:[#allocation32_spill] sm:$0xff] %v7930_v47  ;;  %6070 = vrot.lane.b32.xlu1 %v6069_v33, %s7004_s12  ;;  %v6089_v33 = vpack.i.bf16 %v7628_v45, %v1202_v48 }
  0xc1   : > { %6075 = vrot.lane.b32.xlu0 %v6074_v13, %s7004_s12  ;;  %v1206_v13 = vsel %vm7617_vm0, %v7646_v7, 0.0 }
  0xc2   : > { %v7939_v15 = vpop.permute.xlu1 %5790 }
  0xc3   : > { %11563 = vst [vmem:[#allocation38_spill] sm:$0xff] %v7939_v15  ;;  %v7944_v42 = vpop.permute.xlu0 %5795  ;;  %v1208_v15 = vsel %vm11567_vm11, %v7677_v41, 0.0 }
  0xc4   : > { %11565 = vst [vmem:[#allocation37_spill] sm:$0xff] %v7944_v42  ;;  %6080 = vrot.lane.b32.xlu1 %v6079_v35, %s7004_s12  ;;  %v11569_v35 = vld [vmem:[#allocation68_spill] sm:$0xff]  ;;  %v11570_v42 = vld [vmem:[#allocation70_spill] sm:$0xff] }
  0xc5   : > { %6085 = vrot.lane.b32.xlu0 %v6084_v9, %s7004_s12  ;;  %v6099_v48 = vpack.i.bf16 %v11569_v35, %v1206_v13  ;;  %v6104_v9 = vpack.i.bf16 %v7686_v30, %v1208_v15  ;;  %v1210_v10 = vsel %vm7664_vm4, %v11570_v42, 0.0  ;;  %v6945_v15 = vld [vmem:[%s11064_s1 + $0x8] sm:$0xff]   ;;  %v1214_v30 = vsel %vm7695_vm2, %v7713_v57, 0.0 }
  0xc6   : > { %v7953_v44 = vpop.permute.xlu1 %5800  ;;  %5556 = vmatprep.subr.bf16.mxu0 %v6945_v15  ;;  %v6119_v36 = vpack.i.bf16 %v7734_v61, %v1214_v30  ;;  %vm2572_vm2 = vcmask 1041408  }
  0xc7   : > { %11566 = vst [vmem:[#allocation39_spill] sm:$0xff] %v7953_v44  ;;  %v7958_v47 = vpop.permute.xlu0 %5805  ;;  %5557 = vmatpush3.bf16.msra.mxu0 %v6945_v15 }
  0xc8   : > { %11568 = vst [vmem:[#allocation54_spill] sm:$0xff] %v7958_v47  ;;  %6090 = vrot.lane.b32.xlu1 %v6089_v33, %s7004_s12  ;;  %v11573_v47 = vld [vmem:[#allocation69_spill] sm:$0xff] }
  0xc9   : > { %6095 = vrot.lane.b32.xlu0 %v6094_v55, %s7004_s12  ;;  %vm11574_vm11 = vnez %v11573_v47  ;;  %v6109_v55 = vpack.i.bf16 %v7699_v53, %v1210_v10 }
  0xca   : > { %v7970_v45 = vpop.permute.xlu1 %5810  ;;  %v1212_v33 = vsel %vm11574_vm11, %v7701_v19, 0.0 }
  0xcb   : > { %11572 = vst [vmem:[#allocation60_spill] sm:$0xff] %v7970_v45  ;;  %v7975_v13 = vpop.permute.xlu0 %5815  ;;  %v6114_v45 = vpack.i.bf16 %v7725_v23, %v1212_v33 }
  0xcc   : > { %11575 = vst [vmem:[#allocation70_spill] sm:$0xff] %v7975_v13  ;;  %6100 = vrot.lane.b32.xlu1 %v6099_v48, %s7004_s12  ;;  %v1216_v48 = vsel %vm7709_vm3, %v7739_v18, 0.0  ;;  %v1224_v18 = vld [vmem:[#allocation2 + $0x118] sm:$0xff] }
  0xcd   : > { %6105 = vrot.lane.b32.xlu0 %v6104_v9, %s7004_s12  ;;  %v6946_v9 = vld [vmem:[%s11064_s1 + $0x10] ss:$0 sps:$4 sm:$0x33]   ;;  %v6124_v33 = vpack.i.bf16 %v7747_v21, %v1216_v48  ;;  %v11582_v48 = vld [vmem:[#allocation56_spill] sm:$0xff] }
  0xce   : > { %v7987_v35 = vpop.permute.xlu1 %5820  ;;  %5634 = vmatprep.subr.msk.bf16.mxu0 %vm2572_vm2, %v6946_v9 }
  0xcf   : > { %11576 = vst [vmem:[#allocation91_spill] sm:$0xff] %v7987_v35  ;;  %v7992_v10 = vpop.permute.xlu0 %5825  ;;  %v2574_v35 = vsel %vm2572_vm2, %v6946_v9, 0 }
  0xd0   : > { %6110 = vrot.lane.b32.xlu1 %v6109_v55, %s7004_s12  ;;  %5559 = vmatpush3.bf16.msra.mxu0 %v2574_v35  ;;  %v11581_v35 = vld [vmem:[#allocation55_spill] sm:$0xff] }
  0xd1   : > { %6115 = vrot.lane.b32.xlu0 %v6114_v45, %s7004_s12 }
  0xd2   : > { %v8001_v13 = vpop.permute.xlu1 %5830 }
  0xd3   : > { %v8003_v23 = vpop.permute.xlu0 %5835 }
  0xd4   : > { %6120 = vrot.lane.b32.xlu1 %v6119_v36, %s7004_s12 }
  0xd5   : > { %6125 = vrot.lane.b32.xlu0 %v6124_v33, %s7004_s12  ;;  %v11586_v33 = vld [vmem:[#allocation64_spill] sm:$0xff] }
  0xd6   : > { %v8007_v30 = vpop.permute.xlu1 %5840 }
  0xd7   : > { %11577 = vst [vmem:[#allocation92_spill] sm:$0xff] %v8007_v30  ;;  %v8009_v55 = vpop.permute.xlu0 %5845 }
  0xd8   : > { %11578 = vst [vmem:[#allocation93_spill] sm:$0xff] %v8009_v55  ;;  %6130 = vrot.lane.b32.xlu1 %v7131_v29, %s7005_s19 }
  0xd9   : > { %6135 = vrot.lane.b32.xlu0 %v7139_v37, %s7005_s19 }
  0xda   : > { %v8015_v45 = vpop.permute.xlu1 %5850 }
  0xdb   : > { %11579 = vst [vmem:[#allocation94_spill] sm:$0xff] %v8015_v45  ;;  %v8017_v15 = vpop.permute.xlu0 %5855  ;;  %v6955_v45 = vld [vmem:[#allocation2 + $0x80] sm:$0xff] }
  0xdc   : > { %11580 = vst [vmem:[#allocation95_spill] sm:$0xff] %v8017_v15  ;;  %6140 = vrot.lane.b32.xlu1 %v11581_v35, %s7006_s20  ;;  %v6952_v35 = vld [vmem:[#allocation2 + $0x68] sm:$0xff]  ;;  %v6953_v15 = vld [vmem:[#allocation2 + $0x70] sm:$0xff] }
  0xdd   : > { %6145 = vrot.lane.b32.xlu0 %v11582_v48, %s7006_s20  ;;  %v6169_v48 = vpack.i.bf16 %v6953_v15, %v6952_v35  ;;  %v6956_v15 = vld [vmem:[#allocation2 + $0x88] sm:$0xff] }
  0xde   : > { %v8023_v36 = vpop.permute.xlu1 %5860 }
  0xdf   : > { %11583 = vst [vmem:[#allocation55_spill] sm:$0xff] %v8023_v36  ;;  %v8025_v9 = vpop.permute.xlu0 %5865  ;;  %v11587_v36 = vld [vmem:[#allocation65_spill] sm:$0xff] }
  0xe0   : > { %11584 = vst [vmem:[#allocation56_spill] sm:$0xff] %v8025_v9  ;;  %6150 = vrot.lane.b32.xlu1 %v7145_v39, %s7005_s19  ;;  %v6954_v9 = vld [vmem:[#allocation2 + $0x78] sm:$0xff] }
  0xe1   : > { %6155 = vrot.lane.b32.xlu0 %v7149_v46, %s7005_s19  ;;  %v6174_v55 = vpack.i.bf16 %v6955_v45, %v6954_v9  ;;  %v6958_v45 = vld [vmem:[#allocation2 + $0x98] sm:$0xff]  ;;  %v6959_v9 = vld [vmem:[#allocation2 + $0xa0] sm:$0xff] }
  0xe2   : > { %v8031_v29 = vpop.permute.xlu1 %5870 }
  0xe3   : > { %v8033_v37 = vpop.permute.xlu0 %5875 }
  0xe4   : > { %11585 = vst [vmem:[#allocation96_spill] sm:$0xff] %v8033_v37  ;;  %6160 = vrot.lane.b32.xlu1 %v11586_v33, %s7006_s20 }
  0xe5   : > { %6165 = vrot.lane.b32.xlu0 %v11587_v36, %s7006_s20  ;;  %v6957_v36 = vld [vmem:[#allocation2 + $0x90] sm:$0xff] }
  0xe6   : > { %v8039_v39 = vpop.permute.xlu1 %5880  ;;  %v6189_v35 = vpack.i.bf16 %v6957_v36, %v6956_v15 }
  0xe7   : > { %11588 = vst [vmem:[#allocation64_spill] sm:$0xff] %v8039_v39  ;;  %v8041_v30 = vpop.permute.xlu0 %5885 }
  0xe8   : > { %11589 = vst [vmem:[#allocation65_spill] sm:$0xff] %v8041_v30  ;;  %6170 = vrot.lane.b32.xlu1 %v6169_v48, %s7005_s19  ;;  %v6194_v30 = vpack.i.bf16 %v6959_v9, %v6958_v45  ;;  %v11592_v48 = vld [vmem:[#allocation10_spill] sm:$0xff] }
  0xe9   : > { %6175 = vrot.lane.b32.xlu0 %v6174_v55, %s7005_s19  ;;  %vm11593_vm2 = vnez %v11592_v48  ;;  %v6961_v9 = vld [vmem:[#allocation2 + $0xb0] sm:$0xff]  ;;  %v6963_v48 = vld [vmem:[#allocation2 + $0xc0] sm:$0xff] }
  0xea   : > { %v8045_v46 = vpop.permute.xlu1 %5890  ;;  %v1241_v55 = vsel %vm11593_vm2, %v11506_v14, 0.0  ;;  %v6960_v14 = vld [vmem:[#allocation2 + $0xa8] sm:$0xff] }
  0xeb   : > { %11590 = vst [vmem:[#allocation97_spill] sm:$0xff] %v8045_v46  ;;  %v8047_v33 = vpop.permute.xlu0 %5895  ;;  %v6199_v15 = vpack.i.bf16 %v1241_v55, %v11513_v52  ;;  %v6209_v31 = vpack.i.bf16 %v6961_v9, %v6960_v14  ;;  %v1245_v52 = vsel %vm7302_vm9, %v11516_v62, 0.0  ;;  %v6964_v62 = vld [vmem:[#allocation2 + $0xc8] sm:$0xff]  ;;  %v6965_v14 = vld [vmem:[#allocation2 + $0xd0] sm:$0xff]  ;;  %vm11616_vm9 = vnez %v11479_v60  ;;  %v11693_v60 = vld [vmem:[#allocation43_spill] sm:$0xff] }
  0xec   : > { %11591 = vst [vmem:[#allocation98_spill] sm:$0xff] %v8047_v33  ;;  %6180 = vrot.lane.b32.xlu1 %v7716_v32, %s7006_s20  ;;  %v1243_v33 = vsel %vm7289_vm8, %v11509_v16, 0.0  ;;  %v6962_v16 = vld [vmem:[#allocation2 + $0xb8] sm:$0xff]  ;;  %v6219_v55 = vpack.i.bf16 %v1245_v52, %v11522_v4  ;;  %v6229_v9 = vpack.i.bf16 %v6965_v14, %v6964_v62  ;;  %v1249_v4 = vsel %vm7348_vm12, %v11524_v2, 0.0  ;;  %v11604_v62 = vld [vmem:[#allocation77_spill] sm:$0xff] }
  0xed   : > { %6185 = vrot.lane.b32.xlu0 %v7719_v27, %s7006_s20  ;;  %v6204_v27 = vpack.i.bf16 %v1243_v33, %v11515_v6  ;;  %v1247_v6 = vsel %vm7331_vm10, %v11519_v12, 0.0  ;;  %v6966_v12 = vld [vmem:[#allocation2 + $0xd8] sm:$0xff]  ;;  %v1251_v52 = vsel %vm7354_vm13, %v11527_v24, 0.0  ;;  %vm11614_vm13 = vnez %v11613_v54 }
  0xee   : > { %v8056_v39 = vpop.permute.xlu1 %5900  ;;  %v11605_v14 = vld [vmem:[#allocation75_spill] sm:$0xff]  ;;  %vm11615_vm12 = vnez %v11464_v34 }
  0xef   : > { %v8061_v32 = vpop.permute.xlu0 %5905  ;;  %vm11606_vm10 = vnez %v11605_v14  ;;  %v1190_v54 = vld [vmem:[#allocation2 + $0x117] sm:$0xff] }
  0xf0   : > { %11594 = vst [vmem:[#allocation99_spill] sm:$0xff] %v8061_v32  ;;  %6190 = vrot.lane.b32.xlu1 %v6189_v35, %s7005_s19  ;;  %v6214_v35 = vpack.i.bf16 %v6963_v48, %v6962_v16  ;;  %v6224_v48 = vpack.i.bf16 %v1247_v6, %v11523_v28  ;;  %v6967_v16 = vld [vmem:[#allocation2 + $0xe0] sm:$0xff]  ;;  %v1218_v2 = vsel %vm11606_vm10, %v11604_v62, 0.0  ;;  %v11609_v28 = vld [vmem:[#allocation45_spill] sm:$0xff] }
  0xf1   : > { %6195 = vrot.lane.b32.xlu0 %v6194_v30, %s7005_s19  ;;  %v930_v24 = vsel %vm11550_vm6, %v11609_v28, 0.0  ;;  %v6968_v28 = vld [vmem:[#allocation2 + $0xe8] sm:$0xff]  ;;  %v1225_v32 = vld [vmem:[#allocation2 + $0x120] sm:$0xff] }
  0xf2   : > { %v8067_v36 = vpop.permute.xlu1 %5910 }
  0xf3   : > { %11595 = vst [vmem:[#allocation100_spill] sm:$0xff] %v8067_v36  ;;  %v8069_v45 = vpop.permute.xlu0 %5915  ;;  %v11635_v36 = vld [vmem:[#allocation84_spill] sm:$0xff] }
  0xf4   : > { %11596 = vst [vmem:[#allocation101_spill] sm:$0xff] %v8069_v45  ;;  %6200 = vrot.lane.b32.xlu1 %v6199_v15, %s7006_s20 }
  0xf5   : > { %6205 = vrot.lane.b32.xlu0 %v6204_v27, %s7006_s20 }
  0xf6   : > { %v8076_v30 = vpop.permute.xlu1 %5920 }
  0xf7   : > { %11597 = vst [vmem:[#allocation102_spill] sm:$0xff] %v8076_v30  ;;  %v8081_v33 = vpop.permute.xlu0 %5925 }
  0xf8   : > { %11598 = vst [vmem:[#allocation103_spill] sm:$0xff] %v8081_v33  ;;  %6210 = vrot.lane.b32.xlu1 %v6209_v31, %s7005_s19  ;;  %v6234_v31 = vpack.i.bf16 %v6967_v16, %v6966_v12  ;;  %v833_v33 = vld [vmem:[#allocation2 + $0xf] sm:$0xff] }
  0xf9   : > { %6215 = vrot.lane.b32.xlu0 %v6214_v35, %s7005_s19 }
  0xfa   : > { %v8087_v15 = vpop.permute.xlu1 %5930 }
  0xfb   : > { %11599 = vst [vmem:[#allocation104_spill] sm:$0xff] %v8087_v15  ;;  %v8089_v27 = vpop.permute.xlu0 %5935 }
  0xfc   : > { %11600 = vst [vmem:[#allocation105_spill] sm:$0xff] %v8089_v27  ;;  %6220 = vrot.lane.b32.xlu1 %v6219_v55, %s7006_s20  ;;  %v6239_v55 = vpack.i.bf16 %v1249_v4, %v11531_v38  ;;  %v11612_v4 = vld [vmem:[#allocation36_spill] sm:$0xff]  ;;  %v11623_v27 = vld [vmem:[#allocation42_spill] sm:$0xff] }
  0xfd   : > { %6225 = vrot.lane.b32.xlu0 %v6224_v48, %s7006_s20  ;;  %v6244_v48 = vpack.i.bf16 %v1251_v52, %v11532_v43  ;;  %v932_v43 = vsel %vm7541_vm14, %v7539_v22, 0.0  ;;  %v832_v52 = vld [vmem:[#allocation2 + $0x7] sm:$0xff]  ;;  %vm11634_vm14 = vcmask 31744  }
  0xfe   : > { %v8096_v35 = vpop.permute.xlu1 %5940  ;;  %v6971_v22 = vld [vmem:[#allocation2 + $0x100] sm:$0xff]  ;;  %vm11637_vm6 = vmmov %vm11634_vm14 }
  0xff   : > { %11601 = vst [vmem:[#allocation106_spill] sm:$0xff] %v8096_v35  ;;  %v8101_v6 = vpop.permute.xlu0 %5945 }
 0x100   : > { %11603 = vst [vmem:[#allocation107_spill] sm:$0xff] %v8101_v6  ;;  %6230 = vrot.lane.b32.xlu1 %v6229_v9, %s7005_s19  ;;  %v11610_v9 = vld [vmem:[#allocation79_spill] sm:$0xff] }
 0x101   : > { %6235 = vrot.lane.b32.xlu0 %v6234_v31, %s7005_s19  ;;  %v6249_v38 = vpack.i.bf16 %v11610_v9, %v1218_v2  ;;  %v11621_v31 = vld [vmem:[#allocation81_spill] sm:$0xff] }
 0x102   : > { %v8110_v12 = vpop.permute.xlu1 %5950  ;;  %v5677_v6 = vunpack.i.l.bf16 %v11621_v31 }
 0x103   : > { %11607 = vst [vmem:[#allocation77_spill] sm:$0xff] %v8110_v12  ;;  %v8112_v16 = vpop.permute.xlu0 %5955 }
 0x104   : > { %11608 = vst [vmem:[#allocation108_spill] sm:$0xff] %v8112_v16  ;;  %6240 = vrot.lane.b32.xlu1 %v6239_v55, %s7006_s20  ;;  %v6254_v55 = vpack.i.bf16 %v6969_v11, %v6968_v28  ;;  %v11618_v11 = vld [vmem:[#allocation80_spill] sm:$0xff] }
 0x105   : > { %6245 = vrot.lane.b32.xlu0 %v6244_v48, %s7006_s20  ;;  %v1253_v48 = vsel %vm11614_vm13, %v11612_v4, 0.0  ;;  %v5667_v3 = vunpack.i.l.bf16 %v11618_v11  ;;  %vm11620_vm13 = vnez %v11619_v17  ;;  %v5668_v12 = vunpack.i.h.bf16 %v11618_v11  ;;  %v11624_v4 = vld [vmem:[#allocation33_spill] sm:$0xff]  ;;  %v11626_v17 = vld [vmem:[#allocation82_spill] sm:$0xff] }
 0x106   : > { %v8138_v25 = vpop.permute.xlu1 %5960  ;;  %v928_v28 = vsel %vm11620_vm13, %v832_v52, 0.0  ;;  %vm11625_vm8 = vnez %v11624_v4  ;;  %v5678_v52 = vunpack.i.h.bf16 %v11621_v31  ;;  %v5672_v30 = vunpack.i.l.bf16 %v11626_v17  ;;  %v11628_v11 = vld [vmem:[#allocation78_spill] sm:$0xff]  ;;  %vm11638_vm13 = vmmov %vm11637_vm6 }
 0x107   : > { %11611 = vst [vmem:[#allocation45_spill] sm:$0xff] %v8138_v25  ;;  %v8155_v2 = vpop.permute.xlu0 %5965  ;;  %v6970_v25 = vld [vmem:[#allocation2 + $0xf8] sm:$0xff]  ;;  %v1255_v15 = vsel %vm11625_vm8, %v11623_v27, 0.0  ;;  %vm11629_vm2 = vnez %v11628_v11  ;;  %v8191_v45 = vsel %vm11634_vm14, %v928_v28, %v5667_v3  ;;  %v8198_v31 = vsel %vm11637_vm6, %v833_v33, %v5668_v12  ;;  %v11639_v28 = vld [vmem:[#allocation50_spill] sm:$0xff]  ;;  %vm11640_vm14 = vmmov %vm11637_vm6 }
 0x108   : > { %11617 = vst [vmem:[#allocation79_spill] sm:$0xff] %v8155_v2  ;;  %6250 = vrot.lane.b32.xlu1 %v6249_v38, %s7004_s12  ;;  %v6259_v16 = vpack.i.bf16 %v6971_v22, %v6970_v25  ;;  %v11622_v2 = vld [vmem:[#allocation40_spill] sm:$0xff]  ;;  %v5673_v38 = vunpack.i.h.bf16 %v11626_v17  ;;  %v1222_v46 = vsel %vm11629_vm2, %v1190_v54, 0.0  ;;  %v8201_v37 = vsel %vm11638_vm13, %v932_v43, %v5677_v6  ;;  %vm11641_vm8 = vmmov %vm11637_vm6  ;;  %v11644_v12 = vld [vmem:[#allocation41_spill] sm:$0xff] }
 0x109   : > { %6255 = vrot.lane.b32.xlu0 %v6254_v55, %s7005_s19  ;;  %v6264_v35 = vpack.i.bf16 %v1253_v48, %v11622_v2  ;;  %v1191_v22 = vld [vmem:[#allocation2 + $0x11f] sm:$0xff]  ;;  %v5688_v55 = vunpack.i.h.bf16 %v11635_v36  ;;  %v11636_v2 = vld [vmem:[#allocation46_spill] sm:$0xff]  ;;  %vm11643_vm2 = vmmov %vm11637_vm6  ;;  %vm11645_vm6 = vnez %v11644_v12 }
 0x10a   : > { %v8174_v25 = vpop.permute.xlu1 %5970  ;;  %v11632_v48 = vld [vmem:[#allocation83_spill] sm:$0xff]  ;;  %v6269_v27 = vpack.i.bf16 %v1255_v15, %v11636_v2  ;;  %v6279_v3 = vpack.i.bf16 %v1191_v22, %v1222_v46  ;;  %v11642_v15 = vld [vmem:[#allocation48_spill] sm:$0xff]  ;;  %vm11647_vm13 = vmmov %vm11643_vm2 }
 0x10b   : > { %11627 = vst [vmem:[#allocation36_spill] sm:$0xff] %v8174_v25  ;;  %v5683_v17 = vunpack.i.h.bf16 %v11632_v48  ;;  %v8188_v4 = vpop.permute.xlu0 %5975  ;;  %v1227_v25 = vld [vmem:[#allocation2 + $0x121] sm:$0xff]  ;;  %v5682_v54 = vunpack.i.l.bf16 %v11632_v48  ;;  %v8207_v48 = vsel %vm11640_vm14, %v11639_v28, %v5678_v52  ;;  %v8214_v2 = vsel %vm11643_vm2, %v11642_v15, %v5673_v38  ;;  %v1226_v6 = vld [vmem:[#allocation2 + $0x119] sm:$0xff]  ;;  %vm11655_vm14 = vmmov %vm11643_vm2 }
 0x10c   : > { %11633 = vst [vmem:[#allocation80_spill] sm:$0xff] %v8188_v4  ;;  %6260 = vrot.lane.b32.xlu1 %v6259_v16, %s7005_s19  ;;  %v5687_v4 = vunpack.i.l.bf16 %v11635_v36  ;;  %v8210_v16 = vsel %vm11641_vm8, %v930_v24, %v5672_v30  ;;  %v1259_v36 = vsel %vm11645_vm6, %v1227_v25, 0.0  ;;  %v11646_v43 = vld [vmem:[#allocation52_spill] sm:$0xff]  ;;  %v6289_v24 = vpack.i.bf16 %v1225_v32, %v1224_v18  ;;  %vm11651_vm8 = vmmov %vm11643_vm2  ;;  %v11652_v15 = vld [vmem:[#allocation57_spill] sm:$0xff] }
 0x10d   : > { %6265 = vrot.lane.b32.xlu0 %v6264_v35, %s7006_s20  ;;  %v8222_v46 = vsel %vm11647_vm13, %v11646_v43, %v5683_v17  ;;  %v11648_v35 = vld [vmem:[#allocation85_spill] sm:$0xff]  ;;  %v11650_v38 = vsel %vm11556_vm15, %v7545_v5, 0.0  ;;  %v8237_v25 = vsel %vm11643_vm2, %v11652_v15, %v5688_v55  ;;  %v11653_v17 = vld [vmem:[#allocation86_spill] sm:$0xff]  ;;  %v11654_v18 = vsel %vm7574_vm7, %v7566_v26, 0.0  ;;  %v11656_v5 = vld [vmem:[#allocation87_spill] sm:$0xff] }
 0x10e   : > { %v8216_v33 = vpop.permute.xlu1 %5980  ;;  %v5693_v52 = vunpack.i.h.bf16 %v11648_v35  ;;  %v5692_v22 = vunpack.i.l.bf16 %v11648_v35  ;;  %v8233_v28 = vsel %vm11651_vm8, %v11650_v38, %v5682_v54  ;;  %v5698_v43 = vunpack.i.h.bf16 %v11653_v17  ;;  %v11657_v55 = vld [vmem:[#allocation22_spill] sm:$0xff]  ;;  %v11658_v15 = vld [vmem:[#allocation88_spill] sm:$0xff]  ;;  %vm11660_vm13 = vmmov %vm11643_vm2 }
 0x10f   : > { %v8226_v30 = vpop.permute.xlu0 %5985  ;;  %v5697_v12 = vunpack.i.l.bf16 %v11653_v17  ;;  %v8247_v32 = vsel %vm11655_vm14, %v11654_v18, %v5687_v4  ;;  %v5703_v54 = vunpack.i.h.bf16 %v11656_v5  ;;  %v5702_v35 = vunpack.i.l.bf16 %v11656_v5  ;;  %vm11662_vm8 = vmmov %vm11643_vm2 }
 0x110   : > { %11649 = vst [vmem:[#allocation81_spill] sm:$0xff] %v8226_v30  ;;  %6270 = vrot.lane.b32.xlu1 %v6269_v27, %s7006_s20  ;;  %v6299_v38 = vpack.i.bf16 %v1259_v36, %v1226_v6  ;;  %v5708_v50 = vunpack.i.h.bf16 %v11658_v15  ;;  %v5707_v17 = vunpack.i.l.bf16 %v11658_v15  ;;  %v11659_v27 = vld [vmem:[#allocation89_spill] sm:$0xff]  ;;  %v8261_v4 = vsel %vm11660_vm13, %v7602_v0, %v5693_v52  ;;  %v11663_v36 = vld [vmem:[#allocation90_spill] sm:$0xff]  ;;  %vm11665_vm14 = vmmov %vm11643_vm2 }
 0x111   : > { %6275 = vrot.lane.b32.xlu0 %v11657_v55, %s7004_s12  ;;  %v5713_v30 = vunpack.i.h.bf16 %v11659_v27  ;;  %v5712_v8 = vunpack.i.l.bf16 %v11659_v27  ;;  %v11661_v18 = vsel %vm11562_vm5, %v11554_v58, 0.0  ;;  %v5718_v5 = vunpack.i.h.bf16 %v11663_v36  ;;  %v11666_v58 = vld [vmem:[#allocation28_spill] sm:$0xff]  ;;  %vm11668_vm13 = vmmov %vm11643_vm2 }
 0x112   : > { %v8257_v26 = vpop.permute.xlu1 %5990  ;;  %v8268_v6 = vsel %vm11662_vm8, %v11661_v18, %v5692_v22  ;;  %v5717_v55 = vunpack.i.l.bf16 %v11663_v36  ;;  %v8276_v27 = vsel %vm11643_vm2, %v7623_v1, %v5698_v43  ;;  %v11664_v0 = vsel %vm7609_vm1, %v7607_v63, 0.0  ;;  %v11667_v36 = vld [vmem:[#allocation62_spill] sm:$0xff]  ;;  %vm11670_vm8 = vmmov %vm11643_vm2  ;;  %v11671_v63 = vld [vmem:[#allocation13_spill] sm:$0xff] }
 0x113   : > { %v8272_v15 = vpop.permute.xlu0 %5995  ;;  %v8283_v52 = vsel %vm11665_vm14, %v11664_v0, %v5697_v12  ;;  %v5723_v22 = vunpack.i.h.bf16 %v11666_v58  ;;  %v5722_v18 = vunpack.i.l.bf16 %v11666_v58  ;;  %v8290_v20 = vsel %vm11668_vm13, %v11667_v36, %v5703_v54  ;;  %v11673_v58 = vld [vmem:[#allocation66_spill] sm:$0xff]  ;;  %vm11675_vm14 = vmmov %vm11643_vm2 }
 0x114   : > { %6280 = vrot.lane.b32.xlu1 %v6279_v3, %s7004_s12  ;;  %v11669_v1 = vsel %vm7617_vm0, %v11560_v56, 0.0  ;;  %v5728_v12 = vunpack.i.h.bf16 %v11671_v63  ;;  %v5727_v0 = vunpack.i.l.bf16 %v11671_v63  ;;  %v8305_v3 = vsel %vm11643_vm2, %v11673_v58, %v5708_v50  ;;  %vm11677_vm13 = vmmov %vm11643_vm2  ;;  %v11680_v63 = vld [vmem:[#allocation71_spill] sm:$0xff] }
 0x115   : > { %v8297_v43 = vsel %vm11670_vm8, %v11669_v1, %v5702_v35  ;;  %6285 = vrot.lane.b32.xlu0 %v11672_v59, %s7005_s19  ;;  %v11674_v54 = vsel %vm11615_vm12, %v7633_v40, 0.0  ;;  %v11676_v35 = vld [vmem:[#allocation68_spill] sm:$0xff]  ;;  %v11678_v1 = vsel %vm7664_vm4, %v7646_v7, 0.0  ;;  %vm11679_vm8 = vmmov %vm11643_vm2  ;;  %v8329_v58 = vsel %vm11643_vm2, %v11680_v63, %v5718_v5  ;;  %v11688_v63 = vld [vmem:[#allocation14_spill] sm:$0xff] }
 0x116   : > { %v8312_v56 = vsel %vm11675_vm14, %v11674_v54, %v5707_v17  ;;  %v8316_v36 = vsel %vm11677_vm13, %v11676_v35, %v5713_v30  ;;  %v8323_v59 = vsel %vm11679_vm8, %v11678_v1, %v5712_v8  ;;  %v8325_v50 = vpop.permute.xlu1 %6000  ;;  %v11681_v40 = vsel %vm11574_vm11, %v7677_v41, 0.0  ;;  %vm11682_vm14 = vmmov %vm11643_vm2  ;;  %v11683_v17 = vld [vmem:[#allocation16_spill] sm:$0xff]  ;;  %v11687_v41 = vld [vmem:[#allocation29_spill] sm:$0xff] }
 0x117   : > { %v8336_v30 = vsel %vm11682_vm14, %v11681_v40, %v5717_v55  ;;  %v5733_v54 = vunpack.i.h.bf16 %v11683_v17  ;;  %v5732_v7 = vunpack.i.l.bf16 %v11683_v17  ;;  %v8340_v35 = vpop.permute.xlu0 %6005  ;;  %vm11684_vm13 = vmmov %vm11643_vm2  ;;  %v11685_v5 = vsel %vm11616_vm9, %v11570_v42, 0.0  ;;  %v11689_v17 = vld [vmem:[#allocation74_spill] sm:$0xff] }
 0x118   : > { %v8344_v8 = vsel %vm11684_vm13, %v7699_v53, %v5723_v22  ;;  %vm11686_vm8 = vmmov %vm11643_vm2  ;;  %v5738_v55 = vunpack.i.h.bf16 %v11687_v41  ;;  %v5743_v40 = vunpack.i.h.bf16 %v11688_v63  ;;  %6290 = vrot.lane.b32.xlu1 %v6289_v24, %s7005_s19  ;;  %v8358_v47 = vsel %vm11643_vm2, %v11689_v17, %v5728_v12  ;;  %v11694_v12 = vld [vmem:[#allocation23_spill] sm:$0xff] }
 0x119   : > { %v8351_v1 = vsel %vm11686_vm8, %v11685_v5, %v5722_v18  ;;  %v11690_v53 = vsel %vm7709_vm3, %v7701_v19, 0.0  ;;  %vm11691_vm14 = vmmov %vm11643_vm2  ;;  %v5742_v42 = vunpack.i.l.bf16 %v11688_v63  ;;  %v11692_v18 = vld [vmem:[#allocation31_spill] sm:$0xff]  ;;  %6295 = vrot.lane.b32.xlu0 %v11693_v60, %s7006_s20  ;;  %v5753_v17 = vunpack.i.h.bf16 %v11694_v12 }
 0x11a   : > { %v8365_v22 = vsel %vm11691_vm14, %v11690_v53, %v5727_v0  ;;  %v5748_v5 = vunpack.i.h.bf16 %v11692_v18  ;;  %v5747_v44 = vunpack.i.l.bf16 %v11692_v18  ;;  %v5752_v51 = vunpack.i.l.bf16 %v11694_v12  ;;  %v8375_v34 = vpop.permute.xlu1 %6010  ;;  %vm11695_vm13 = vmmov %vm11643_vm2  ;;  %v11698_v63 = vld [vmem:[#allocation19_spill] sm:$0xff] }
 0x11b   : > { %v8379_v19 = vsel %vm11695_vm13, %v7734_v61, %v5733_v54  ;;  %v11696_v0 = vsel %vm11606_vm10, %v7713_v57, 0.0  ;;  %vm11697_vm8 = vmmov %vm11643_vm2  ;;  %v5758_v53 = vunpack.i.h.bf16 %v11698_v63  ;;  %v5757_v18 = vunpack.i.l.bf16 %v11698_v63  ;;  %v8390_v24 = vpop.permute.xlu0 %6015  ;;  %v11701_v54 = vld [vmem:[#allocation26_spill] sm:$0xff] }
 0x11c   : > { %v8386_v60 = vsel %vm11697_vm8, %v11696_v0, %v5732_v7  ;;  %v8394_v12 = vsel %vm11643_vm2, %v7747_v21, %v5738_v55  ;;  %vm11700_vm14 = vmmov %vm11643_vm2  ;;  %v5763_v14 = vunpack.i.h.bf16 %v11701_v54  ;;  %v5762_v57 = vunpack.i.l.bf16 %v11701_v54  ;;  %6300 = vrot.lane.b32.xlu1 %v6299_v38, %s7006_s20  ;;  %v11706_v55 = vld [vmem:[#allocation25_spill] sm:$0xff] }
 0x11d   : > { %11699 = vst [vmem:[#allocation40_spill] sm:$0xff] %v8394_v12  ;;  %v8398_v61 = vsel %vm11700_vm14, %v11610_v9, %v5743_v40  ;;  %vm11702_vm13 = vnez %v11628_v11  ;;  %vm11704_vm8 = vmmov %vm11643_vm2  ;;  %vm11705_vm2 = vcmask 64512   ;;  %v5768_v9 = vunpack.i.h.bf16 %v11706_v55 }
 0x11e   : > { %v11703_v7 = vsel %vm11702_vm13, %v11604_v62, 0.0  ;;  %v8412_v21 = vsel %vm11705_vm2, %v8198_v31, %v5748_v5  ;;  %v5767_v40 = vunpack.i.l.bf16 %v11706_v55  ;;  %vm11707_vm14 = vmmov %vm11705_vm2  ;;  %v8429_v31 = vpop.permute.xlu1 %6020 }
 0x11f   : > { %v8408_v0 = vsel %vm11704_vm8, %v11703_v7, %v5742_v42  ;;  %v8418_v63 = vsel %vm11707_vm14, %v8191_v45, %v5747_v44  ;;  %vm11708_vm10 = vmmov %vm11705_vm2  ;;  %v11710_v42 = vld [vmem:[#allocation30_spill] sm:$0xff]  ;;  %v8437_v44 = vsel %vm11705_vm2, %v8201_v37, %v5757_v18  ;;  %v8441_v7 = vpop.permute.xlu0 %6025 }
 0x120   : > { %v8422_v38 = vsel %vm11708_vm10, %v8210_v16, %v5752_v51  ;;  %vm11709_vm13 = vmmov %vm11705_vm2  ;;  %v5773_v54 = vunpack.i.h.bf16 %v11710_v42  ;;  %v5772_v45 = vunpack.i.l.bf16 %v11710_v42  ;;  %v11712_v51 = vld [vmem:[#allocation27_spill] sm:$0xff] }
 0x121   : > { %v8426_v62 = vsel %vm11709_vm13, %v8214_v2, %v5753_v17  ;;  %vm11711_vm8 = vmmov %vm11705_vm2  ;;  %v5777_v16 = vunpack.i.l.bf16 %v11712_v51 }
 0x122   : > { %v8433_v5 = vsel %vm11711_vm8, %v8207_v48, %v5758_v53  ;;  %vm11713_vm10 = vmmov %vm11705_vm2  ;;  %v5778_v48 = vunpack.i.h.bf16 %v11712_v51  ;;  %v11715_v53 = vld [vmem:[#allocation34_spill] sm:$0xff] }
 0x123   : > { %v8445_v2 = vsel %vm11713_vm10, %v8222_v46, %v5763_v14  ;;  %vm11714_vm13 = vmmov %vm11705_vm2  ;;  %v5783_v55 = vunpack.i.h.bf16 %v11715_v53  ;;  %v5782_v42 = vunpack.i.l.bf16 %v11715_v53  ;;  %v11718_v14 = vld [vmem:[#allocation32_spill] sm:$0xff]  ;;  %v11720_v51 = vld [vmem:[#allocation38_spill] sm:$0xff] }
 0x124   : > { %v8449_v17 = vsel %vm11714_vm13, %v8233_v28, %v5762_v57  ;;  %vm11716_vm14 = vmmov %vm11705_vm2  ;;  %v5787_v46 = vunpack.i.l.bf16 %v11718_v14  ;;  %v5788_v57 = vunpack.i.h.bf16 %v11718_v14  ;;  %v5793_v11 = vunpack.i.h.bf16 %v11720_v51  ;;  %v11723_v53 = vld [vmem:[#allocation37_spill] sm:$0xff] }
 0x125   : > { %v8455_v37 = vsel %vm11716_vm14, %v8247_v32, %v5767_v40  ;;  %vm11717_vm8 = vmmov %vm11705_vm2  ;;  %v5792_v32 = vunpack.i.l.bf16 %v11720_v51  ;;  %v8470_v40 = vpop.permute.xlu1 %6030  ;;  %v5798_v49 = vunpack.i.h.bf16 %v11723_v53 }
 0x126   : > { %v8459_v18 = vsel %vm11717_vm8, %v8237_v25, %v5768_v9  ;;  %vm11719_vm10 = vmmov %vm11705_vm2 }
 0x127   : > { %v8465_v28 = vsel %vm11719_vm10, %v8261_v4, %v5773_v54  ;;  %vm11721_vm13 = vmmov %vm11705_vm2  ;;  %v5797_v4 = vunpack.i.l.bf16 %v11723_v53  ;;  %v8482_v54 = vpop.permute.xlu0 %6035  ;;  %v11729_v53 = vld [vmem:[#allocation54_spill] sm:$0xff] }
 0x128   : > { %v8474_v25 = vsel %vm11721_vm13, %v8268_v6, %v5772_v45  ;;  %vm11722_vm14 = vmmov %vm11705_vm2  ;;  %v11726_v6 = vld [vmem:[#allocation39_spill] sm:$0xff]  ;;  %v5808_v41 = vunpack.i.h.bf16 %v11729_v53 }
 0x129   : > { %v8478_v9 = vsel %vm11722_vm14, %v8283_v52, %v5777_v16  ;;  %vm11724_vm8 = vmmov %vm11705_vm2  ;;  %v5803_v45 = vunpack.i.h.bf16 %v11726_v6  ;;  %v5802_v12 = vunpack.i.l.bf16 %v11726_v6 }
 0x12a   : > { %v8486_v14 = vsel %vm11724_vm8, %v8276_v27, %v5778_v48  ;;  %vm11725_vm10 = vmmov %vm11705_vm2  ;;  %v5807_v27 = vunpack.i.l.bf16 %v11729_v53  ;;  %v5983_v53 = vunpack.i.h.bf16 %v8216_v33 }
 0x12b   : > { %v8490_v51 = vsel %vm11725_vm10, %v8290_v20, %v5783_v55  ;;  %vm11727_vm13 = vmmov %vm11705_vm2  ;;  %v11732_v55 = vld [vmem:[#allocation60_spill] sm:$0xff]  ;;  %v8529_v6 = vpop.permute.xlu0 %6045 }
 0x12c   : > { %v8496_v52 = vsel %vm11727_vm13, %v8297_v43, %v5782_v42  ;;  %vm11728_vm14 = vmmov %vm11705_vm2  ;;  %v8514_v43 = vsel %vm11705_vm2, %v8323_v59, %v5792_v32  ;;  %v5813_v42 = vunpack.i.h.bf16 %v11732_v55  ;;  %11736 = vst [vmem:[#allocation42_spill] sm:$0xff] %v8529_v6  ;;  %v8533_v59 = vsel %vm11705_vm2, %v8344_v8, %v5803_v45 }
 0x12d   : > { %v8500_v16 = vsel %vm11728_vm14, %v8312_v56, %v5787_v46  ;;  %vm11730_vm8 = vmmov %vm11705_vm2  ;;  %v8517_v56 = vpop.permute.xlu1 %6040  ;;  %v5827_v8 = vunpack.i.l.bf16 %v7992_v10  ;;  %v5832_v45 = vunpack.i.l.bf16 %v8001_v13 }
 0x12e   : > { %v8506_v20 = vsel %vm11730_vm8, %v8305_v3, %v5788_v57  ;;  %vm11731_vm10 = vmmov %vm11705_vm2  ;;  %v5812_v57 = vunpack.i.l.bf16 %v11732_v55 }
 0x12f   : > { %v8510_v48 = vsel %vm11731_vm10, %v8316_v36, %v5793_v11  ;;  %vm11733_vm13 = vmmov %vm11705_vm2  ;;  %v11735_v11 = vld [vmem:[#allocation91_spill] sm:$0xff] }
 0x130   : > { %v8521_v46 = vsel %vm11733_vm13, %v8336_v30, %v5797_v4  ;;  %vm11734_vm14 = vmmov %vm11705_vm2  ;;  %v5823_v36 = vunpack.i.h.bf16 %v11735_v11  ;;  %v5822_v30 = vunpack.i.l.bf16 %v11735_v11  ;;  %v5833_v11 = vunpack.i.h.bf16 %v8001_v13 }
 0x131   : > { %v8525_v3 = vsel %vm11734_vm14, %v8329_v58, %v5798_v49  ;;  %vm11737_vm10 = vmmov %vm11705_vm2  ;;  %v5828_v49 = vunpack.i.h.bf16 %v7992_v10 }
 0x132   : > { %v8537_v32 = vsel %vm11737_vm10, %v8351_v1, %v5802_v12  ;;  %vm11738_vm14 = vmmov %vm11705_vm2  ;;  %v8553_v1 = vsel %vm11705_vm2, %v8379_v19, %v5813_v42  ;;  %v5902_v19 = vunpack.i.l.bf16 %v8056_v39 }
 0x133   : > { %v8543_v58 = vsel %vm11738_vm14, %v8365_v22, %v5807_v27  ;;  %vm11739_vm8 = vmmov %vm11705_vm2  ;;  %11740 = vst [vmem:[#allocation82_spill] sm:$0xff] %v8553_v1  ;;  %v8558_v22 = vpop.permute.xlu1 %6050  ;;  %v8568_v27 = vpop.permute.xlu0 %6055 }
 0x134   : > { %v8547_v4 = vsel %vm11739_vm8, %v8358_v47, %v5808_v41  ;;  %11742 = vst [vmem:[#allocation83_spill] sm:$0xff] %v8558_v22  ;;  %vm11743_vm10 = vmmov %vm11705_vm2  ;;  %v5903_v41 = vunpack.i.h.bf16 %v8056_v39  ;;  %v11755_v22 = vld [vmem:[#allocation94_spill] sm:$0xff] }
 0x135   : > { %v8562_v47 = vsel %vm11743_vm10, %v8386_v60, %v5812_v57  ;;  %vm11745_vm8 = vmmov %vm11705_vm2  ;;  %11746 = vst [vmem:[#allocation46_spill] sm:$0xff] %v8568_v27  ;;  %v5982_v60 = vunpack.i.l.bf16 %v8216_v33  ;;  %v5838_v57 = vunpack.i.h.bf16 %v8003_v23 }
 0x136   : > { %11744 = vst [vmem:[#allocation84_spill] sm:$0xff] %v8562_v47  ;;  %v2288_v10 = vsel %vm11745_vm8, %v8398_v61, %v5823_v36  ;;  %vm11747_vm14 = vmmov %vm11705_vm2  ;;  %vm11748_vm2 = vcmask 97280   ;;  %v11752_v36 = vld [vmem:[#allocation92_spill] sm:$0xff] }
 0x137   : > { %v2287_v42 = vsel %vm11747_vm14, %v8408_v0, %v5822_v30  ;;  %v8574_v13 = vsel %vm11748_vm2, %v8412_v21, %v5828_v49  ;;  %vm11749_vm10 = vmmov %vm11748_vm2  ;;  %v5837_v0 = vunpack.i.l.bf16 %v8003_v23  ;;  %v5843_v30 = vunpack.i.h.bf16 %v11752_v36  ;;  %v11753_v49 = vld [vmem:[#allocation93_spill] sm:$0xff]  ;;  %v8597_v27 = vpop.permute.xlu0 %6065 }
 0x138   : > { %v8580_v61 = vsel %vm11749_vm10, %v8418_v63, %v5827_v8  ;;  %vm11750_vm8 = vmmov %vm11748_vm2  ;;  %v5842_v33 = vunpack.i.l.bf16 %v11752_v36  ;;  %v5848_v55 = vunpack.i.h.bf16 %v11753_v49  ;;  %v6061_v63 = vpop.permute.xlu1 %6060  ;;  %v2320_v8 = vsel %vm11748_vm2, %v2287_v42, %v5902_v19 }
 0x139   : > { %v8584_v39 = vsel %vm11750_vm8, %v8422_v38, %v5832_v45  ;;  %vm11751_vm14 = vmmov %vm11748_vm2  ;;  %v6063_v45 = vunpack.i.h.bf16 %v6061_v63  ;;  %v6062_v12 = vunpack.i.l.bf16 %v6061_v63  ;;  %v5847_v23 = vunpack.i.l.bf16 %v11753_v49 }
 0x13a   : > { %v8590_v21 = vsel %vm11751_vm14, %v8426_v62, %v5833_v11  ;;  %vm11754_vm10 = vmmov %vm11748_vm2  ;;  %v5852_v62 = vunpack.i.l.bf16 %v11755_v22  ;;  %vm11756_vm8 = vcmask 130048   ;;  %v5853_v19 = vunpack.i.h.bf16 %v11755_v22  ;;  %v11768_v22 = vld [vmem:[#allocation55_spill] sm:$0xff] }
 0x13b   : > { %v2321_v38 = vsel %vm11754_vm10, %v2288_v10, %v5903_v41  ;;  %v2353_v11 = vsel %vm11756_vm8, %v2320_v8, %v5982_v60  ;;  %vm11757_vm14 = vmmov %vm11756_vm8  ;;  %v11770_v8 = vld [vmem:[#allocation56_spill] sm:$0xff] }
 0x13c   : > { %v2354_v1 = vsel %vm11757_vm14, %v2321_v38, %v5983_v53  ;;  %vm11758_vm13 = vmmov %vm11748_vm2  ;;  %vm11759_vm2 = vcmask 162816   ;;  %v11765_v53 = vld [vmem:[#allocation95_spill] sm:$0xff]  ;;  %v5872_v38 = vunpack.i.l.bf16 %v8031_v29 }
 0x13d   : > { %v8605_v36 = vsel %vm11758_vm13, %v8433_v5, %v5838_v57  ;;  %v8609_v10 = vsel %vm11759_vm2, %v2353_v11, %v6062_v12  ;;  %vm11761_vm10 = vmmov %vm11759_vm2  ;;  %v5858_v49 = vunpack.i.h.bf16 %v11765_v53  ;;  %v5857_v5 = vunpack.i.l.bf16 %v11765_v53  ;;  %v8622_v57 = vpop.permute.xlu1 %6070 }
 0x13e   : > { %11760 = vst [vmem:[#allocation50_spill] sm:$0xff] %v8609_v10  ;;  %v8612_v41 = vsel %vm11761_vm10, %v2354_v1, %v6063_v45  ;;  %vm11763_vm3 = vmmov %vm11758_vm13  ;;  %v11772_v45 = vld [vmem:[#allocation96_spill] sm:$0xff] }
 0x13f   : > { %11762 = vst [vmem:[#allocation48_spill] sm:$0xff] %v8612_v41  ;;  %v2294_v42 = vsel %vm11763_vm3, %v8437_v44, %v5837_v0  ;;  %vm11764_vm9 = vmmov %vm11763_vm3  ;;  %v5863_v44 = vunpack.i.h.bf16 %v11768_v22  ;;  %v5862_v0 = vunpack.i.l.bf16 %v11768_v22  ;;  %v5878_v11 = vunpack.i.h.bf16 %v11772_v45  ;;  %v11781_v41 = vld [vmem:[#allocation99_spill] sm:$0xff] }
 0x140   : > { %v8618_v60 = vsel %vm11764_vm9, %v8449_v17, %v5842_v33  ;;  %vm11766_vm13 = vmmov %vm11763_vm3  ;;  %v8634_v17 = vpop.permute.xlu0 %6075  ;;  %v2298_v33 = vsel %vm11763_vm3, %v8455_v37, %v5847_v23  ;;  %v5877_v23 = vunpack.i.l.bf16 %v11772_v45  ;;  %v5907_v10 = vunpack.i.l.bf16 %v11781_v41 }
 0x141   : > { %v8626_v12 = vsel %vm11766_vm13, %v8445_v2, %v5843_v30  ;;  %vm11767_vm8 = vmmov %vm11763_vm3  ;;  %v5868_v2 = vunpack.i.h.bf16 %v11770_v8  ;;  %v5867_v30 = vunpack.i.l.bf16 %v11770_v8  ;;  %v8659_v22 = vpop.permute.xlu1 %6080  ;;  %v11778_v8 = vld [vmem:[#allocation65_spill] sm:$0xff] }
 0x142   : > { %v8630_v1 = vsel %vm11767_vm8, %v8459_v18, %v5848_v55  ;;  %vm11769_vm9 = vmmov %vm11763_vm3  ;;  %v5873_v55 = vunpack.i.h.bf16 %v8031_v29  ;;  %v5887_v45 = vunpack.i.l.bf16 %v11778_v8 }
 0x143   : > { %v8640_v63 = vsel %vm11769_vm9, %v8474_v25, %v5852_v62  ;;  %vm11771_vm14 = vmmov %vm11763_vm3  ;;  %v11775_v62 = vld [vmem:[#allocation64_spill] sm:$0xff] }
 0x144   : > { %v8646_v18 = vsel %vm11771_vm14, %v8465_v28, %v5853_v19  ;;  %vm11773_vm2 = vmmov %vm11763_vm3  ;;  %v5882_v53 = vunpack.i.l.bf16 %v11775_v62  ;;  %v5883_v19 = vunpack.i.h.bf16 %v11775_v62 }
 0x145   : > { %v8653_v37 = vsel %vm11773_vm2, %v8486_v14, %v5858_v49  ;;  %vm11774_vm10 = vmmov %vm11773_vm2  ;;  %v5888_v14 = vunpack.i.h.bf16 %v11778_v8  ;;  %v8667_v49 = vpop.permute.xlu0 %6085 }
 0x146   : > { %v2302_v25 = vsel %vm11774_vm10, %v8478_v9, %v5857_v5  ;;  %vm11776_vm13 = vmmov %vm11773_vm2 }
 0x147   : > { %v2304_v28 = vsel %vm11776_vm13, %v8496_v52, %v5862_v0  ;;  %vm11777_vm8 = vmmov %vm11773_vm2  ;;  %v5908_v0 = vunpack.i.h.bf16 %v11781_v41 }
 0x148   : > { %v2305_v29 = vsel %vm11777_vm8, %v8490_v51, %v5863_v44  ;;  %vm11779_vm3 = vmmov %vm11773_vm2  ;;  %v2309_v51 = vsel %vm11773_vm2, %v8510_v48, %v5873_v55 }
 0x149   : > { %v2307_v9 = vsel %vm11779_vm3, %v8506_v20, %v5868_v2  ;;  %vm11780_vm9 = vmmov %vm11773_vm2  ;;  %v11786_v2 = vld [vmem:[#allocation100_spill] sm:$0xff] }
 0x14a   : > { %v2306_v5 = vsel %vm11780_vm9, %v8500_v16, %v5867_v30  ;;  %vm11782_vm14 = vmmov %vm11773_vm2  ;;  %v5913_v30 = vunpack.i.h.bf16 %v11786_v2 }
 0x14b   : > { %v2308_v52 = vsel %vm11782_vm14, %v8514_v43, %v5872_v38  ;;  %vm11783_vm10 = vmmov %vm11773_vm2  ;;  %v5912_v43 = vunpack.i.l.bf16 %v11786_v2  ;;  %v8694_v38 = vpop.permute.xlu1 %6090  ;;  %v11798_v2 = vld [vmem:[#allocation103_spill] sm:$0xff] }
 0x14c   : > { %v8681_v44 = vsel %vm11783_vm10, %v8525_v3, %v5878_v11  ;;  %vm11784_vm13 = vmmov %vm11773_vm2  ;;  %v5928_v62 = vunpack.i.h.bf16 %v11798_v2 }
 0x14d   : > { %v8686_v20 = vsel %vm11784_vm13, %v8521_v46, %v5877_v23  ;;  %vm11785_vm8 = vmmov %vm11773_vm2  ;;  %v11791_v46 = vld [vmem:[#allocation101_spill] sm:$0xff] }
 0x14e   : > { %v8690_v16 = vsel %vm11785_vm8, %v8537_v32, %v5882_v53  ;;  %vm11787_vm3 = vmmov %vm11773_vm2  ;;  %v5918_v41 = vunpack.i.h.bf16 %v11791_v46  ;;  %v5917_v55 = vunpack.i.l.bf16 %v11791_v46  ;;  %v8706_v32 = vpop.permute.xlu0 %6095  ;;  %v5927_v46 = vunpack.i.l.bf16 %v11798_v2  ;;  %v11801_v53 = vld [vmem:[#allocation104_spill] sm:$0xff]  ;;  %v11806_v2 = vld [vmem:[#allocation107_spill] sm:$0xff] }
 0x14f   : > { %v8698_v48 = vsel %vm11787_vm3, %v8533_v59, %v5883_v19  ;;  %vm11789_vm9 = vmmov %vm11773_vm2  ;;  %v11797_v19 = vld [vmem:[#allocation102_spill] sm:$0xff]  ;;  %v5947_v23 = vunpack.i.l.bf16 %v11806_v2 }
 0x150   : > { %11788 = vst [vmem:[#allocation52_spill] sm:$0xff] %v8698_v48  ;;  %v8702_v3 = vsel %vm11789_vm9, %v8547_v4, %v5888_v14  ;;  %vm11792_vm14 = vmmov %vm11773_vm2  ;;  %vm11795_vm2 = vcmask 130048   ;;  %v5923_v8 = vunpack.i.h.bf16 %v11797_v19  ;;  %v5922_v14 = vunpack.i.l.bf16 %v11797_v19  ;;  %v11804_v19 = vld [vmem:[#allocation105_spill] sm:$0xff] }
 0x151   : > { %11790 = vst [vmem:[#allocation85_spill] sm:$0xff] %v8702_v3  ;;  %v8710_v11 = vsel %vm11792_vm14, %v8543_v58, %v5887_v45  ;;  %v2323_v59 = vsel %vm11795_vm2, %v8580_v61, %v5907_v10  ;;  %vm11796_vm10 = vmmov %vm11795_vm2  ;;  %v5932_v3 = vunpack.i.l.bf16 %v11801_v53  ;;  %v8727_v61 = vpop.permute.xlu1 %6100 }
 0x152   : > { %11793 = vst [vmem:[#allocation57_spill] sm:$0xff] %v8710_v11  ;;  %v2324_v4 = vsel %vm11796_vm10, %v8574_v13, %v5908_v0  ;;  %vm11799_vm13 = vmmov %vm11795_vm2  ;;  %v5933_v0 = vunpack.i.h.bf16 %v11801_v53  ;;  %v5937_v11 = vunpack.i.l.bf16 %v11804_v19  ;;  %v8734_v47 = vpop.permute.xlu0 %6105 }
 0x153   : > { %v2325_v58 = vsel %vm11799_vm13, %v8584_v39, %v5912_v43  ;;  %vm11800_vm8 = vmmov %vm11795_vm2  ;;  %v5938_v39 = vunpack.i.h.bf16 %v11804_v19 }
 0x154   : > { %v2326_v45 = vsel %vm11800_vm8, %v8590_v21, %v5913_v30  ;;  %vm11802_vm3 = vmmov %vm11795_vm2  ;;  %v11805_v21 = vld [vmem:[#allocation106_spill] sm:$0xff] }
 0x155   : > { %v2327_v13 = vsel %vm11802_vm3, %v2294_v42, %v5917_v55  ;;  %vm11803_vm9 = vmmov %vm11795_vm2  ;;  %v5943_v30 = vunpack.i.h.bf16 %v11805_v21  ;;  %v5942_v43 = vunpack.i.l.bf16 %v11805_v21  ;;  %v5948_v55 = vunpack.i.h.bf16 %v11806_v2  ;;  %v11811_v21 = vld [vmem:[#allocation77_spill] sm:$0xff] }
 0x156   : > { %v2328_v10 = vsel %vm11803_vm9, %v8605_v36, %v5918_v41  ;;  %vm11807_vm14 = vmmov %vm11795_vm2  ;;  %v2330_v36 = vsel %vm11795_vm2, %v8626_v12, %v5923_v8  ;;  %v5953_v6 = vunpack.i.h.bf16 %v11811_v21  ;;  %v11814_v8 = vld [vmem:[#allocation108_spill] sm:$0xff] }
 0x157   : > { %v2329_v42 = vsel %vm11807_vm14, %v8618_v60, %v5922_v14  ;;  %vm11808_vm10 = vmmov %vm11795_vm2  ;;  %v5952_v60 = vunpack.i.l.bf16 %v11811_v21  ;;  %v8758_v14 = vpop.permute.xlu1 %6110 }
 0x158   : > { %v8745_v41 = vsel %vm11808_vm10, %v2298_v33, %v5927_v46  ;;  %vm11809_vm13 = vmmov %vm11795_vm2 }
 0x159   : > { %v8750_v53 = vsel %vm11809_vm13, %v8630_v1, %v5928_v62  ;;  %vm11810_vm8 = vmmov %vm11795_vm2  ;;  %v5958_v1 = vunpack.i.h.bf16 %v11814_v8  ;;  %v5957_v62 = vunpack.i.l.bf16 %v11814_v8  ;;  %v5992_v8 = vunpack.i.l.bf16 %v8257_v26 }
 0x15a   : > { %v8754_v19 = vsel %vm11810_vm8, %v8640_v63, %v5932_v3  ;;  %vm11812_vm3 = vmmov %vm11795_vm2  ;;  %v8769_v63 = vpop.permute.xlu0 %6115  ;;  %v8773_v3 = vsel %vm11795_vm2, %v8653_v37, %v5938_v39  ;;  %v8791_v37 = vsel %vm11795_vm2, %v2308_v52, %v5952_v60  ;;  %v11826_v52 = vld [vmem:[#allocation45_spill] sm:$0xff] }
 0x15b   : > { %v8762_v12 = vsel %vm11812_vm3, %v8646_v18, %v5933_v0  ;;  %vm11813_vm9 = vmmov %vm11795_vm2  ;;  %v11819_v0 = vld [vmem:[#allocation81_spill] sm:$0xff] }
 0x15c   : > { %v8765_v33 = vsel %vm11813_vm9, %v2302_v25, %v5937_v11  ;;  %vm11815_vm10 = vmmov %vm11795_vm2  ;;  %v5988_v2 = vunpack.i.h.bf16 %v11819_v0  ;;  %v5987_v21 = vunpack.i.l.bf16 %v11819_v0  ;;  %v6002_v0 = vunpack.i.l.bf16 %v8325_v50 }
 0x15d   : > { %v8776_v46 = vsel %vm11815_vm10, %v2304_v28, %v5942_v43  ;;  %vm11816_vm13 = vmmov %vm11795_vm2 }
 0x15e   : > { %v8779_v18 = vsel %vm11816_vm13, %v2305_v29, %v5943_v30  ;;  %vm11817_vm8 = vmmov %vm11795_vm2  ;;  %v5993_v29 = vunpack.i.h.bf16 %v8257_v26  ;;  %v6068_v26 = vunpack.i.h.bf16 %v8597_v27 }
 0x15f   : > { %v8782_v25 = vsel %vm11817_vm8, %v2306_v5, %v5947_v23  ;;  %vm11818_vm3 = vmmov %vm11795_vm2  ;;  %v5997_v5 = vunpack.i.l.bf16 %v8272_v15  ;;  %v8798_v23 = vpop.permute.xlu1 %6120 }
 0x160   : > { %v8785_v11 = vsel %vm11818_vm3, %v2307_v9, %v5948_v55  ;;  %vm11820_vm10 = vmmov %vm11795_vm2  ;;  %11821 = vst [vmem:[#allocation86_spill] sm:$0xff] %v8798_v23  ;;  %v6067_v55 = vunpack.i.l.bf16 %v8597_v27  ;;  %v6013_v27 = vunpack.i.h.bf16 %v8375_v34 }
 0x161   : > { %v8794_v28 = vsel %vm11820_vm10, %v2309_v51, %v5953_v6  ;;  %vm11822_vm8 = vmmov %vm11795_vm2  ;;  %v5998_v6 = vunpack.i.h.bf16 %v8272_v15  ;;  %v8810_v51 = vpop.permute.xlu0 %6125 }
 0x162   : > { %v8802_v9 = vsel %vm11822_vm8, %v8686_v20, %v5957_v62  ;;  %vm11824_vm3 = vmmov %vm11795_vm2  ;;  %11827 = vst [vmem:[#allocation88_spill] sm:$0xff] %v8810_v51  ;;  %vm11829_vm2 = vcmask 162816  }
 0x163   : > { %11823 = vst [vmem:[#allocation87_spill] sm:$0xff] %v8802_v9  ;;  %v8806_v39 = vsel %vm11824_vm3, %v8681_v44, %v5958_v1  ;;  %v2356_v20 = vsel %vm11829_vm2, %v2323_v59, %v5987_v21  ;;  %vm11830_vm10 = vmmov %vm11829_vm2  ;;  %v6003_v1 = vunpack.i.h.bf16 %v8325_v50  ;;  %v6131_v60 = vpop.permute.xlu1 %6130  ;;  %v6008_v59 = vunpack.i.h.bf16 %v8340_v35 }
 0x164   : > { %11825 = vst [vmem:[#allocation22_spill] sm:$0xff] %v8806_v39  ;;  %v2357_v62 = vsel %vm11830_vm10, %v2324_v4, %v5988_v2  ;;  %vm11831_vm8 = vmmov %vm11829_vm2  ;;  %v6073_v4 = vunpack.i.h.bf16 %v8622_v57  ;;  %v2362_v50 = vsel %vm11829_vm2, %v2329_v42, %v6002_v0  ;;  %v6133_v21 = vunpack.i.h.bf16 %v6131_v60 }
 0x165   : > { %v2358_v44 = vsel %vm11831_vm8, %v2325_v58, %v5992_v8  ;;  %vm11832_vm13 = vmmov %vm11829_vm2  ;;  %v6072_v58 = vunpack.i.l.bf16 %v8622_v57  ;;  %v6136_v2 = vpop.permute.xlu0 %6135 }
 0x166   : > { %v2359_v15 = vsel %vm11832_vm13, %v2326_v45, %v5993_v29  ;;  %vm11833_vm9 = vmmov %vm11829_vm2  ;;  %v6007_v45 = vunpack.i.l.bf16 %v8340_v35  ;;  %v6138_v29 = vunpack.i.h.bf16 %v6136_v2 }
 0x167   : > { %v2360_v30 = vsel %vm11833_vm9, %v2327_v13, %v5997_v5  ;;  %vm11834_vm14 = vmmov %vm11829_vm2  ;;  %v6132_v13 = vunpack.i.l.bf16 %v6131_v60  ;;  %v6137_v5 = vunpack.i.l.bf16 %v6136_v2  ;;  %v6141_v51 = vpop.permute.xlu1 %6140 }
 0x168   : > { %v2361_v43 = vsel %vm11834_vm14, %v2328_v10, %v5998_v6  ;;  %vm11835_vm9 = vmmov %vm11829_vm2  ;;  %v6012_v10 = vunpack.i.l.bf16 %v8375_v34  ;;  %v6078_v6 = vunpack.i.h.bf16 %v8634_v17  ;;  %vm11836_vm14 = vcmask 195584  }
 0x169   : > { %v2363_v8 = vsel %vm11835_vm9, %v2330_v36, %v6003_v1  ;;  %v2389_v57 = vsel %vm11836_vm14, %v2356_v20, %v6067_v55  ;;  %vm11837_vm13 = vmmov %vm11836_vm14  ;;  %v6143_v60 = vunpack.i.h.bf16 %v6141_v51  ;;  %v6142_v0 = vunpack.i.l.bf16 %v6141_v51  ;;  %v6146_v36 = vpop.permute.xlu0 %6145 }
 0x16a   : > { %v2390_v39 = vsel %vm11837_vm13, %v2357_v62, %v6068_v26  ;;  %vm11838_vm10 = vmmov %vm11837_vm13  ;;  %v6148_v1 = vunpack.i.h.bf16 %v6146_v36  ;;  %v6147_v9 = vunpack.i.l.bf16 %v6146_v36  ;;  %vm11840_vm2 = vcmask 228352  }
 0x16b   : > { %v2391_v42 = vsel %vm11838_vm10, %v2358_v44, %v6072_v58  ;;  %vm11839_vm8 = vmmov %vm11838_vm10  ;;  %v2422_v2 = vsel %vm11840_vm2, %v2389_v57, %v6132_v13  ;;  %vm11844_vm14 = vcmask 261120   ;;  %v6077_v20 = vunpack.i.l.bf16 %v8634_v17  ;;  %v6151_v44 = vpop.permute.xlu1 %6150 }
 0x16c   : > { %v2392_v35 = vsel %vm11839_vm8, %v2359_v15, %v6073_v4  ;;  %vm11841_vm9 = vmmov %vm11840_vm2  ;;  %v2455_v55 = vsel %vm11844_vm14, %v2422_v2, %v6142_v0  ;;  %v6082_v58 = vunpack.i.l.bf16 %v8659_v22  ;;  %v6018_v17 = vunpack.i.h.bf16 %v8390_v24 }
 0x16d   : > { %v2423_v34 = vsel %vm11841_vm9, %v2390_v39, %v6133_v21  ;;  %vm11842_vm3 = vmmov %vm11840_vm2  ;;  %v6083_v39 = vunpack.i.h.bf16 %v8659_v22  ;;  %v6156_v21 = vpop.permute.xlu0 %6155  ;;  %v6088_v57 = vunpack.i.h.bf16 %v8667_v49 }
 0x16e   : > { %v2425_v48 = vsel %vm11842_vm3, %v2392_v35, %v6138_v29  ;;  %vm11843_vm11 = vmmov %vm11840_vm2  ;;  %vm11848_vm2 = vcmask 162816   ;;  %vm11850_vm3 = vcmask 293888  }
 0x16f   : > { %v2424_v23 = vsel %vm11843_vm11, %v2391_v42, %v6137_v5  ;;  %vm11845_vm13 = vmmov %vm11844_vm14  ;;  %v2364_v4 = vsel %vm11848_vm2, %v8745_v41, %v6007_v45  ;;  %v6153_v5 = vunpack.i.h.bf16 %v6151_v44  ;;  %v6017_v41 = vunpack.i.l.bf16 %v8390_v24  ;;  %v6161_v42 = vpop.permute.xlu1 %6160 }
 0x170   : > { %v2456_v26 = vsel %vm11845_vm13, %v2423_v34, %v6143_v60  ;;  %vm11846_vm10 = vmmov %vm11845_vm13  ;;  %v6157_v45 = vunpack.i.l.bf16 %v6156_v21  ;;  %v6162_v24 = vunpack.i.l.bf16 %v6161_v42 }
 0x171   : > { %v2457_v62 = vsel %vm11846_vm10, %v2424_v23, %v6147_v9  ;;  %vm11847_vm8 = vmmov %vm11846_vm10  ;;  %v2487_v15 = vpack.c.bf16 %v2456_v26, %v2455_v55  ;;  %v6152_v23 = vunpack.i.l.bf16 %v6151_v44  ;;  %v6158_v9 = vunpack.i.h.bf16 %v6156_v21  ;;  %v6166_v60 = vpop.permute.xlu0 %6165 }
 0x172   : > { %v2458_v51 = vsel %vm11847_vm8, %v2425_v48, %v6148_v1  ;;  %vm11849_vm11 = vmmov %vm11848_vm2  ;;  %vm11854_vm10 = vcmask 195584   ;;  %v6168_v1 = vunpack.i.h.bf16 %v6166_v60  ;;  %v6022_v21 = vunpack.i.l.bf16 %v8429_v31 }
 0x173   : > { %v2488_v13 = vpack.c.bf16 %v2458_v51, %v2457_v62  ;;  %v2365_v29 = vsel %vm11849_vm11, %v8750_v53, %v6008_v59  ;;  %5560 = vmatprep.mubr.msk.bf16.mxu0 %vm11850_vm3, %v2487_v15  ;;  %vm11851_vm9 = vmmov %vm11848_vm2  ;;  %v2393_v53 = vsel %vm11854_vm10, %v2360_v30, %v6077_v20  ;;  %v6171_v34 = vpop.permute.xlu1 %6170  ;;  %v6093_v20 = vunpack.i.h.bf16 %v8694_v38 }
 0x174   : > { %v2366_v48 = vsel %vm11851_vm9, %v8754_v19, %v6012_v10  ;;  %vm11852_vm14 = vmmov %vm11850_vm3  ;;  %v6163_v10 = vunpack.i.h.bf16 %v6161_v42  ;;  %vm11858_vm3 = vcmask 228352   ;;  %v6092_v62 = vunpack.i.l.bf16 %v8694_v38 }
 0x175   : > { %5561 = vmatmul.mubr.msk.bf16.vlgmr.msra.gmra.mrb[0].mxu0 %vm11852_vm14, %v2488_v13  ;;  %vm11853_vm13 = vmmov %vm11848_vm2  ;;  %v2426_v0 = vsel %vm11858_vm3, %v2393_v53, %v6152_v23  ;;  %v6176_v51 = vpop.permute.xlu0 %6175  ;;  %v6028_v13 = vunpack.i.h.bf16 %v8441_v7  ;;  %v6027_v38 = vunpack.i.l.bf16 %v8441_v7 }
 0x176   : > { %v2367_v22 = vsel %vm11853_vm13, %v8762_v12, %v6013_v27  ;;  %vm11855_vm8 = vmmov %vm11854_vm10  ;;  %v6167_v12 = vunpack.i.l.bf16 %v6166_v60  ;;  %vm11862_vm10 = vcmask 261120  }
 0x177   : > { %v2394_v59 = vsel %vm11855_vm8, %v2361_v43, %v6078_v6  ;;  %vm11856_vm2 = vmmov %vm11855_vm8  ;;  %v2459_v27 = vsel %vm11862_vm10, %v2426_v0, %v6162_v24 }
 0x178   : > { %v2395_v35 = vsel %vm11856_vm2, %v2362_v50, %v6082_v58  ;;  %vm11857_vm11 = vmmov %vm11856_vm2  ;;  %v6087_v50 = vunpack.i.l.bf16 %v8667_v49  ;;  %v6023_v49 = vunpack.i.h.bf16 %v8429_v31  ;;  %v6172_v58 = vunpack.i.l.bf16 %v6171_v34 }
 0x179   : > { %v2396_v19 = vsel %vm11857_vm11, %v2363_v8, %v6083_v39  ;;  %vm11859_vm9 = vmmov %vm11858_vm3  ;;  %v6173_v39 = vunpack.i.h.bf16 %v6171_v34 }
 0x17a   : > { %v2427_v36 = vsel %vm11859_vm9, %v2394_v59, %v6153_v5  ;;  %vm11860_vm14 = vmmov %vm11858_vm3  ;;  %v6177_v5 = vunpack.i.l.bf16 %v6176_v51  ;;  %v6186_v59 = vpop.permute.xlu0 %6185 }
 0x17b   : > { %v2429_v30 = vsel %vm11860_vm14, %v2396_v19, %v6158_v9  ;;  %vm11861_vm13 = vmmov %vm11858_vm3  ;;  %vm11866_vm3 = vcmask 162816   ;;  %vm11868_vm14 = vcmask 293888   ;;  %v6188_v19 = vunpack.i.h.bf16 %v6186_v59 }
 0x17c   : > { %v2428_v43 = vsel %vm11861_vm13, %v2395_v35, %v6157_v45  ;;  %vm11863_vm8 = vmmov %vm11862_vm10  ;;  %v2368_v26 = vsel %vm11866_vm3, %v8765_v33, %v6017_v41  ;;  %v6178_v33 = vunpack.i.h.bf16 %v6176_v51  ;;  %vm11870_vm10 = vcmask 195584   ;;  %v6181_v41 = vpop.permute.xlu1 %6180 }
 0x17d   : > { %v2460_v6 = vsel %vm11863_vm8, %v2427_v36, %v6163_v10  ;;  %vm11864_vm2 = vmmov %vm11863_vm8  ;;  %v2397_v23 = vsel %vm11870_vm10, %v2364_v4, %v6087_v50  ;;  %v6183_v31 = vunpack.i.h.bf16 %v6181_v41  ;;  %v6182_v53 = vunpack.i.l.bf16 %v6181_v41 }
 0x17e   : > { %v2461_v8 = vsel %vm11864_vm2, %v2428_v43, %v6167_v12  ;;  %vm11865_vm11 = vmmov %vm11864_vm2  ;;  %v2489_v55 = vpack.c.bf16 %v2460_v6, %v2459_v27  ;;  %v6187_v7 = vunpack.i.l.bf16 %v6186_v59  ;;  %v6102_v12 = vunpack.i.l.bf16 %v8727_v61 }
 0x17f   : > { %v2462_v2 = vsel %vm11865_vm11, %v2429_v30, %v6168_v1  ;;  %vm11867_vm9 = vmmov %vm11866_vm3  ;;  %vm11874_vm3 = vcmask 228352   ;;  %v6103_v1 = vunpack.i.h.bf16 %v8727_v61  ;;  %v6196_v30 = vpop.permute.xlu0 %6195  ;;  %v6032_v61 = vunpack.i.l.bf16 %v8470_v40 }
 0x180   : > { %v2490_v44 = vpack.c.bf16 %v2462_v2, %v2461_v8  ;;  %v2369_v15 = vsel %vm11867_vm9, %v8773_v3, %v6018_v17  ;;  %5564 = vmatprep.mubr.msk.bf16.mxu0 %vm11868_vm14, %v2489_v55  ;;  %vm11869_vm13 = vmmov %vm11868_vm14  ;;  %v6098_v17 = vunpack.i.h.bf16 %v8706_v32  ;;  %v2430_v42 = vsel %vm11874_vm3, %v2397_v23, %v6172_v58  ;;  %v6191_v60 = vpop.permute.xlu1 %6190 }
 0x181   : > { %vm11871_vm8 = vmmov %vm11870_vm10  ;;  %vm11878_vm10 = vcmask 261120   ;;  %v6193_v6 = vunpack.i.h.bf16 %v6191_v60  ;;  %v6192_v50 = vunpack.i.l.bf16 %v6191_v60  ;;  %v6198_v2 = vunpack.i.h.bf16 %v6196_v30 }
 0x182   : > { %5565 = vmatmul.mubr.msk.bf16.gmra.mrb[4].mxu0 %vm11869_vm13, %v2490_v44  ;;  %v2398_v3 = vsel %vm11871_vm8, %v2365_v29, %v6088_v57  ;;  %vm11872_vm2 = vmmov %vm11871_vm8  ;;  %v2463_v57 = vsel %vm11878_vm10, %v2430_v42, %v6182_v53  ;;  %v6197_v34 = vunpack.i.l.bf16 %v6196_v30  ;;  %v6038_v41 = vunpack.i.h.bf16 %v8482_v54 }
 0x183   : > { %v2399_v9 = vsel %vm11872_vm2, %v2366_v48, %v6092_v62  ;;  %vm11873_vm11 = vmmov %vm11872_vm2  ;;  %v6097_v48 = vunpack.i.l.bf16 %v8706_v32  ;;  %v6037_v42 = vunpack.i.l.bf16 %v8482_v54  ;;  %v6118_v54 = vunpack.i.h.bf16 %v8769_v63 }
 0x184   : > { %v2400_v45 = vsel %vm11873_vm11, %v2367_v22, %v6093_v20  ;;  %vm11875_vm9 = vmmov %vm11874_vm3  ;;  %v6201_v20 = vpop.permute.xlu1 %6200 }
 0x185   : > { %v2431_v35 = vsel %vm11875_vm9, %v2398_v3, %v6173_v39  ;;  %vm11876_vm14 = vmmov %vm11874_vm3  ;;  %v6202_v44 = vunpack.i.l.bf16 %v6201_v20 }
 0x186   : > { %v2433_v4 = vsel %vm11876_vm14, %v2400_v45, %v6178_v33  ;;  %vm11877_vm13 = vmmov %vm11874_vm3  ;;  %vm11882_vm3 = vcmask 162816   ;;  %v6112_v45 = vunpack.i.l.bf16 %v8758_v14 }
 0x187   : > { %v2432_v29 = vsel %vm11877_vm13, %v2399_v9, %v6177_v5  ;;  %vm11879_vm8 = vmmov %vm11878_vm10  ;;  %v2370_v36 = vsel %vm11882_vm3, %v8776_v46, %v6022_v21  ;;  %vm11885_vm13 = vcmask 293888   ;;  %v6033_v46 = vunpack.i.h.bf16 %v8470_v40 }
 0x188   : > { %v2464_v10 = vsel %vm11879_vm8, %v2431_v35, %v6183_v31  ;;  %vm11880_vm2 = vmmov %vm11879_vm8  ;;  %v6107_v5 = vunpack.i.l.bf16 %v8734_v47  ;;  %v6211_v3 = vpop.permute.xlu1 %6210  ;;  %v6113_v9 = vunpack.i.h.bf16 %v8758_v14  ;;  %v6042_v14 = vunpack.i.l.bf16 %v8517_v56 }
 0x189   : > { %v2465_v22 = vsel %vm11880_vm2, %v2432_v29, %v6187_v7  ;;  %vm11881_vm11 = vmmov %vm11880_vm2  ;;  %v2491_v0 = vpack.c.bf16 %v2464_v10, %v2463_v57  ;;  %vm11888_vm2 = vcmask 195584   ;;  %v6212_v35 = vunpack.i.l.bf16 %v6211_v3 }
 0x18a   : > { %v2466_v24 = vsel %vm11881_vm11, %v2433_v4, %v6188_v19  ;;  %vm11883_vm9 = vmmov %vm11882_vm3  ;;  %v6043_v7 = vunpack.i.h.bf16 %v8517_v56 }
 0x18b   : > { %v2492_v43 = vpack.c.bf16 %v2466_v24, %v2465_v22  ;;  %v2371_v27 = vsel %vm11883_vm9, %v8779_v18, %v6023_v49  ;;  %vm11884_vm14 = vmmov %vm11882_vm3  ;;  %5568 = vmatprep.mubr.msk.bf16.mxu0 %vm11885_vm13, %v2491_v0  ;;  %v2401_v18 = vsel %vm11888_vm2, %v2368_v26, %v6097_v48  ;;  %v6206_v49 = vpop.permute.xlu0 %6205 }
 0x18c   : > { %v2372_v32 = vsel %vm11884_vm14, %v8782_v25, %v6027_v38  ;;  %vm11886_vm10 = vmmov %vm11882_vm3  ;;  %v6108_v25 = vunpack.i.h.bf16 %v8734_v47  ;;  %vm11892_vm14 = vcmask 228352   ;;  %v6208_v21 = vunpack.i.h.bf16 %v6206_v49  ;;  %v6221_v10 = vpop.permute.xlu1 %6220 }
 0x18d   : > { %v2373_v8 = vsel %vm11886_vm10, %v8785_v11, %v6028_v13  ;;  %vm11887_vm8 = vmmov %vm11885_vm13  ;;  %v6203_v11 = vunpack.i.h.bf16 %v6201_v20  ;;  %v2434_v39 = vsel %vm11892_vm14, %v2401_v18, %v6192_v50  ;;  %v6207_v40 = vunpack.i.l.bf16 %v6206_v49 }
 0x18e   : > { %5569 = vmatmul.mubr.msk.bf16.gmra.mrb[8].mxu0 %vm11887_vm8, %v2492_v43  ;;  %vm11889_vm11 = vmmov %vm11888_vm2  ;;  %v6213_v47 = vunpack.i.h.bf16 %v6211_v3  ;;  %v6222_v24 = vunpack.i.l.bf16 %v6221_v10 }
 0x18f   : > { %v2402_v55 = vsel %vm11889_vm11, %v2369_v15, %v6098_v17  ;;  %vm11890_vm3 = vmmov %vm11888_vm2  ;;  %v6216_v31 = vpop.permute.xlu0 %6215 }
 0x190   : > { %v2403_v62 = vsel %vm11890_vm3, %v2370_v36, %v6102_v12  ;;  %vm11891_vm9 = vmmov %vm11888_vm2  ;;  %vm11896_vm2 = vcmask 261120   ;;  %v6218_v4 = vunpack.i.h.bf16 %v6216_v31  ;;  %v6217_v29 = vunpack.i.l.bf16 %v6216_v31 }
 0x191   : > { %v2404_v51 = vsel %vm11891_vm9, %v2371_v27, %v6103_v1  ;;  %vm11893_vm13 = vmmov %vm11892_vm14  ;;  %v2467_v13 = vsel %vm11896_vm2, %v2434_v39, %v6202_v44  ;;  %vm11900_vm14 = vcmask 162816  }
 0x192   : > { %v2435_v58 = vsel %vm11893_vm13, %v2402_v55, %v6193_v6  ;;  %vm11894_vm10 = vmmov %vm11893_vm13  ;;  %v2374_v59 = vsel %vm11900_vm14, %v8791_v37, %v6032_v61  ;;  %vm11901_vm13 = vcmask 293888   ;;  %v11918_v61 = vld [vmem:[#allocation86_spill] sm:$0xff] }
 0x193   : > { %v2437_v26 = vsel %vm11894_vm10, %v2404_v51, %v6198_v2  ;;  %vm11895_vm8 = vmmov %vm11894_vm10  ;;  %v6226_v60 = vpop.permute.xlu0 %6225  ;;  %v11916_v2 = vunpack.i.l.bf16 %v11826_v52  ;;  %v6123_v18 = vunpack.i.h.bf16 %v11918_v61  ;;  %v6122_v55 = vunpack.i.l.bf16 %v11918_v61 }
 0x194   : > { %v2436_v15 = vsel %vm11895_vm8, %v2403_v62, %v6197_v34  ;;  %vm11897_vm11 = vmmov %vm11896_vm2  ;;  %v6228_v1 = vunpack.i.h.bf16 %v6226_v60  ;;  %v6227_v56 = vunpack.i.l.bf16 %v6226_v60  ;;  %v11919_v62 = vunpack.i.h.bf16 %v11826_v52  ;;  %v11945_v60 = vld [vmem:[#allocation97_spill] sm:$0xff] }
 0x195   : > { %v2468_v33 = vsel %vm11897_vm11, %v2435_v58, %v6203_v11  ;;  %vm11898_vm3 = vmmov %vm11896_vm2  ;;  %v11922_v11 = vld [vmem:[#allocation87_spill] sm:$0xff]  ;;  %v11925_v58 = vld [vmem:[#allocation22_spill] sm:$0xff] }
 0x196   : > { %v2469_v38 = vsel %vm11898_vm3, %v2436_v15, %v6207_v40  ;;  %vm11899_vm9 = vmmov %vm11896_vm2  ;;  %v2493_v17 = vpack.c.bf16 %v2468_v33, %v2467_v13  ;;  %vm11904_vm2 = vcmask 195584  }
 0x197   : > { %v2470_v23 = vsel %vm11899_vm9, %v2437_v26, %v6208_v21  ;;  %vm11902_vm10 = vmmov %vm11900_vm14  ;;  %v2405_v57 = vsel %vm11904_vm2, %v2372_v32, %v6107_v5  ;;  %vm11908_vm14 = vcmask 228352   ;;  %v6117_v32 = vunpack.i.l.bf16 %v8769_v63  ;;  %v11920_v63 = vld [vmem:[#allocation52_spill] sm:$0xff]  ;;  %v11927_v21 = vld [vmem:[#allocation42_spill] sm:$0xff] }
 0x198   : > { %v2494_v53 = vpack.c.bf16 %v2470_v23, %v2469_v38  ;;  %5572 = vmatprep.mubr.msk.bf16.mxu0 %vm11901_vm13, %v2493_v17  ;;  %v2375_v19 = vsel %vm11902_vm10, %v8794_v28, %v6033_v46  ;;  %vm11903_vm8 = vmmov %vm11901_vm13  ;;  %v6223_v28 = vunpack.i.h.bf16 %v6221_v10  ;;  %v2438_v0 = vsel %vm11908_vm14, %v2405_v57, %v6212_v35  ;;  %v11944_v10 = vld [vmem:[#allocation88_spill] sm:$0xff] }
 0x199   : > { %vm11905_vm11 = vmmov %vm11904_vm2  ;;  %v6048_v40 = vunpack.i.h.bf16 %v11927_v21 }
 0x19a   : > { %5573 = vmatmul.mubr.msk.bf16.gmra.mrb[12].mxu0 %vm11903_vm8, %v2494_v53  ;;  %v2406_v37 = vsel %vm11905_vm11, %v2373_v8, %v6108_v25  ;;  %vm11906_vm3 = vmmov %vm11904_vm2  ;;  %v6231_v8 = vpop.permute.xlu1 %6230  ;;  %v6236_v25 = vpop.permute.xlu0 %6235 }
 0x19b   : > { %v2407_v48 = vsel %vm11906_vm3, %v2374_v59, %v6112_v45  ;;  %vm11907_vm9 = vmmov %vm11904_vm2  ;;  %vm11912_vm2 = vcmask 261120   ;;  %v6233_v49 = vunpack.i.h.bf16 %v6231_v8  ;;  %v6232_v39 = vunpack.i.l.bf16 %v6231_v8  ;;  %v11957_v8 = vld [vmem:[#allocation85_spill] sm:$0xff] }
 0x19c   : > { %v2408_v22 = vsel %vm11907_vm9, %v2375_v19, %v6113_v9  ;;  %vm11909_vm13 = vmmov %vm11908_vm14  ;;  %v2471_v43 = vsel %vm11912_vm2, %v2438_v0, %v6222_v24  ;;  %vm11917_vm14 = vcmask 130048   ;;  %v6238_v26 = vunpack.i.h.bf16 %v6236_v25 }
 0x19d   : > { %v2439_v36 = vsel %vm11909_vm13, %v2406_v37, %v6213_v47  ;;  %vm11910_vm10 = vmmov %vm11909_vm13  ;;  %v2345_v34 = vsel %vm11917_vm14, %v8690_v16, %v11916_v2  ;;  %v6237_v15 = vunpack.i.l.bf16 %v6236_v25  ;;  %v11943_v37 = vld [vmem:[#allocation36_spill] sm:$0xff]  ;;  %v11946_v0 = vunpack.i.l.bf16 %v11945_v60 }
 0x19e   : > { %v2441_v12 = vsel %vm11910_vm10, %v2408_v22, %v6218_v4  ;;  %vm11911_vm8 = vmmov %vm11910_vm10  ;;  %vm11923_vm10 = vcmask 162816   ;;  %v6241_v38 = vpop.permute.xlu1 %6240  ;;  %v6246_v9 = vpop.permute.xlu0 %6245  ;;  %v6127_v22 = vunpack.i.l.bf16 %v11944_v10  ;;  %v5973_v2 = vunpack.i.h.bf16 %v11943_v37 }
 0x19f   : > { %v2440_v30 = vsel %vm11911_vm8, %v2407_v48, %v6217_v29  ;;  %vm11913_vm11 = vmmov %vm11912_vm2  ;;  %v2376_v44 = vsel %vm11923_vm10, %v11922_v11, %v6037_v42  ;;  %vm11924_vm8 = vcmask 293888   ;;  %v6243_v17 = vunpack.i.h.bf16 %v6241_v38 }
 0x1a0   : > { %v2472_v27 = vsel %vm11913_vm11, %v2439_v36, %v6223_v28  ;;  %vm11914_vm3 = vmmov %vm11912_vm2  ;;  %v6248_v53 = vunpack.i.h.bf16 %v6246_v9  ;;  %v6247_v59 = vunpack.i.l.bf16 %v6246_v9  ;;  %v6128_v48 = vunpack.i.h.bf16 %v11944_v10  ;;  %v11947_v36 = vld [vmem:[#allocation84_spill] sm:$0xff]  ;;  %v11983_v10 = vld [vmem:[#allocation17_spill] sm:$0xff] }
 0x1a1   : > { %v2473_v6 = vsel %vm11914_vm3, %v2440_v30, %v6227_v56  ;;  %vm11915_vm9 = vmmov %vm11912_vm2  ;;  %v2495_v46 = vpack.c.bf16 %v2472_v27, %v2471_v43  ;;  %v11949_v56 = vunpack.i.h.bf16 %v11945_v60  ;;  %v11952_v43 = vld [vmem:[#allocation79_spill] sm:$0xff] }
 0x1a2   : > { %v2474_v50 = vsel %vm11915_vm9, %v2441_v12, %v6228_v1  ;;  %vm11921_vm13 = vmmov %vm11917_vm14  ;;  %vm11931_vm14 = vcmask 195584   ;;  %v6256_v28 = vpop.permute.xlu0 %6255  ;;  %v11950_v12 = vld [vmem:[#allocation82_spill] sm:$0xff]  ;;  %v11953_v27 = vunpack.i.l.bf16 %v11952_v43 }
 0x1a3   : > { %v2496_v20 = vpack.c.bf16 %v2474_v50, %v2473_v6  ;;  %v2346_v51 = vsel %vm11921_vm13, %v11920_v63, %v11919_v62  ;;  %5576 = vmatprep.mubr.msk.bf16.mxu0 %vm11924_vm8, %v2495_v46  ;;  %vm11926_vm2 = vmmov %vm11923_vm10  ;;  %v2409_v33 = vsel %vm11931_vm14, %v2376_v44, %v6117_v32  ;;  %v11954_v32 = vld [vmem:[#allocation57_spill] sm:$0xff]  ;;  %v11956_v50 = vunpack.i.h.bf16 %v11952_v43 }
 0x1a4   : > { %v2377_v16 = vsel %vm11926_vm2, %v11925_v58, %v6038_v41  ;;  %vm11928_vm11 = vmmov %vm11924_vm8  ;;  %v6242_v41 = vunpack.i.l.bf16 %v6241_v38 }
 0x1a5   : > { %5577 = vmatmul.mubr.msk.bf16.gmra.mrb[16].mxu0 %vm11928_vm11, %v2496_v20  ;;  %vm11929_vm3 = vmmov %vm11926_vm2 }
 0x1a6   : > { %v2378_v52 = vsel %vm11929_vm3, %v2345_v34, %v6042_v14  ;;  %vm11930_vm9 = vmmov %vm11926_vm2  ;;  %vm11935_vm2 = vcmask 228352   ;;  %v6251_v14 = vpop.permute.xlu1 %6250  ;;  %v11960_v34 = vld [vmem:[#allocation83_spill] sm:$0xff]  ;;  %v6266_v58 = vpop.permute.xlu0 %6265 }
 0x1a7   : > { %v2379_v13 = vsel %vm11930_vm9, %v2346_v51, %v6043_v7  ;;  %vm11932_vm13 = vmmov %vm11931_vm14  ;;  %v2442_v45 = vsel %vm11935_vm2, %v2409_v33, %v6232_v39  ;;  %vm11939_vm9 = vcmask 261120   ;;  %v6047_v7 = vunpack.i.l.bf16 %v11927_v21 }
 0x1a8   : > { %v2410_v5 = vsel %vm11932_vm13, %v2377_v16, %v6118_v54  ;;  %vm11933_vm10 = vmmov %vm11932_vm13  ;;  %v2475_v35 = vsel %vm11939_vm9, %v2442_v45, %v6242_v41  ;;  %v5972_v54 = vunpack.i.l.bf16 %v11943_v37  ;;  %v6052_v61 = vunpack.i.l.bf16 %v11960_v34  ;;  %v11981_v37 = vld [vmem:[#allocation29_spill] sm:$0xff] }
 0x1a9   : > { %v2411_v23 = vsel %vm11933_vm10, %v2378_v52, %v6122_v55  ;;  %vm11934_vm8 = vmmov %vm11933_vm10  ;;  %v6257_v55 = vunpack.i.l.bf16 %v6256_v28  ;;  %v6053_v62 = vunpack.i.h.bf16 %v11960_v34  ;;  %v6252_v63 = vunpack.i.l.bf16 %v6251_v14 }
 0x1aa   : > { %v2412_v3 = vsel %vm11934_vm8, %v2379_v13, %v6123_v18  ;;  %vm11936_vm6 = vmmov %vm11935_vm2  ;;  %v6258_v18 = vunpack.i.h.bf16 %v6256_v28  ;;  %v6261_v51 = vpop.permute.xlu1 %6260  ;;  %v6253_v39 = vunpack.i.h.bf16 %v6251_v14 }
 0x1ab   : > { %v2443_v31 = vsel %vm11936_vm6, %v2410_v5, %v6233_v49  ;;  %vm11937_vm11 = vmmov %vm11935_vm2  ;;  %vm11948_vm6 = vcmask 97280   ;;  %v6263_v16 = vunpack.i.h.bf16 %v6261_v51  ;;  %v6262_v21 = vunpack.i.l.bf16 %v6261_v51 }
 0x1ac   : > { %v2445_v42 = vsel %vm11937_vm11, %v2412_v3, %v6238_v26  ;;  %vm11938_vm3 = vmmov %vm11935_vm2  ;;  %v2316_v1 = vsel %vm11948_vm6, %v11947_v36, %v11946_v0  ;;  %vm11955_vm2 = vcmask 130048   ;;  %v6268_v26 = vunpack.i.h.bf16 %v6266_v58 }
 0x1ad   : > { %v2444_v47 = vsel %vm11938_vm3, %v2411_v23, %v6237_v15  ;;  %vm11940_vm14 = vmmov %vm11939_vm9  ;;  %v2347_v6 = vsel %vm11955_vm2, %v11954_v32, %v11953_v27  ;;  %vm11959_vm3 = vcmask 293888   ;;  %v6267_v15 = vunpack.i.l.bf16 %v6266_v58  ;;  %v11993_v27 = vld [vmem:[#allocation40_spill] sm:$0xff] }
 0x1ae   : > { %v2476_v19 = vsel %vm11940_vm14, %v2443_v31, %v6243_v17  ;;  %vm11941_vm13 = vmmov %vm11939_vm9  ;;  %vm11962_vm14 = vcmask 162816   ;;  %v6271_v17 = vpop.permute.xlu1 %6270  ;;  %v6276_v31 = vpop.permute.xlu0 %6275 }
 0x1af   : > { %v2477_v4 = vsel %vm11941_vm13, %v2444_v47, %v6247_v59  ;;  %vm11942_vm10 = vmmov %vm11939_vm9  ;;  %v2497_v57 = vpack.c.bf16 %v2476_v19, %v2475_v35  ;;  %v2380_v25 = vsel %vm11962_vm14, %v2347_v6, %v6047_v7  ;;  %v6273_v9 = vunpack.i.h.bf16 %v6271_v17  ;;  %v11974_v59 = vld [vmem:[#allocation98_spill] sm:$0xff]  ;;  %v11977_v7 = vld [vmem:[#allocation80_spill] sm:$0xff] }
 0x1b0   : > { %v2478_v29 = vsel %vm11942_vm10, %v2445_v42, %v6248_v53  ;;  %vm11951_vm8 = vmmov %vm11948_vm6  ;;  %vm11965_vm6 = vcmask 195584   ;;  %v6272_v45 = vunpack.i.l.bf16 %v6271_v17  ;;  %v5898_v42 = vunpack.i.h.bf16 %v11974_v59 }
 0x1b1   : > { %v2498_v24 = vpack.c.bf16 %v2478_v29, %v2477_v4  ;;  %v2317_v30 = vsel %vm11951_vm8, %v11950_v12, %v11949_v56  ;;  %vm11958_vm11 = vmmov %vm11955_vm2  ;;  %5580 = vmatprep.mubr.msk.bf16.mxu0 %vm11959_vm3, %v2497_v57  ;;  %v2413_v44 = vsel %vm11965_vm6, %v2380_v25, %v6127_v22  ;;  %v5897_v47 = vunpack.i.l.bf16 %v11974_v59  ;;  %v11989_v56 = vld [vmem:[#allocation70_spill] sm:$0xff] }
 0x1b2   : > { %v2348_v46 = vsel %vm11958_vm11, %v11957_v8, %v11956_v50  ;;  %vm11961_vm9 = vmmov %vm11959_vm3  ;;  %v2350_v52 = vsel %vm11955_vm2, %v2317_v30, %v5973_v2  ;;  %vm11968_vm3 = vcmask 228352   ;;  %v5978_v4 = vunpack.i.h.bf16 %v11977_v7  ;;  %v6281_v36 = vpop.permute.xlu1 %6280  ;;  %v6286_v8 = vpop.permute.xlu0 %6285 }
 0x1b3   : > { %5581 = vmatmul.mubr.msk.bf16.gmra.mrb[20].mxu0 %vm11961_vm9, %v2498_v24  ;;  %vm11963_vm13 = vmmov %vm11962_vm14  ;;  %v2446_v13 = vsel %vm11968_vm3, %v2413_v44, %v6257_v55  ;;  %v5977_v29 = vunpack.i.l.bf16 %v11977_v7  ;;  %v11988_v24 = vld [vmem:[#allocation46_spill] sm:$0xff]  ;;  %v11990_v12 = vunpack.i.l.bf16 %v11989_v56  ;;  %v11992_v43 = vunpack.i.h.bf16 %v11989_v56 }
 0x1b4   : > { %v2381_v20 = vsel %vm11963_vm13, %v2348_v46, %v6048_v40  ;;  %vm11964_vm10 = vmmov %vm11955_vm2  ;;  %v6058_v60 = vunpack.i.h.bf16 %v11988_v24  ;;  %v6057_v0 = vunpack.i.l.bf16 %v11988_v24  ;;  %v6278_v6 = vunpack.i.h.bf16 %v6276_v31 }
 0x1b5   : > { %v2349_v11 = vsel %vm11964_vm10, %v2316_v1, %v5972_v54  ;;  %vm11966_vm8 = vmmov %vm11965_vm6  ;;  %vm11972_vm10 = vcmask 261120   ;;  %v11982_v54 = vunpack.i.l.bf16 %v11981_v37  ;;  %v6277_v50 = vunpack.i.l.bf16 %v6276_v31 }
 0x1b6   : > { %v2414_v49 = vsel %vm11966_vm8, %v2381_v20, %v6128_v48  ;;  %vm11967_vm11 = vmmov %vm11963_vm13  ;;  %v2479_v23 = vsel %vm11972_vm10, %v2446_v13, %v6267_v15  ;;  %v11985_v48 = vld [vmem:[#allocation76_spill] sm:$0xff]  ;;  %v6283_v34 = vunpack.i.h.bf16 %v6281_v36  ;;  %v6288_v25 = vunpack.i.h.bf16 %v6286_v8  ;;  %v6291_v51 = vpop.permute.xlu1 %6290  ;;  %v6296_v58 = vpop.permute.xlu0 %6295 }
 0x1b7   : > { %v2382_v40 = vsel %vm11967_vm11, %v2349_v11, %v6052_v61  ;;  %vm11969_vm9 = vmmov %vm11968_vm3  ;;  %v6282_v61 = vunpack.i.l.bf16 %v6281_v36  ;;  %v6287_v20 = vunpack.i.l.bf16 %v6286_v8 }
 0x1b8   : > { %v2447_v33 = vsel %vm11969_vm9, %v2414_v49, %v6258_v18  ;;  %vm11970_vm14 = vmmov %vm11967_vm11  ;;  %v6293_v49 = vunpack.i.h.bf16 %v6291_v51 }
 0x1b9   : > { %v2383_v5 = vsel %vm11970_vm14, %v2350_v52, %v6053_v62  ;;  %vm11971_vm13 = vmmov %vm11965_vm6  ;;  %vm11980_vm14 = vcmask 293888   ;;  %v6298_v52 = vunpack.i.h.bf16 %v6296_v58 }
 0x1ba   : > { %v2415_v38 = vsel %vm11971_vm13, %v2382_v40, %v6252_v63  ;;  %vm11973_vm6 = vmmov %vm11972_vm10  ;;  %v2416_v41 = vsel %vm11966_vm8, %v2383_v5, %v6253_v39  ;;  %vm11984_vm13 = vnez %v11983_v10  ;;  %vm11987_vm10 = vcmask 31744   ;;  %v6301_v17 = vpop.permute.xlu1 %6300 }
 0x1bb   : > { %v2480_v3 = vsel %vm11973_vm6, %v2447_v33, %v6268_v26  ;;  %vm11975_vm2 = vmmov %vm11968_vm3  ;;  %v11986_v22 = vsel %vm11984_vm13, %v11985_v48, 0.0  ;;  %v6292_v39 = vunpack.i.l.bf16 %v6291_v51  ;;  %v12006_v26 = vld [vmem:[#allocation48_spill] sm:$0xff]  ;;  %v6297_v40 = vunpack.i.l.bf16 %v6296_v58 }
 0x1bc   : > { %v2499_v53 = vpack.c.bf16 %v2480_v3, %v2479_v23  ;;  %v2448_v35 = vsel %vm11975_vm2, %v2415_v38, %v6262_v21  ;;  %vm11976_vm11 = vmmov %vm11975_vm2  ;;  %v2252_v28 = vsel %vm11987_vm10, %v11986_v22, %v11982_v54  ;;  %vm11995_vm2 = vcmask 97280  }
 0x1bd   : > { %v2449_v19 = vsel %vm11976_vm11, %v2416_v41, %v6263_v16  ;;  %vm11978_vm3 = vmmov %vm11973_vm6  ;;  %vm11991_vm6 = vcmask 64512   ;;  %vm12000_vm10 = vcmask 162816   ;;  %v12004_v16 = vld [vmem:[#allocation50_spill] sm:$0xff]  ;;  %v6303_v41 = vunpack.i.h.bf16 %v6301_v17 }
 0x1be   : > { %v2481_v14 = vsel %vm11978_vm3, %v2448_v35, %v6272_v45  ;;  %vm11979_vm9 = vmmov %vm11978_vm3  ;;  %5584 = vmatprep.mubr.msk.bf16.mxu0 %vm11980_vm14, %v2499_v53  ;;  %v2285_v30 = vsel %vm11991_vm6, %v2252_v28, %v11990_v12  ;;  %vm12016_vm13 = vcmask 293888  }
 0x1bf   : > { %v2482_v57 = vsel %vm11979_vm9, %v2449_v19, %v6273_v9  ;;  %vm11994_vm8 = vmmov %vm11991_vm6  ;;  %vm11998_vm9 = vcmask 130048   ;;  %v6302_v9 = vunpack.i.l.bf16 %v6301_v17  ;;  %v9077_v19 = vld [vmem:[%s11065_s2] ss:$0 sm:$0xff] }
 0x1c0   : > { %v2500_v1 = vpack.c.bf16 %v2482_v57, %v2481_v14  ;;  %v2286_v32 = vsel %vm11994_vm8, %v11993_v27, %v11992_v43  ;;  %vm11996_vm11 = vmmov %vm11995_vm2  ;;  %vm12002_vm8 = vcmask 195584  }
 0x1c1   : > { %v2319_v46 = vsel %vm11995_vm2, %v2286_v32, %v5898_v42  ;;  %v2318_v2 = vsel %vm11996_vm11, %v2285_v30, %v5897_v47  ;;  %vm11997_vm3 = vmmov %vm11980_vm14  ;;  %v2949_v42 = vld [vmem:[#allocation3 + $0x8] sm:$0xff]  ;;  %v2950_v47 = vld [vmem:[#allocation3 + $0x10] sm:$0xff] }
 0x1c2   : > { %5585 = vmatmul.mubr.msk.bf16.gmra.mrb[24].mxu0 %vm11997_vm3, %v2500_v1  ;;  %v2351_v18 = vsel %vm11998_vm9, %v2318_v2, %v5977_v29  ;;  %vm11999_vm14 = vmmov %vm11998_vm9  ;;  %vm12008_vm9 = vcmask 228352   ;;  %v6304_v35 = vpack.i.bf16 %v2950_v47, %v2949_v42 }
 0x1c3   : > { %v2352_v55 = vsel %vm11999_vm14, %v2319_v46, %v5978_v4  ;;  %v2384_v62 = vsel %vm12000_vm10, %v2351_v18, %v6057_v0  ;;  %vm12001_vm6 = vmmov %vm12000_vm10  ;;  %v9082_v4 = vld [vmem:[%s11066_s3] ss:$0 sm:$0xff] }
 0x1c4   : > { %v2385_v63 = vsel %vm12001_vm6, %v2352_v55, %v6058_v60  ;;  %v2417_v11 = vsel %vm12002_vm8, %v2384_v62, %v6277_v50  ;;  %vm12003_vm2 = vmmov %vm12002_vm8  ;;  %vm12012_vm8 = vcmask 261120   ;;  %6305 = vrot.lane.b32.xlu0 %v6304_v35, %s7000_s8 }
 0x1c5   : > { %v2418_v44 = vsel %vm12003_vm2, %v2385_v63, %v6278_v6  ;;  %vm12005_vm11 = vmmov %vm12003_vm2  ;;  %v2450_v13 = vsel %vm12008_vm9, %v2417_v11, %v6287_v20 }
 0x1c6   : > { %v2419_v21 = vsel %vm12005_vm11, %v12004_v16, %v6282_v61  ;;  %vm12007_vm3 = vmmov %vm12003_vm2  ;;  %v2483_v23 = vsel %vm12012_vm8, %v2450_v13, %v6297_v40 }
 0x1c7   : > { %v2420_v15 = vsel %vm12007_vm3, %v12006_v26, %v6283_v34  ;;  %vm12009_vm14 = vmmov %vm12008_vm9  ;;  %v2981_v26 = vld [vmem:[#allocation3 + $0x9] sm:$0xff] }
 0x1c8   : > { %v2451_v33 = vsel %vm12009_vm14, %v2418_v44, %v6288_v25  ;;  %vm12010_vm10 = vmmov %vm12008_vm9 }
 0x1c9   : > { %v2452_v5 = vsel %vm12010_vm10, %v2419_v21, %v6292_v39  ;;  %vm12011_vm6 = vmmov %vm12008_vm9 }
 0x1ca   : > { %v2453_v38 = vsel %vm12011_vm6, %v2420_v15, %v6293_v49  ;;  %vm12013_vm2 = vmmov %vm12012_vm8  ;;  %v12026_v15 = vld [vmem:[#allocation4_spill] sm:$0xff] }
 0x1cb   : > { %v2484_v3 = vsel %vm12013_vm2, %v2451_v33, %v6298_v52  ;;  %vm12014_vm11 = vmmov %vm12013_vm2 }
 0x1cc   : > { %v2501_v45 = vpack.c.bf16 %v2484_v3, %v2483_v23  ;;  %v2485_v31 = vsel %vm12014_vm11, %v2452_v5, %v6302_v9  ;;  %vm12015_vm3 = vmmov %vm12013_vm2 }
 0x1cd   : > { %v2486_v53 = vsel %vm12015_vm3, %v2453_v38, %v6303_v41  ;;  %vm12017_vm9 = vmmov %vm12016_vm13 }
 0x1ce   : > { %5588 = vmatprep.mubr.msk.bf16.mxu0 %vm12016_vm13, %v2501_v45  ;;  %v2502_v59 = vpack.c.bf16 %v2486_v53, %v2485_v31  ;;  %vm12018_vm13 = vcmask 64512  }
 0x1cf   : > { %vm12019_vm14 = vmmov %vm12018_vm13 }
 0x1d0   : > { %5589 = vmatmul.mubr.msk.bf16.gmra.mrb[28].mxu0 %vm12017_vm9, %v2502_v59  ;;  %vm12020_vm10 = vmmov %vm12018_vm13  ;;  %vm12027_vm9 = vnez %v12026_v15 }
 0x1d1   : > { %vm12021_vm6 = vmmov %vm12020_vm10 }
 0x1d2   : > { %vm12022_vm8 = vmmov %vm12021_vm6 }
 0x1d3   : > { %vm12023_vm2 = vmmov %vm12021_vm6 }
 0x1d4   : > { %vm12024_vm11 = vmmov %vm12023_vm2 }
 0x1d5   : > { %vm12025_vm3 = vmmov %vm12023_vm2 }
 0x248   : > { %v5562_v7 = vpop.f32.mrb[0].mxu0 }
 0x249   : > { %v2746_v29 = vmul.f32 %v5562_v7, %v9077_v19  ;;  %v2610_v14 = vpop.f32.mrb[1].mxu0 }
 0x24a   : > { %v2744_v57 = vmul.f32 %v9077_v19, %v2610_v14  ;;  %v5563_v37 = vpop.f32.mrb[2].mxu0 }
 0x24b   : > { %v2785_v54 = vadd.f32 %v9082_v4, %v2746_v29  ;;  %v2747_v48 = vmul.f32 %v5563_v37, %v9077_v19  ;;  %v2613_v22 = vpop.f32.mrb[3].mxu0 }
 0x24c   : > { %v2783_v28 = vadd.f32 %v9082_v4, %v2744_v57  ;;  %v2745_v24 = vmul.f32 %v9077_v19, %v2613_v22 }
 0x24d   : > { %v2817_v60 = vmax.f32 %v2785_v54, 0.0  ;;  %v2786_v0 = vadd.f32 %v9082_v4, %v2747_v48  ;;  %v12032_v48 = vld [vmem:[#allocation5_spill] sm:$0xff] }
 0x24e   : > { %v2815_v36 = vmax.f32 %v2783_v28, 0.0  ;;  %v2784_v1 = vadd.f32 %v9082_v4, %v2745_v24  ;;  %v12034_v24 = vld [vmem:[#allocation44_spill] sm:$0xff] }
 0x24f   : > { %2855 = vst.msk [vmem:[#allocation3 + $0x28] sm:$0xff] %vm12018_vm13, %v2817_v60  ;;  %v2818_v56 = vmax.f32 %v2786_v0, 0.0  ;;  %vm12028_vm13 = vmmov %vm12023_vm2 }
 0x250   : > { %2853 = vst.msk [vmem:[#allocation3 + $0x18] sm:$0xff] %vm12019_vm14, %v2815_v36  ;;  %v2816_v12 = vmax.f32 %v2784_v1, 0.0  ;;  %vm12029_vm14 = vmmov %vm12023_vm2 }
 0x251   : > { %2856 = vst.msk [vmem:[#allocation3 + $0x30] sm:$0xff] %vm12020_vm10, %v2818_v56  ;;  %vm12030_vm10 = vmmov %vm12023_vm2 }
 0x252   : > { %2854 = vst.msk [vmem:[#allocation3 + $0x20] sm:$0xff] %vm12021_vm6, %v2816_v12  ;;  %vm12031_vm6 = vmmov %vm12023_vm2 }
 0x255   : > { %v5566_v30 = vpop.f32.mrb[4].mxu0 }
 0x256   : > { %v2750_v43 = vmul.f32 %v5566_v30, %v9077_v19  ;;  %v2626_v27 = vpop.f32.mrb[5].mxu0  ;;  %v2953_v11 = vld [vmem:[#allocation3 + $0x28] sm:$0xff] }
 0x257   : > { %v2748_v32 = vmul.f32 %v9077_v19, %v2626_v27  ;;  %v5567_v6 = vpop.f32.mrb[6].mxu0  ;;  %v2982_v62 = vld [vmem:[#allocation3 + $0x11] sm:$0xff] }
 0x258   : > { %v2789_v50 = vadd.f32 %v9082_v4, %v2750_v43  ;;  %v2751_v8 = vmul.f32 %v5567_v6, %v9077_v19  ;;  %v2629_v46 = vpop.f32.mrb[7].mxu0  ;;  %v2954_v44 = vld [vmem:[#allocation3 + $0x30] sm:$0xff]  ;;  %v3014_v52 = vsel %vm12027_vm9, %v2982_v62, 0.0  ;;  %v2951_v3 = vld [vmem:[#allocation3 + $0x18] sm:$0xff] }
 0x259   : > { %v2787_v2 = vadd.f32 %v9082_v4, %v2748_v32  ;;  %v2749_v34 = vmul.f32 %v9077_v19, %v2629_v46  ;;  %v6324_v58 = vpack.i.bf16 %v2954_v44, %v2953_v11  ;;  %v2952_v40 = vld [vmem:[#allocation3 + $0x20] sm:$0xff]  ;;  %v6314_v9 = vpack.i.bf16 %v3014_v52, %v2981_v26  ;;  %v9125_v47 = vld [vmem:[#allocation3 + $0x17] sm:$0xff]  ;;  %v12036_v46 = vld [vmem:[#allocation47_spill] sm:$0xff] }
 0x25a   : > { %v2821_v61 = vmax.f32 %v2789_v50, 0.0  ;;  %v2790_v18 = vadd.f32 %v9082_v4, %v2751_v8  ;;  %v6329_v45 = vpack.i.bf16 %v2952_v40, %v2951_v3  ;;  %v9123_v42 = vld [vmem:[#allocation3 + $0x21] sm:$0xff]  ;;  %v2983_v54 = vld [vmem:[#allocation3 + $0x19] sm:$0xff]  ;;  %v6947_v26 = vld [vmem:[%s11067_s4] sm:$0xff]  }
 0x25b   : > { %v2819_v55 = vmax.f32 %v2787_v2, 0.0  ;;  %v2788_v25 = vadd.f32 %v9082_v4, %v2749_v34  ;;  %6325 = vrot.lane.b32.xlu1 %v6324_v58, %s7007_s27  ;;  %6310 = vrot.lane.b32.xlu0 %v6324_v58, %s7000_s8  ;;  %v9135_v28 = vld [vmem:[#allocation3 + $0x1f] sm:$0xff]  ;;  %v9144_v56 = vld [vmem:[#allocation3 + $0x27] sm:$0xff] }
 0x25c   : > { %2859 = vst.msk [vmem:[#allocation3 + $0x48] sm:$0xff] %vm12022_vm8, %v2821_v61  ;;  %v2822_v20 = vmax.f32 %v2790_v18, 0.0  ;;  %vm12033_vm8 = vnez %v12032_v48  ;;  %5592 = vmatprep.subr.bf16.mxu1 %v6947_v26 }
 0x25d   : > { %2857 = vst.msk [vmem:[#allocation3 + $0x38] sm:$0xff] %vm12023_vm2, %v2819_v55  ;;  %v2820_v63 = vmax.f32 %v2788_v25, 0.0  ;;  %v3016_v22 = vsel %vm12033_vm8, %v9123_v42, 0.0  ;;  %vm12035_vm2 = vnez %v12034_v24  ;;  %5593 = vmatpush3.bf16.msra.mxu1 %v6947_v26 }
 0x25e   : > { %2860 = vst.msk [vmem:[#allocation3 + $0x50] sm:$0xff] %vm12024_vm11, %v2822_v20  ;;  %v3047_v60 = vsel %vm12035_vm2, %v9125_v47, 0.0  ;;  %v6344_v32 = vpack.i.bf16 %v3016_v22, %v2983_v54  ;;  %vm12037_vm11 = vnez %v12036_v46  ;;  %v9160_v20 = vld [vmem:[#allocation3 + $0x2f] sm:$0xff] }
 0x25f   : > { %2858 = vst.msk [vmem:[#allocation3 + $0x40] sm:$0xff] %vm12025_vm3, %v2820_v63  ;;  %6315 = vrot.lane.b32.xlu0 %v6314_v9, %s7002_s10  ;;  %6330 = vrot.lane.b32.xlu1 %v6329_v45, %s7000_s8  ;;  %v6334_v6 = vpack.i.bf16 %v9135_v28, %v3047_v60  ;;  %v3049_v2 = vsel %vm12037_vm11, %v9144_v56, 0.0  ;;  %v6948_v60 = vld [vmem:[%s11067_s4 + $0x8] sm:$0xff]  }
 0x260   : > { %v6349_v11 = vpack.i.bf16 %v9160_v20, %v3049_v2  ;;  %5594 = vmatprep.subr.bf16.mxu1 %v6948_v60 }
 0x261   : > { %v5570_v51 = vpop.f32.mrb[8].mxu0  ;;  %5595 = vmatpush3.bf16.msra.mxu1 %v6948_v60 }
 0x262   : > { %v2754_v49 = vmul.f32 %v5570_v51, %v9077_v19  ;;  %v2642_v39 = vpop.f32.mrb[9].mxu0 }
 0x263   : > { %v2752_v16 = vmul.f32 %v9077_v19, %v2642_v39  ;;  %v5571_v21 = vpop.f32.mrb[10].mxu0  ;;  %6320 = vrot.lane.b32.xlu0 %v6324_v58, %s7006_s20  ;;  %6340 = vrot.lane.b32.xlu1 %v6329_v45, %s7006_s20  ;;  %v2957_v62 = vld [vmem:[#allocation3 + $0x48] sm:$0xff]  ;;  %v3084_v58 = vsel %vm12027_vm9, %v9123_v42, 0.0 }
 0x264   : > { %v2793_v13 = vadd.f32 %v9082_v4, %v2754_v49  ;;  %v2755_v33 = vmul.f32 %v5571_v21, %v9077_v19  ;;  %v2645_v5 = vpop.f32.mrb[11].mxu0  ;;  %v9157_v18 = vld [vmem:[#allocation3 + $0x31] sm:$0xff] }
 0x265   : > { %v2791_v38 = vadd.f32 %v9082_v4, %v2752_v16  ;;  %v2753_v23 = vmul.f32 %v9077_v19, %v2645_v5  ;;  %v2958_v34 = vld [vmem:[#allocation3 + $0x50] sm:$0xff]  ;;  %v12041_v16 = vld [vmem:[#allocation6_spill] sm:$0xff]  ;;  %v3154_v22 = vsel %vm12027_vm9, %v9157_v18, 0.0 }
 0x266   : > { %v2825_v17 = vmax.f32 %v2793_v13, 0.0  ;;  %v2794_v41 = vadd.f32 %v9082_v4, %v2755_v33  ;;  %v9165_v44 = vpack.i.bf16 %v2958_v34, %v2957_v62  ;;  %v9221_v2 = vld [vmem:[#allocation3 + $0x3f] sm:$0xff]  ;;  %v9274_v60 = vld [vmem:[#allocation3 + $0x4f] sm:$0xff] }
 0x267   : > { %v2823_v31 = vmax.f32 %v2791_v38, 0.0  ;;  %v2792_v53 = vadd.f32 %v9082_v4, %v2753_v23  ;;  %6345 = vrot.lane.b32.xlu1 %v6344_v32, %s7002_s10  ;;  %6335 = vrot.lane.b32.xlu0 %v6334_v6, %s7004_s12  ;;  %v2985_v38 = vld [vmem:[#allocation3 + $0x29] sm:$0xff]  ;;  %v12046_v34 = vld [vmem:[#allocation49_spill] sm:$0xff]  ;;  %v2956_v62 = vld [vmem:[#allocation3 + $0x40] sm:$0xff] }
 0x268   : > { %2863 = vst.msk [vmem:[#allocation3 + $0x68] sm:$0xff] %vm12028_vm13, %v2825_v17  ;;  %v2826_v59 = vmax.f32 %v2794_v41, 0.0  ;;  %vm12038_vm13 = vmmov %vm12025_vm3  ;;  %v6354_v17 = vpack.i.bf16 %v3084_v58, %v2983_v54  ;;  %v6379_v6 = vpack.i.bf16 %v3154_v22, %v2985_v38  ;;  %vm12047_vm9 = vnez %v12046_v34  ;;  %v2955_v58 = vld [vmem:[#allocation3 + $0x38] sm:$0xff] }
 0x269   : > { %2861 = vst.msk [vmem:[#allocation3 + $0x58] sm:$0xff] %vm12029_vm14, %v2823_v31  ;;  %v2824_v35 = vmax.f32 %v2792_v53, 0.0  ;;  %vm12039_vm14 = vmmov %vm12025_vm3  ;;  %v3117_v31 = vsel %vm12035_vm2, %v9144_v56, 0.0  ;;  %v3086_v53 = vsel %vm12033_vm8, %v9157_v18, 0.0 }
 0x26a   : > { %2864 = vst.msk [vmem:[#allocation3 + $0x70] sm:$0xff] %vm12030_vm10, %v2826_v59  ;;  %vm12040_vm10 = vmmov %vm12025_vm3 }
 0x26b   : > { %2862 = vst.msk [vmem:[#allocation3 + $0x60] sm:$0xff] %vm12031_vm6, %v2824_v35  ;;  %vm12042_vm6 = vnez %v12041_v16  ;;  %6350 = vrot.lane.b32.xlu1 %v6349_v11, %s7004_s12  ;;  %6365 = vrot.lane.b32.xlu0 %v9165_v44, %s7000_s8 }
 0x26c   : > { %v3018_v21 = vsel %vm12042_vm6, %v9157_v18, 0.0 }
 0x26d   : > { %v5574_v7 = vpop.f32.mrb[12].mxu0  ;;  %v6369_v41 = vpack.i.bf16 %v3018_v21, %v2985_v38 }
 0x26e   : > { %v2758_v29 = vmul.f32 %v5574_v7, %v9077_v19  ;;  %v2658_v14 = vpop.f32.mrb[13].mxu0 }
 0x26f   : > { %v2756_v57 = vmul.f32 %v9077_v19, %v2658_v14  ;;  %v5575_v37 = vpop.f32.mrb[14].mxu0  ;;  %6355 = vrot.lane.b32.xlu1 %v6354_v17, %s7008_s30  ;;  %6370 = vrot.lane.b32.xlu0 %v6369_v41, %s7002_s10  ;;  %v6359_v14 = vpack.i.bf16 %v9160_v20, %v3117_v31  ;;  %v2987_v31 = vld [vmem:[#allocation3 + $0x39] sm:$0xff] }
 0x270   : > { %v2797_v0 = vadd.f32 %v9082_v4, %v2758_v29  ;;  %v2759_v36 = vmul.f32 %v5575_v37, %v9077_v19  ;;  %v2661_v1 = vpop.f32.mrb[15].mxu0 }
 0x271   : > { %v2795_v12 = vadd.f32 %v9082_v4, %v2756_v57  ;;  %v2757_v30 = vmul.f32 %v9077_v19, %v2661_v1  ;;  %v6374_v57 = vpack.i.bf16 %v3086_v53, %v2985_v38  ;;  %v12051_v53 = vld [vmem:[#allocation7_spill] sm:$0xff] }
 0x272   : > { %v2829_v43 = vmax.f32 %v2797_v0, 0.0  ;;  %v2798_v27 = vadd.f32 %v9082_v4, %v2759_v36 }
 0x273   : > { %v2827_v50 = vmax.f32 %v2795_v12, 0.0  ;;  %v2796_v8 = vadd.f32 %v9082_v4, %v2757_v30  ;;  %6360 = vrot.lane.b32.xlu1 %v6359_v14, %s7009_s13  ;;  %6375 = vrot.lane.b32.xlu0 %v6374_v57, %s7008_s30  ;;  %v9212_v12 = vld [vmem:[#allocation3 + $0x37] sm:$0xff] }
 0x274   : > { %2867 = vst.msk [vmem:[#allocation3 + $0x88] sm:$0xff] %vm12025_vm3, %v2829_v43  ;;  %v2830_v61 = vmax.f32 %v2798_v27, 0.0  ;;  %v6949_v43 = vld [vmem:[%s11067_s4 + $0x10] sm:$0xff]  }
 0x275   : > { %2865 = vst.msk [vmem:[#allocation3 + $0x78] sm:$0xff] %vm12038_vm13, %v2827_v50  ;;  %v2828_v55 = vmax.f32 %v2796_v8, 0.0  ;;  %vm12043_vm13 = vmmov %vm12025_vm3  ;;  %5596 = vmatprep.subr.bf16.mxu1 %v6949_v43 }
 0x276   : > { %2868 = vst.msk [vmem:[#allocation3 + $0x90] sm:$0xff] %vm12039_vm14, %v2830_v61  ;;  %vm12044_vm14 = vmmov %vm12025_vm3  ;;  %v3051_v61 = vsel %vm12047_vm9, %v9212_v12, 0.0  ;;  %5597 = vmatpush3.bf16.msra.mxu1 %v6949_v43 }
 0x277   : > { %2866 = vst.msk [vmem:[#allocation3 + $0x80] sm:$0xff] %vm12040_vm10, %v2828_v55  ;;  %vm12045_vm10 = vmmov %vm12025_vm3  ;;  %6380 = vrot.lane.b32.xlu1 %v6379_v6, %s7010_s16  ;;  %6385 = vrot.lane.b32.xlu0 %v9165_v44, %s7006_s20 }
 0x278   : > { %v5578_v25 = vpop.f32.mrb[16].mxu0 }
 0x279   : > { %v2762_v63 = vmul.f32 %v5578_v25, %v9077_v19  ;;  %v2674_v51 = vpop.f32.mrb[17].mxu0  ;;  %v6399_v25 = vpack.i.bf16 %v9221_v2, %v3051_v61 }
 0x27a   : > { %v2760_v49 = vmul.f32 %v9077_v19, %v2674_v51  ;;  %v5579_v39 = vpop.f32.mrb[18].mxu0  ;;  %v6950_v51 = vld [vmem:[%s11067_s4 + $0x18] sm:$0xff]  }
 0x27b   : > { %v2801_v52 = vadd.f32 %v9082_v4, %v2762_v63  ;;  %v2763_v40 = vmul.f32 %v5579_v39, %v9077_v19  ;;  %v2677_v13 = vpop.f32.mrb[19].mxu0  ;;  %v3119_v63 = vsel %vm12037_vm11, %v9212_v12, 0.0  ;;  %6390 = vrot.lane.b32.xlu1 %v9165_v44, %s7007_s27  ;;  %6400 = vrot.lane.b32.xlu0 %v6399_v25, %s7004_s12  ;;  %vm12060_vm11 = vmmov %vm12025_vm3 }
 0x27c   : > { %v2799_v33 = vadd.f32 %v9082_v4, %v2760_v49  ;;  %v2761_v5 = vmul.f32 %v9077_v19, %v2677_v13  ;;  %5598 = vmatprep.subr.bf16.mxu1 %v6950_v51 }
 0x27d   : > { %v2833_v23 = vmax.f32 %v2801_v52, 0.0  ;;  %v2802_v3 = vadd.f32 %v9082_v4, %v2763_v40  ;;  %v6394_v52 = vpack.i.bf16 %v2956_v62, %v2955_v58  ;;  %v6404_v40 = vpack.i.bf16 %v9221_v2, %v3119_v63  ;;  %5599 = vmatpush3.bf16.msra.mxu1 %v6950_v51 }
 0x27e   : > { %v2831_v9 = vmax.f32 %v2799_v33, 0.0  ;;  %v2800_v45 = vadd.f32 %v9082_v4, %v2761_v5 }
 0x27f   : > { %2871 = vst.msk [vmem:[#allocation3 + $0xa8] sm:$0xff] %vm12025_vm3, %v2833_v23  ;;  %v2834_v59 = vmax.f32 %v2802_v3, 0.0  ;;  %6395 = vrot.lane.b32.xlu1 %v6394_v52, %s7000_s8  ;;  %6405 = vrot.lane.b32.xlu0 %v6404_v40, %s7009_s13  ;;  %v2988_v23 = vld [vmem:[#allocation3 + $0x41] sm:$0xff] }
 0x280   : > { %2869 = vst.msk [vmem:[#allocation3 + $0x98] sm:$0xff] %vm12043_vm13, %v2831_v9  ;;  %v2832_v42 = vmax.f32 %v2800_v45, 0.0  ;;  %vm12048_vm13 = vmmov %vm12025_vm3  ;;  %v3088_v6 = vsel %vm12042_vm6, %v2988_v23, 0.0 }
 0x281   : > { %2872 = vst.msk [vmem:[#allocation3 + $0xb0] sm:$0xff] %vm12044_vm14, %v2834_v59  ;;  %vm12049_vm14 = vmmov %vm12025_vm3 }
 0x282   : > { %2870 = vst.msk [vmem:[#allocation3 + $0xa0] sm:$0xff] %vm12045_vm10, %v2832_v42  ;;  %vm12050_vm10 = vmmov %vm12025_vm3  ;;  %v3156_v42 = vsel %vm12033_vm8, %v2988_v23, 0.0  ;;  %vm4510_vm8 = vcmask 1043456  }
 0x283   : > { %6415 = vrot.lane.b32.xlu1 %v6394_v52, %s7006_s20  ;;  %6410 = vrot.lane.b32.xlu0 %v6394_v52, %s7007_s27  ;;  %v6429_v14 = vpack.i.bf16 %v3156_v42, %v2987_v31 }
 0x286   : > { %v5582_v35 = vpop.f32.mrb[20].mxu0 }
 0x287   : > { %v2766_v7 = vmul.f32 %v5582_v35, %v9077_v19  ;;  %v2690_v29 = vpop.f32.mrb[21].mxu0  ;;  %v9259_v35 = vld [vmem:[#allocation3 + $0x47] sm:$0xff]  ;;  %6430 = vrot.lane.b32.xlu0 %v6429_v14, %s7010_s16 }
 0x288   : > { %v2764_v37 = vmul.f32 %v9077_v19, %v2690_v29  ;;  %v5583_v54 = vpop.f32.mrb[22].mxu0  ;;  %v3053_v48 = vsel %vm11556_vm15, %v9259_v35, 0.0 }
 0x289   : > { %v2805_v0 = vadd.f32 %v9082_v4, %v2766_v7  ;;  %v2767_v36 = vmul.f32 %v5583_v54, %v9077_v19  ;;  %v2693_v1 = vpop.f32.mrb[23].mxu0  ;;  %v6951_v54 = vld [vmem:[%s11067_s4 + $0x20] ss:$0 sps:$4 sm:$0xff]  }
 0x28a   : > { %v2803_v30 = vadd.f32 %v9082_v4, %v2764_v37  ;;  %v2765_v15 = vmul.f32 %v9077_v19, %v2693_v1  ;;  %v2962_v37 = vld [vmem:[#allocation3 + $0x70] sm:$0xff]  ;;  %5635 = vmatprep.subr.msk.bf16.mxu1 %vm4510_vm8, %v6951_v54  ;;  %v4512_v25 = vsel %vm4510_vm8, %v6951_v54, 0  ;;  %vm12059_vm8 = vmmov %vm12025_vm3 }
 0x28b   : > { %v2837_v27 = vmax.f32 %v2805_v0, 0.0  ;;  %v2806_v32 = vadd.f32 %v9082_v4, %v2767_v36  ;;  %v2990_v0 = vld [vmem:[#allocation3 + $0x51] sm:$0xff]  ;;  %5601 = vmatpush3.bf16.msra.mxu1 %v4512_v25 }
 0x28c   : > { %v2835_v50 = vmax.f32 %v2803_v30, 0.0  ;;  %v2804_v8 = vadd.f32 %v9082_v4, %v2765_v15  ;;  %v6424_v30 = vpack.i.bf16 %v9274_v60, %v3053_v48  ;;  %v2961_v15 = vld [vmem:[#allocation3 + $0x68] sm:$0xff]  ;;  %v2966_v25 = vld [vmem:[#allocation3 + $0x90] sm:$0xff] }
 0x28d   : > { %2875 = vst.msk [vmem:[#allocation3 + $0xc8] sm:$0xff] %vm12025_vm3, %v2837_v27  ;;  %v2838_v18 = vmax.f32 %v2806_v32, 0.0  ;;  %v6444_v32 = vpack.i.bf16 %v2962_v37, %v2961_v15  ;;  %v2991_v15 = vld [vmem:[#allocation3 + $0x59] sm:$0xff] }
 0x28e   : > { %2873 = vst.msk [vmem:[#allocation3 + $0xb8] sm:$0xff] %vm12048_vm13, %v2835_v50  ;;  %v2836_v55 = vmax.f32 %v2804_v8, 0.0  ;;  %vm12052_vm13 = vnez %v12051_v53 }
 0x28f   : > { %2876 = vst.msk [vmem:[#allocation3 + $0xd0] sm:$0xff] %vm12049_vm14, %v2838_v18  ;;  %v3020_v59 = vsel %vm12052_vm13, %v2988_v23, 0.0  ;;  %vm12053_vm14 = vmmov %vm12025_vm3  ;;  %v12056_v18 = vld [vmem:[#allocation8_spill] sm:$0xff]  ;;  %6445 = vrot.lane.b32.xlu0 %v6444_v32, %s7000_s8  ;;  %v3090_v40 = vsel %vm12052_vm13, %v2990_v0, 0.0  ;;  %v2896_v23 = vld [vmem:[#allocation3 + $0x5f] sm:$0xff] }
 0x290   : > { %2874 = vst.msk [vmem:[#allocation3 + $0xc0] sm:$0xff] %vm12050_vm10, %v2836_v55  ;;  %vm12054_vm10 = vmmov %vm12025_vm3  ;;  %v6419_v29 = vpack.i.bf16 %v3020_v59, %v2987_v31 }
 0x292   : > { %6420 = vrot.lane.b32.xlu1 %v6419_v29, %s7002_s10  ;;  %v2959_v29 = vld [vmem:[#allocation3 + $0x58] sm:$0xff] }
 0x295   : > { %v5586_v11 = vpop.f32.mrb[24].mxu0 }
 0x296   : > { %v2770_v49 = vmul.f32 %v5586_v11, %v9077_v19  ;;  %v2706_v39 = vpop.f32.mrb[25].mxu0  ;;  %6425 = vrot.lane.b32.xlu1 %v6424_v30, %s7004_s12 }
 0x297   : > { %v2768_v21 = vmul.f32 %v9077_v19, %v2706_v39  ;;  %v5587_v26 = vpop.f32.mrb[26].mxu0 }
 0x298   : > { %v2809_v13 = vadd.f32 %v9082_v4, %v2770_v49  ;;  %v2771_v33 = vmul.f32 %v5587_v26, %v9077_v19  ;;  %v2709_v44 = vpop.f32.mrb[27].mxu0  ;;  %v2989_v49 = vld [vmem:[#allocation3 + $0x49] sm:$0xff] }
 0x299   : > { %v2807_v5 = vadd.f32 %v9082_v4, %v2768_v21  ;;  %v2769_v38 = vmul.f32 %v9077_v19, %v2709_v44  ;;  %v6434_v21 = vpack.i.bf16 %v3088_v6, %v2987_v31  ;;  %v3158_v44 = vsel %vm12042_vm6, %v2990_v0, 0.0  ;;  %v2960_v31 = vld [vmem:[#allocation3 + $0x60] sm:$0xff] }
 0x29a   : > { %v2841_v3 = vmax.f32 %v2809_v13, 0.0  ;;  %v2810_v17 = vadd.f32 %v9082_v4, %v2771_v33  ;;  %v6454_v33 = vpack.i.bf16 %v3090_v40, %v2989_v49  ;;  %v6474_v37 = vpack.i.bf16 %v2960_v31, %v2959_v29  ;;  %v2897_v6 = vld [vmem:[#allocation3 + $0x67] sm:$0xff]  ;;  %v2963_v31 = vld [vmem:[#allocation3 + $0x78] sm:$0xff] }
 0x29b   : > { %v2839_v41 = vmax.f32 %v2807_v5, 0.0  ;;  %v2808_v9 = vadd.f32 %v9082_v4, %v2769_v38  ;;  %6435 = vrot.lane.b32.xlu1 %v6434_v21, %s7008_s30  ;;  %v2895_v5 = vld [vmem:[#allocation3 + $0x57] sm:$0xff]  ;;  %v6459_v38 = vpack.i.bf16 %v3158_v44, %v2989_v49  ;;  %v2993_v21 = vld [vmem:[#allocation3 + $0x69] sm:$0xff] }
 0x29c   : > { %2879 = vst.msk [vmem:[#allocation3 + $0xe8] sm:$0xff] %vm12025_vm3, %v2841_v3  ;;  %v2842_v45 = vmax.f32 %v2810_v17, 0.0  ;;  %v3055_v17 = vsel %vm7574_vm7, %v2895_v5, 0.0  ;;  %v3123_v16 = vsel %vm11556_vm15, %v2895_v5, 0.0  ;;  %v2899_v44 = vld [vmem:[#allocation3 + $0x77] sm:$0xff] }
 0x29d   : > { %2877 = vst.msk [vmem:[#allocation3 + $0xd8] sm:$0xff] %vm12053_vm14, %v2839_v41  ;;  %v2840_v7 = vmax.f32 %v2808_v9, 0.0  ;;  %vm12057_vm14 = vnez %v12056_v18  ;;  %v6479_v9 = vpack.i.bf16 %v2896_v23, %v3055_v17  ;;  %v6484_v54 = vpack.i.bf16 %v2896_v23, %v3123_v16  ;;  %v2995_v29 = vld [vmem:[#allocation3 + $0x79] sm:$0xff] }
 0x29e   : > { %2880 = vst.msk [vmem:[#allocation3 + $0xf0] sm:$0xff] %vm12054_vm10, %v2842_v45  ;;  %v3022_v55 = vsel %vm12057_vm14, %v2990_v0, 0.0  ;;  %vm12058_vm10 = vmmov %vm12025_vm3  ;;  %v12064_v0 = vld [vmem:[#allocation35_spill] sm:$0xff]  ;;  %v3059_v17 = vsel %vm7609_vm1, %v2899_v44, 0.0  ;;  %v3127_v18 = vsel %vm11562_vm5, %v2899_v44, 0.0 }
 0x29f   : > { %2878 = vst.msk [vmem:[#allocation3 + $0xe0] sm:$0xff] %vm12025_vm3, %v2840_v7  ;;  %v6449_v26 = vpack.i.bf16 %v3022_v55, %v2989_v49  ;;  %v3057_v55 = vsel %vm11562_vm5, %v2897_v6, 0.0 }
 0x2a1   : > { %6450 = vrot.lane.b32.xlu0 %v6449_v26, %s7002_s10 }
 0x2a3   : > { %v5590_v22 = vpop.f32.mrb[28].mxu0  ;;  %v2977_v45 = vld [vmem:[#allocation3 + $0xe8] sm:$0xff] }
 0x2a4   : > { %v2774_v36 = vmul.f32 %v5590_v22, %v9077_v19  ;;  %v2722_v1 = vpop.f32.mrb[29].mxu0 }
 0x2a5   : > { %v2772_v43 = vmul.f32 %v9077_v19, %v2722_v1  ;;  %v5591_v27 = vpop.f32.mrb[30].mxu0  ;;  %6455 = vrot.lane.b32.xlu0 %v6454_v33, %s7008_s30  ;;  %v2978_v41 = vld [vmem:[#allocation3 + $0xf0] sm:$0xff]  ;;  %v2992_v1 = vld [vmem:[#allocation3 + $0x61] sm:$0xff] }
 0x2a6   : > { %v2813_v50 = vadd.f32 %v9082_v4, %v2774_v36  ;;  %v2775_v8 = vmul.f32 %v5591_v27, %v9077_v19  ;;  %v2725_v61 = vpop.f32.mrb[31].mxu0  ;;  %v9313_v42 = vpack.i.bf16 %v2978_v41, %v2977_v45  ;;  %v3092_v49 = vsel %vm12057_vm14, %v2992_v1, 0.0  ;;  %v2996_v45 = vld [vmem:[#allocation3 + $0x81] sm:$0xff] }
 0x2a7   : > { %v2811_v62 = vadd.f32 %v9082_v4, %v2772_v43  ;;  %v2773_v63 = vmul.f32 %v9077_v19, %v2725_v61  ;;  %v3121_v19 = vsel %vm12047_vm9, %v9259_v35, 0.0  ;;  %v12067_v43 = vld [vmem:[#allocation9_spill] sm:$0xff]  ;;  %v6514_v26 = vpack.i.bf16 %v3092_v49, %v2991_v15 }
 0x2a8   : > { %v2845_v51 = vmax.f32 %v2813_v50, 0.0  ;;  %v2814_v11 = vadd.f32 %v9082_v4, %v2775_v8  ;;  %12062 = vst [vmem:[#allocation89_spill] sm:$0xff] %v9313_v42  ;;  %vm12068_vm6 = vnez %v12067_v43  ;;  %v2969_v43 = vld [vmem:[#allocation3 + $0xa8] sm:$0xff] }
 0x2a9   : > { %v2843_v39 = vmax.f32 %v2811_v62, 0.0  ;;  %v2812_v58 = vadd.f32 %v9082_v4, %v2773_v63  ;;  %v6439_v4 = vpack.i.bf16 %v9274_v60, %v3121_v19  ;;  %6465 = vrot.lane.b32.xlu0 %v6444_v32, %s7006_s20  ;;  %v3024_v27 = vsel %vm12068_vm6, %v2992_v1, 0.0  ;;  %v2994_v62 = vld [vmem:[#allocation3 + $0x71] sm:$0xff] }
 0x2aa   : > { %2883 = vst.msk [vmem:[#allocation3 + $0x108] sm:$0xff] %vm12058_vm10, %v2845_v51  ;;  %v2846_v52 = vmax.f32 %v2814_v11, 0.0  ;;  %v6499_v50 = vpack.i.bf16 %v3024_v27, %v2991_v15  ;;  %v2898_v63 = vld [vmem:[#allocation3 + $0x6f] sm:$0xff]  ;;  %v3125_v19 = vsel %vm7574_vm7, %v2897_v6, 0.0  ;;  %v3094_v40 = vsel %vm12068_vm6, %v2994_v62, 0.0 }
 0x2ab   : > { %2881 = vst.msk [vmem:[#allocation3 + $0xf8] sm:$0xff] %vm12025_vm3, %v2843_v39  ;;  %v2844_v13 = vmax.f32 %v2812_v58, 0.0  ;;  %6440 = vrot.lane.b32.xlu1 %v6439_v4, %s7009_s13  ;;  %v2965_v51 = vld [vmem:[#allocation3 + $0x88] sm:$0xff]  ;;  %v6504_v53 = vpack.i.bf16 %v2898_v63, %v3057_v55  ;;  %v12070_v39 = vld [vmem:[#allocation10_spill] sm:$0xff]  ;;  %v6534_v4 = vpack.i.bf16 %v3094_v40, %v2993_v21  ;;  %v3162_v33 = vsel %vm12057_vm14, %v2994_v62, 0.0  ;;  %v2903_v40 = vld [vmem:[#allocation3 + $0x97] sm:$0xff] }
 0x2ac   : > { %2884 = vst.msk [vmem:[#allocation3 + $0x110] sm:$0xff] %vm12059_vm8, %v2846_v52  ;;  %v6524_v11 = vpack.i.bf16 %v2966_v25, %v2965_v51  ;;  %v6539_v5 = vpack.i.bf16 %v3162_v33, %v2993_v21  ;;  %v2902_v6 = vld [vmem:[#allocation3 + $0x8f] sm:$0xff]  ;;  %v9382_v25 = vpop.permute.xlu0 %6305 }
 0x2ad   : > { %2882 = vst.msk [vmem:[#allocation3 + $0x100] sm:$0xff] %vm12060_vm11, %v2844_v13  ;;  %6480 = vrot.lane.b32.xlu0 %v6479_v9, %s7004_s12  ;;  %vm12065_vm11 = vnez %v12064_v0  ;;  %v6519_v13 = vpack.i.bf16 %v2898_v63, %v3125_v19  ;;  %v2964_v9 = vld [vmem:[#allocation3 + $0x80] sm:$0xff] }
 0x2ae   : > { %v6554_v16 = vpack.i.bf16 %v2964_v9, %v2963_v31  ;;  %v2968_v19 = vld [vmem:[#allocation3 + $0xa0] sm:$0xff] }
 0x2af   : > { %6460 = vrot.lane.b32.xlu1 %v6459_v38, %s7010_s16  ;;  %v2900_v38 = vld [vmem:[#allocation3 + $0x7f] sm:$0xff] }
 0x2b0   : > { %v6559_v41 = vpack.i.bf16 %v2900_v38, %v3059_v17  ;;  %v3131_v17 = vsel %vm7617_vm0, %v2903_v40, 0.0 }
 0x2b1   : > { %6485 = vrot.lane.b32.xlu0 %v6484_v54, %s7009_s13 }
 0x2b2   : > { %v9319_v14 = vld [vmem:[#allocation3 + $0xf8] sm:$0xff] }
 0x2b3   : > { %6470 = vrot.lane.b32.xlu1 %v6444_v32, %s7007_s27  ;;  %12063 = vst [vmem:[#allocation90_spill] sm:$0xff] %v9319_v14  ;;  %v3160_v32 = vsel %vm12052_vm13, %v2992_v1, 0.0  ;;  %vm12071_vm13 = vnez %v12070_v39 }
 0x2b4   : > { %v2980_v59 = vld [vmem:[#allocation3 + $0x100] sm:$0xff]  ;;  %v6509_v8 = vpack.i.bf16 %v3160_v32, %v2991_v15  ;;  %v3026_v58 = vsel %vm12071_vm13, %v2994_v62, 0.0  ;;  %v2998_v32 = vld [vmem:[#allocation3 + $0x91] sm:$0xff]  ;;  %v2997_v62 = vld [vmem:[#allocation3 + $0x89] sm:$0xff] }
 0x2b5   : > { %v9317_v7 = vld [vmem:[#allocation3 + $0x101] sm:$0xff]  ;;  %v9321_v48 = vld [vmem:[#allocation3 + $0xf9] sm:$0xff]  ;;  %v9324_v22 = vpack.i.bf16 %v2980_v59, %v9319_v14  ;;  %6490 = vrot.lane.b32.xlu0 %v6474_v37, %s7007_s27  ;;  %v6529_v52 = vpack.i.bf16 %v3026_v58, %v2993_v21  ;;  %v6564_v59 = vpack.i.bf16 %v2900_v38, %v3127_v18  ;;  %v9536_v15 = vld [vmem:[#allocation3 + $0xc9] sm:$0xff] }
 0x2b6   : > { %v3112_v36 = vsel %vm12065_vm11, %v9317_v7, 0.0  ;;  %v2904_v38 = vld [vmem:[#allocation3 + $0x9f] sm:$0xff] }
 0x2b7   : > { %6475 = vrot.lane.b32.xlu1 %v6474_v37, %s7000_s8  ;;  %v9332_v30 = vpack.i.bf16 %v3112_v36, %v9321_v48  ;;  %v2901_v36 = vld [vmem:[#allocation3 + $0x87] sm:$0xff]  ;;  %v6634_v18 = vpack.i.bf16 %v2904_v38, %v3131_v17  ;;  %v2975_v14 = vld [vmem:[#allocation3 + $0xd8] sm:$0xff] }
 0x2b8   : > { %v3061_v27 = vsel %vm7617_vm0, %v2901_v36, 0.0 }
 0x2b9   : > { %12066 = vst [vmem:[#allocation28_spill] sm:$0xff] %v9332_v30  ;;  %6510 = vrot.lane.b32.xlu0 %v6509_v8, %s7010_s16  ;;  %v3164_v8 = vsel %vm12068_vm6, %v2996_v45, 0.0  ;;  %vm12083_vm6 = vcmask 130048   ;;  %v9530_v30 = vld [vmem:[#allocation3 + $0xe1] sm:$0xff] }
 0x2ba   : > { %v6584_v63 = vpack.i.bf16 %v3164_v8, %v2995_v29 }
 0x2bb   : > { %6495 = vrot.lane.b32.xlu1 %v6474_v37, %s7006_s20  ;;  %v12073_v37 = vld [vmem:[#allocation11_spill] sm:$0xff] }
 0x2bc   : > { %vm12074_vm14 = vnez %v12073_v37 }
 0x2bd   : > { %6525 = vrot.lane.b32.xlu0 %v6524_v11, %s7000_s8  ;;  %v3028_v54 = vsel %vm12074_vm14, %v2996_v45, 0.0  ;;  %v3098_v55 = vsel %vm12074_vm14, %v2998_v32, 0.0 }
 0x2be   : > { %v6579_v1 = vpack.i.bf16 %v3028_v54, %v2995_v29  ;;  %v6614_v51 = vpack.i.bf16 %v3098_v55, %v2997_v62  ;;  %v6308_v55 = vunpack.i.h.bf16 %v9382_v25 }
 0x2bf   : > { %6500 = vrot.lane.b32.xlu1 %v6499_v50, %s7002_s10  ;;  %v6589_v50 = vpack.i.bf16 %v2902_v6, %v3061_v27  ;;  %v9421_v27 = vld [vmem:[#allocation3 + $0x99] sm:$0xff] }
 0x2c1   : > { %6530 = vrot.lane.b32.xlu0 %v6529_v52, %s7002_s10  ;;  %v3129_v52 = vsel %vm7609_vm1, %v2901_v36, 0.0 }
 0x2c2   : > { %v6599_v44 = vpack.i.bf16 %v2902_v6, %v3129_v52  ;;  %v12078_v6 = vld [vmem:[#allocation15_spill] sm:$0xff] }
 0x2c3   : > { %6505 = vrot.lane.b32.xlu1 %v6504_v53, %s7004_s12  ;;  %v3096_v53 = vsel %vm12071_vm13, %v2996_v45, 0.0  ;;  %v12076_v45 = vld [vmem:[#allocation12_spill] sm:$0xff]  ;;  %vm12079_vm3 = vnez %v12078_v6 }
 0x2c4   : > { %v6594_v21 = vpack.i.bf16 %v3096_v53, %v2995_v29  ;;  %vm12077_vm10 = vnez %v12076_v45 }
 0x2c5   : > { %6535 = vrot.lane.b32.xlu0 %v6534_v4, %s7008_s30  ;;  %v3030_v31 = vsel %vm12077_vm10, %v2998_v32, 0.0 }
 0x2c6   : > { %v6609_v36 = vpack.i.bf16 %v3030_v31, %v2997_v62 }
 0x2c7   : > { %6515 = vrot.lane.b32.xlu1 %v6514_v26, %s7008_s30 }
 0x2c9   : > { %6550 = vrot.lane.b32.xlu0 %v6524_v11, %s7007_s27 }
 0x2cb   : > { %6520 = vrot.lane.b32.xlu1 %v6519_v13, %s7009_s13  ;;  %v2967_v13 = vld [vmem:[#allocation3 + $0x98] sm:$0xff] }
 0x2cd   : > { %6560 = vrot.lane.b32.xlu0 %v6559_v41, %s7004_s12  ;;  %v9388_v49 = vpop.permute.xlu1 %6325  ;;  %v9390_v58 = vpop.permute.xlu0 %6310 }
 0x2cf   : > { %6540 = vrot.lane.b32.xlu1 %v6539_v5, %s7010_s16  ;;  %v9401_v5 = vpack.i.bf16 %v2968_v19, %v2967_v13  ;;  %v3063_v19 = vsel %vm11615_vm12, %v2903_v40, 0.0 }
 0x2d0   : > { %v6644_v40 = vpack.i.bf16 %v2904_v38, %v3063_v19 }
 0x2d1   : > { %6565 = vrot.lane.b32.xlu0 %v6564_v59, %s7009_s13  ;;  %v6316_v4 = vpop.permute.xlu0 %6315  ;;  %v9399_v33 = vpop.permute.xlu1 %6330  ;;  %v2885_v59 = vld [vmem:[#allocation3 + $0x7] sm:$0xff] }
 0x2d2   : > { %v2917_v8 = vsel %vm12035_vm2, %v2885_v59, 0.0  ;;  %vm12081_vm2 = vmmov %vm12059_vm8 }
 0x2d3   : > { %6545 = vrot.lane.b32.xlu1 %v6524_v11, %s7006_s20  ;;  %v2970_v11 = vld [vmem:[#allocation3 + $0xb0] sm:$0xff]  ;;  %vm12082_vm8 = vmmov %vm12081_vm2 }
 0x2d4   : > { %v9392_v26 = vpack.i.bf16 %v2970_v11, %v2969_v43  ;;  %v2886_v11 = vld [vmem:[#allocation3 + $0xf] sm:$0xff]  ;;  %v6318_v43 = vunpack.i.h.bf16 %v6316_v4 }
 0x2d5   : > { %6570 = vrot.lane.b32.xlu0 %v6554_v16, %s7007_s27  ;;  %v9408_v41 = vpop.permute.xlu0 %6320  ;;  %v6341_v9 = vpop.permute.xlu1 %6340 }
 0x2d6   : > { %v6343_v38 = vunpack.i.h.bf16 %v6341_v9 }
 0x2d7   : > { %6555 = vrot.lane.b32.xlu1 %v6554_v16, %s7000_s8 }
 0x2d9   : > { %6575 = vrot.lane.b32.xlu0 %v6554_v16, %s7006_s20  ;;  %v9415_v16 = vld [vmem:[#allocation3 + $0xa1] sm:$0xff]  ;;  %v9417_v29 = vpop.permute.xlu1 %6345  ;;  %v6336_v54 = vpop.permute.xlu0 %6335 }
 0x2da   : > { %v3168_v24 = vsel %vm12074_vm14, %v9415_v16, 0.0  ;;  %v6338_v13 = vunpack.i.h.bf16 %v6336_v54  ;;  %vm12086_vm14 = vcmask 195584  }
 0x2db   : > { %6580 = vrot.lane.b32.xlu1 %v6579_v1, %s7002_s10  ;;  %v3166_v1 = vsel %vm12071_vm13, %v2998_v32, 0.0  ;;  %v6659_v31 = vpack.i.bf16 %v3168_v24, %v9421_v27  ;;  %vm12084_vm13 = vmmov %vm12083_vm6 }
 0x2dc   : > { %vm12087_vm0 = vmmov %vm12086_vm14 }
 0x2dd   : > { %6585 = vrot.lane.b32.xlu0 %v6584_v63, %s7010_s16  ;;  %v6307_v63 = vunpack.i.l.bf16 %v9382_v25  ;;  %v9433_v39 = vpop.permute.xlu1 %6350  ;;  %v9435_v32 = vpop.permute.xlu0 %6365  ;;  %v9445_v25 = vld [vmem:[#allocation3 + $0xa7] sm:$0xff] }
 0x2df   : > { %6590 = vrot.lane.b32.xlu1 %v6589_v50, %s7004_s12  ;;  %v3032_v50 = vsel %vm12079_vm3, %v9415_v16, 0.0  ;;  %v4149_v17 = vsel %vm12082_vm8, %v2917_v8, %v6307_v63  ;;  %v6342_v63 = vunpack.i.l.bf16 %v6341_v9  ;;  %vm11340_vm8 = vcmask 392192  }
 0x2e0   : > { %v6654_v53 = vpack.i.bf16 %v3032_v50, %v9421_v27 }
 0x2e1   : > { %6595 = vrot.lane.b32.xlu0 %v6594_v21, %s7008_s30  ;;  %v6317_v21 = vunpack.i.l.bf16 %v6316_v4  ;;  %v6356_v4 = vpop.permute.xlu1 %6355 }
 0x2e2   : > { %v6357_v8 = vunpack.i.l.bf16 %v6356_v4 }
 0x2e3   : > { %6615 = vrot.lane.b32.xlu1 %v6614_v51, %s7008_s30  ;;  %v6619_v51 = vpack.i.bf16 %v3166_v1, %v2997_v62  ;;  %v4150_v62 = vsel %vm12081_vm2, %v2886_v11, %v6308_v55  ;;  %v4181_v59 = vsel %vm12084_vm13, %v4149_v17, %v6317_v21  ;;  %v6358_v55 = vunpack.i.h.bf16 %v6356_v4  ;;  %v2974_v21 = vld [vmem:[#allocation3 + $0xd0] sm:$0xff]  ;;  %v2973_v4 = vld [vmem:[#allocation3 + $0xc8] sm:$0xff] }
 0x2e4   : > { %v4182_v37 = vsel %vm12083_vm6, %v4150_v62, %v6318_v43  ;;  %vm11346_vm2 = vcmask 326656   ;;  %vm12088_vm6 = vcmask 261120   ;;  %v2972_v62 = vld [vmem:[#allocation3 + $0xc0] sm:$0xff]  ;;  %vm11344_vm13 = vcmask 457728  }
 0x2e5   : > { %6600 = vrot.lane.b32.xlu0 %v6599_v44, %s7009_s13  ;;  %v6337_v44 = vunpack.i.l.bf16 %v6336_v54  ;;  %v4214_v1 = vsel %vm12086_vm14, %v4182_v37, %v6338_v13  ;;  %v2971_v37 = vld [vmem:[#allocation3 + $0xb8] sm:$0xff]  ;;  %vm11341_vm14 = vcmask 523264   ;;  %v6983_v54 = vld [vmem:[#allocation3 + $0x8f] sm:$0xff] }
 0x2e7   : > { %6625 = vrot.lane.b32.xlu1 %v9392_v26, %s7006_s20  ;;  %v4213_v50 = vsel %vm12087_vm0, %v4181_v59, %v6337_v44  ;;  %vm12089_vm0 = vmmov %vm12088_vm6 }
 0x2e8   : > { %v4245_v19 = vsel %vm12088_vm6, %v4213_v50, %v6342_v63  ;;  %v4246_v24 = vsel %vm12089_vm0, %v4214_v1, %v6343_v38  ;;  %v9479_v1 = vld [vmem:[#allocation3 + $0xc1] sm:$0xff]  ;;  %v6328_v50 = vunpack.i.h.bf16 %v9388_v49  ;;  %v9485_v38 = vpack.i.bf16 %v2972_v62, %v2971_v37 }
 0x2e9   : > { %6605 = vrot.lane.b32.xlu0 %v9392_v26, %s7000_s8  ;;  %v4278_v17 = vsel %vm11346_vm2, %v4245_v19, %v6357_v8  ;;  %v4279_v9 = vsel %vm11346_vm2, %v4246_v24, %v6358_v55  ;;  %v6327_v55 = vunpack.i.l.bf16 %v9388_v49  ;;  %v9496_v24 = vld [vmem:[#allocation3 + $0xb9] sm:$0xff] }
 0x2eb   : > { %6630 = vrot.lane.b32.xlu1 %v9401_v5, %s7000_s8 }
 0x2ed   : > { %6610 = vrot.lane.b32.xlu0 %v6609_v36, %s7002_s10  ;;  %v3065_v36 = vsel %vm7664_vm4, %v9445_v25, 0.0 }
 0x2ef   : > { %6635 = vrot.lane.b32.xlu1 %v6634_v18, %s7009_s13  ;;  %v9449_v18 = vpop.permute.xlu0 %6370 }
 0x2f1   : > { %6620 = vrot.lane.b32.xlu0 %v6619_v51, %s7010_s16  ;;  %v9461_v51 = vld [vmem:[#allocation3 + $0xaf] sm:$0xff] }
 0x2f2   : > { %v6664_v43 = vpack.i.bf16 %v9461_v51, %v3065_v36 }
 0x2f3   : > { %6640 = vrot.lane.b32.xlu1 %v9401_v5, %s7007_s27  ;;  %v9463_v11 = vpop.permute.xlu0 %6375 }
 0x2f4   : > { %v6378_v61 = vunpack.i.h.bf16 %v9463_v11 }
 0x2f5   : > { %6645 = vrot.lane.b32.xlu0 %v6644_v40, %s7004_s12  ;;  %v9473_v40 = vld [vmem:[#allocation3 + $0xb1] sm:$0xff] }
 0x2f7   : > { %6655 = vrot.lane.b32.xlu1 %v6654_v53, %s7002_s10  ;;  %v6361_v53 = vpop.permute.xlu1 %6360  ;;  %v9483_v8 = vpop.permute.xlu0 %6385 }
 0x2f8   : > { %v6363_v13 = vunpack.i.h.bf16 %v6361_v53  ;;  %v6362_v44 = vunpack.i.l.bf16 %v6361_v53 }
 0x2f9   : > { %6650 = vrot.lane.b32.xlu0 %v9401_v5, %s7006_s20 }
 0x2fa   : > { %v4311_v59 = vsel %vm11340_vm8, %v4278_v17, %v6362_v44  ;;  %v4312_v36 = vsel %vm11340_vm8, %v4279_v9, %v6363_v13  ;;  %v12092_v13 = vld [vmem:[#allocation20_spill] sm:$0xff]  ;;  %vm11342_vm8 = vcmask 588800  }
 0x2fb   : > { %6660 = vrot.lane.b32.xlu1 %v6659_v31, %s7010_s16  ;;  %v9475_v31 = vpack.i.bf16 %v2974_v21, %v2973_v4  ;;  %v6381_v5 = vpop.permute.xlu1 %6380  ;;  %v4344_v49 = vsel %vm11344_vm13, %v4311_v59, %v6327_v55  ;;  %v4345_v19 = vsel %vm11344_vm13, %v4312_v36, %v6328_v50  ;;  %vm12093_vm0 = vnez %v12092_v13  ;;  %v9503_v9 = vld [vmem:[#allocation3 + $0xa9] sm:$0xff]  ;;  %v9507_v37 = vpop.permute.xlu0 %6400  ;;  %v9510_v50 = vld [vmem:[#allocation3 + $0xd1] sm:$0xff] }
 0x2fc   : > { %v6383_v63 = vunpack.i.h.bf16 %v6381_v5  ;;  %v6382_v53 = vunpack.i.l.bf16 %v6381_v5  ;;  %v3036_v44 = vsel %vm12093_vm0, %v9479_v1, 0.0  ;;  %v6333_v5 = vunpack.i.h.bf16 %v9399_v33 }
 0x2fd   : > { %6670 = vrot.lane.b32.xlu0 %v9475_v31, %s7000_s8  ;;  %v6684_v55 = vpack.i.bf16 %v3036_v44, %v9496_v24  ;;  %vm12097_vm13 = vcmask 64512   ;;  %v3106_v57 = vsel %vm12093_vm0, %v9510_v50, 0.0 }
 0x2fe   : > { %v4377_v62 = vsel %vm11341_vm14, %v4344_v49, %v6382_v53  ;;  %v4378_v17 = vsel %vm11341_vm14, %v4345_v19, %v6383_v63  ;;  %v6332_v53 = vunpack.i.l.bf16 %v9399_v33  ;;  %v3102_v63 = vsel %vm12079_vm3, %v9473_v40, 0.0  ;;  %v12094_v19 = vld [vmem:[#allocation21_spill] sm:$0xff]  ;;  %vm12098_vm2 = vmmov %vm12097_vm13 }
 0x2ff   : > { %6665 = vrot.lane.b32.xlu1 %v6664_v43, %s7004_s12  ;;  %v12090_v43 = vld [vmem:[#allocation18_spill] sm:$0xff]  ;;  %v9505_v4 = vpop.permute.xlu1 %6390  ;;  %v4409_v59 = vpack.c.bf16 %v4378_v17, %v4377_v62  ;;  %v6348_v49 = vunpack.i.h.bf16 %v9417_v29  ;;  %vm12095_vm14 = vnez %v12094_v19  ;;  %v6353_v33 = vunpack.i.h.bf16 %v9433_v39 }
 0x300   : > { %vm12091_vm6 = vnez %v12090_v43  ;;  %v3038_v44 = vsel %vm12095_vm14, %v9510_v50, 0.0  ;;  %v6352_v62 = vunpack.i.l.bf16 %v9433_v39  ;;  %v4152_v10 = vsel %vm12098_vm2, %v9135_v28, %v6333_v5  ;;  %v12101_v28 = vld [vmem:[#allocation33_spill] sm:$0xff] }
 0x301   : > { %v3034_v21 = vsel %vm12091_vm6, %v9473_v40, 0.0  ;;  %5602 = vmatprep.mubr.msk.bf16.mxu1 %vm11342_vm8, %v4409_v59  ;;  %v6406_v59 = vpop.permute.xlu0 %6405  ;;  %vm12096_vm8 = vnez %v12036_v46  ;;  %v6694_v39 = vpack.i.bf16 %v3038_v44, %v9536_v15  ;;  %v3100_v46 = vsel %vm12077_vm10, %v9415_v16, 0.0 }
 0x302   : > { %v6674_v36 = vpack.i.bf16 %v3034_v21, %v9503_v9  ;;  %v6347_v21 = vunpack.i.l.bf16 %v9417_v29  ;;  %v2919_v29 = vsel %vm12096_vm8, %v9125_v47, 0.0  ;;  %vm12099_vm8 = vcmask 130048  }
 0x303   : > { %6680 = vrot.lane.b32.xlu1 %v9485_v38, %s7000_s8  ;;  %v9528_v17 = vpop.permute.xlu1 %6395  ;;  %v4151_v23 = vsel %vm12097_vm13, %v2919_v29, %v6332_v53  ;;  %vm12100_vm1 = vmmov %vm12099_vm8  ;;  %vm12102_vm2 = vnez %v12101_v28  ;;  %vm12103_vm13 = vcmask 195584   ;;  %v6377_v16 = vunpack.i.l.bf16 %v9463_v11 }
 0x304   : > { %6675 = vrot.lane.b32.xlu0 %v6674_v36, %s7002_s10  ;;  %v2976_v36 = vld [vmem:[#allocation3 + $0xe0] sm:$0xff]  ;;  %v4183_v47 = vsel %vm12099_vm8, %v4151_v23, %v6347_v21  ;;  %v3040_v5 = vsel %vm12102_vm2, %v9530_v30, 0.0  ;;  %vm12104_vm5 = vmmov %vm12103_vm13  ;;  %v6407_v21 = vunpack.i.l.bf16 %v6406_v59  ;;  %vm12107_vm8 = vcmask 326656  }
 0x305   : > { %v9550_v53 = vpack.i.bf16 %v2976_v36, %v2975_v14  ;;  %v4215_v29 = vsel %vm12103_vm13, %v4183_v47, %v6352_v62  ;;  %v6411_v23 = vpop.permute.xlu0 %6410  ;;  %v6322_v14 = vunpack.i.l.bf16 %v9408_v41  ;;  %v9563_v36 = vld [vmem:[#allocation3 + $0xd9] sm:$0xff]  ;;  %vm12108_vm13 = vmmov %vm12107_vm8  ;;  %vm12111_vm2 = vcmask 457728  }
 0x306   : > { %v6413_v62 = vunpack.i.h.bf16 %v6411_v23  ;;  %v6412_v47 = vunpack.i.l.bf16 %v6411_v23  ;;  %v6714_v23 = vpack.i.bf16 %v3040_v5, %v9563_v36  ;;  %v6393_v45 = vunpack.i.h.bf16 %v9505_v4 }
 0x307   : > { %6685 = vrot.lane.b32.xlu1 %v6684_v55, %s7002_s10  ;;  %v6704_v55 = vpack.i.bf16 %v3102_v63, %v9503_v9  ;;  %v4184_v63 = vsel %vm12100_vm1, %v4152_v10, %v6348_v49  ;;  %v6323_v10 = vunpack.i.h.bf16 %v9408_v41  ;;  %v6408_v49 = vunpack.i.h.bf16 %v6406_v59 }
 0x308   : > { %6690 = vrot.lane.b32.xlu0 %v9313_v42, %s7000_s8  ;;  %v4216_v44 = vsel %vm12104_vm5, %v4184_v63, %v6353_v33  ;;  %v9559_v42 = vpop.permute.xlu1 %6415  ;;  %vm12105_vm1 = vcmask 261120   ;;  %v6699_v63 = vpack.i.bf16 %v3100_v46, %v9421_v27  ;;  %v6398_v6 = vunpack.i.h.bf16 %v9528_v17 }
 0x309   : > { %v4247_v33 = vsel %vm12105_vm1, %v4215_v29, %v6322_v14  ;;  %vm12106_vm5 = vmmov %vm12105_vm1  ;;  %v6431_v19 = vpop.permute.xlu0 %6430  ;;  %vm12109_vm1 = vcmask 392192  }
 0x30a   : > { %v4248_v11 = vsel %vm12106_vm5, %v4216_v44, %v6323_v10  ;;  %v4280_v59 = vsel %vm12108_vm13, %v4247_v33, %v6377_v16  ;;  %vm12110_vm5 = vmmov %vm12109_vm1  ;;  %v6433_v10 = vunpack.i.h.bf16 %v6431_v19  ;;  %v6432_v14 = vunpack.i.l.bf16 %v6431_v19  ;;  %v9589_v16 = vld [vmem:[#allocation3 + $0xe9] sm:$0xff] }
 0x30b   : > { %6705 = vrot.lane.b32.xlu1 %v6704_v55, %s7008_s30  ;;  %v9565_v55 = vld [vmem:[#allocation3 + $0xf1] sm:$0xff]  ;;  %v4281_v41 = vsel %vm12107_vm8, %v4248_v11, %v6378_v61  ;;  %v4313_v44 = vsel %vm12110_vm5, %v4280_v59, %v6407_v21  ;;  %vm12112_vm8 = vmmov %vm12111_vm2  ;;  %vm12113_vm13 = vcmask 523264   ;;  %v6312_v11 = vunpack.i.l.bf16 %v9390_v58 }
 0x30c   : > { %6695 = vrot.lane.b32.xlu0 %v6694_v39, %s7002_s10  ;;  %v9575_v28 = vpop.permute.xlu1 %6420  ;;  %v3042_v39 = vsel %vm12065_vm11, %v9565_v55, 0.0  ;;  %v4314_v29 = vsel %vm12109_vm1, %v4281_v41, %v6408_v49  ;;  %v4346_v27 = vsel %vm12111_vm2, %v4313_v44, %v6412_v47  ;;  %vm12114_vm14 = vmmov %vm12113_vm13  ;;  %v6313_v47 = vunpack.i.h.bf16 %v9390_v58  ;;  %v2907_v59 = vld [vmem:[#allocation3 + $0xb7] sm:$0xff] }
 0x30d   : > { %v4347_v61 = vsel %vm12112_vm8, %v4314_v29, %v6413_v62  ;;  %v4379_v46 = vsel %vm12113_vm13, %v4346_v27, %v6432_v14  ;;  %v9593_v49 = vpop.permute.xlu0 %6445  ;;  %v6719_v19 = vpack.i.bf16 %v3042_v39, %v9589_v16  ;;  %v3133_v62 = vsel %vm11615_vm12, %v9445_v25, 0.0 }
 0x30e   : > { %v4380_v5 = vsel %vm12114_vm14, %v4347_v61, %v6433_v10  ;;  %vm12115_vm14 = vcmask 588800   ;;  %v6372_v39 = vunpack.i.l.bf16 %v9449_v18  ;;  %v2921_v58 = vsel %vm12047_vm9, %v9144_v56, 0.0 }
 0x30f   : > { %6710 = vrot.lane.b32.xlu1 %v9550_v53, %s7000_s8  ;;  %v4410_v21 = vpack.c.bf16 %v4380_v5, %v4379_v46  ;;  %v6403_v29 = vunpack.i.h.bf16 %v9507_v37  ;;  %v6402_v44 = vunpack.i.l.bf16 %v9507_v37  ;;  %v6418_v27 = vunpack.i.h.bf16 %v9559_v42  ;;  %v9621_v46 = vld [vmem:[#allocation3 + $0xbf] sm:$0xff] }
 0x310   : > { %6700 = vrot.lane.b32.xlu0 %v6699_v63, %s7008_s30  ;;  %v9591_v33 = vpop.permute.xlu1 %6425  ;;  %v12116_v63 = vld [vmem:[#allocation41_spill] sm:$0xff]  ;;  %v3135_v56 = vsel %vm7664_vm4, %v2907_v59, 0.0  ;;  %vm12118_vm9 = vcmask 64512   ;;  %vm12120_vm5 = vcmask 130048   ;;  %vm12122_vm13 = vcmask 195584  }
 0x311   : > { %5603 = vmatmul.mubr.msk.bf16.vlgmr.msra.gmra.mrb[0].mxu1 %vm12115_vm14, %v4410_v21  ;;  %vm12117_vm2 = vnez %v12116_v63  ;;  %v4153_v34 = vsel %vm12118_vm9, %v2921_v58, %v6312_v11  ;;  %vm12119_vm1 = vmmov %vm12118_vm9  ;;  %v6739_v11 = vpack.i.bf16 %v9621_v46, %v3135_v56  ;;  %vm12124_vm9 = vcmask 261120  }
 0x312   : > { %v3044_v41 = vsel %vm12117_vm2, %v9317_v7, 0.0  ;;  %v6724_v7 = vpack.i.bf16 %v9461_v51, %v3133_v62  ;;  %v4154_v37 = vsel %vm12119_vm1, %v9160_v20, %v6313_v47  ;;  %vm12121_vm8 = vmmov %vm12120_vm5  ;;  %v3170_v20 = vsel %vm12077_vm10, %v9473_v40, 0.0 }
 0x313   : > { %6715 = vrot.lane.b32.xlu1 %v6714_v23, %s7002_s10  ;;  %v6373_v23 = vunpack.i.h.bf16 %v9449_v18  ;;  %v9615_v14 = vpop.permute.xlu0 %6450  ;;  %v6417_v18 = vunpack.i.l.bf16 %v9559_v42  ;;  %v6734_v61 = vpack.i.bf16 %v3044_v41, %v9321_v48  ;;  %v4185_v42 = vsel %vm12121_vm8, %v4153_v34, %v6372_v39  ;;  %vm12123_vm14 = vmmov %vm12122_vm13 }
 0x314   : > { %6720 = vrot.lane.b32.xlu0 %v6719_v19, %s7002_s10  ;;  %v6436_v10 = vpop.permute.xlu1 %6435  ;;  %v4217_v19 = vsel %vm12123_vm14, %v4185_v42, %v6402_v44  ;;  %vm12125_vm1 = vmmov %vm12124_vm9  ;;  %v6392_v40 = vunpack.i.l.bf16 %v9505_v4  ;;  %v3172_v4 = vsel %vm12079_vm3, %v9479_v1, 0.0  ;;  %vm12136_vm3 = vcmask 588800  }
 0x315   : > { %v6438_v5 = vunpack.i.h.bf16 %v6436_v10  ;;  %v6437_v21 = vunpack.i.l.bf16 %v6436_v10  ;;  %v4186_v51 = vsel %vm12120_vm5, %v4154_v37, %v6373_v23  ;;  %v4249_v47 = vsel %vm12124_vm9, %v4217_v19, %v6417_v18  ;;  %v12130_v37 = vld [vmem:[#allocation69_spill] sm:$0xff] }
 0x316   : > { %v4218_v48 = vsel %vm12122_vm13, %v4186_v51, %v6403_v29  ;;  %vm12126_vm5 = vcmask 326656   ;;  %vm12128_vm13 = vcmask 392192   ;;  %vm12131_vm10 = vnez %v12130_v37 }
 0x317   : > { %6730 = vrot.lane.b32.xlu1 %v9324_v22, %s7000_s8  ;;  %v9634_v41 = vpop.permute.xlu0 %6455  ;;  %v4250_v23 = vsel %vm12125_vm1, %v4218_v48, %v6418_v27  ;;  %v4282_v10 = vsel %vm12126_vm5, %v4249_v47, %v6437_v21  ;;  %vm12127_vm8 = vmmov %vm12126_vm5  ;;  %vm12132_vm9 = vcmask 457728   ;;  %vm12134_vm5 = vcmask 523264   ;;  %v12137_v47 = vld [vmem:[#allocation72_spill] sm:$0xff] }
 0x318   : > { %6725 = vrot.lane.b32.xlu0 %v6724_v7, %s7009_s13  ;;  %v4283_v29 = vsel %vm12127_vm8, %v4250_v23, %v6438_v5  ;;  %vm12129_vm14 = vmmov %vm12128_vm13 }
 0x319   : > { %vm12133_vm1 = vmmov %vm12132_vm9 }
 0x31a   : > { %vm12135_vm8 = vmmov %vm12134_vm5 }
 0x31b   : > { %6735 = vrot.lane.b32.xlu1 %v6734_v61, %s7002_s10  ;;  %v9651_v18 = vpop.permute.xlu0 %6465  ;;  %v6754_v61 = vpack.i.bf16 %v3170_v20, %v9503_v9  ;;  %v9666_v9 = vld [vmem:[#allocation3 + $0xc7] sm:$0xff]  ;;  %v6397_v20 = vunpack.i.l.bf16 %v9528_v17 }
 0x31c   : > { %6745 = vrot.lane.b32.xlu0 %v9392_v26, %s7007_s27  ;;  %v3067_v26 = vsel %vm12131_vm10, %v2907_v59, 0.0 }
 0x31d   : > { %v6441_v62 = vpop.permute.xlu1 %6440 }
 0x31e   : > { %v6443_v39 = vunpack.i.h.bf16 %v6441_v62  ;;  %v6442_v58 = vunpack.i.l.bf16 %v6441_v62  ;;  %v6764_v62 = vpack.i.bf16 %v9621_v46, %v3067_v26  ;;  %v6457_v26 = vunpack.i.l.bf16 %v9634_v41 }
 0x31f   : > { %6740 = vrot.lane.b32.xlu1 %v6739_v11, %s7009_s13  ;;  %v9670_v48 = vpop.permute.xlu0 %6480  ;;  %v6759_v11 = vpack.i.bf16 %v3172_v4, %v9496_v24  ;;  %v6388_v4 = vunpack.i.h.bf16 %v9483_v8 }
 0x320   : > { %v4315_v44 = vsel %vm12128_vm13, %v4282_v10, %v6442_v58  ;;  %v4316_v7 = vsel %vm12129_vm14, %v4283_v29, %v6443_v39  ;;  %6755 = vrot.lane.b32.xlu0 %v6754_v61, %s7010_s16  ;;  %vm12138_vm13 = vnez %v12137_v47  ;;  %v6423_v39 = vunpack.i.h.bf16 %v9575_v28 }
 0x321   : > { %v6461_v27 = vpop.permute.xlu1 %6460  ;;  %v4348_v5 = vsel %vm12132_vm9, %v4315_v44, %v6392_v40  ;;  %v4349_v21 = vsel %vm12133_vm1, %v4316_v7, %v6393_v45  ;;  %v3069_v23 = vsel %vm12138_vm13, %v9666_v9, 0.0  ;;  %v6422_v58 = vunpack.i.l.bf16 %v9575_v28  ;;  %v2910_v7 = vld [vmem:[#allocation3 + $0xcf] sm:$0xff] }
 0x322   : > { %v6463_v56 = vunpack.i.h.bf16 %v6461_v27  ;;  %v6462_v34 = vunpack.i.l.bf16 %v6461_v27  ;;  %v6428_v10 = vunpack.i.h.bf16 %v9591_v33  ;;  %v6427_v29 = vunpack.i.l.bf16 %v9591_v33 }
 0x323   : > { %6750 = vrot.lane.b32.xlu1 %v9485_v38, %s7007_s27  ;;  %v6486_v17 = vpop.permute.xlu0 %6485  ;;  %v3104_v45 = vsel %vm12091_vm6, %v9479_v1, 0.0  ;;  %v2923_v40 = vsel %vm11556_vm15, %v9212_v12, 0.0  ;;  %v6769_v27 = vpack.i.bf16 %v2910_v7, %v3069_v23  ;;  %vm12139_vm14 = vcmask 64512  }
 0x324   : > { %v4382_v51 = vsel %vm12134_vm5, %v4349_v21, %v6463_v56  ;;  %v4381_v42 = vsel %vm12135_vm8, %v4348_v5, %v6462_v34  ;;  %6765 = vrot.lane.b32.xlu0 %v6764_v62, %s7004_s12  ;;  %v4155_v28 = vsel %vm12139_vm14, %v2923_v40, %v6397_v20  ;;  %vm12140_vm9 = vmmov %vm12139_vm14  ;;  %v3137_v33 = vsel %vm12131_vm10, %v9666_v9, 0.0 }
 0x325   : > { %v9668_v59 = vpop.permute.xlu1 %6470  ;;  %v4411_v19 = vpack.c.bf16 %v4382_v51, %v4381_v42  ;;  %v4156_v61 = vsel %vm12140_vm9, %v9221_v2, %v6398_v6  ;;  %vm12141_vm1 = vcmask 130048   ;;  %v6784_v12 = vpack.i.bf16 %v3104_v45, %v9496_v24 }
 0x326   : > { %v4187_v56 = vsel %vm12141_vm1, %v4155_v28, %v6422_v58  ;;  %vm12142_vm5 = vmmov %vm12141_vm1  ;;  %vm12143_vm15 = vcmask 195584   ;;  %v6458_v34 = vunpack.i.h.bf16 %v9634_v41  ;;  %v6387_v51 = vunpack.i.l.bf16 %v9483_v8  ;;  %v9722_v41 = vld [vmem:[#allocation3 + $0xd7] sm:$0xff] }
 0x327   : > { %5606 = vmatprep.mubr.msk.bf16.mxu1 %vm12136_vm3, %v4411_v19  ;;  %6760 = vrot.lane.b32.xlu1 %v6759_v11, %s7010_s16  ;;  %v4188_v1 = vsel %vm12142_vm5, %v4156_v61, %v6423_v39  ;;  %v4219_v2 = vsel %vm12143_vm15, %v4187_v56, %v6427_v29  ;;  %vm12144_vm8 = vmmov %vm12143_vm15  ;;  %v6491_v21 = vpop.permute.xlu0 %6490  ;;  %v6488_v24 = vunpack.i.h.bf16 %v6486_v17  ;;  %v6487_v42 = vunpack.i.l.bf16 %v6486_v17  ;;  %v9734_v61 = vld [vmem:[#allocation3 + $0xdf] sm:$0xff] }
 0x328   : > { %6775 = vrot.lane.b32.xlu0 %v9485_v38, %s7006_s20  ;;  %v4220_v38 = vsel %vm12144_vm8, %v4188_v1, %v6428_v10  ;;  %v6493_v19 = vunpack.i.h.bf16 %v6491_v21  ;;  %v6492_v62 = vunpack.i.l.bf16 %v6491_v21  ;;  %vm12145_vm3 = vcmask 261120  }
 0x329   : > { %v9686_v44 = vpop.permute.xlu1 %6475  ;;  %v4251_v11 = vsel %vm12145_vm3, %v4219_v2, %v6387_v51  ;;  %vm12146_vm14 = vmmov %vm12145_vm3  ;;  %vm12147_vm9 = vcmask 326656   ;;  %v6794_v58 = vpack.i.bf16 %v2910_v7, %v3137_v33  ;;  %v6789_v10 = vpack.i.bf16 %v3106_v57, %v9536_v15 }
 0x32a   : > { %v4252_v6 = vsel %vm12146_vm14, %v4220_v38, %v6388_v4  ;;  %vm12148_vm1 = vmmov %vm12147_vm9  ;;  %vm12149_vm5 = vcmask 392192   ;;  %vm12151_vm8 = vcmask 457728   ;;  %v3139_v7 = vsel %vm12138_vm13, %v9722_v41, 0.0 }
 0x32b   : > { %6770 = vrot.lane.b32.xlu1 %v6769_v27, %s7004_s12  ;;  %v4285_v20 = vsel %vm12147_vm9, %v4252_v6, %v6458_v34  ;;  %v4284_v23 = vsel %vm12148_vm1, %v4251_v11, %v6457_v26  ;;  %v6511_v39 = vpop.permute.xlu0 %6510  ;;  %vm12150_vm15 = vmmov %vm12149_vm5  ;;  %vm12153_vm14 = vcmask 523264   ;;  %v6799_v2 = vpack.i.bf16 %v9734_v61, %v3139_v7  ;;  %v12168_v7 = vld [vmem:[#allocation75_spill] sm:$0xff] }
 0x32c   : > { %6785 = vrot.lane.b32.xlu0 %v6784_v12, %s7008_s30  ;;  %v4318_v29 = vsel %vm12149_vm5, %v4285_v20, %v6488_v24  ;;  %v4317_v17 = vsel %vm12150_vm15, %v4284_v23, %v6487_v42  ;;  %v6513_v45 = vunpack.i.h.bf16 %v6511_v39  ;;  %v6512_v40 = vunpack.i.l.bf16 %v6511_v39  ;;  %vm12152_vm3 = vmmov %vm12151_vm8  ;;  %v9782_v20 = vld [vmem:[#allocation3 + $0xe7] sm:$0xff] }
 0x32d   : > { %v9713_v5 = vpop.permute.xlu1 %6495  ;;  %v4350_v27 = vsel %vm12151_vm8, %v4317_v17, %v6492_v62  ;;  %v4351_v28 = vsel %vm12152_vm3, %v4318_v29, %v6493_v19  ;;  %vm12154_vm9 = vmmov %vm12153_vm14  ;;  %v3174_v38 = vsel %vm12091_vm6, %v9510_v50, 0.0  ;;  %v6368_v34 = vunpack.i.h.bf16 %v9435_v32 }
 0x32e   : > { %v4383_v33 = vsel %vm12153_vm14, %v4350_v27, %v6512_v40  ;;  %v4384_v56 = vsel %vm12154_vm9, %v4351_v28, %v6513_v45  ;;  %v6367_v26 = vunpack.i.l.bf16 %v9435_v32  ;;  %vm12155_vm1 = vcmask 588800  }
 0x32f   : > { %6780 = vrot.lane.b32.xlu1 %v9475_v31, %s7006_s20  ;;  %v9744_v12 = vpop.permute.xlu0 %6525  ;;  %v4412_v57 = vpack.c.bf16 %v4384_v56, %v4383_v33  ;;  %v2925_v21 = vsel %vm7574_vm7, %v9259_v35, 0.0  ;;  %v6453_v4 = vunpack.i.h.bf16 %v9615_v14  ;;  %v6452_v51 = vunpack.i.l.bf16 %v9615_v14  ;;  %v12156_v35 = vld [vmem:[#allocation73_spill] sm:$0xff] }
 0x330   : > { %6795 = vrot.lane.b32.xlu0 %v6794_v58, %s7009_s13  ;;  %v6483_v43 = vunpack.i.h.bf16 %v9670_v48  ;;  %v6482_v50 = vunpack.i.l.bf16 %v9670_v48  ;;  %v6814_v42 = vpack.i.bf16 %v3174_v38, %v9536_v15  ;;  %v6497_v3 = vunpack.i.l.bf16 %v9713_v5 }
 0x331   : > { %v9726_v8 = vpop.permute.xlu1 %6500  ;;  %5607 = vmatmul.mubr.msk.bf16.gmra.mrb[4].mxu1 %vm12155_vm1, %v4412_v57  ;;  %vm12157_vm7 = vnez %v12156_v35  ;;  %v3176_v14 = vsel %vm12093_vm0, %v9530_v30, 0.0  ;;  %vm12158_vm6 = vcmask 64512   ;;  %vm12160_vm15 = vcmask 130048  }
 0x332   : > { %v3071_v19 = vsel %vm12157_vm7, %v9722_v41, 0.0  ;;  %v4157_v62 = vsel %vm12158_vm6, %v2925_v21, %v6367_v26  ;;  %vm12159_vm5 = vmmov %vm12158_vm6  ;;  %vm12162_vm3 = vcmask 195584   ;;  %vm12164_vm14 = vcmask 261120   ;;  %v9805_v21 = vld [vmem:[#allocation3 + $0xef] sm:$0xff] }
 0x333   : > { %6790 = vrot.lane.b32.xlu1 %v6789_v10, %s7008_s30  ;;  %v9763_v24 = vpop.permute.xlu0 %6530  ;;  %v4158_v48 = vsel %vm12159_vm5, %v9274_v60, %v6368_v34  ;;  %vm12161_vm8 = vmmov %vm12160_vm15  ;;  %v6824_v60 = vpack.i.bf16 %v9734_v61, %v3071_v19  ;;  %v6819_v10 = vpack.i.bf16 %v3176_v14, %v9563_v36  ;;  %vm12166_vm1 = vcmask 326656  }
 0x334   : > { %6805 = vrot.lane.b32.xlu0 %v9475_v31, %s7007_s27  ;;  %v6498_v31 = vunpack.i.h.bf16 %v9713_v5  ;;  %v4190_v15 = vsel %vm12160_vm15, %v4158_v48, %v6453_v4  ;;  %v4189_v5 = vsel %vm12161_vm8, %v4157_v62, %v6452_v51  ;;  %vm12163_vm0 = vmmov %vm12162_vm3  ;;  %vm12169_vm5 = vnez %v12168_v7 }
 0x335   : > { %v9742_v1 = vpop.permute.xlu1 %6505  ;;  %v4222_v13 = vsel %vm12162_vm3, %v4190_v15, %v6483_v43  ;;  %v4221_v23 = vsel %vm12163_vm0, %v4189_v5, %v6482_v50  ;;  %vm12165_vm9 = vmmov %vm12164_vm14  ;;  %v3073_v33 = vsel %vm12169_vm5, %v9782_v20, 0.0  ;;  %vm12170_vm15 = vcmask 392192   ;;  %v12172_v50 = vld [vmem:[#allocation21_spill] sm:$0xff] }
 0x336   : > { %v4253_v29 = vsel %vm12164_vm14, %v4221_v23, %v6497_v3  ;;  %v4254_v17 = vsel %vm12165_vm9, %v4222_v13, %v6498_v31  ;;  %vm12167_vm6 = vmmov %vm12166_vm1  ;;  %v6472_v38 = vunpack.i.l.bf16 %v9668_v59  ;;  %v6829_v43 = vpack.i.bf16 %v9805_v21, %v3073_v33  ;;  %v9833_v15 = vld [vmem:[#allocation3 + $0xf7] sm:$0xff] }
 0x337   : > { %6800 = vrot.lane.b32.xlu1 %v6799_v2, %s7009_s13  ;;  %v9786_v58 = vpop.permute.xlu0 %6535  ;;  %vm12171_vm8 = vmmov %vm12170_vm15  ;;  %v6473_v2 = vunpack.i.h.bf16 %v9668_v59  ;;  %vm12173_vm3 = vnez %v12172_v50  ;;  %vm12174_vm0 = vcmask 457728   ;;  %vm12176_vm9 = vcmask 523264  }
 0x338   : > { %6815 = vrot.lane.b32.xlu0 %v6814_v42, %s7010_s16  ;;  %vm12175_vm14 = vmmov %vm12174_vm0  ;;  %v3141_v48 = vsel %vm12157_vm7, %v9782_v20, 0.0 }
 0x339   : > { %v6516_v32 = vpop.permute.xlu1 %6515  ;;  %v6854_v13 = vpack.i.bf16 %v9805_v21, %v3141_v48  ;;  %v6537_v48 = vunpack.i.l.bf16 %v9786_v58 }
 0x33a   : > { %v6518_v11 = vunpack.i.h.bf16 %v6516_v32  ;;  %v6517_v6 = vunpack.i.l.bf16 %v6516_v32  ;;  %v3108_v32 = vsel %vm12173_vm3, %v9530_v30, 0.0 }
 0x33b   : > { %6810 = vrot.lane.b32.xlu1 %v9550_v53, %s7007_s27  ;;  %v9803_v26 = vpop.permute.xlu0 %6550  ;;  %v6844_v30 = vpack.i.bf16 %v3108_v32, %v9563_v36 }
 0x33c   : > { %v4286_v27 = vsel %vm12166_vm1, %v4253_v29, %v6517_v6  ;;  %v4287_v28 = vsel %vm12167_vm6, %v4254_v17, %v6518_v11  ;;  %6825 = vrot.lane.b32.xlu0 %v6824_v60, %s7004_s12  ;;  %vm12177_vm1 = vmmov %vm12176_vm9  ;;  %vm12178_vm6 = vcmask 588800   ;;  %v12181_v6 = vld [vmem:[#allocation89_spill] sm:$0xff]  ;;  %v6477_v60 = vunpack.i.l.bf16 %v9686_v44 }
 0x33d   : > { %v6521_v39 = vpop.permute.xlu1 %6520  ;;  %v3143_v29 = vsel %vm12169_vm5, %v9833_v15, 0.0  ;;  %v6503_v17 = vunpack.i.h.bf16 %v9726_v8 }
 0x33e   : > { %v6523_v45 = vunpack.i.h.bf16 %v6521_v39  ;;  %v6522_v40 = vunpack.i.l.bf16 %v6521_v39  ;;  %v6478_v39 = vunpack.i.h.bf16 %v9686_v44  ;;  %v6508_v44 = vunpack.i.h.bf16 %v9742_v1 }
 0x33f   : > { %6820 = vrot.lane.b32.xlu1 %v6819_v10, %s7010_s16  ;;  %v9820_v14 = vpop.permute.xlu0 %6560  ;;  %v9842_v10 = vld [vmem:[#allocation3 + $0xff] sm:$0xff] }
 0x340   : > { %v4319_v56 = vsel %vm12170_vm15, %v4286_v27, %v6522_v40  ;;  %v4320_v57 = vsel %vm12171_vm8, %v4287_v28, %v6523_v45  ;;  %6835 = vrot.lane.b32.xlu0 %v9550_v53, %s7006_s20  ;;  %v12179_v53 = vld [vmem:[#allocation33_spill] sm:$0xff]  ;;  %v6502_v45 = vunpack.i.l.bf16 %v9726_v8  ;;  %v3178_v40 = vsel %vm12173_vm3, %v9565_v55, 0.0 }
 0x341   : > { %v6541_v34 = vpop.permute.xlu1 %6540  ;;  %v4352_v42 = vsel %vm12174_vm0, %v4319_v56, %v6472_v38  ;;  %v4353_v31 = vsel %vm12175_vm14, %v4320_v57, %v6473_v2  ;;  %vm12180_vm15 = vnez %v12179_v53  ;;  %v6507_v27 = vunpack.i.l.bf16 %v9742_v1  ;;  %v6972_v56 = vld [vmem:[#allocation3 + $0x57] sm:$0xff]  ;;  %v12182_v57 = vld [vmem:[#allocation58_spill] sm:$0xff] }
 0x342   : > { %v6543_v4 = vunpack.i.h.bf16 %v6541_v34  ;;  %v6542_v51 = vunpack.i.l.bf16 %v6541_v34  ;;  %v3110_v11 = vsel %vm12180_vm15, %v9565_v55, 0.0  ;;  %vm12183_vm8 = vnez %v12182_v57  ;;  %v6973_v34 = vld [vmem:[#allocation3 + $0x5f] sm:$0xff] }
 0x343   : > { %6830 = vrot.lane.b32.xlu1 %v6829_v43, %s7004_s12  ;;  %v6566_v36 = vpop.permute.xlu0 %6565  ;;  %v6849_v23 = vpack.i.bf16 %v3110_v11, %v9589_v16  ;;  %v2927_v2 = vsel %vm12183_vm8, %v6972_v56, 0.0  ;;  %v6859_v38 = vpack.i.bf16 %v9842_v10, %v3143_v29  ;;  %vm12184_vm0 = vcmask 64512   ;;  %v6974_v1 = vld [vmem:[#allocation3 + $0x100] sm:$0xff] }
 0x344   : > { %v4386_v59 = vsel %vm12176_vm9, %v4353_v31, %v6543_v4  ;;  %v4385_v3 = vsel %vm12177_vm1, %v4352_v42, %v6542_v51  ;;  %6845 = vrot.lane.b32.xlu0 %v6844_v30, %s7008_s30  ;;  %v4159_v8 = vsel %vm12184_vm0, %v2927_v2, %v6477_v60  ;;  %vm12185_vm14 = vmmov %vm12184_vm0  ;;  %v6874_v55 = vpack.i.bf16 %v3178_v40, %v9589_v16  ;;  %v12186_v51 = vld [vmem:[#allocation90_spill] sm:$0xff]  ;;  %v12189_v42 = vld [vmem:[#allocation17_spill] sm:$0xff] }
 0x345   : > { %v9818_v19 = vpop.permute.xlu1 %6545  ;;  %v4413_v62 = vpack.c.bf16 %v4386_v59, %v4385_v3  ;;  %v4160_v4 = vsel %vm12185_vm14, %v6973_v34, %v6478_v39  ;;  %v6869_v43 = vpack.i.bf16 %v6974_v1, %v12186_v51  ;;  %vm12187_vm3 = vcmask 130048   ;;  %v6975_v59 = vld [vmem:[#allocation3 + $0x101] sm:$0xff] }
 0x346   : > { %v4191_v50 = vsel %vm12187_vm3, %v4159_v8, %v6502_v45  ;;  %vm12188_vm9 = vmmov %vm12187_vm3  ;;  %vm12190_vm1 = vnez %v12189_v42  ;;  %v3180_v3 = vsel %vm12180_vm15, %v6975_v59, 0.0  ;;  %v6538_v30 = vunpack.i.h.bf16 %v9786_v58  ;;  %v3045_v58 = vld [vmem:[#allocation3 + $0x107] sm:$0xff] }
 0x347   : > { %5610 = vmatprep.mubr.msk.bf16.mxu1 %vm12178_vm6, %v4413_v62  ;;  %6840 = vrot.lane.b32.xlu1 %v12181_v6, %s7006_s20  ;;  %v6571_v33 = vpop.permute.xlu0 %6570  ;;  %v4192_v32 = vsel %vm12188_vm9, %v4160_v4, %v6503_v17  ;;  %v3075_v31 = vsel %vm12190_vm1, %v9833_v15, 0.0  ;;  %vm12191_vm6 = vcmask 195584   ;;  %v6568_v39 = vunpack.i.h.bf16 %v6566_v36 }
 0x348   : > { %6855 = vrot.lane.b32.xlu0 %v6854_v13, %s7009_s13  ;;  %v4223_v62 = vsel %vm12191_vm6, %v4191_v50, %v6507_v27  ;;  %vm12192_vm8 = vmmov %vm12191_vm6  ;;  %v6468_v13 = vunpack.i.h.bf16 %v9651_v18  ;;  %v6567_v60 = vunpack.i.l.bf16 %v6566_v36  ;;  %v6573_v53 = vunpack.i.h.bf16 %v6571_v33  ;;  %v6976_v36 = vld [vmem:[#allocation3 + $0xf9] sm:$0xff]  ;;  %v3082_v50 = vld [vmem:[#allocation3 + $0x111] sm:$0xff] }
 0x349   : > { %v9835_v5 = vpop.permute.xlu1 %6555  ;;  %v4224_v16 = vsel %vm12192_vm8, %v4192_v32, %v6508_v44  ;;  %v6572_v29 = vunpack.i.l.bf16 %v6571_v33  ;;  %vm12193_vm15 = vcmask 261120   ;;  %vm12195_vm14 = vcmask 326656  }
 0x34a   : > { %vm12194_vm0 = vmmov %vm12193_vm15  ;;  %v6879_v33 = vpack.i.bf16 %v3180_v3, %v6976_v36  ;;  %vm12197_vm9 = vcmask 392192   ;;  %vm12199_vm8 = vcmask 457728   ;;  %v3046_v3 = vld [vmem:[#allocation3 + $0x10f] sm:$0xff]  ;;  %v12208_v36 = vld [vmem:[#allocation61_spill] sm:$0xff]  ;;  %v6527_v42 = vunpack.i.l.bf16 %v9744_v12 }
 0x34b   : > { %6850 = vrot.lane.b32.xlu1 %v6849_v23, %s7008_s30  ;;  %v6467_v23 = vunpack.i.l.bf16 %v9651_v18  ;;  %v4256_v45 = vsel %vm12194_vm0, %v4224_v16, %v6468_v13  ;;  %vm12196_vm3 = vmmov %vm12195_vm14  ;;  %v6884_v18 = vpack.i.bf16 %v9842_v10, %v3075_v31  ;;  %v6448_v13 = vunpack.i.h.bf16 %v9593_v49 }
 0x34c   : > { %6865 = vrot.lane.b32.xlu0 %v12181_v6, %s7007_s27  ;;  %v9880_v6 = vpop.permute.xlu0 %6575  ;;  %v4289_v40 = vsel %vm12195_vm14, %v4256_v45, %v6538_v30  ;;  %vm12198_vm6 = vmmov %vm12197_vm9  ;;  %vm12203_vm14 = vcmask 523264   ;;  %v3080_v30 = vld [vmem:[#allocation3 + $0x110] sm:$0xff]  ;;  %v3079_v45 = vld [vmem:[#allocation3 + $0x108] sm:$0xff] }
 0x34d   : > { %v9855_v28 = vpop.permute.xlu1 %6580  ;;  %v4255_v17 = vsel %vm12193_vm15, %v4223_v62, %v6467_v23  ;;  %v4322_v57 = vsel %vm12197_vm9, %v4289_v40, %v6568_v39  ;;  %vm12200_vm15 = vmmov %vm12199_vm8  ;;  %v3115_v62 = vld [vmem:[#allocation3 + $0x117] sm:$0xff]  ;;  %v6447_v23 = vunpack.i.l.bf16 %v9593_v49  ;;  %vm12205_vm9 = vcmask 588800   ;;  %v3116_v49 = vld [vmem:[#allocation3 + $0x11f] sm:$0xff] }
 0x34e   : > { %v4288_v44 = vsel %vm12196_vm3, %v4255_v17, %v6537_v48  ;;  %v4355_v4 = vsel %vm12200_vm15, %v4322_v57, %v6573_v53  ;;  %vm12204_vm3 = vmmov %vm12203_vm14  ;;  %v3152_v48 = vld [vmem:[#allocation3 + $0x121] sm:$0xff]  ;;  %v3145_v39 = vsel %vm12190_vm1, %v3045_v58, 0.0  ;;  %v3114_v53 = vsel %vm12117_vm2, %v3082_v50, 0.0 }
 0x34f   : > { %6860 = vrot.lane.b32.xlu1 %v6859_v38, %s7009_s13  ;;  %v4321_v2 = vsel %vm12198_vm6, %v4288_v44, %v6567_v60  ;;  %v3081_v60 = vld [vmem:[#allocation3 + $0x109] sm:$0xff]  ;;  %v6532_v17 = vunpack.i.l.bf16 %v9763_v24  ;;  %v3184_v0 = vsel %vm12117_vm2, %v3152_v48, 0.0  ;;  %v6552_v48 = vunpack.i.l.bf16 %v9803_v26 }
 0x350   : > { %6875 = vrot.lane.b32.xlu0 %v6874_v55, %s7010_s16  ;;  %v6586_v27 = vpop.permute.xlu0 %6585  ;;  %v4354_v34 = vsel %vm12199_vm8, %v4321_v2, %v6572_v29  ;;  %v12201_v55 = vld [vmem:[#allocation78_spill] sm:$0xff]  ;;  %v6533_v29 = vunpack.i.h.bf16 %v9763_v24  ;;  %vm12209_vm8 = vnez %v12208_v36  ;;  %v6899_v2 = vpack.i.bf16 %v3080_v30, %v3079_v45 }
 0x351   : > { %v9878_v11 = vpop.permute.xlu1 %6590  ;;  %v6588_v38 = vunpack.i.h.bf16 %v6586_v27  ;;  %v6587_v8 = vunpack.i.l.bf16 %v6586_v27  ;;  %vm12202_vm0 = vnez %v12201_v55  ;;  %v6977_v44 = vld [vmem:[#allocation3 + $0x67] sm:$0xff] }
 0x352   : > { %v3077_v1 = vsel %vm12202_vm0, %v3045_v58, 0.0  ;;  %v3147_v40 = vsel %vm12202_vm0, %v3115_v62, 0.0  ;;  %v12206_v58 = vld [vmem:[#allocation59_spill] sm:$0xff]  ;;  %v12212_v62 = vld [vmem:[#allocation28_spill] sm:$0xff]  ;;  %v6593_v36 = vunpack.i.h.bf16 %v9878_v11 }
 0x353   : > { %6870 = vrot.lane.b32.xlu1 %v6869_v43, %s7007_s27  ;;  %v4387_v51 = vsel %vm12203_vm14, %v4354_v34, %v6587_v8  ;;  %v4388_v43 = vsel %vm12204_vm3, %v4355_v4, %v6588_v38  ;;  %v6889_v16 = vpack.i.bf16 %v3046_v3, %v3077_v1  ;;  %vm12207_vm6 = vnez %v12206_v58  ;;  %v9929_v38 = vld [vmem:[#allocation3 + $0x118] sm:$0xff]  ;;  %v9931_v8 = vld [vmem:[#allocation3 + $0x120] sm:$0xff] }
 0x354   : > { %6885 = vrot.lane.b32.xlu0 %v6884_v18, %s7004_s12  ;;  %v9903_v32 = vpop.permute.xlu0 %6595  ;;  %v4414_v59 = vpack.c.bf16 %v4388_v43, %v4387_v51  ;;  %v2929_v27 = vsel %vm12207_vm6, %v6977_v44, 0.0  ;;  %v6978_v18 = vld [vmem:[#allocation3 + $0x77] sm:$0xff]  ;;  %v2937_v4 = vsel %vm12131_vm10, %v9445_v25, 0.0  ;;  %v6914_v1 = vpack.i.bf16 %v3046_v3, %v3145_v39 }
 0x355   : > { %v9890_v56 = vpop.permute.xlu1 %6615  ;;  %v3151_v34 = vld [vmem:[#allocation3 + $0x119] sm:$0xff]  ;;  %v6909_v51 = vpack.i.bf16 %v3114_v53, %v3081_v60  ;;  %vm12213_vm14 = vcmask 130048   ;;  %v6929_v25 = vpack.i.bf16 %v9931_v8, %v9929_v38  ;;  %v6553_v3 = vunpack.i.h.bf16 %v9803_v26 }
 0x356   : > { %5611 = vmatmul.mubr.msk.bf16.gmra.mrb[8].mxu1 %vm12205_vm9, %v4414_v59  ;;  %vm12214_vm3 = vmmov %vm12213_vm14  ;;  %v9947_v37 = vpack.i.bf16 %v3184_v0, %v3151_v34  ;;  %v6558_v53 = vunpack.i.h.bf16 %v9835_v5  ;;  %v6583_v26 = vunpack.i.h.bf16 %v9855_v28  ;;  %v6582_v44 = vunpack.i.l.bf16 %v9855_v28 }
 0x357   : > { %6880 = vrot.lane.b32.xlu1 %v6879_v33, %s7010_s16  ;;  %v2931_v33 = vsel %vm12209_vm8, %v6978_v18, 0.0  ;;  %vm12216_vm10 = vcmask 195584   ;;  %v6592_v34 = vunpack.i.l.bf16 %v9878_v11  ;;  %v6548_v28 = vunpack.i.h.bf16 %v9818_v19 }
 0x358   : > { %6895 = vrot.lane.b32.xlu0 %v9324_v22, %s7006_s20  ;;  %v3182_v22 = vsel %vm12065_vm11, %v3082_v50, 0.0  ;;  %v6601_v57 = vpop.permute.xlu0 %6600  ;;  %vm12210_vm11 = vcmask 64512   ;;  %v6979_v50 = vld [vmem:[#allocation3 + $0x6f] sm:$0xff]  ;;  %vm12217_vm9 = vmmov %vm12216_vm10  ;;  %vm12218_vm6 = vcmask 261120  }
 0x359   : > { %v9905_v31 = vpop.permute.xlu1 %6625  ;;  %v4161_v43 = vsel %vm12210_vm11, %v2929_v27, %v6447_v23  ;;  %vm12211_vm15 = vmmov %vm12210_vm11  ;;  %v6934_v30 = vpack.i.bf16 %v3182_v22, %v3081_v60  ;;  %v6562_v23 = vunpack.i.l.bf16 %v9820_v14  ;;  %v6598_v22 = vunpack.i.h.bf16 %v9903_v32 }
 0x35a   : > { %v4162_v59 = vsel %vm12211_vm15, %v6979_v50, %v6448_v13  ;;  %v4193_v63 = vsel %vm12214_vm3, %v4161_v43, %v6532_v17  ;;  %v6563_v13 = vunpack.i.h.bf16 %v9820_v14  ;;  %v6577_v17 = vunpack.i.l.bf16 %v9880_v6  ;;  %vm12215_vm2 = vmmov %vm12210_vm11  ;;  %v6980_v43 = vld [vmem:[#allocation3 + $0x7f] sm:$0xff] }
 0x35b   : > { %6890 = vrot.lane.b32.xlu1 %v6889_v16, %s7004_s12  ;;  %v6919_v16 = vpack.i.bf16 %v3116_v49, %v3147_v40  ;;  %v4194_v45 = vsel %vm12213_vm14, %v4162_v59, %v6533_v29  ;;  %v6578_v29 = vunpack.i.h.bf16 %v9880_v6  ;;  %v6557_v40 = vunpack.i.l.bf16 %v9835_v5  ;;  %vm12219_vm8 = vmmov %vm12218_vm6 }
 0x35c   : > { %6905 = vrot.lane.b32.xlu0 %v12212_v62, %s7008_s30  ;;  %v9953_v39 = vpop.permute.xlu0 %6605  ;;  %v6597_v14 = vunpack.i.l.bf16 %v9903_v32  ;;  %v6603_v58 = vunpack.i.h.bf16 %v6601_v57  ;;  %v6602_v27 = vunpack.i.l.bf16 %v6601_v57  ;;  %v4226_v6 = vsel %vm12216_vm10, %v4194_v45, %v6563_v13  ;;  %vm12220_vm11 = vmmov %vm12215_vm2 }
 0x35d   : > { %v9927_v24 = vpop.permute.xlu1 %6630  ;;  %v6607_v49 = vunpack.i.l.bf16 %v9953_v39  ;;  %v4225_v5 = vsel %vm12217_vm9, %v4193_v63, %v6562_v23  ;;  %v6547_v57 = vunpack.i.l.bf16 %v9818_v19  ;;  %vm12221_vm15 = vmmov %vm12215_vm2  ;;  %vm12222_vm14 = vcmask 326656  }
 0x35e   : > { %v4164_v50 = vsel %vm12221_vm15, %v6980_v43, %v6558_v53  ;;  %vm12223_vm3 = vmmov %vm12222_vm14  ;;  %vm12226_vm9 = vcmask 392192   ;;  %v6618_v23 = vunpack.i.h.bf16 %v9890_v56  ;;  %v6617_v53 = vunpack.i.l.bf16 %v9890_v56 }
 0x35f   : > { %6900 = vrot.lane.b32.xlu1 %v6899_v2, %s7006_s20  ;;  %v9968_v18 = vsel %vm12215_vm2, %v2937_v4, %v6607_v49  ;;  %v4257_v4 = vsel %vm12218_vm6, %v4225_v5, %v6577_v17  ;;  %vm12224_vm2 = vcmask 130048   ;;  %vm12227_vm6 = vmmov %vm12226_vm9  ;;  %vm12230_vm15 = vcmask 457728  }
 0x360   : > { %6915 = vrot.lane.b32.xlu0 %v6914_v1, %s7009_s13  ;;  %v9975_v32 = vpop.permute.xlu0 %6610  ;;  %v4258_v1 = vsel %vm12219_vm8, %v4226_v6, %v6578_v29  ;;  %v4290_v59 = vsel %vm12222_vm14, %v4257_v4, %v6597_v14  ;;  %vm12225_vm10 = vmmov %vm12224_vm2  ;;  %vm12228_vm8 = vcmask 195584   ;;  %v6633_v7 = vunpack.i.h.bf16 %v9927_v24 }
 0x361   : > { %v9955_v60 = vpop.permute.xlu1 %6635  ;;  %v4291_v11 = vsel %vm12223_vm3, %v4258_v1, %v6598_v22  ;;  %v4196_v45 = vsel %vm12225_vm10, %v4164_v50, %v6583_v26  ;;  %v4323_v19 = vsel %vm12226_vm9, %v4290_v59, %v6602_v27  ;;  %vm12231_vm14 = vmmov %vm12230_vm15  ;;  %vm12232_vm3 = vcmask 261120  }
 0x362   : > { %v4324_v63 = vsel %vm12227_vm6, %v4291_v11, %v6603_v58  ;;  %v6638_v17 = vunpack.i.h.bf16 %v9955_v60  ;;  %v6637_v49 = vunpack.i.l.bf16 %v9955_v60  ;;  %vm12234_vm10 = vcmask 523264  }
 0x363   : > { %6910 = vrot.lane.b32.xlu1 %v6909_v51, %s7008_s30  ;;  %v4163_v51 = vsel %vm12220_vm11, %v2931_v33, %v6557_v40  ;;  %vm12229_vm11 = vmmov %vm12228_vm8  ;;  %vm12236_vm6 = vcmask 326656   ;;  %v2941_v11 = vsel %vm12157_vm7, %v9666_v9, 0.0  ;;  %v6612_v52 = vunpack.i.l.bf16 %v9975_v32 }
 0x364   : > { %6925 = vrot.lane.b32.xlu0 %v6899_v2, %s7007_s27  ;;  %v4195_v62 = vsel %vm12224_vm2, %v4163_v51, %v6582_v44  ;;  %v4228_v13 = vsel %vm12229_vm11, %v4196_v45, %v6593_v36  ;;  %v6621_v29 = vpop.permute.xlu0 %6620  ;;  %v4357_v44 = vsel %vm12231_vm14, %v4324_v63, %v6553_v3  ;;  %vm12233_vm2 = vmmov %vm12232_vm3  ;;  %vm12238_vm11 = vcmask 392192  }
 0x365   : > { %v6641_v0 = vpop.permute.xlu1 %6640  ;;  %v4227_v33 = vsel %vm12228_vm8, %v4195_v62, %v6592_v34  ;;  %v6623_v40 = vunpack.i.h.bf16 %v6621_v29  ;;  %v6622_v26 = vunpack.i.l.bf16 %v6621_v29  ;;  %v4260_v56 = vsel %vm12233_vm2, %v4228_v13, %v6548_v28  ;;  %vm12235_vm9 = vmmov %vm12234_vm10 }
 0x366   : > { %v6643_v22 = vunpack.i.h.bf16 %v6641_v0  ;;  %v6642_v14 = vunpack.i.l.bf16 %v6641_v0  ;;  %v4259_v58 = vsel %vm12232_vm3, %v4227_v33, %v6547_v57  ;;  %v4293_v60 = vsel %vm12236_vm6, %v4260_v56, %v6618_v23  ;;  %vm12237_vm8 = vmmov %vm12236_vm6 }
 0x367   : > { %6920 = vrot.lane.b32.xlu1 %v6919_v16, %s7009_s13  ;;  %v4356_v16 = vsel %vm12230_vm15, %v4323_v19, %v6552_v48  ;;  %v4390_v27 = vsel %vm12234_vm10, %v4357_v44, %v6623_v40  ;;  %v4292_v48 = vsel %vm12237_vm8, %v4259_v58, %v6617_v53  ;;  %v4326_v36 = vsel %vm12238_vm11, %v4293_v60, %v6638_v17  ;;  %vm12239_vm15 = vmmov %vm12238_vm11 }
 0x368   : > { %6935 = vrot.lane.b32.xlu0 %v6934_v30, %s7010_s16  ;;  %v4389_v6 = vsel %vm12235_vm9, %v4356_v16, %v6622_v26  ;;  %v10012_v5 = vpop.permute.xlu0 %6645  ;;  %v4325_v34 = vsel %vm12239_vm15, %v4292_v48, %v6637_v49  ;;  %vm12240_vm3 = vmmov %vm12231_vm14  ;;  %vm12241_vm2 = vcmask 588800   ;;  %vm12244_vm8 = vcmask 64512   ;;  %v6982_v16 = vld [vmem:[#allocation3 + $0x97] sm:$0xff] }
 0x369   : > { %v9995_v2 = vpop.permute.xlu1 %6655  ;;  %v4415_v3 = vpack.c.bf16 %v4390_v27, %v4389_v6  ;;  %v4358_v57 = vsel %vm12231_vm14, %v4325_v34, %v6642_v14  ;;  %v4359_v4 = vsel %vm12240_vm3, %v4326_v36, %v6643_v22  ;;  %vm12242_vm10 = vmmov %vm12235_vm9  ;;  %v2945_v13 = vsel %vm12190_vm1, %v9782_v20, 0.0  ;;  %v6981_v22 = vld [vmem:[#allocation3 + $0x87] sm:$0xff] }
 0x36a   : > { %vm12243_vm6 = vmmov %vm12241_vm2  ;;  %v2943_v29 = vsel %vm12169_vm5, %v9722_v41, 0.0  ;;  %v6528_v40 = vunpack.i.h.bf16 %v9744_v12  ;;  %v2933_v14 = vsel %vm11615_vm12, %v6981_v22, 0.0  ;;  %v2935_v41 = vsel %vm7664_vm4, %v6982_v16, 0.0 }
 0x36b   : > { %6930 = vrot.lane.b32.xlu1 %v6929_v25, %s7007_s27  ;;  %5614 = vmatprep.mubr.msk.bf16.mxu1 %vm12241_vm2, %v4415_v3  ;;  %vm12245_vm11 = vmmov %vm12244_vm8  ;;  %v6632_v44 = vunpack.i.l.bf16 %v9927_v24  ;;  %v6613_v58 = vunpack.i.h.bf16 %v9975_v32  ;;  %v2947_v12 = vsel %vm12202_vm0, %v9833_v15, 0.0  ;;  %v6627_v34 = vunpack.i.l.bf16 %v9905_v31 }
 0x36c   : > { %v10023_v1 = vpop.permute.xlu0 %6650  ;;  %vm12246_vm7 = vmmov %vm12244_vm8  ;;  %vm12250_vm1 = vcmask 130048  }
 0x36d   : > { %v6661_v30 = vpop.permute.xlu1 %6660  ;;  %vm12247_vm5 = vmmov %vm12246_vm7 }
 0x36e   : > { %v6663_v0 = vunpack.i.h.bf16 %v6661_v30  ;;  %v6662_v28 = vunpack.i.l.bf16 %v6661_v30  ;;  %v4165_v27 = vsel %vm12247_vm5, %v2933_v14, %v6527_v42  ;;  %vm12248_vm4 = vmmov %vm12247_vm5  ;;  %v6628_v30 = vunpack.i.h.bf16 %v9905_v31 }
 0x36f   : > { %6940 = vrot.lane.b32.xlu1 %v9947_v37, %s7010_s16  ;;  %v4166_v3 = vsel %vm12248_vm4, %v6983_v54, %v6528_v40  ;;  %vm12249_vm12 = vmmov %vm12248_vm4  ;;  %vm12262_vm5 = vcmask 195584  }
 0x370   : > { %v4391_v38 = vsel %vm12242_vm10, %v4358_v57, %v6662_v28  ;;  %v4392_v8 = vsel %vm12235_vm9, %v4359_v4, %v6663_v0  ;;  %v10028_v43 = vpop.permute.xlu0 %6670  ;;  %vm12251_vm0 = vmmov %vm12250_vm1  ;;  %v6984_v28 = vld [vmem:[#allocation3 + $0x9f] sm:$0xff] }
 0x371   : > { %v4416_v25 = vpack.c.bf16 %v4392_v8, %v4391_v38  ;;  %v10025_v51 = vpop.permute.xlu1 %6665  ;;  %v6672_v59 = vunpack.i.l.bf16 %v10028_v43  ;;  %vm12252_vm15 = vmmov %vm12248_vm4 }
 0x372   : > { %v4167_v0 = vsel %vm12252_vm15, %v2935_v41, %v6632_v44  ;;  %vm12253_vm14 = vmmov %vm12248_vm4  ;;  %v6668_v42 = vunpack.i.h.bf16 %v10025_v51  ;;  %v6667_v40 = vunpack.i.l.bf16 %v10025_v51 }
 0x373   : > { %5615 = vmatmul.mubr.msk.bf16.gmra.mrb[12].mxu1 %vm12243_vm6, %v4416_v25  ;;  %v10037_v62 = vsel %vm12244_vm8, %v2941_v11, %v6672_v59  ;;  %v4168_v57 = vsel %vm12253_vm14, %v6984_v28, %v6633_v7  ;;  %vm12254_vm3 = vmmov %vm12251_vm0  ;;  %v6658_v25 = vunpack.i.h.bf16 %v9995_v2  ;;  %v6657_v59 = vunpack.i.l.bf16 %v9995_v2 }
 0x374   : > { %v4198_v4 = vsel %vm12254_vm3, %v4166_v3, %v6613_v58  ;;  %vm12255_vm2 = vmmov %vm12248_vm4  ;;  %v6648_v11 = vunpack.i.h.bf16 %v10012_v5  ;;  %vm12268_vm14 = vcmask 326656  }
 0x375   : > { %v10030_v50 = vpop.permute.xlu1 %6680  ;;  %vm12256_vm10 = vmmov %vm12251_vm0 }
 0x376   : > { %v10039_v37 = vpop.permute.xlu0 %6675  ;;  %v4197_v8 = vsel %vm12256_vm10, %v4165_v27, %v6612_v52  ;;  %vm12257_vm9 = vmmov %vm12255_vm2 }
 0x377   : > { %vm12258_vm6 = vmmov %vm12251_vm0 }
 0x378   : > { %vm12259_vm8 = vmmov %vm12251_vm0 }
 0x379   : > { %v10041_v45 = vpop.permute.xlu1 %6685  ;;  %vm12263_vm4 = vmmov %vm12262_vm5 }
 0x37a   : > { %v6691_v19 = vpop.permute.xlu0 %6690  ;;  %vm12269_vm3 = vmmov %vm12268_vm14 }
 0x37b   : > { %v6692_v33 = vunpack.i.l.bf16 %v6691_v19  ;;  %v6693_v26 = vunpack.i.h.bf16 %v6691_v19 }
 0x37d   : > { %v10043_v63 = vpop.permute.xlu1 %6705  ;;  %v4177_v23 = vsel %vm12245_vm11, %v2945_v13, %v6692_v33  ;;  %v4178_v24 = vsel %vm12249_vm12, %v9805_v21, %v6693_v26  ;;  %v6647_v33 = vunpack.i.l.bf16 %v10012_v5  ;;  %v6653_v13 = vunpack.i.h.bf16 %v10023_v1  ;;  %vm12260_vm11 = vmmov %vm12251_vm0 }
 0x37e   : > { %v10049_v53 = vpop.permute.xlu0 %6695  ;;  %vm12264_vm12 = vcmask 261120  }
 0x37f   : > { %v4229_v58 = vsel %vm12263_vm4, %v4197_v8, %v6647_v33 }
 0x381   : > { %v10051_v9 = vpop.permute.xlu1 %6710 }
 0x382   : > { %v6712_v35 = vunpack.i.l.bf16 %v10051_v9  ;;  %v10060_v49 = vpop.permute.xlu0 %6700 }
 0x383   : > { %v6703_v2 = vunpack.i.h.bf16 %v10060_v49  ;;  %v6702_v22 = vunpack.i.l.bf16 %v10060_v49 }
 0x384   : > { %v10058_v17 = vsel %vm12246_vm7, %v2943_v29, %v6712_v35  ;;  %v6652_v29 = vunpack.i.l.bf16 %v10023_v1  ;;  %v4199_v1 = vsel %vm12260_vm11, %v4167_v0, %v6657_v59  ;;  %vm12261_vm7 = vmmov %vm12251_vm0 }
 0x385   : > { %v10063_v20 = vpop.permute.xlu1 %6715  ;;  %v4200_v41 = vsel %vm12261_vm7, %v4168_v57, %v6658_v25 }
 0x386   : > { %v6721_v56 = vpop.permute.xlu0 %6720 }
 0x387   : > { %v6723_v6 = vunpack.i.h.bf16 %v6721_v56  ;;  %v6722_v60 = vunpack.i.l.bf16 %v6721_v56 }
 0x389   : > { %v6731_v48 = vpop.permute.xlu1 %6730  ;;  %v10084_v15 = vsel %vm12250_vm1, %v4178_v24, %v6723_v6  ;;  %v10087_v55 = vsel %vm12251_vm0, %v4177_v23, %v6722_v60  ;;  %vm12265_vm1 = vmmov %vm12264_vm12  ;;  %v6708_v60 = vunpack.i.h.bf16 %v10043_v63 }
 0x38a   : > { %v6732_v36 = vunpack.i.l.bf16 %v6731_v48  ;;  %v6733_v32 = vunpack.i.h.bf16 %v6731_v48  ;;  %v6726_v21 = vpop.permute.xlu0 %6725  ;;  %vm12266_vm0 = vmmov %vm12263_vm4  ;;  %v6707_v48 = vunpack.i.l.bf16 %v10043_v63 }
 0x38b   : > { %v6728_v7 = vunpack.i.h.bf16 %v6726_v21  ;;  %v6727_v51 = vunpack.i.l.bf16 %v6726_v21  ;;  %v4231_v52 = vsel %vm12266_vm0, %v4199_v1, %v6667_v40  ;;  %vm12267_vm15 = vmmov %vm12266_vm0 }
 0x38c   : > { %v4179_v38 = vsel %vm12255_vm2, %v2947_v12, %v6732_v36  ;;  %v4180_v26 = vsel %vm12257_vm9, %v9842_v10, %v6733_v32  ;;  %v4230_v10 = vsel %vm12262_vm5, %v4198_v4, %v6648_v11  ;;  %v4261_v12 = vsel %vm12264_vm12, %v4229_v58, %v6652_v29  ;;  %vm12276_vm7 = vmmov %vm12265_vm1 }
 0x38d   : > { %v6736_v19 = vpop.permute.xlu1 %6735  ;;  %v4262_v27 = vsel %vm12265_vm1, %v4230_v10, %v6653_v13  ;;  %v4232_v6 = vsel %vm12267_vm15, %v4200_v41, %v6668_v42  ;;  %v4294_v3 = vsel %vm12269_vm3, %v4261_v12, %v6702_v22  ;;  %vm12270_vm2 = vcmask 392192   ;;  %vm12277_vm5 = vmmov %vm12265_vm1 }
 0x38e   : > { %v6738_v23 = vunpack.i.h.bf16 %v6736_v19  ;;  %v6737_v35 = vunpack.i.l.bf16 %v6736_v19  ;;  %v6746_v16 = vpop.permute.xlu0 %6745  ;;  %v4295_v54 = vsel %vm12268_vm14, %v4262_v27, %v6703_v2  ;;  %vm12271_vm10 = vmmov %vm12270_vm2  ;;  %vm12272_vm9 = vcmask 457728  }
 0x38f   : > { %v6748_v56 = vunpack.i.h.bf16 %v6746_v16  ;;  %v6747_v49 = vunpack.i.l.bf16 %v6746_v16  ;;  %v4328_v36 = vsel %vm12270_vm2, %v4295_v54, %v6728_v7  ;;  %v4327_v32 = vsel %vm12271_vm10, %v4294_v3, %v6727_v51  ;;  %vm12278_vm4 = vmmov %vm12269_vm3  ;;  %v6986_v54 = vld [vmem:[#allocation3 + $0xb7] sm:$0xff] }
 0x390   : > { %v10107_v14 = vsel %vm12258_vm6, %v4179_v38, %v6737_v35  ;;  %v10110_v5 = vsel %vm12259_vm8, %v4180_v26, %v6738_v23  ;;  %vm12273_vm6 = vmmov %vm12272_vm9  ;;  %vm12274_vm8 = vcmask 523264   ;;  %v4263_v19 = vsel %vm12276_vm7, %v4231_v52, %v6627_v34 }
 0x391   : > { %v6741_v44 = vpop.permute.xlu1 %6740  ;;  %v4360_v4 = vsel %vm12272_vm9, %v4327_v32, %v6747_v49  ;;  %v4361_v38 = vsel %vm12273_vm6, %v4328_v36, %v6748_v56  ;;  %vm12275_vm11 = vmmov %vm12274_vm8  ;;  %v4264_v33 = vsel %vm12277_vm5, %v4232_v6, %v6628_v30  ;;  %vm12282_vm15 = vcmask 588800  }
 0x392   : > { %v6756_v24 = vpop.permute.xlu0 %6755  ;;  %v6743_v21 = vunpack.i.h.bf16 %v6741_v44  ;;  %v6742_v8 = vunpack.i.l.bf16 %v6741_v44  ;;  %v4297_v35 = vsel %vm12278_vm4, %v4264_v33, %v6708_v60  ;;  %vm12279_vm12 = vmmov %vm12269_vm3  ;;  %v6608_v44 = vunpack.i.h.bf16 %v9953_v39  ;;  %v6985_v60 = vld [vmem:[#allocation3 + $0xaf] sm:$0xff] }
 0x393   : > { %v6758_v0 = vunpack.i.h.bf16 %v6756_v24  ;;  %v6757_v28 = vunpack.i.l.bf16 %v6756_v24  ;;  %v4296_v29 = vsel %vm12279_vm12, %v4263_v19, %v6707_v48  ;;  %vm12280_vm1 = vmmov %vm12270_vm2  ;;  %v6683_v58 = vunpack.i.h.bf16 %v10030_v50 }
 0x394   : > { %v4330_v40 = vsel %vm12280_vm1, %v4297_v35, %v6743_v21  ;;  %vm12281_vm0 = vmmov %vm12280_vm1  ;;  %v6682_v56 = vunpack.i.l.bf16 %v10030_v50  ;;  %v6678_v49 = vunpack.i.h.bf16 %v10039_v37  ;;  %v6677_v12 = vunpack.i.l.bf16 %v10039_v37 }
 0x395   : > { %v6751_v57 = vpop.permute.xlu1 %6750  ;;  %v4393_v63 = vsel %vm12274_vm8, %v4360_v4, %v6757_v28  ;;  %v4394_v25 = vsel %vm12275_vm11, %v4361_v38, %v6758_v0  ;;  %v4329_v26 = vsel %vm12281_vm0, %v4296_v29, %v6742_v8  ;;  %vm12283_vm14 = vmmov %vm12273_vm6  ;;  %v6688_v27 = vunpack.i.h.bf16 %v10041_v45 }
 0x396   : > { %v6753_v59 = vunpack.i.h.bf16 %v6751_v57  ;;  %v6752_v11 = vunpack.i.l.bf16 %v6751_v57  ;;  %v4417_v13 = vpack.c.bf16 %v4394_v25, %v4393_v63  ;;  %v6766_v23 = vpop.permute.xlu0 %6765  ;;  %vm12284_vm3 = vmmov %vm12273_vm6  ;;  %v6687_v52 = vunpack.i.l.bf16 %v10041_v45 }
 0x397   : > { %vm12285_vm2 = vmmov %vm12274_vm8  ;;  %vm12288_vm6 = vcmask 64512   ;;  %v2939_v39 = vsel %vm12138_vm13, %v6986_v54, 0.0  ;;  %v6768_v3 = vunpack.i.h.bf16 %v6766_v23  ;;  %v6767_v24 = vunpack.i.l.bf16 %v6766_v23 }
 0x398   : > { %5618 = vmatprep.mubr.msk.bf16.mxu1 %vm12282_vm15, %v4417_v13  ;;  %v4362_v34 = vsel %vm12283_vm14, %v4329_v26, %v6752_v11  ;;  %v4363_v31 = vsel %vm12284_vm3, %v4330_v40, %v6753_v59  ;;  %vm12286_vm10 = vmmov %vm12285_vm2  ;;  %v4170_v48 = vsel %vm12288_vm6, %v6985_v60, %v6608_v44  ;;  %vm12291_vm7 = vcmask 130048  }
 0x399   : > { %v6761_v42 = vpop.permute.xlu1 %6760  ;;  %vm12287_vm9 = vmmov %vm12282_vm15  ;;  %v4202_v45 = vsel %vm12291_vm7, %v4170_v48, %v6678_v49  ;;  %vm12295_vm12 = vcmask 195584   ;;  %vm12297_vm0 = vcmask 261120  }
 0x39a   : > { %v6763_v2 = vunpack.i.h.bf16 %v6761_v42  ;;  %v6762_v22 = vunpack.i.l.bf16 %v6761_v42  ;;  %v6776_v1 = vpop.permute.xlu0 %6775  ;;  %vm12289_vm8 = vmmov %vm12288_vm6  ;;  %v4234_v25 = vsel %vm12295_vm12, %v4202_v45, %v6768_v3 }
 0x39b   : > { %v4171_v50 = vsel %vm12289_vm8, %v2939_v39, %v6682_v56  ;;  %vm12290_vm11 = vmmov %vm12288_vm6  ;;  %v6778_v32 = vunpack.i.h.bf16 %v6776_v1  ;;  %v6777_v0 = vunpack.i.l.bf16 %v6776_v1  ;;  %vm12305_vm8 = vcmask 457728  }
 0x39c   : > { %v4395_v30 = vsel %vm12285_vm2, %v4362_v34, %v6762_v22  ;;  %v4396_v16 = vsel %vm12286_vm10, %v4363_v31, %v6763_v2  ;;  %v4172_v37 = vsel %vm12290_vm11, %v9621_v46, %v6683_v58  ;;  %vm12292_vm5 = vmmov %vm12291_vm7  ;;  %vm12301_vm2 = vcmask 326656  }
 0x39d   : > { %v4418_v41 = vpack.c.bf16 %v4396_v16, %v4395_v30  ;;  %v6771_v7 = vpop.permute.xlu1 %6770  ;;  %v4201_v28 = vsel %vm12292_vm5, %v9968_v18, %v6677_v12  ;;  %vm12293_vm4 = vmmov %vm12292_vm5  ;;  %vm12307_vm7 = vcmask 523264  }
 0x39e   : > { %v6786_v51 = vpop.permute.xlu0 %6785  ;;  %v6773_v57 = vunpack.i.h.bf16 %v6771_v7  ;;  %v6772_v4 = vunpack.i.l.bf16 %v6771_v7  ;;  %v4203_v47 = vsel %vm12293_vm4, %v4171_v50, %v6687_v52  ;;  %vm12294_vm13 = vmmov %vm12293_vm4 }
 0x39f   : > { %5619 = vmatmul.mubr.msk.bf16.gmra.mrb[16].mxu1 %vm12287_vm9, %v4418_v41  ;;  %v4204_v38 = vsel %vm12294_vm13, %v4172_v37, %v6688_v27  ;;  %v6788_v21 = vunpack.i.h.bf16 %v6786_v51  ;;  %v6787_v8 = vunpack.i.l.bf16 %v6786_v51  ;;  %vm12296_vm1 = vmmov %vm12295_vm12  ;;  %vm12303_vm9 = vcmask 392192  }
 0x3a0   : > { %v4233_v46 = vsel %vm12296_vm1, %v4201_v28, %v6767_v24  ;;  %vm12298_vm15 = vmmov %vm12297_vm0 }
 0x3a1   : > { %v6781_v10 = vpop.permute.xlu1 %6780  ;;  %v4265_v33 = vsel %vm12297_vm0, %v4233_v46, %v6777_v0  ;;  %v4266_v18 = vsel %vm12298_vm15, %v4234_v25, %v6778_v32  ;;  %vm12299_vm14 = vmmov %vm12296_vm1  ;;  %v6697_v25 = vunpack.i.l.bf16 %v10049_v53  ;;  %v6713_v46 = vunpack.i.h.bf16 %v10051_v9 }
 0x3a2   : > { %v6796_v6 = vpop.permute.xlu0 %6795  ;;  %v4236_v35 = vsel %vm12299_vm14, %v4204_v38, %v6773_v57  ;;  %vm12300_vm3 = vmmov %vm12296_vm1  ;;  %v6783_v42 = vunpack.i.h.bf16 %v6781_v10  ;;  %v6782_v40 = vunpack.i.l.bf16 %v6781_v10  ;;  %v4298_v26 = vsel %vm12301_vm2, %v4265_v33, %v6787_v8  ;;  %v6987_v33 = vld [vmem:[#allocation3 + $0xcf] sm:$0xff] }
 0x3a3   : > { %v6798_v59 = vunpack.i.h.bf16 %v6796_v6  ;;  %v6797_v11 = vunpack.i.l.bf16 %v6796_v6  ;;  %v4235_v29 = vsel %vm12300_vm3, %v4203_v47, %v6772_v4  ;;  %vm12302_vm10 = vmmov %vm12301_vm2  ;;  %vm12315_vm14 = vcmask 588800  }
 0x3a4   : > { %v4299_v2 = vsel %vm12302_vm10, %v4266_v18, %v6788_v21  ;;  %vm12304_vm6 = vmmov %vm12303_vm9  ;;  %v6673_v21 = vunpack.i.h.bf16 %v10028_v43 }
 0x3a5   : > { %v6791_v36 = vpop.permute.xlu1 %6790  ;;  %v4331_v30 = vsel %vm12303_vm9, %v4298_v26, %v6797_v11  ;;  %v4332_v16 = vsel %vm12304_vm6, %v4299_v2, %v6798_v59  ;;  %vm12306_vm11 = vmmov %vm12305_vm8  ;;  %v6718_v59 = vunpack.i.h.bf16 %v10063_v20  ;;  %v6717_v11 = vunpack.i.l.bf16 %v10063_v20 }
 0x3a6   : > { %v6806_v63 = vpop.permute.xlu0 %6805  ;;  %v6793_v22 = vunpack.i.h.bf16 %v6791_v36  ;;  %v6792_v34 = vunpack.i.l.bf16 %v6791_v36  ;;  %vm12308_vm5 = vmmov %vm12307_vm7 }
 0x3a7   : > { %v6808_v13 = vunpack.i.h.bf16 %v6806_v63  ;;  %v6807_v23 = vunpack.i.l.bf16 %v6806_v63  ;;  %vm12309_vm4 = vmmov %vm12297_vm0  ;;  %v6698_v63 = vunpack.i.h.bf16 %v10049_v53 }
 0x3a8   : > { %v4267_v52 = vsel %vm12309_vm4, %v4235_v29, %v6782_v40  ;;  %vm12310_vm13 = vmmov %vm12297_vm0 }
 0x3a9   : > { %v6801_v19 = vpop.permute.xlu1 %6800  ;;  %v4364_v51 = vsel %vm12305_vm8, %v4331_v30, %v6807_v23  ;;  %v4365_v44 = vsel %vm12306_vm11, %v4332_v16, %v6808_v13  ;;  %v4268_v6 = vsel %vm12310_vm13, %v4236_v35, %v6783_v42  ;;  %vm12311_vm12 = vmmov %vm12301_vm2  ;;  %vm12322_vm11 = vcmask 130048  }
 0x3aa   : > { %v6816_v31 = vpop.permute.xlu0 %6815  ;;  %v6803_v58 = vunpack.i.h.bf16 %v6801_v19  ;;  %v6802_v10 = vunpack.i.l.bf16 %v6801_v19  ;;  %v4300_v54 = vsel %vm12311_vm12, %v4267_v52, %v6792_v34  ;;  %vm12312_vm1 = vmmov %vm12301_vm2  ;;  %vm12327_vm12 = vcmask 195584  }
 0x3ab   : > { %v6818_v1 = vunpack.i.h.bf16 %v6816_v31  ;;  %v6817_v41 = vunpack.i.l.bf16 %v6816_v31  ;;  %v4301_v39 = vsel %vm12312_vm1, %v4268_v6, %v6793_v22  ;;  %vm12313_vm0 = vmmov %vm12304_vm6 }
 0x3ac   : > { %v4333_v24 = vsel %vm12313_vm0, %v4300_v54, %v6802_v10  ;;  %vm12314_vm15 = vmmov %vm12313_vm0  ;;  %vm12329_vm0 = vcmask 261120  }
 0x3ad   : > { %v6811_v7 = vpop.permute.xlu1 %6810  ;;  %v4397_v56 = vsel %vm12307_vm7, %v4364_v51, %v6817_v41  ;;  %v4398_v49 = vsel %vm12308_vm5, %v4365_v44, %v6818_v1  ;;  %v4334_v36 = vsel %vm12314_vm15, %v4301_v39, %v6803_v58  ;;  %vm12316_vm3 = vmmov %vm12305_vm8  ;;  %vm12321_vm8 = vcmask 64512  }
 0x3ae   : > { %v6813_v12 = vunpack.i.h.bf16 %v6811_v7  ;;  %v6812_v27 = vunpack.i.l.bf16 %v6811_v7  ;;  %v4419_v60 = vpack.c.bf16 %v4398_v49, %v4397_v56  ;;  %v6826_v48 = vpop.permute.xlu0 %6825  ;;  %vm12317_vm2 = vmmov %vm12316_vm3  ;;  %v4174_v18 = vsel %vm12321_vm8, %v6987_v33, %v6673_v21 }
 0x3af   : > { %vm12318_vm10 = vmmov %vm12308_vm5  ;;  %v6828_v13 = vunpack.i.h.bf16 %v6826_v48  ;;  %v6827_v23 = vunpack.i.l.bf16 %v6826_v48  ;;  %v4206_v43 = vsel %vm12322_vm11, %v4174_v18, %v6698_v63 }
 0x3b0   : > { %5622 = vmatprep.mubr.msk.bf16.mxu1 %vm12315_vm14, %v4419_v60  ;;  %v4366_v32 = vsel %vm12316_vm3, %v4333_v24, %v6812_v27  ;;  %v4367_v0 = vsel %vm12317_vm2, %v4334_v36, %v6813_v12  ;;  %vm12319_vm9 = vmmov %vm12308_vm5  ;;  %vm12333_vm2 = vcmask 326656  }
 0x3b1   : > { %v6821_v3 = vpop.permute.xlu1 %6820  ;;  %vm12320_vm6 = vmmov %vm12315_vm14  ;;  %v4238_v30 = vsel %vm12327_vm12, %v4206_v43, %v6828_v13 }
 0x3b2   : > { %v6823_v50 = vunpack.i.h.bf16 %v6821_v3  ;;  %v6822_v37 = vunpack.i.l.bf16 %v6821_v3  ;;  %v6836_v57 = vpop.permute.xlu0 %6835  ;;  %vm12323_vm7 = vmmov %vm12322_vm11 }
 0x3b3   : > { %v6838_v29 = vunpack.i.h.bf16 %v6836_v57  ;;  %v6837_v42 = vunpack.i.l.bf16 %v6836_v57  ;;  %v4205_v53 = vsel %vm12323_vm7, %v10037_v62, %v6697_v25  ;;  %vm12324_vm5 = vmmov %vm12321_vm8  ;;  %vm12337_vm8 = vcmask 457728  }
 0x3b4   : > { %v4399_v45 = vsel %vm12318_vm10, %v4366_v32, %v6822_v37  ;;  %v4400_v28 = vsel %vm12319_vm9, %v4367_v0, %v6823_v50  ;;  %v4176_v9 = vsel %vm12324_vm5, %v9734_v61, %v6713_v46  ;;  %vm12325_vm4 = vmmov %vm12323_vm7  ;;  %vm12335_vm9 = vcmask 392192  }
 0x3b5   : > { %v4420_v4 = vpack.c.bf16 %v4400_v28, %v4399_v45  ;;  %v6831_v47 = vpop.permute.xlu1 %6830  ;;  %v4207_v20 = vsel %vm12325_vm4, %v10058_v17, %v6717_v11  ;;  %vm12326_vm13 = vmmov %vm12325_vm4  ;;  %vm12339_vm7 = vcmask 523264  }
 0x3b6   : > { %v6846_v38 = vpop.permute.xlu0 %6845  ;;  %v6833_v40 = vunpack.i.h.bf16 %v6831_v47  ;;  %v6832_v26 = vunpack.i.l.bf16 %v6831_v47  ;;  %v4208_v2 = vsel %vm12326_vm13, %v4176_v9, %v6718_v59  ;;  %vm12328_vm1 = vmmov %vm12327_vm12 }
 0x3b7   : > { %5623 = vmatmul.mubr.msk.bf16.gmra.mrb[20].mxu1 %vm12320_vm6, %v4420_v4  ;;  %v6848_v22 = vunpack.i.h.bf16 %v6846_v38  ;;  %v6847_v34 = vunpack.i.l.bf16 %v6846_v38  ;;  %v4237_v16 = vsel %vm12328_vm1, %v4205_v53, %v6827_v23  ;;  %vm12330_vm15 = vmmov %vm12329_vm0 }
 0x3b8   : > { %v4269_v7 = vsel %vm12329_vm0, %v4237_v16, %v6837_v42  ;;  %v4270_v61 = vsel %vm12330_vm15, %v4238_v30, %v6838_v29  ;;  %vm12331_vm14 = vmmov %vm12328_vm1 }
 0x3b9   : > { %v6841_v8 = vpop.permute.xlu1 %6840  ;;  %v4240_v17 = vsel %vm12331_vm14, %v4208_v2, %v6833_v40  ;;  %vm12332_vm3 = vmmov %vm12328_vm1  ;;  %v4302_v49 = vsel %vm12333_vm2, %v4269_v7, %v6847_v34  ;;  %vm12347_vm14 = vcmask 588800  }
 0x3ba   : > { %v6856_v19 = vpop.permute.xlu0 %6855  ;;  %v4239_v58 = vsel %vm12332_vm3, %v4207_v20, %v6832_v26  ;;  %v6843_v10 = vunpack.i.h.bf16 %v6841_v8  ;;  %v6842_v56 = vunpack.i.l.bf16 %v6841_v8  ;;  %vm12334_vm10 = vmmov %vm12333_vm2 }
 0x3bb   : > { %v6858_v1 = vunpack.i.h.bf16 %v6856_v19  ;;  %v6857_v41 = vunpack.i.l.bf16 %v6856_v19  ;;  %v4303_v12 = vsel %vm12334_vm10, %v4270_v61, %v6848_v22  ;;  %vm12336_vm6 = vmmov %vm12335_vm9 }
 0x3bc   : > { %vm12338_vm11 = vmmov %vm12337_vm8 }
 0x3bd   : > { %v6851_v35 = vpop.permute.xlu1 %6850  ;;  %v4335_v60 = vsel %vm12335_vm9, %v4302_v49, %v6857_v41  ;;  %v4336_v48 = vsel %vm12336_vm6, %v4303_v12, %v6858_v1  ;;  %vm12340_vm5 = vmmov %vm12339_vm7 }
 0x3be   : > { %v6866_v31 = vpop.permute.xlu0 %6865  ;;  %v6853_v27 = vunpack.i.h.bf16 %v6851_v35  ;;  %v6852_v52 = vunpack.i.l.bf16 %v6851_v35  ;;  %vm12341_vm4 = vmmov %vm12329_vm0 }
 0x3bf   : > { %v6868_v51 = vunpack.i.h.bf16 %v6866_v31  ;;  %v6867_v44 = vunpack.i.l.bf16 %v6866_v31  ;;  %v4271_v57 = vsel %vm12341_vm4, %v4239_v58, %v6842_v56  ;;  %vm12342_vm13 = vmmov %vm12329_vm0 }
 0x3c0   : > { %v4272_v4 = vsel %vm12342_vm13, %v4240_v17, %v6843_v10  ;;  %vm12343_vm12 = vmmov %vm12333_vm2 }
 0x3c1   : > { %v6861_v62 = vpop.permute.xlu1 %6860  ;;  %v4368_v24 = vsel %vm12337_vm8, %v4335_v60, %v6867_v44  ;;  %v4369_v36 = vsel %vm12338_vm11, %v4336_v48, %v6868_v51  ;;  %v4304_v21 = vsel %vm12343_vm12, %v4271_v57, %v6852_v52  ;;  %vm12344_vm1 = vmmov %vm12333_vm2 }
 0x3c2   : > { %v6876_v6 = vpop.permute.xlu0 %6875  ;;  %v6863_v50 = vunpack.i.h.bf16 %v6861_v62  ;;  %v6862_v37 = vunpack.i.l.bf16 %v6861_v62  ;;  %v4305_v8 = vsel %vm12344_vm1, %v4272_v4, %v6853_v27  ;;  %vm12345_vm0 = vmmov %vm12336_vm6 }
 0x3c3   : > { %v6878_v54 = vunpack.i.h.bf16 %v6876_v6  ;;  %v6877_v39 = vunpack.i.l.bf16 %v6876_v6  ;;  %vm12346_vm15 = vmmov %vm12345_vm0 }
 0x3c4   : > { %v4338_v25 = vsel %vm12345_vm0, %v4305_v8, %v6863_v50  ;;  %v4337_v46 = vsel %vm12346_vm15, %v4304_v21, %v6862_v37  ;;  %vm12348_vm3 = vmmov %vm12337_vm8  ;;  %vm12353_vm8 = vcmask 195584  }
 0x3c5   : > { %v6871_v3 = vpop.permute.xlu1 %6870  ;;  %v4401_v32 = vsel %vm12339_vm7, %v4368_v24, %v6877_v39  ;;  %v4402_v0 = vsel %vm12340_vm5, %v4369_v36, %v6878_v54  ;;  %vm12349_vm2 = vmmov %vm12348_vm3 }
 0x3c6   : > { %v6873_v45 = vunpack.i.h.bf16 %v6871_v3  ;;  %v6872_v28 = vunpack.i.l.bf16 %v6871_v3  ;;  %v4421_v47 = vpack.c.bf16 %v4402_v0, %v4401_v32  ;;  %v6886_v38 = vpop.permute.xlu0 %6885  ;;  %vm12350_vm10 = vmmov %vm12340_vm5 }
 0x3c7   : > { %vm12351_vm9 = vmmov %vm12340_vm5  ;;  %v6888_v9 = vunpack.i.h.bf16 %v6886_v38  ;;  %v6887_v40 = vunpack.i.l.bf16 %v6886_v38 }
 0x3c8   : > { %5626 = vmatprep.mubr.msk.bf16.mxu1 %vm12347_vm14, %v4421_v47  ;;  %v4370_v19 = vsel %vm12348_vm3, %v4337_v46, %v6872_v28  ;;  %v4371_v33 = vsel %vm12349_vm2, %v4338_v25, %v6873_v45  ;;  %vm12352_vm6 = vmmov %vm12347_vm14 }
 0x3c9   : > { %v6881_v63 = vpop.permute.xlu1 %6880  ;;  %v4242_v1 = vsel %vm12353_vm8, %v10084_v15, %v6888_v9  ;;  %vm12354_vm11 = vmmov %vm12353_vm8 }
 0x3ca   : > { %v6883_v59 = vunpack.i.h.bf16 %v6881_v63  ;;  %v6882_v11 = vunpack.i.l.bf16 %v6881_v63  ;;  %v6896_v23 = vpop.permute.xlu0 %6895  ;;  %v4241_v41 = vsel %vm12354_vm11, %v10087_v55, %v6887_v40  ;;  %vm12355_vm7 = vmmov %vm12341_vm4 }
 0x3cb   : > { %v6898_v20 = vunpack.i.h.bf16 %v6896_v23  ;;  %v6897_v2 = vunpack.i.l.bf16 %v6896_v23  ;;  %vm12356_vm5 = vmmov %vm12341_vm4  ;;  %v10267_v23 = vld [vmem:[%s11069_s6] ss:$0 sm:$0xff] }
 0x3cc   : > { %v4403_v18 = vsel %vm12350_vm10, %v4370_v19, %v6882_v11  ;;  %v4404_v13 = vsel %vm12351_vm9, %v4371_v33, %v6883_v59  ;;  %vm12357_vm4 = vmmov %vm12353_vm8 }
 0x3cd   : > { %v4422_v35 = vpack.c.bf16 %v4404_v13, %v4403_v18  ;;  %v6891_v43 = vpop.permute.xlu1 %6890  ;;  %v4273_v51 = vsel %vm12355_vm7, %v4241_v41, %v6897_v2  ;;  %v4274_v44 = vsel %vm12356_vm5, %v4242_v1, %v6898_v20  ;;  %vm12358_vm13 = vmmov %vm12357_vm4  ;;  %v10262_v18 = vld [vmem:[%s11068_s5] ss:$0 sm:$0xff] }
 0x3ce   : > { %v6906_v29 = vpop.permute.xlu0 %6905  ;;  %v6893_v22 = vunpack.i.h.bf16 %v6891_v43  ;;  %v6892_v34 = vunpack.i.l.bf16 %v6891_v43  ;;  %vm12359_vm12 = vmmov %vm12344_vm1 }
 0x3cf   : > { %5627 = vmatmul.mubr.msk.bf16.gmra.mrb[24].mxu1 %vm12352_vm6, %v4422_v35  ;;  %v6908_v31 = vunpack.i.h.bf16 %v6906_v29  ;;  %v6907_v30 = vunpack.i.l.bf16 %v6906_v29  ;;  %vm12360_vm15 = vmmov %vm12345_vm0 }
 0x3d0   : > { %v4243_v10 = vsel %vm12357_vm4, %v10107_v14, %v6892_v34  ;;  %v4244_v56 = vsel %vm12358_vm13, %v10110_v5, %v6893_v22  ;;  %vm12361_vm14 = vmmov %vm12349_vm2  ;;  %vm12371_vm4 = vcmask 588800  }
 0x3d1   : > { %v6901_v42 = vpop.permute.xlu1 %6900  ;;  %v4306_v12 = vsel %vm12359_vm12, %v4273_v51, %v6907_v30  ;;  %v4307_v55 = vsel %vm12344_vm1, %v4274_v44, %v6908_v31  ;;  %vm12362_vm3 = vmmov %vm12349_vm2 }
 0x3d2   : > { %v6916_v53 = vpop.permute.xlu0 %6915  ;;  %v6903_v49 = vunpack.i.h.bf16 %v6901_v42  ;;  %v6902_v15 = vunpack.i.l.bf16 %v6901_v42  ;;  %vm12363_vm2 = vmmov %vm12351_vm9 }
 0x3d3   : > { %v6918_v62 = vunpack.i.h.bf16 %v6916_v53  ;;  %v6917_v7 = vunpack.i.l.bf16 %v6916_v53  ;;  %vm12364_vm10 = vmmov %vm12363_vm2 }
 0x3d4   : > { %vm12365_vm9 = vmmov %vm12356_vm5 }
 0x3d5   : > { %v6911_v26 = vpop.permute.xlu1 %6910  ;;  %v4339_v60 = vsel %vm12345_vm0, %v4306_v12, %v6917_v7  ;;  %v4340_v48 = vsel %vm12360_vm15, %v4307_v55, %v6918_v62  ;;  %v4275_v45 = vsel %vm12365_vm9, %v4243_v10, %v6902_v15  ;;  %vm12366_vm6 = vmmov %vm12356_vm5  ;;  %vm4814_vm9 = vcmask 1045509  }
 0x3d6   : > { %v6926_v16 = vpop.permute.xlu0 %6925  ;;  %v6913_v27 = vunpack.i.h.bf16 %v6911_v26  ;;  %v6912_v52 = vunpack.i.l.bf16 %v6911_v26  ;;  %v4276_v28 = vsel %vm12366_vm6, %v4244_v56, %v6903_v49  ;;  %vm12367_vm8 = vmmov %vm12344_vm1  ;;  %vm4817_vm6 = vcmask 1046534  }
 0x3d7   : > { %v6928_v17 = vunpack.i.h.bf16 %v6926_v16  ;;  %v6927_v58 = vunpack.i.l.bf16 %v6926_v16  ;;  %vm12368_vm11 = vmmov %vm12344_vm1 }
 0x3d8   : > { %v4308_v4 = vsel %vm12367_vm8, %v4275_v45, %v6912_v52  ;;  %v4309_v47 = vsel %vm12368_vm11, %v4276_v28, %v6913_v27  ;;  %vm12369_vm7 = vmmov %vm12345_vm0  ;;  %vm4820_vm8 = vcmask 1047559   ;;  %vm12377_vm11 = vcmask 64512  }
 0x3d9   : > { %v6921_v61 = vpop.permute.xlu1 %6920  ;;  %v4372_v14 = vsel %vm12361_vm14, %v4339_v60, %v6927_v58  ;;  %v4373_v5 = vsel %vm12362_vm3, %v4340_v48, %v6928_v17  ;;  %vm12370_vm5 = vmmov %vm12345_vm0  ;;  %vm4802_vm14 = vcmask 1041409  }
 0x3da   : > { %v6936_v6 = vpop.permute.xlu0 %6935  ;;  %v6923_v24 = vunpack.i.h.bf16 %v6921_v61  ;;  %v6922_v36 = vunpack.i.l.bf16 %v6921_v61  ;;  %vm12372_vm13 = vmmov %vm12362_vm3 }
 0x3db   : > { %v6938_v54 = vunpack.i.h.bf16 %v6936_v6  ;;  %v6937_v39 = vunpack.i.l.bf16 %v6936_v6  ;;  %vm12373_vm12 = vmmov %vm12362_vm3  ;;  %vm4805_vm3 = vcmask 1042434  }
 0x3dc   : > { %v4341_v21 = vsel %vm12369_vm7, %v4308_v4, %v6922_v36  ;;  %v4342_v8 = vsel %vm12370_vm5, %v4309_v47, %v6923_v24  ;;  %vm12374_vm1 = vmmov %vm12363_vm2  ;;  %vm12378_vm7 = vcmask 130048   ;;  %vm12379_vm5 = vcmask 195584  }
 0x3dd   : > { %v6931_v3 = vpop.permute.xlu1 %6930  ;;  %v4405_v50 = vsel %vm12363_vm2, %v4372_v14, %v6937_v39  ;;  %v4406_v37 = vsel %vm12364_vm10, %v4373_v5, %v6938_v54  ;;  %vm12375_vm0 = vmmov %vm12374_vm1  ;;  %vm4808_vm2 = vcmask 1043459   ;;  %vm4811_vm10 = vcmask 1044484  }
 0x3de   : > { %v6933_v32 = vunpack.i.h.bf16 %v6931_v3  ;;  %v6932_v0 = vunpack.i.l.bf16 %v6931_v3  ;;  %v4423_v57 = vpack.c.bf16 %v4406_v37, %v4405_v50  ;;  %vm12376_vm15 = vmmov %vm12371_vm4 }
 0x3e0   : > { %5630 = vmatprep.mubr.msk.bf16.mxu1 %vm12371_vm4, %v4423_v57  ;;  %v4374_v46 = vsel %vm12372_vm13, %v4341_v21, %v6932_v0  ;;  %v4375_v59 = vsel %vm12373_vm12, %v4342_v8, %v6933_v32  ;;  %vm12380_vm4 = vcmask 261120   ;;  %vm12381_vm13 = vcmask 326656  }
 0x3e1   : > { %v6941_v38 = vpop.permute.xlu1 %6940  ;;  %vm12382_vm12 = vcmask 392192  }
 0x3e2   : > { %v6943_v63 = vunpack.i.h.bf16 %v6941_v38  ;;  %v6942_v25 = vunpack.i.l.bf16 %v6941_v38 }
 0x3e4   : > { %v4407_v11 = vsel %vm12374_vm1, %v4374_v46, %v6942_v25  ;;  %v4408_v19 = vsel %vm12375_vm0, %v4375_v59, %v6943_v63  ;;  %v5604_v13 = vpop.f32.mrb[0].mxu1  ;;  %vm12383_vm1 = vcmask 457728   ;;  %vm5382_vm0 = vcmask 654336  }
 0x3e5   : > { %v4424_v33 = vpack.c.bf16 %v4408_v19, %v4407_v11  ;;  %v4684_v35 = vmul.f32 %v5604_v13, %v10262_v18  ;;  %v4548_v43 = vpop.f32.mrb[1].mxu1 }
 0x3e6   : > { %v4682_v29 = vmul.f32 %v10262_v18, %v4548_v43  ;;  %v5605_v42 = vpop.f32.mrb[2].mxu1 }
 0x3e7   : > { %5631 = vmatmul.mubr.msk.bf16.gmra.mrb[28].mxu1 %vm12376_vm15, %v4424_v33  ;;  %v4723_v53 = vadd.f32 %v10267_v23, %v4684_v35  ;;  %v4685_v9 = vmul.f32 %v5605_v42, %v10262_v18  ;;  %v4551_v40 = vpop.f32.mrb[3].mxu1  ;;  %vm12384_vm15 = vcmask 523264  }
 0x3e8   : > { %v4721_v26 = vadd.f32 %v10267_v23, %v4682_v29  ;;  %v4683_v20 = vmul.f32 %v10262_v18, %v4551_v40 }
 0x3e9   : > { %v4755_v2 = vmax.f32 %v4723_v53, 0.0  ;;  %v4724_v22 = vadd.f32 %v10267_v23, %v4685_v9 }
 0x3ea   : > { %v4753_v34 = vmax.f32 %v4721_v26, 0.0  ;;  %v4722_v31 = vadd.f32 %v10267_v23, %v4683_v20 }
 0x3eb   : > { %v4756_v30 = vmax.f32 %v4724_v22, 0.0  ;;  %v5009_v16 = vrot.slane %v4755_v2, 5  ;;  %v4873_v1 = vrot.slane %v4755_v2, 1  ;;  %v4907_v41 = vrot.slane %v4755_v2, 2 }
 0x3ec   : > { %v4754_v62 = vmax.f32 %v4722_v31, 0.0  ;;  %v5008_v7 = vrot.slane %v4753_v34, 6  ;;  %v4838_v61 = vrot.slane %v4753_v34, 1  ;;  %v4872_v51 = vrot.slane %v4753_v34, 2 }
 0x3ed   : > { %v4906_v44 = vrot.slane %v4753_v34, 3  ;;  %v4940_v17 = vrot.slane %v4753_v34, 4  ;;  %v4941_v58 = vrot.slane %v4755_v2, 3  ;;  %v4974_v10 = vrot.slane %v4753_v34, 5 }
 0x3ee   : > { %v10278_v56 = vsel %vm4802_vm14, %v5009_v16, %v5008_v7  ;;  %v10281_v49 = vsel %vm4802_vm14, %v4755_v2, %v4838_v61  ;;  %v4874_v15 = vsel %vm4802_vm14, %v4873_v1, %v4872_v51  ;;  %v4975_v12 = vrot.slane %v4755_v2, 4 }
 0x3ef   : > { %v10285_v55 = vsel %vm4802_vm14, %v4907_v41, %v4906_v44  ;;  %v10288_v27 = vsel %vm4802_vm14, %v4941_v58, %v4940_v17  ;;  %v5042_v52 = vrot.slane %v4753_v34, 7  ;;  %v5043_v6 = vrot.slane %v4755_v2, 6 }
 0x3f0   : > { %v10291_v60 = vsel %vm4802_vm14, %v4975_v12, %v4974_v10  ;;  %v5296_v48 = vrot.slane %v4754_v62, 6  ;;  %v5297_v54 = vrot.slane %v4756_v30, 5  ;;  %v5092_v39 = vrot.slane %v4756_v30, 7 }
 0x3f1   : > { %v10294_v3 = vsel %vm4802_vm14, %v5043_v6, %v5042_v52  ;;  %v5126_v14 = vrot.slane %v4754_v62, 1  ;;  %v5160_v5 = vrot.slane %v4754_v62, 2  ;;  %v5161_v24 = vrot.slane %v4756_v30, 1 }
 0x3f2   : > { %v10297_v36 = vsel %vm4802_vm14, %v5297_v54, %v5296_v48  ;;  %v10300_v50 = vsel %vm4802_vm14, %v5092_v39, %v4754_v62  ;;  %v5194_v37 = vrot.slane %v4754_v62, 3  ;;  %v5195_v32 = vrot.slane %v4756_v30, 2 }
 0x3f3   : > { %v10303_v0 = vsel %vm4802_vm14, %v4756_v30, %v5126_v14  ;;  %v10306_v45 = vsel %vm4802_vm14, %v5161_v24, %v5160_v5  ;;  %v5228_v28 = vrot.slane %v4754_v62, 4  ;;  %v5229_v57 = vrot.slane %v4756_v30, 3 }
 0x3f4   : > { %v10309_v4 = vsel %vm4802_vm14, %v5195_v32, %v5194_v37  ;;  %v5262_v47 = vrot.slane %v4754_v62, 5  ;;  %v5263_v38 = vrot.slane %v4756_v30, 4  ;;  %v5330_v21 = vrot.slane %v4754_v62, 7 }
 0x3f5   : > { %v10312_v8 = vsel %vm4802_vm14, %v5229_v57, %v5228_v28  ;;  %v5331_v63 = vrot.slane %v4756_v30, 6  ;;  %v4801_v25 = vrot.slane %v4755_v2, 7 }
 0x3f6   : > { %v10315_v46 = vsel %vm4802_vm14, %v5263_v38, %v5262_v47 }
 0x3f7   : > { %v10318_v59 = vsel %vm4802_vm14, %v5331_v63, %v5330_v21  ;;  %v10321_v11 = vsel %vm4802_vm14, %v4801_v25, %v4753_v34 }
 0x404   : > { %v5608_v19 = vpop.f32.mrb[4].mxu1 }
 0x405   : > { %v4688_v33 = vmul.f32 %v5608_v19, %v10262_v18  ;;  %v4564_v13 = vpop.f32.mrb[5].mxu1 }
 0x406   : > { %v4686_v35 = vmul.f32 %v10262_v18, %v4564_v13  ;;  %v5609_v43 = vpop.f32.mrb[6].mxu1 }
 0x407   : > { %v4727_v29 = vadd.f32 %v10267_v23, %v4688_v33  ;;  %v4689_v42 = vmul.f32 %v5609_v43, %v10262_v18  ;;  %v4567_v53 = vpop.f32.mrb[7].mxu1 }
 0x408   : > { %v4725_v9 = vadd.f32 %v10267_v23, %v4686_v35  ;;  %v4687_v40 = vmul.f32 %v10262_v18, %v4567_v53 }
 0x409   : > { %v10329_v26 = vmax.f32 %v4727_v29, 0.0  ;;  %v4728_v20 = vadd.f32 %v10267_v23, %v4689_v42 }
 0x40a   : > { %v10332_v2 = vmax.f32 %v4725_v9, 0.0  ;;  %v4726_v22 = vadd.f32 %v10267_v23, %v4687_v40 }
 0x40b   : > { %v4760_v34 = vmax.f32 %v4728_v20, 0.0  ;;  %v5013_v31 = vrot.slane %v10329_v26, 3  ;;  %v4842_v30 = vrot.slane %v10329_v26, 6  ;;  %v4876_v16 = vrot.slane %v10329_v26, 7 }
 0x40c   : > { %v4758_v1 = vmax.f32 %v4726_v22, 0.0  ;;  %v5011_v41 = vrot.slane %v10332_v2, 4  ;;  %v4840_v62 = vrot.slane %v10332_v2, 7  ;;  %v4875_v7 = vsel %vm4805_vm3, %v10332_v2, %v4874_v15 }
 0x40d   : > { %v10343_v61 = vsel %vm4808_vm2, %v4876_v16, %v4875_v7  ;;  %v4909_v51 = vrot.slane %v10332_v2, 1  ;;  %v4943_v44 = vrot.slane %v10332_v2, 2  ;;  %v4945_v17 = vrot.slane %v10329_v26, 1 }
 0x40e   : > { %v5012_v58 = vsel %vm4805_vm3, %v5011_v41, %v10278_v56  ;;  %v4841_v10 = vsel %vm4805_vm3, %v4840_v62, %v10281_v49  ;;  %v4977_v12 = vrot.slane %v10332_v2, 3  ;;  %v4979_v52 = vrot.slane %v10329_v26, 2 }
 0x40f   : > { %v10355_v15 = vsel %vm4808_vm2, %v5013_v31, %v5012_v58  ;;  %v10358_v6 = vsel %vm4808_vm2, %v4842_v30, %v4841_v10  ;;  %v4910_v48 = vsel %vm4805_vm3, %v4909_v51, %v10285_v55  ;;  %v4944_v54 = vsel %vm4805_vm3, %v4943_v44, %v10288_v27 }
 0x410   : > { %v10366_v56 = vsel %vm4808_vm2, %v10329_v26, %v4910_v48  ;;  %v10369_v49 = vsel %vm4808_vm2, %v4945_v17, %v4944_v54  ;;  %v4978_v39 = vsel %vm4805_vm3, %v4977_v12, %v10291_v60  ;;  %v5045_v14 = vrot.slane %v10332_v2, 5 }
 0x411   : > { %v10375_v5 = vsel %vm4808_vm2, %v4979_v52, %v4978_v39  ;;  %v5047_v55 = vrot.slane %v10329_v26, 4  ;;  %v5299_v24 = vrot.slane %v4758_v1, 4  ;;  %v5301_v37 = vrot.slane %v4760_v34, 3 }
 0x412   : > { %v5046_v27 = vsel %vm4805_vm3, %v5045_v14, %v10294_v3  ;;  %v5094_v32 = vrot.slane %v4758_v1, 6  ;;  %v5096_v28 = vrot.slane %v4760_v34, 5  ;;  %v5128_v57 = vrot.slane %v4758_v1, 7 }
 0x413   : > { %v10381_v47 = vsel %vm4808_vm2, %v5047_v55, %v5046_v27  ;;  %v5300_v60 = vsel %vm4805_vm3, %v5299_v24, %v10297_v36  ;;  %v5130_v38 = vrot.slane %v4760_v34, 6  ;;  %v5163_v21 = vsel %vm4805_vm3, %v4758_v1, %v10306_v45 }
 0x414   : > { %v10388_v63 = vsel %vm4808_vm2, %v5301_v37, %v5300_v60  ;;  %v5095_v25 = vsel %vm4805_vm3, %v5094_v32, %v10300_v50  ;;  %v5129_v3 = vsel %vm4805_vm3, %v5128_v57, %v10303_v0  ;;  %v5164_v19 = vrot.slane %v4760_v34, 7 }
 0x415   : > { %v10395_v33 = vsel %vm4808_vm2, %v5096_v28, %v5095_v25  ;;  %v10398_v13 = vsel %vm4808_vm2, %v5130_v38, %v5129_v3  ;;  %v5197_v36 = vrot.slane %v4758_v1, 1  ;;  %v5231_v35 = vrot.slane %v4758_v1, 2 }
 0x416   : > { %v10401_v45 = vsel %vm4808_vm2, %v5164_v19, %v5163_v21  ;;  %v5233_v43 = vrot.slane %v4760_v34, 1  ;;  %v5265_v29 = vrot.slane %v4758_v1, 3  ;;  %v5267_v42 = vrot.slane %v4760_v34, 2 }
 0x417   : > { %v5198_v50 = vsel %vm4805_vm3, %v5197_v36, %v10309_v4  ;;  %v5232_v0 = vsel %vm4805_vm3, %v5231_v35, %v10312_v8  ;;  %v5333_v53 = vrot.slane %v4758_v1, 5  ;;  %v5335_v9 = vrot.slane %v4760_v34, 4 }
 0x418   : > { %v10408_v40 = vsel %vm4808_vm2, %v4760_v34, %v5198_v50  ;;  %v10411_v20 = vsel %vm4808_vm2, %v5233_v43, %v5232_v0  ;;  %v5266_v22 = vsel %vm4805_vm3, %v5265_v29, %v10315_v46  ;;  %v4804_v31 = vrot.slane %v10332_v2, 6 }
 0x419   : > { %v10417_v30 = vsel %vm4808_vm2, %v5267_v42, %v5266_v22  ;;  %v5334_v4 = vsel %vm4805_vm3, %v5333_v53, %v10318_v59  ;;  %v4807_v8 = vrot.slane %v10329_v26, 5 }
 0x41a   : > { %v10423_v16 = vsel %vm4808_vm2, %v5335_v9, %v5334_v4  ;;  %v4806_v34 = vsel %vm4805_vm3, %v4804_v31, %v10321_v11 }
 0x41b   : > { %v10428_v1 = vsel %vm4808_vm2, %v4807_v8, %v4806_v34 }
 0x429   : > { %v5612_v46 = vpop.f32.mrb[8].mxu1 }
 0x42a   : > { %v4692_v2 = vmul.f32 %v5612_v46, %v10262_v18  ;;  %v4580_v41 = vpop.f32.mrb[9].mxu1 }
 0x42b   : > { %v4690_v62 = vmul.f32 %v10262_v18, %v4580_v41  ;;  %v5613_v7 = vpop.f32.mrb[10].mxu1 }
 0x42c   : > { %v4731_v59 = vadd.f32 %v10267_v23, %v4692_v2  ;;  %v4693_v26 = vmul.f32 %v5613_v7, %v10262_v18  ;;  %v4583_v51 = vpop.f32.mrb[11].mxu1 }
 0x42d   : > { %v4729_v44 = vadd.f32 %v10267_v23, %v4690_v62  ;;  %v4691_v17 = vmul.f32 %v10262_v18, %v4583_v51 }
 0x42e   : > { %v10436_v11 = vmax.f32 %v4731_v59, 0.0  ;;  %v4732_v58 = vadd.f32 %v10267_v23, %v4693_v26 }
 0x42f   : > { %v10439_v10 = vmax.f32 %v4729_v44, 0.0  ;;  %v4730_v12 = vadd.f32 %v10267_v23, %v4691_v17 }
 0x430   : > { %v4764_v52 = vmax.f32 %v4732_v58, 0.0  ;;  %v5017_v48 = vrot.slane %v10436_v11, 1  ;;  %v4846_v54 = vrot.slane %v10436_v11, 4  ;;  %v4880_v39 = vrot.slane %v10436_v11, 5 }
 0x431   : > { %v4762_v14 = vmax.f32 %v4730_v12, 0.0  ;;  %v5015_v55 = vrot.slane %v10439_v10, 2  ;;  %v4844_v24 = vrot.slane %v10439_v10, 5  ;;  %v4878_v37 = vrot.slane %v10439_v10, 6 }
 0x432   : > { %v4912_v27 = vrot.slane %v10439_v10, 7  ;;  %v4914_v32 = vrot.slane %v10436_v11, 6  ;;  %v4947_v28 = vsel %vm4811_vm10, %v10439_v10, %v10369_v49  ;;  %v4948_v57 = vrot.slane %v10436_v11, 7 }
 0x433   : > { %v5016_v60 = vsel %vm4811_vm10, %v5015_v55, %v10355_v15  ;;  %v4845_v38 = vsel %vm4811_vm10, %v4844_v24, %v10358_v6  ;;  %v4879_v21 = vsel %vm4811_vm10, %v4878_v37, %v10343_v61  ;;  %v4981_v25 = vrot.slane %v10439_v10, 1 }
 0x434   : > { %v10462_v3 = vsel %vm4814_vm9, %v5017_v48, %v5016_v60  ;;  %v10465_v19 = vsel %vm4814_vm9, %v4846_v54, %v4845_v38  ;;  %v10468_v49 = vsel %vm4814_vm9, %v4880_v39, %v4879_v21  ;;  %v4913_v15 = vsel %vm4811_vm10, %v4912_v27, %v10366_v56 }
 0x435   : > { %v10473_v36 = vsel %vm4814_vm9, %v4914_v32, %v4913_v15  ;;  %v10476_v6 = vsel %vm4814_vm9, %v4948_v57, %v4947_v28  ;;  %v4982_v61 = vsel %vm4811_vm10, %v4981_v25, %v10375_v5  ;;  %v5049_v35 = vrot.slane %v10439_v10, 3 }
 0x436   : > { %v10483_v43 = vsel %vm4814_vm9, %v10436_v11, %v4982_v61  ;;  %v5051_v29 = vrot.slane %v10436_v11, 2  ;;  %v5303_v42 = vrot.slane %v4762_v14, 2  ;;  %v5305_v50 = vrot.slane %v4764_v52, 1 }
 0x437   : > { %v5050_v56 = vsel %vm4811_vm10, %v5049_v35, %v10381_v47  ;;  %v5098_v0 = vrot.slane %v4762_v14, 4  ;;  %v5100_v53 = vrot.slane %v4764_v52, 3  ;;  %v5132_v9 = vrot.slane %v4762_v14, 5 }
 0x438   : > { %v10489_v22 = vsel %vm4814_vm9, %v5051_v29, %v5050_v56  ;;  %v5304_v5 = vsel %vm4811_vm10, %v5303_v42, %v10388_v63  ;;  %v5134_v31 = vrot.slane %v4764_v52, 4  ;;  %v5166_v4 = vrot.slane %v4762_v14, 6 }
 0x439   : > { %v10494_v8 = vsel %vm4814_vm9, %v5305_v50, %v5304_v5  ;;  %v5099_v34 = vsel %vm4811_vm10, %v5098_v0, %v10395_v33  ;;  %v5133_v47 = vsel %vm4811_vm10, %v5132_v9, %v10398_v13  ;;  %v5168_v46 = vrot.slane %v4764_v52, 5 }
 0x43a   : > { %v10501_v2 = vsel %vm4814_vm9, %v5100_v53, %v5099_v34  ;;  %v10504_v41 = vsel %vm4814_vm9, %v5134_v31, %v5133_v47  ;;  %v5167_v63 = vsel %vm4811_vm10, %v5166_v4, %v10401_v45  ;;  %v5200_v62 = vrot.slane %v4762_v14, 7 }
 0x43b   : > { %v10509_v7 = vsel %vm4814_vm9, %v5168_v46, %v5167_v63  ;;  %v5202_v59 = vrot.slane %v4764_v52, 6  ;;  %v5235_v33 = vsel %vm4811_vm10, %v4762_v14, %v10411_v20  ;;  %v5236_v26 = vrot.slane %v4764_v52, 7 }
 0x43c   : > { %v5201_v13 = vsel %vm4811_vm10, %v5200_v62, %v10408_v40  ;;  %v5269_v51 = vrot.slane %v4762_v14, 1  ;;  %v5337_v44 = vrot.slane %v4762_v14, 3  ;;  %v5339_v45 = vrot.slane %v4764_v52, 2 }
 0x43d   : > { %v10516_v17 = vsel %vm4814_vm9, %v5202_v59, %v5201_v13  ;;  %v10519_v58 = vsel %vm4814_vm9, %v5236_v26, %v5235_v33  ;;  %v4810_v12 = vrot.slane %v10439_v10, 4  ;;  %v4813_v54 = vrot.slane %v10436_v11, 3 }
 0x43e   : > { %v5270_v48 = vsel %vm4811_vm10, %v5269_v51, %v10417_v30  ;;  %v5338_v20 = vsel %vm4811_vm10, %v5337_v44, %v10423_v16 }
 0x43f   : > { %v10528_v40 = vsel %vm4814_vm9, %v4764_v52, %v5270_v48  ;;  %v10531_v39 = vsel %vm4814_vm9, %v5339_v45, %v5338_v20  ;;  %v4812_v14 = vsel %vm4811_vm10, %v4810_v12, %v10428_v1 }
 0x440   : > { %v10536_v55 = vsel %vm4814_vm9, %v4813_v54, %v4812_v14 }
 0x446   : > { %v5616_v10 = vpop.f32.mrb[12].mxu1 }
 0x447   : > { %v4696_v30 = vmul.f32 %v5616_v10, %v10262_v18  ;;  %v4596_v24 = vpop.f32.mrb[13].mxu1 }
 0x448   : > { %v4694_v16 = vmul.f32 %v10262_v18, %v4596_v24  ;;  %v5617_v37 = vpop.f32.mrb[14].mxu1 }
 0x449   : > { %v4735_v11 = vadd.f32 %v10267_v23, %v4696_v30  ;;  %v4697_v52 = vmul.f32 %v5617_v37, %v10262_v18  ;;  %v4599_v27 = vpop.f32.mrb[15].mxu1 }
 0x44a   : > { %v4733_v32 = vadd.f32 %v10267_v23, %v4694_v16  ;;  %v4695_v28 = vmul.f32 %v10262_v18, %v4599_v27 }
 0x44b   : > { %v10544_v1 = vmax.f32 %v4735_v11, 0.0  ;;  %v4736_v57 = vadd.f32 %v10267_v23, %v4697_v52 }
 0x44c   : > { %v10547_v60 = vmax.f32 %v4733_v32, 0.0  ;;  %v4734_v38 = vadd.f32 %v10267_v23, %v4695_v28 }
 0x44d   : > { %v10550_v21 = vmax.f32 %v4736_v57, 0.0  ;;  %v5020_v25 = vrot.slane %v10544_v1, 7  ;;  %v4850_v15 = vrot.slane %v10544_v1, 2  ;;  %v4884_v61 = vrot.slane %v10544_v1, 3 }
 0x44e   : > { %v4766_v35 = vmax.f32 %v4734_v38, 0.0  ;;  %v5019_v29 = vsel %vm4817_vm6, %v10547_v60, %v10462_v3  ;;  %v4848_v42 = vrot.slane %v10547_v60, 3  ;;  %v4882_v50 = vrot.slane %v10547_v60, 4 }
 0x44f   : > { %v5021_v56 = vsel %vm4820_vm8, %v5020_v25, %v5019_v29  ;;  %v4916_v0 = vrot.slane %v10547_v60, 5  ;;  %v4918_v53 = vrot.slane %v10544_v1, 4  ;;  %v4950_v9 = vrot.slane %v10547_v60, 6 }
 0x450   : > { %5036 = vrot.lane.b32.xlu0 %v5021_v56, %s7009_s13  ;;  %v4849_v5 = vsel %vm4817_vm6, %v4848_v42, %v10465_v19  ;;  %v4883_v3 = vsel %vm4817_vm6, %v4882_v50, %v10468_v49  ;;  %v4952_v31 = vrot.slane %v10544_v1, 5  ;;  %v4984_v4 = vrot.slane %v10547_v60, 7 }
 0x451   : > { %v4851_v34 = vsel %vm4820_vm8, %v4850_v15, %v4849_v5  ;;  %v4885_v47 = vsel %vm4820_vm8, %v4884_v61, %v4883_v3  ;;  %v4917_v46 = vsel %vm4817_vm6, %v4916_v0, %v10473_v36  ;;  %v4951_v63 = vsel %vm4817_vm6, %v4950_v9, %v10476_v6 }
 0x452   : > { %v4919_v62 = vsel %vm4820_vm8, %v4918_v53, %v4917_v46  ;;  %v4953_v19 = vsel %vm4820_vm8, %v4952_v31, %v4951_v63  ;;  %v4985_v49 = vsel %vm4817_vm6, %v4984_v4, %v10483_v43  ;;  %v4986_v59 = vrot.slane %v10544_v1, 6 }
 0x453   : > { %v5053_v33 = vrot.slane %v10547_v60, 1  ;;  %v5307_v26 = vsel %vm4817_vm6, %v4766_v35, %v10494_v8  ;;  %v5308_v13 = vrot.slane %v10550_v21, 7  ;;  %v5102_v36 = vrot.slane %v4766_v35, 2 }
 0x454   : > { %4866 = vrot.lane.b32.xlu0 %v4851_v34, %s7000_s8  ;;  %v4987_v6 = vsel %vm4820_vm8, %v4986_v59, %v4985_v49  ;;  %v5104_v51 = vrot.slane %v10550_v21, 1  ;;  %v5136_v44 = vrot.slane %v4766_v35, 3  ;;  %v5138_v45 = vrot.slane %v10550_v21, 2 }
 0x455   : > { %v5054_v43 = vsel %vm4817_vm6, %v5053_v33, %v10489_v22  ;;  %v5309_v12 = vsel %vm4820_vm8, %v5308_v13, %v5307_v26  ;;  %v5103_v8 = vsel %vm4817_vm6, %v5102_v36, %v10501_v2  ;;  %v5170_v48 = vrot.slane %v4766_v35, 4 }
 0x456   : > { %v5055_v20 = vsel %vm4820_vm8, %v10544_v1, %v5054_v43  ;;  %v5105_v54 = vsel %vm4820_vm8, %v5104_v51, %v5103_v8  ;;  %v5137_v14 = vsel %vm4817_vm6, %v5136_v44, %v10504_v41  ;;  %v5172_v10 = vrot.slane %v10550_v21, 3 }
 0x457   : > { %v5139_v30 = vsel %vm4820_vm8, %v5138_v45, %v5137_v14  ;;  %v5171_v22 = vsel %vm4817_vm6, %v5170_v48, %v10509_v7  ;;  %v5204_v24 = vrot.slane %v4766_v35, 5  ;;  %v5206_v16 = vrot.slane %v10550_v21, 4 }
 0x458   : > { %4900 = vrot.lane.b32.xlu0 %v4885_v47, %s7002_s10  ;;  %v5173_v2 = vsel %vm4820_vm8, %v5172_v10, %v5171_v22  ;;  %v5238_v37 = vrot.slane %v4766_v35, 6  ;;  %v5240_v11 = vrot.slane %v10550_v21, 5  ;;  %v5272_v52 = vrot.slane %v4766_v35, 7 }
 0x459   : > { %v5205_v41 = vsel %vm4817_vm6, %v5204_v24, %v10516_v17  ;;  %v5274_v27 = vrot.slane %v10550_v21, 6  ;;  %v5341_v32 = vrot.slane %v4766_v35, 1  ;;  %v4816_v28 = vrot.slane %v10547_v60, 2 }
 0x45a   : > { %v5207_v7 = vsel %vm4820_vm8, %v5206_v16, %v5205_v41  ;;  %v5239_v57 = vsel %vm4817_vm6, %v5238_v37, %v10519_v58  ;;  %v5273_v38 = vsel %vm4817_vm6, %v5272_v52, %v10528_v40  ;;  %v4819_v25 = vrot.slane %v10544_v1, 1 }
 0x45b   : > { %v5241_v15 = vsel %vm4820_vm8, %v5240_v11, %v5239_v57  ;;  %v10620_v61 = vsel %vm4820_vm8, %v5274_v27, %v5273_v38  ;;  %v5342_v17 = vsel %vm4817_vm6, %v5341_v32, %v10531_v39  ;;  %v4818_v60 = vsel %vm4817_vm6, %v4816_v28, %v10536_v55 }
 0x45c   : > { %4934 = vrot.lane.b32.xlu0 %v4919_v62, %s7004_s12  ;;  %v10629_v58 = vsel %vm4820_vm8, %v10550_v21, %v5342_v17  ;;  %v10632_v40 = vsel %vm4820_vm8, %v4819_v25, %v4818_v60 }
 0x460   : > { %4968 = vrot.lane.b32.xlu0 %v4953_v19, %s7006_s20 }
 0x464   : > { %5002 = vrot.lane.b32.xlu0 %v4987_v6, %s7008_s30 }
 0x468   : > { %5070 = vrot.lane.b32.xlu0 %v5055_v20, %s7007_s27 }
 0x46c   : > { %5324 = vrot.lane.b32.xlu0 %v5309_v12, %s7011_s29 }
 0x470   : > { %5120 = vrot.lane.b32.xlu0 %v5105_v54, %s7010_s16 }
 0x472   : > { %v5620_v39 = vpop.f32.mrb[16].mxu1 }
 0x473   : > { %v4700_v55 = vmul.f32 %v5620_v39, %v10262_v18  ;;  %v4612_v1 = vpop.f32.mrb[17].mxu1 }
 0x474   : > { %5154 = vrot.lane.b32.xlu0 %v5139_v30, %s7012_s9  ;;  %v4698_v21 = vmul.f32 %v10262_v18, %v4612_v1  ;;  %v5621_v35 = vpop.f32.mrb[18].mxu1 }
 0x475   : > { %v4739_v29 = vadd.f32 %v10267_v23, %v4700_v55  ;;  %v4701_v42 = vmul.f32 %v5621_v35, %v10262_v18  ;;  %v4615_v50 = vpop.f32.mrb[19].mxu1 }
 0x476   : > { %v4737_v56 = vadd.f32 %v10267_v23, %v4698_v21  ;;  %v4699_v0 = vmul.f32 %v10262_v18, %v4615_v50 }
 0x477   : > { %v4771_v53 = vmax.f32 %v4739_v29, 0.0  ;;  %v4740_v9 = vadd.f32 %v10267_v23, %v4701_v42 }
 0x478   : > { %5188 = vrot.lane.b32.xlu0 %v5173_v2, %s7013_s11  ;;  %v4769_v5 = vmax.f32 %v4737_v56, 0.0  ;;  %v4738_v3 = vadd.f32 %v10267_v23, %v4699_v0 }
 0x479   : > { %v4772_v31 = vmax.f32 %v4740_v9, 0.0  ;;  %v5023_v4 = vrot.slane %v4771_v53, 5  ;;  %v4887_v34 = vrot.slane %v4771_v53, 1  ;;  %v4921_v47 = vrot.slane %v4771_v53, 2 }
 0x47a   : > { %v4770_v46 = vmax.f32 %v4738_v3, 0.0  ;;  %v5022_v63 = vrot.slane %v4769_v5, 6  ;;  %v4852_v62 = vrot.slane %v4769_v5, 1  ;;  %v4886_v19 = vrot.slane %v4769_v5, 2 }
 0x47b   : > { %v4920_v49 = vrot.slane %v4769_v5, 3  ;;  %v4954_v59 = vrot.slane %v4769_v5, 4  ;;  %v4955_v33 = vrot.slane %v4771_v53, 3  ;;  %v4988_v26 = vrot.slane %v4769_v5, 5 }
 0x47c   : > { %5222 = vrot.lane.b32.xlu0 %v5207_v7, %s7014_s14  ;;  %v10651_v13 = vsel %vm4802_vm14, %v5023_v4, %v5022_v63  ;;  %v10654_v36 = vsel %vm4802_vm14, %v4771_v53, %v4852_v62  ;;  %v4888_v6 = vsel %vm4802_vm14, %v4887_v34, %v4886_v19  ;;  %v4989_v51 = vrot.slane %v4771_v53, 4 }
 0x47d   : > { %v10658_v44 = vsel %vm4802_vm14, %v4921_v47, %v4920_v49  ;;  %v10661_v45 = vsel %vm4802_vm14, %v4955_v33, %v4954_v59  ;;  %v5056_v43 = vrot.slane %v4769_v5, 7  ;;  %v5057_v12 = vrot.slane %v4771_v53, 6 }
 0x47e   : > { %v10664_v8 = vsel %vm4802_vm14, %v4989_v51, %v4988_v26  ;;  %v5310_v48 = vrot.slane %v4770_v46, 6  ;;  %v5311_v20 = vrot.slane %v4772_v31, 5  ;;  %v5106_v54 = vrot.slane %v4772_v31, 7 }
 0x47f   : > { %v10668_v14 = vsel %vm4802_vm14, %v5057_v12, %v5056_v43  ;;  %v5140_v10 = vrot.slane %v4770_v46, 1  ;;  %v5174_v30 = vrot.slane %v4770_v46, 2  ;;  %v5175_v22 = vrot.slane %v4772_v31, 1 }
 0x480   : > { %5256 = vrot.lane.b32.xlu0 %v5241_v15, %s7015_s15  ;;  %v10671_v24 = vsel %vm4802_vm14, %v5311_v20, %v5310_v48  ;;  %v10674_v16 = vsel %vm4802_vm14, %v5106_v54, %v4770_v46  ;;  %v5208_v2 = vrot.slane %v4770_v46, 3  ;;  %v5209_v37 = vrot.slane %v4772_v31, 2 }
 0x481   : > { %v10677_v11 = vsel %vm4802_vm14, %v4772_v31, %v5140_v10  ;;  %v10680_v52 = vsel %vm4802_vm14, %v5175_v22, %v5174_v30  ;;  %v5242_v41 = vrot.slane %v4770_v46, 4  ;;  %v5243_v27 = vrot.slane %v4772_v31, 3 }
 0x482   : > { %v10683_v32 = vsel %vm4802_vm14, %v5209_v37, %v5208_v2  ;;  %v5276_v28 = vrot.slane %v4770_v46, 5  ;;  %v5277_v7 = vrot.slane %v4772_v31, 4  ;;  %v5344_v57 = vrot.slane %v4770_v46, 7 }
 0x483   : > { %v10688_v38 = vsel %vm4802_vm14, %v5243_v27, %v5242_v41  ;;  %v5345_v25 = vrot.slane %v4772_v31, 6  ;;  %v4822_v15 = vrot.slane %v4771_v53, 7 }
 0x484   : > { %5290 = vrot.lane.b32.xlu0 %v10620_v61, %s7016_s17  ;;  %v10691_v17 = vsel %vm4802_vm14, %v5277_v7, %v5276_v28 }
 0x485   : > { %v10694_v60 = vsel %vm4802_vm14, %v5345_v25, %v5344_v57  ;;  %v10697_v39 = vsel %vm4802_vm14, %v4822_v15, %v4769_v5  ;;  %vm5385_vm14 = vcmask 719872  }
 0x488   : > { %5358 = vrot.lane.b32.xlu0 %v10629_v58, %s7017_s18 }
 0x48a   : > { %v5624_v55 = vpop.f32.mrb[20].mxu1 }
 0x48b   : > { %v4704_v61 = vmul.f32 %v5624_v55, %v10262_v18  ;;  %v4628_v1 = vpop.f32.mrb[21].mxu1 }
 0x48c   : > { %v4702_v21 = vmul.f32 %v10262_v18, %v4628_v1  ;;  %v5625_v35 = vpop.f32.mrb[22].mxu1 }
 0x48d   : > { %v4743_v29 = vadd.f32 %v10267_v23, %v4704_v61  ;;  %v4705_v42 = vmul.f32 %v5625_v35, %v10262_v18  ;;  %v4631_v50 = vpop.f32.mrb[23].mxu1 }
 0x48e   : > { %v4741_v56 = vadd.f32 %v10267_v23, %v4702_v21  ;;  %v4703_v0 = vmul.f32 %v10262_v18, %v4631_v50 }
 0x48f   : > { %v10707_v53 = vmax.f32 %v4743_v29, 0.0  ;;  %v4744_v58 = vadd.f32 %v10267_v23, %v4705_v42 }
 0x490   : > { %v10710_v9 = vmax.f32 %v4741_v56, 0.0  ;;  %v4742_v5 = vadd.f32 %v10267_v23, %v4703_v0 }
 0x491   : > { %v4776_v3 = vmax.f32 %v4744_v58, 0.0  ;;  %v5027_v31 = vrot.slane %v10707_v53, 3  ;;  %v4856_v4 = vrot.slane %v10707_v53, 6  ;;  %v4890_v34 = vrot.slane %v10707_v53, 7 }
 0x492   : > { %v4774_v47 = vmax.f32 %v4742_v5, 0.0  ;;  %v5025_v46 = vrot.slane %v10710_v9, 4  ;;  %v4854_v63 = vrot.slane %v10710_v9, 7  ;;  %v4889_v62 = vsel %vm4805_vm3, %v10710_v9, %v4888_v6 }
 0x493   : > { %v10721_v19 = vsel %vm4808_vm2, %v4890_v34, %v4889_v62  ;;  %v4923_v49 = vrot.slane %v10710_v9, 1  ;;  %v4957_v59 = vrot.slane %v10710_v9, 2  ;;  %v4959_v33 = vrot.slane %v10707_v53, 1 }
 0x494   : > { %v5026_v26 = vsel %vm4805_vm3, %v5025_v46, %v10651_v13  ;;  %v4855_v51 = vsel %vm4805_vm3, %v4854_v63, %v10654_v36  ;;  %v4991_v43 = vrot.slane %v10710_v9, 3  ;;  %v4993_v12 = vrot.slane %v10707_v53, 2 }
 0x495   : > { %v10733_v6 = vsel %vm4808_vm2, %v5027_v31, %v5026_v26  ;;  %v10736_v48 = vsel %vm4808_vm2, %v4856_v4, %v4855_v51  ;;  %v4924_v20 = vsel %vm4805_vm3, %v4923_v49, %v10658_v44  ;;  %v4958_v54 = vsel %vm4805_vm3, %v4957_v59, %v10661_v45 }
 0x496   : > { %v10744_v13 = vsel %vm4808_vm2, %v10707_v53, %v4924_v20  ;;  %v10747_v36 = vsel %vm4808_vm2, %v4959_v33, %v4958_v54  ;;  %v4992_v10 = vsel %vm4805_vm3, %v4991_v43, %v10664_v8  ;;  %v5059_v30 = vrot.slane %v10710_v9, 5 }
 0x497   : > { %v10753_v22 = vsel %vm4808_vm2, %v4993_v12, %v4992_v10  ;;  %v5061_v44 = vrot.slane %v10707_v53, 4  ;;  %v5313_v2 = vrot.slane %v4774_v47, 4  ;;  %v5315_v37 = vrot.slane %v4776_v3, 3 }
 0x498   : > { %v5060_v45 = vsel %vm4805_vm3, %v5059_v30, %v10668_v14  ;;  %v5108_v41 = vrot.slane %v4774_v47, 6  ;;  %v5110_v27 = vrot.slane %v4776_v3, 5  ;;  %v5142_v28 = vrot.slane %v4774_v47, 7 }
 0x499   : > { %v10759_v7 = vsel %vm4808_vm2, %v5061_v44, %v5060_v45  ;;  %v5314_v8 = vsel %vm4805_vm3, %v5313_v2, %v10671_v24  ;;  %v5144_v57 = vrot.slane %v4776_v3, 6  ;;  %v5177_v25 = vsel %vm4805_vm3, %v4774_v47, %v10680_v52 }
 0x49a   : > { %v10766_v15 = vsel %vm4808_vm2, %v5315_v37, %v5314_v8  ;;  %v5109_v55 = vsel %vm4805_vm3, %v5108_v41, %v10674_v16  ;;  %v5143_v14 = vsel %vm4805_vm3, %v5142_v28, %v10677_v11  ;;  %v5178_v61 = vrot.slane %v4776_v3, 7 }
 0x49b   : > { %v10773_v1 = vsel %vm4808_vm2, %v5110_v27, %v5109_v55  ;;  %v10776_v21 = vsel %vm4808_vm2, %v5144_v57, %v5143_v14  ;;  %v5211_v24 = vrot.slane %v4774_v47, 1  ;;  %v5245_v35 = vrot.slane %v4774_v47, 2 }
 0x49c   : > { %v10779_v52 = vsel %vm4808_vm2, %v5178_v61, %v5177_v25  ;;  %v5247_v29 = vrot.slane %v4776_v3, 1  ;;  %v5279_v42 = vrot.slane %v4774_v47, 3  ;;  %v5281_v50 = vrot.slane %v4776_v3, 2 }
 0x49d   : > { %v5212_v16 = vsel %vm4805_vm3, %v5211_v24, %v10683_v32  ;;  %v5246_v11 = vsel %vm4805_vm3, %v5245_v35, %v10688_v38  ;;  %v5347_v56 = vrot.slane %v4774_v47, 5  ;;  %v5349_v0 = vrot.slane %v4776_v3, 4 }
 0x49e   : > { %v10786_v58 = vsel %vm4808_vm2, %v4776_v3, %v5212_v16  ;;  %v10789_v5 = vsel %vm4808_vm2, %v5247_v29, %v5246_v11  ;;  %v5280_v31 = vsel %vm4805_vm3, %v5279_v42, %v10691_v17  ;;  %v4824_v4 = vrot.slane %v10710_v9, 6 }
 0x49f   : > { %v10795_v34 = vsel %vm4808_vm2, %v5281_v50, %v5280_v31  ;;  %v5348_v32 = vsel %vm4805_vm3, %v5347_v56, %v10694_v60  ;;  %v4826_v38 = vrot.slane %v10707_v53, 5 }
 0x4a0   : > { %v10801_v47 = vsel %vm4808_vm2, %v5349_v0, %v5348_v32  ;;  %v4825_v3 = vsel %vm4805_vm3, %v4824_v4, %v10697_v39  ;;  %vm12385_vm3 = vcmask 588800  }
 0x4a1   : > { %v10806_v46 = vsel %vm4808_vm2, %v4826_v38, %v4825_v3  ;;  %vm5388_vm2 = vcmask 785408  }
 0x4a2   : > { %v5628_v17 = vpop.f32.mrb[24].mxu1 }
 0x4a3   : > { %v4708_v9 = vmul.f32 %v5628_v17, %v10262_v18  ;;  %v4644_v63 = vpop.f32.mrb[25].mxu1 }
 0x4a4   : > { %v4706_v62 = vmul.f32 %v10262_v18, %v4644_v63  ;;  %v5629_v49 = vpop.f32.mrb[26].mxu1 }
 0x4a5   : > { %v4747_v60 = vadd.f32 %v10267_v23, %v4708_v9  ;;  %v4709_v53 = vmul.f32 %v5629_v49, %v10262_v18  ;;  %v4647_v59 = vpop.f32.mrb[27].mxu1 }
 0x4a6   : > { %v4745_v33 = vadd.f32 %v10267_v23, %v4706_v62  ;;  %v4707_v26 = vmul.f32 %v10262_v18, %v4647_v59 }
 0x4a7   : > { %v10814_v39 = vmax.f32 %v4747_v60, 0.0  ;;  %v4748_v51 = vadd.f32 %v10267_v23, %v4709_v53 }
 0x4a8   : > { %v10817_v43 = vmax.f32 %v4745_v33, 0.0  ;;  %v4746_v12 = vadd.f32 %v10267_v23, %v4707_v26 }
 0x4a9   : > { %v4780_v20 = vmax.f32 %v4748_v51, 0.0  ;;  %v5031_v54 = vrot.slane %v10814_v39, 1  ;;  %v4860_v10 = vrot.slane %v10814_v39, 4  ;;  %v4894_v30 = vrot.slane %v10814_v39, 5 }
 0x4aa   : > { %v4778_v44 = vmax.f32 %v4746_v12, 0.0  ;;  %v5029_v2 = vrot.slane %v10817_v43, 2  ;;  %v4858_v18 = vrot.slane %v10817_v43, 5  ;;  %v4892_v37 = vrot.slane %v10817_v43, 6 }
 0x4ab   : > { %v4926_v45 = vrot.slane %v10817_v43, 7  ;;  %v4928_v41 = vrot.slane %v10814_v39, 6  ;;  %v4961_v23 = vsel %vm4811_vm10, %v10817_v43, %v10747_v36  ;;  %v4962_v27 = vrot.slane %v10814_v39, 7 }
 0x4ac   : > { %v5030_v28 = vsel %vm4811_vm10, %v5029_v2, %v10733_v6  ;;  %v4859_v8 = vsel %vm4811_vm10, %v4858_v18, %v10736_v48  ;;  %v4893_v57 = vsel %vm4811_vm10, %v4892_v37, %v10721_v19  ;;  %v4995_v25 = vrot.slane %v10817_v43, 1 }
 0x4ad   : > { %v10840_v55 = vsel %vm4814_vm9, %v5031_v54, %v5030_v28  ;;  %v10843_v14 = vsel %vm4814_vm9, %v4860_v10, %v4859_v8  ;;  %v10846_v36 = vsel %vm4814_vm9, %v4894_v30, %v4893_v57  ;;  %v4927_v6 = vsel %vm4811_vm10, %v4926_v45, %v10744_v13 }
 0x4ae   : > { %v10851_v61 = vsel %vm4814_vm9, %v4928_v41, %v4927_v6  ;;  %v10854_v48 = vsel %vm4814_vm9, %v4962_v27, %v4961_v23  ;;  %v4996_v19 = vsel %vm4811_vm10, %v4995_v25, %v10753_v22  ;;  %v5063_v24 = vrot.slane %v10817_v43, 3 }
 0x4af   : > { %v10861_v35 = vsel %vm4814_vm9, %v10814_v39, %v4996_v19  ;;  %v5065_v29 = vrot.slane %v10814_v39, 2  ;;  %v5317_v42 = vrot.slane %v4778_v44, 2  ;;  %v5319_v50 = vrot.slane %v4780_v20, 1 }
 0x4b0   : > { %v5064_v13 = vsel %vm4811_vm10, %v5063_v24, %v10759_v7  ;;  %v5112_v16 = vrot.slane %v4778_v44, 4  ;;  %v5114_v11 = vrot.slane %v4780_v20, 3  ;;  %v5146_v56 = vrot.slane %v4778_v44, 5 }
 0x4b1   : > { %v10867_v0 = vsel %vm4814_vm9, %v5065_v29, %v5064_v13  ;;  %v5318_v22 = vsel %vm4811_vm10, %v5317_v42, %v10766_v15  ;;  %v5148_v31 = vrot.slane %v4780_v20, 4  ;;  %v5180_v4 = vrot.slane %v4778_v44, 6 }
 0x4b2   : > { %v10872_v32 = vsel %vm4814_vm9, %v5319_v50, %v5318_v22  ;;  %v5113_v38 = vsel %vm4811_vm10, %v5112_v16, %v10773_v1  ;;  %v5147_v7 = vsel %vm4811_vm10, %v5146_v56, %v10776_v21  ;;  %v5182_v3 = vrot.slane %v4780_v20, 5 }
 0x4b3   : > { %v10879_v17 = vsel %vm4814_vm9, %v5114_v11, %v5113_v38  ;;  %v10882_v9 = vsel %vm4814_vm9, %v5148_v31, %v5147_v7  ;;  %v5181_v15 = vsel %vm4811_vm10, %v5180_v4, %v10779_v52  ;;  %v5214_v63 = vrot.slane %v4778_v44, 7 }
 0x4b4   : > { %v10887_v62 = vsel %vm4814_vm9, %v5182_v3, %v5181_v15  ;;  %v5216_v49 = vrot.slane %v4780_v20, 6  ;;  %v5249_v1 = vsel %vm4811_vm10, %v4778_v44, %v10789_v5  ;;  %v5250_v60 = vrot.slane %v4780_v20, 7 }
 0x4b5   : > { %v5215_v21 = vsel %vm4811_vm10, %v5214_v63, %v10786_v58  ;;  %v5283_v53 = vrot.slane %v4778_v44, 1  ;;  %v5351_v59 = vrot.slane %v4778_v44, 3  ;;  %v5353_v52 = vrot.slane %v4780_v20, 2 }
 0x4b6   : > { %v10894_v33 = vsel %vm4814_vm9, %v5216_v49, %v5215_v21  ;;  %v10897_v26 = vsel %vm4814_vm9, %v5250_v60, %v5249_v1  ;;  %v4828_v51 = vrot.slane %v10817_v43, 4  ;;  %v4830_v54 = vrot.slane %v10814_v39, 3 }
 0x4b7   : > { %v5284_v12 = vsel %vm4811_vm10, %v5283_v53, %v10795_v34  ;;  %v5352_v5 = vsel %vm4811_vm10, %v5351_v59, %v10801_v47  ;;  %v6988_v34 = vld [vmem:[%s11068_s5] ss:$0 sm:$0xff] }
 0x4b8   : > { %v10906_v58 = vsel %vm4814_vm9, %v4780_v20, %v5284_v12  ;;  %v10909_v10 = vsel %vm4814_vm9, %v5353_v52, %v5352_v5  ;;  %v4829_v30 = vsel %vm4811_vm10, %v4828_v51, %v10806_v46  ;;  %v6989_v20 = vld [vmem:[%s11069_s6] ss:$0 sm:$0xff]  ;;  %vm5391_vm10 = vcmask 850944  }
 0x4b9   : > { %v10914_v44 = vsel %vm4814_vm9, %v4830_v54, %v4829_v30  ;;  %vm5394_vm9 = vcmask 916480  }
 0x4ba   : > { %v5632_v43 = vpop.f32.mrb[28].mxu1 }
 0x4bb   : > { %v4712_v47 = vmul.f32 %v6988_v34, %v5632_v43  ;;  %v4660_v2 = vpop.f32.mrb[29].mxu1 }
 0x4bc   : > { %v4710_v39 = vmul.f32 %v6988_v34, %v4660_v2  ;;  %v5633_v18 = vpop.f32.mrb[30].mxu1 }
 0x4bd   : > { %v4751_v37 = vadd.f32 %v6989_v20, %v4712_v47  ;;  %v4713_v45 = vmul.f32 %v6988_v34, %v5633_v18  ;;  %v4663_v41 = vpop.f32.mrb[31].mxu1 }
 0x4be   : > { %v4749_v46 = vadd.f32 %v6989_v20, %v4710_v39  ;;  %v4711_v23 = vmul.f32 %v6988_v34, %v4663_v41 }
 0x4bf   : > { %v10922_v27 = vmax.f32 %v4751_v37, 0.0  ;;  %v4752_v28 = vadd.f32 %v6989_v20, %v4713_v45 }
 0x4c0   : > { %v10924_v8 = vmax.f32 %v4749_v46, 0.0  ;;  %v4750_v57 = vadd.f32 %v6989_v20, %v4711_v23 }
 0x4c1   : > { %v10926_v25 = vmax.f32 %v4752_v28, 0.0  ;;  %v5034_v19 = vrot.slane %v10922_v27, 7  ;;  %v4864_v24 = vrot.slane %v10922_v27, 2  ;;  %v4898_v29 = vrot.slane %v10922_v27, 3 }
 0x4c2   : > { %v10928_v6 = vpop.permute.xlu0 %5036  ;;  %v4782_v42 = vmax.f32 %v4750_v57, 0.0  ;;  %v5033_v50 = vsel %vm4817_vm6, %v10924_v8, %v10840_v55  ;;  %v4862_v13 = vrot.slane %v10924_v8, 3  ;;  %v4896_v16 = vrot.slane %v10924_v8, 4 }
 0x4c3   : > { %v5035_v11 = vsel %vm4820_vm8, %v5034_v19, %v5033_v50  ;;  %v4930_v56 = vrot.slane %v10924_v8, 5  ;;  %v4932_v22 = vrot.slane %v10922_v27, 4  ;;  %v4964_v31 = vrot.slane %v10924_v8, 6 }
 0x4c4   : > { %5038 = vrot.lane.b32.xlu1 %v5035_v11, %s7009_s13  ;;  %v4863_v4 = vsel %vm4817_vm6, %v4862_v13, %v10843_v14  ;;  %v4897_v55 = vsel %vm4817_vm6, %v4896_v16, %v10846_v36  ;;  %v4966_v38 = vrot.slane %v10922_v27, 5  ;;  %v4998_v7 = vrot.slane %v10924_v8, 7 }
 0x4c5   : > { %v4865_v15 = vsel %vm4820_vm8, %v4864_v24, %v4863_v4  ;;  %v4899_v63 = vsel %vm4820_vm8, %v4898_v29, %v4897_v55  ;;  %v4931_v49 = vsel %vm4817_vm6, %v4930_v56, %v10851_v61  ;;  %v4965_v1 = vsel %vm4817_vm6, %v4964_v31, %v10854_v48 }
 0x4c6   : > { %v10949_v3 = vpop.permute.xlu0 %4866  ;;  %v4933_v14 = vsel %vm4820_vm8, %v4932_v22, %v4931_v49  ;;  %v4967_v36 = vsel %vm4820_vm8, %v4966_v38, %v4965_v1  ;;  %v4999_v60 = vsel %vm4817_vm6, %v4998_v7, %v10861_v35  ;;  %v5000_v21 = vrot.slane %v10922_v27, 6 }
 0x4c7   : > { %v5067_v53 = vrot.slane %v10924_v8, 1  ;;  %v5321_v59 = vsel %vm4817_vm6, %v4782_v42, %v10872_v32  ;;  %v5322_v52 = vrot.slane %v10926_v25, 7  ;;  %v5116_v61 = vrot.slane %v4782_v42, 2 }
 0x4c8   : > { %4868 = vrot.lane.b32.xlu1 %v4865_v15, %s7000_s8  ;;  %v5118_v48 = vrot.slane %v10926_v25, 1  ;;  %v5150_v51 = vrot.slane %v4782_v42, 3  ;;  %v5152_v12 = vrot.slane %v10926_v25, 2  ;;  %v5001_v35 = vsel %vm4820_vm8, %v5000_v21, %v4999_v60  ;;  %s5513_s8 = sshll.u32 %s12396_s25, 4 }
 0x4c9   : > { %v5068_v54 = vsel %vm4817_vm6, %v5067_v53, %v10867_v0  ;;  %v5323_v30 = vsel %vm4820_vm8, %v5322_v52, %v5321_v59  ;;  %v5184_v43 = vrot.slane %v4782_v42, 4  ;;  %v5117_v34 = vsel %vm4817_vm6, %v5116_v61, %v10879_v17 }
 0x4ca   : > { %v4901_v5 = vpop.permute.xlu0 %4900  ;;  %v5069_v32 = vsel %vm4820_vm8, %v10922_v27, %v5068_v54  ;;  %v5151_v47 = vsel %vm4817_vm6, %v5150_v51, %v10882_v9  ;;  %v5119_v2 = vsel %vm4820_vm8, %v5118_v48, %v5117_v34  ;;  %v5186_v0 = vrot.slane %v10926_v25, 3 }
 0x4cb   : > { %v5153_v39 = vsel %vm4820_vm8, %v5152_v12, %v5151_v47  ;;  %v5185_v18 = vsel %vm4817_vm6, %v5184_v43, %v10887_v62  ;;  %v5218_v20 = vrot.slane %v4782_v42, 5  ;;  %v5220_v37 = vrot.slane %v10926_v25, 4 }
 0x4cc   : > { %4902 = vrot.lane.b32.xlu1 %v4899_v63, %s7002_s10  ;;  %v5252_v45 = vrot.slane %v4782_v42, 6  ;;  %v5187_v17 = vsel %vm4820_vm8, %v5186_v0, %v5185_v18  ;;  %v5254_v9 = vrot.slane %v10926_v25, 5  ;;  %v5286_v46 = vrot.slane %v4782_v42, 7 }
 0x4cd   : > { %v5355_v23 = vrot.slane %v4782_v42, 1  ;;  %v5219_v28 = vsel %vm4817_vm6, %v5218_v20, %v10894_v33  ;;  %v5288_v57 = vrot.slane %v10926_v25, 6  ;;  %v4834_v16 = vrot.slane %v10922_v27, 1 }
 0x4ce   : > { %v4935_v41 = vpop.permute.xlu0 %4934  ;;  %v5253_v62 = vsel %vm4817_vm6, %v5252_v45, %v10897_v26  ;;  %v5221_v19 = vsel %vm4820_vm8, %v5220_v37, %v5219_v28  ;;  %v5287_v29 = vsel %vm4817_vm6, %v5286_v46, %v10906_v58  ;;  %v4832_v26 = vrot.slane %v10924_v8, 2 }
 0x4cf   : > { %v5255_v24 = vsel %vm4820_vm8, %v5254_v9, %v5253_v62  ;;  %v5356_v50 = vsel %vm4817_vm6, %v5355_v23, %v10909_v10  ;;  %v5289_v42 = vsel %vm4820_vm8, %v5288_v57, %v5287_v29 }
 0x4d0   : > { %4936 = vrot.lane.b32.xlu1 %v4933_v14, %s7004_s12  ;;  %v5357_v33 = vsel %vm4820_vm8, %v10926_v25, %v5356_v50  ;;  %v4833_v11 = vsel %vm4817_vm6, %v4832_v26, %v10914_v44  ;;  %v5364_v44 = vsel %vm12377_vm11, %v10632_v40, %v10949_v3  ;;  %vm5397_vm6 = vcmask 982016  }
 0x4d1   : > { %v4835_v58 = vsel %vm4820_vm8, %v4834_v16, %v4833_v11  ;;  %v5366_v25 = vsel %vm12378_vm7, %v5364_v44, %v4901_v5  ;;  %vm12386_vm8 = vmmov %vm12377_vm11 }
 0x4d2   : > { %v4969_v13 = vpop.permute.xlu0 %4968  ;;  %v5368_v4 = vsel %vm12379_vm5, %v5366_v25, %v4935_v41  ;;  %vm12387_vm11 = vmmov %vm12378_vm7 }
 0x4d3   : > { %v5370_v55 = vsel %vm12380_vm4, %v5368_v4, %v4969_v13  ;;  %vm12388_vm7 = vmmov %vm12379_vm5 }
 0x4d4   : > { %4970 = vrot.lane.b32.xlu1 %v4967_v36, %s7006_s20  ;;  %s11038_s20 = scalar_lea.vmem %s11070_s7, %s5513_s8  ;;  %vm12389_vm5 = vmmov %vm12380_vm4 }
 0x4d5   : > { %vm12390_vm4 = vmmov %vm12381_vm13 }
 0x4d6   : > { %v5003_v10 = vpop.permute.xlu0 %5002 }
 0x4d7   : > { %v5372_v38 = vsel %vm12381_vm13, %v5370_v55, %v5003_v10  ;;  %vm12391_vm13 = vmmov %vm12382_vm12 }
 0x4d8   : > { %5004 = vrot.lane.b32.xlu1 %v5001_v35, %s7008_s30  ;;  %v5374_v15 = vsel %vm12382_vm12, %v5372_v38, %v10928_v6  ;;  %vm12392_vm12 = vmmov %vm12383_vm1 }
 0x4da   : > { %v5071_v56 = vpop.permute.xlu0 %5070 }
 0x4db   : > { %v5376_v40 = vsel %vm12383_vm1, %v5374_v15, %v5071_v56  ;;  %vm12393_vm1 = vmmov %vm12384_vm15 }
 0x4dc   : > { %5072 = vrot.lane.b32.xlu1 %v5069_v32, %s7007_s27 }
 0x4de   : > { %v5325_v22 = vpop.permute.xlu0 %5324 }
 0x4e0   : > { %5326 = vrot.lane.b32.xlu1 %v5323_v30, %s7011_s29 }
 0x4e2   : > { %v5121_v8 = vpop.permute.xlu0 %5120 }
 0x4e3   : > { %v5378_v3 = vsel %vm12384_vm15, %v5376_v40, %v5121_v8  ;;  %vm12394_vm15 = vmmov %vm12385_vm3 }
 0x4e4   : > { %5122 = vrot.lane.b32.xlu1 %v5119_v2, %s7010_s16 }
 0x4e6   : > { %v5155_v27 = vpop.permute.xlu0 %5154 }
 0x4e7   : > { %v5380_v49 = vsel %vm12385_vm3, %v5378_v3, %v5155_v27 }
 0x4e8   : > { %5156 = vrot.lane.b32.xlu1 %v5153_v39, %s7012_s9 }
 0x4ea   : > { %v5189_v31 = vpop.permute.xlu0 %5188 }
 0x4eb   : > { %v5383_v1 = vsel %vm5382_vm0, %v5380_v49, %v5189_v31 }
 0x4ec   : > { %5190 = vrot.lane.b32.xlu1 %v5187_v17, %s7013_s11 }
 0x4ee   : > { %v5223_v7 = vpop.permute.xlu0 %5222 }
 0x4ef   : > { %v5386_v14 = vsel %vm5385_vm14, %v5383_v1, %v5223_v7 }
 0x4f0   : > { %5224 = vrot.lane.b32.xlu1 %v5221_v19, %s7014_s14 }
 0x4f2   : > { %v5257_v63 = vpop.permute.xlu0 %5256 }
 0x4f3   : > { %v5389_v6 = vsel %vm5388_vm2, %v5386_v14, %v5257_v63 }
 0x4f4   : > { %5258 = vrot.lane.b32.xlu1 %v5255_v24, %s7015_s15 }
 0x4f6   : > { %v5291_v36 = vpop.permute.xlu0 %5290 }
 0x4f7   : > { %v5392_v60 = vsel %vm5391_vm10, %v5389_v6, %v5291_v36 }
 0x4f8   : > { %5292 = vrot.lane.b32.xlu1 %v5289_v42, %s7016_s17  ;;  %v5395_v21 = vsel %vm5394_vm9, %v5392_v60, %v5325_v22 }
 0x4fa   : > { %v5359_v53 = vpop.permute.xlu0 %5358 }
 0x4fb   : > { %v5398_v59 = vsel %vm5397_vm6, %v5395_v21, %v5359_v53 }
 0x4fc   : > { %5400 = vst [vmem:[%s11038_s20] sm:$0xff] %v5398_v59  ;;  %5360 = vrot.lane.b32.xlu1 %v5357_v33, %s7017_s18 }
 0x536   : > { %v5039_v52 = vpop.permute.xlu1 %5038 }
 0x53a   : > { %v4869_v61 = vpop.permute.xlu1 %4868 }
 0x53b   : > { %v5365_v32 = vsel %vm12386_vm8, %v4835_v58, %v4869_v61 }
 0x53e   : > { %v4903_v48 = vpop.permute.xlu1 %4902 }
 0x53f   : > { %v5367_v34 = vsel %vm12387_vm11, %v5365_v32, %v4903_v48 }
 0x542   : > { %v4937_v51 = vpop.permute.xlu1 %4936 }
 0x543   : > { %v5369_v2 = vsel %vm12388_vm7, %v5367_v34, %v4937_v51 }
 0x546   : > { %v4971_v12 = vpop.permute.xlu1 %4970 }
 0x547   : > { %v5371_v39 = vsel %vm12389_vm5, %v5369_v2, %v4971_v12 }
 0x54a   : > { %v5005_v5 = vpop.permute.xlu1 %5004 }
 0x54b   : > { %v5373_v18 = vsel %vm12390_vm4, %v5371_v39, %v5005_v5 }
 0x54c   : > { %v5375_v20 = vsel %vm12391_vm13, %v5373_v18, %v5039_v52 }
 0x54e   : > { %v5073_v35 = vpop.permute.xlu1 %5072 }
 0x54f   : > { %v5377_v37 = vsel %vm12392_vm12, %v5375_v20, %v5073_v35 }
 0x552   : > { %v5327_v54 = vpop.permute.xlu1 %5326 }
 0x556   : > { %v5123_v30 = vpop.permute.xlu1 %5122 }
 0x557   : > { %v5379_v45 = vsel %vm12393_vm1, %v5377_v37, %v5123_v30 }
 0x55a   : > { %v5157_v43 = vpop.permute.xlu1 %5156 }
 0x55b   : > { %v5381_v17 = vsel %vm12394_vm15, %v5379_v45, %v5157_v43 }
 0x55e   : > { %v5191_v47 = vpop.permute.xlu1 %5190 }
 0x55f   : > { %v5384_v9 = vsel %vm5382_vm0, %v5381_v17, %v5191_v47 }
 0x562   : > { %v5225_v0 = vpop.permute.xlu1 %5224 }
 0x563   : > { %v5387_v46 = vsel %vm5385_vm14, %v5384_v9, %v5225_v0 }
 0x566   : > { %v5259_v41 = vpop.permute.xlu1 %5258 }
 0x567   : > { %v5390_v23 = vsel %vm5388_vm2, %v5387_v46, %v5259_v41 }
 0x56a   : > { %v5293_v28 = vpop.permute.xlu1 %5292 }
 0x56b   : > { %v5393_v62 = vsel %vm5391_vm10, %v5390_v23, %v5293_v28 }
 0x56c   : > { %v5396_v57 = vsel %vm5394_vm9, %v5393_v62, %v5327_v54 }
 0x56e   : > { %v5361_v19 = vpop.permute.xlu1 %5360 }
 0x56f   : > { %v5399_v24 = vsel %vm5397_vm6, %v5396_v57, %v5361_v19 }
 0x570   : > { %5401 = vst [vmem:[%s11038_s20 + $0x8] sm:$0xff] %v5399_v24 }
 0x571 PF: > { %s17_s24 = sadd.s32 1, %s6996_s24  }
 0x572   : > { %p14_p4 = scmp.ge.s32.totalorder %s17_s24, 4  }
 0x574   :  { %16 = sbr.rel (!%p14_p4) target bundleno = 1 (0x1), region = 78 }

</bundles_post_ra>
